<compile_context>
chip_gen: v6e
topology: v6e:2x2x1
jax: 0.10.0
libtpu: 0.0.40
codegen_flags: <defaults>
</compile_context>

<pallas_src>
import functools
import math

import jax
import jax.numpy as jnp
from jax import lax
from jax.experimental import pallas as pl
from jax.experimental.pallas import tpu as pltpu

# MXU operand dtype: bf16 operands, f32 accumulation (preferred_element_type).
MATMUL_DTYPE = jnp.bfloat16
# Inter-layer sequence buffer: only ever consumed as a matmul operand, so
# storing it in the matmul dtype is a free VMEM / bandwidth halving.
SEQ_DTYPE = MATMUL_DTYPE
# Hoisted gate projections: kept f32 for accuracy; flip to bf16 on v7x if the
# (T*BB, 3*Hp) buffer is what blows the 64 MiB VMEM budget.
GI_DTYPE = jnp.float32

LANE = 128


def _round_up(x, m):
    return (x + m - 1) // m * m


# ----------------------------------------------------------------------------
# Fused kernel: L GRU layers + pooling + fc/LeakyReLU + renorms + similarity.
# One grid step == one batch chunk of BB (padded) sequences.
# ----------------------------------------------------------------------------
def fea_fused_kernel(x_ref, wih0_ref, wihr_ref, whh_ref, bgi_ref, bhn_ref,
                     wfc_ref, bfc_ref, wcls_ref,
                     feat_ref, sim_ref,
                     seq_scr, gi_scr, h_scr):
    # x_ref:     (T*BB, Din)     time-major rows of this batch chunk
    # wih0_ref:  (Din, 3Hp)      layer-0 input weights (pre-transposed, gate-padded)
    # wihr_ref:  (L-1|1, Hp,3Hp) layer 1.. input weights
    # whh_ref:   (L, Hp, 3Hp)    recurrent weights
    # bgi_ref:   (L, 1, 3Hp)     b_ih + [b_hh_r, b_hh_z, 0]  (r/z bias folded in)
    # bhn_ref:   (L, 1, Hp)      n-gate recurrent bias (stays inside r*(...))
    # wfc_ref:   (3Hp, Hp)       encoder fc weight (pre-transposed, piece-padded)
    # bfc_ref:   (1, Hp)
    # wcls_ref:  (4Hp, Cp)       classifier weight, pre-transposed (renorm in-kernel)
    # feat_ref:  (BB, 4Hp)       output: renormed feature (padded lanes are 0)
    # sim_ref:   (BB, Cp)        output: similarity logits (padded classes are 0)
    # seq_scr:   VMEM (T*BB, Hp)   inter-layer sequence (bf16, never touches HBM)
    # gi_scr:    VMEM (T*BB, 3Hp)  hoisted input-gate projections
    # h_scr:     VMEM (BB, Hp)     recurrent hidden state (kept f32 across steps)
    TBB = gi_scr.shape[0]
    L, Hp, _ = whh_ref.shape
    BB = h_scr.shape[0]
    T = TBB // BB
    md = MATMUL_DTYPE
    # TODO(synk): sweep the unroll depth (2/4/8) at production H and check vregs.
    unroll = T if T <= 8 else 8

    h_finals = []            # per-layer final hidden states (values)
    h_max = None             # last-layer max-pool accumulator
    h_sum = None             # last-layer sum-pool accumulator

    for l in range(L):       # static Python layer loop (L is small)
        # ---- hoisted input projection: ONE large MXU matmul per layer -------
        if l == 0:
            xin = x_ref[...].astype(md)
            wih = wih0_ref[...].astype(md)
        else:
            xin = seq_scr[...].astype(md)        # previous layer's output seq
            wih = wihr_ref[l - 1].astype(md)
        gi = jnp.dot(xin, wih, preferred_element_type=jnp.float32) + bgi_ref[l]
        gi_scr[...] = gi.astype(gi_scr.dtype)

        # TODO(synk): hold whh_l resident in the MXU across the unrolled steps
        # via pltpu.matmul_push_rhs/matmul_acc_lhs/matmul_pop (per-step latency
        # trim on the serial chain); plain jnp.dot kept here for robustness.
        whh_l = whh_ref[l].astype(md)
        bhn_b = jnp.broadcast_to(bhn_ref[l], (BB, Hp))   # hoisted bias broadcast
        h_scr[...] = jnp.zeros_like(h_scr)               # PyTorch default h0 = 0
        is_last = (l == L - 1)

        def step(t, carry, whh_l=whh_l, bhn_b=bhn_b, is_last=is_last):
            h_prev = h_scr[...]
            gh = jnp.dot(h_prev.astype(md), whh_l,
                         preferred_element_type=jnp.float32)
            off = pl.multiple_of(t * BB, BB)             # aligned per-step slab
            gi_t = gi_scr[pl.ds(off, BB), :].astype(jnp.float32)
            # lane-aligned gate slices (Hp is a multiple of 128)
            r = jax.nn.sigmoid(gi_t[:, 0:Hp] + gh[:, 0:Hp])
            z = jax.nn.sigmoid(gi_t[:, Hp:2 * Hp] + gh[:, Hp:2 * Hp])
            n = jnp.tanh(gi_t[:, 2 * Hp:] + r * (gh[:, 2 * Hp:] + bhn_b))
            h_new = (1.0 - z) * n + z * h_prev
            h_scr[...] = h_new
            if is_last:
                # fused max/mean pooling: last-layer sequence never stored
                m, s = carry
                return jnp.maximum(m, h_new), s + h_new
            seq_scr[pl.ds(off, BB), :] = h_new.astype(seq_scr.dtype)
            return carry

        if is_last:
            init = (jnp.full((BB, Hp), -jnp.inf, dtype=jnp.float32),
                    jnp.zeros((BB, Hp), dtype=jnp.float32))
            h_max, h_sum = lax.fori_loop(0, T, step, init, unroll=unroll)
        else:
            lax.fori_loop(0, T, step, 0, unroll=unroll)

        h_finals.append(h_scr[...])          # final hidden state of this layer

    # -------- pooling + fc head: split matmuls, no concatenates --------------
    h1 = h_max                               # max-pool over time      (BB, Hp)
    h2 = h_sum * (1.0 / float(T))            # mean-pool over time     (BB, Hp)
    h3 = h_finals[-1]                        # last-layer final state  (BB, Hp)

    wfc = wfc_ref[...]                       # (3Hp, Hp), aligned row slices
    glob = (jnp.dot(h1.astype(md), wfc[0:Hp, :].astype(md),
                    preferred_element_type=jnp.float32)
            + jnp.dot(h2.astype(md), wfc[Hp:2 * Hp, :].astype(md),
                      preferred_element_type=jnp.float32)
            + jnp.dot(h3.astype(md), wfc[2 * Hp:3 * Hp, :].astype(md),
                      preferred_element_type=jnp.float32)
            + bfc_ref[...])
    glob = jnp.where(glob > 0.0, glob, 0.2 * glob)       # LeakyReLU(0.2)

    # feature = cat([glob, h_final_0, ..., h_final_{L-1}]); renorm(2,0,1e-5)*1e5.
    # Norm computed piecewise in f32 (padded lanes are exactly 0 -> no bias).
    pieces = [glob] + h_finals
    sq = None
    for p in pieces:
        s = jnp.sum(p * p, axis=-1, keepdims=True)
        sq = s if sq is None else sq + s
    fnorm = jnp.sqrt(sq)
    fscale = jnp.where(fnorm > 1e-5, 1e-5 / (fnorm + 1e-7), 1.0) * 1e5   # (BB,1)

    # classifier weight renorm on the PRE-TRANSPOSED weight: per-column norm of
    # (4Hp, Cp) == per-row norm of the PyTorch (C, 4H) weight (pads are zero).
    wt = wcls_ref[...]
    wnorm = jnp.sqrt(jnp.sum(wt * wt, axis=0, keepdims=True))            # (1,Cp)
    wscale = jnp.where(wnorm > 1e-5, 1e-5 / (wnorm + 1e-7), 1.0) * 1e5

    sim = None
    for i, p in enumerate(pieces):
        ps = p * fscale
        feat_ref[:, i * Hp:(i + 1) * Hp] = ps            # lane-dense stores
        d = jnp.dot(ps.astype(md), wt[i * Hp:(i + 1) * Hp, :].astype(md),
                    preferred_element_type=jnp.float32)
        sim = d if sim is None else sim + d
    sim_ref[...] = sim * wscale


# ----------------------------------------------------------------------------
# pallas_call wrapper (grid over batch chunks).
# ----------------------------------------------------------------------------
def fea_fused_call(x3, prep, *, BB, T):
    # x3: (NB, T*BB, Din) -- one time-major flattened slab per batch chunk
    NB, TBB, Din = x3.shape
    L, Hp, H3p = prep['whh'].shape
    Cp = prep['wcls_t'].shape[1]
    B_pad = NB * BB
    feat_dim_p = (L + 1) * Hp

    weights = [prep['wih0'], prep['wih_r'], prep['whh'], prep['bgi'],
               prep['bhn'], prep['wfc_t'], prep['bfc'], prep['wcls_t']]

    def full_spec(a):
        nd = a.ndim
        return pl.BlockSpec(a.shape, lambda b, _nd=nd: (0,) * _nd)  # resident

    in_specs = ([pl.BlockSpec((None, TBB, Din), lambda b: (b, 0, 0))]
                + [full_spec(a) for a in weights])
    out_specs = (pl.BlockSpec((BB, feat_dim_p), lambda b: (b, 0)),
                 pl.BlockSpec((BB, Cp), lambda b: (b, 0)))
    scratch = [
        pltpu.VMEM((TBB, Hp), SEQ_DTYPE),      # inter-layer sequence buffer
        pltpu.VMEM((TBB, 3 * Hp), GI_DTYPE),   # hoisted input-gate projections
        pltpu.VMEM((BB, Hp), jnp.float32),     # recurrent hidden state (f32)
    ]
    # TODO(synk): for very long T additionally tile the time axis (time-chunked
    # gi/seq with the hidden state carried in scratch) so the chunk fits v7x's
    # 64 MiB VMEM; the batch grid alone is enough at these shapes.

    def nbytes(shape, dt=jnp.float32):
        return math.prod(shape) * jnp.dtype(dt).itemsize

    weight_bytes = sum(nbytes(a.shape, a.dtype) for a in weights)
    footprint = (2 * nbytes((TBB, Din))                         # x (dbl-buffered)
                 + 2 * weight_bytes                              # resident weights
                 + 2 * (nbytes((BB, feat_dim_p)) + nbytes((BB, Cp)))
                 + nbytes((TBB, Hp), SEQ_DTYPE)
                 + nbytes((TBB, 3 * Hp), GI_DTYPE)
                 + nbytes((BB, Hp)))
    vmem_limit = int(min(100 * 2**20,
                         max(32 * 2**20, int(1.5 * footprint) + (8 << 20))))

    flops = NB * (2 * TBB * Din * 3 * Hp              # layer-0 input projection
                  + 2 * (L - 1) * TBB * Hp * 3 * Hp   # layer 1.. projections
                  + 2 * L * TBB * Hp * 3 * Hp         # recurrent matmuls
                  + L * TBB * 10 * Hp                 # gate elementwise
                  + 2 * BB * 3 * Hp * Hp + 2 * BB * feat_dim_p * Cp)
    transcendentals = NB * L * TBB * 3 * Hp
    bytes_accessed = (x3.size * 4 + NB * weight_bytes
                      + B_pad * (feat_dim_p + Cp) * 4)

    grid_spec = pltpu.PrefetchScalarGridSpec(
        num_scalar_prefetch=0, grid=(NB,),
        in_specs=in_specs, out_specs=out_specs, scratch_shapes=scratch)

    return pl.pallas_call(
        fea_fused_kernel,
        out_shape=(jax.ShapeDtypeStruct((B_pad, feat_dim_p), jnp.float32),
                   jax.ShapeDtypeStruct((B_pad, Cp), jnp.float32)),
        grid_spec=grid_spec,
        compiler_params=pltpu.CompilerParams(
            dimension_semantics=("parallel",),       # batch chunks: 2 TCs on v7x
            vmem_limit_bytes=vmem_limit),
        cost_estimate=pl.CostEstimate(flops=int(flops),
                                      transcendentals=int(transcendentals),
                                      bytes_accessed=int(bytes_accessed)),
    )(x3, *weights)


# ----------------------------------------------------------------------------
# Parameter init (deterministic, PyTorch-default-style uniform init).
# ----------------------------------------------------------------------------
def init_params(key, input_dims, hidden_dims, layers, num_class):
    H = hidden_dims

    def uni(k, shape, bound):
        return jax.random.uniform(k, shape, jnp.float32, -bound, bound)

    gru = []
    k = key
    gru_bound = 1.0 / math.sqrt(H)
    for l in range(layers):
        in_d = input_dims if l == 0 else H
        k, k1, k2, k3, k4 = jax.random.split(k, 5)
        gru.append(dict(
            w_ih=uni(k1, (3 * H, in_d), gru_bound),
            w_hh=uni(k2, (3 * H, H), gru_bound),
            b_ih=uni(k3, (3 * H,), gru_bound),
            b_hh=uni(k4, (3 * H,), gru_bound),
        ))

    k, k1, k2, k3 = jax.random.split(k, 4)
    fc_bound = 1.0 / math.sqrt(3 * H)
    cls_bound = 1.0 / math.sqrt(4 * H)
    return dict(
        hidden=H,
        gru=gru,
        fc_w=uni(k1, (H, 3 * H), fc_bound),            # encoder fc: Linear(3H, H)
        fc_b=uni(k2, (H,), fc_bound),
        cls_w=uni(k3, (num_class, 4 * H), cls_bound),  # FeaModel.fc weight (bias unused)
    )


def prepare_params(params):
    """One-time layout prep: transpose, pad H to 128 lanes per gate/piece,
    pad classes to 128 lanes, fold r/z recurrent biases into the input bias."""
    H = params['hidden']
    L = len(params['gru'])
    C = params['cls_w'].shape[0]
    Hp = _round_up(H, LANE)
    Cp = _round_up(C, LANE)

    def pad_gate_cols(w_t):                              # (in, 3H) -> (in, 3Hp)
        i = w_t.shape[0]
        return jnp.pad(w_t.reshape(i, 3, H),
                       ((0, 0), (0, 0), (0, Hp - H))).reshape(i, 3 * Hp)

    def pad_gate_vec(b):                                 # (3H,) -> (3Hp,)
        return jnp.pad(b.reshape(3, H), ((0, 0), (0, Hp - H))).reshape(3 * Hp)

    wih0 = pad_gate_cols(params['gru'][0]['w_ih'].T)     # (Din, 3Hp)
    wih_rest, whh_list, bgi_list, bhn_list = [], [], [], []
    for l, p in enumerate(params['gru']):
        if l > 0:
            w = pad_gate_cols(p['w_ih'].T)               # (H, 3Hp)
            wih_rest.append(jnp.pad(w, ((0, Hp - H), (0, 0))))     # (Hp, 3Hp)
        whh_t = pad_gate_cols(p['w_hh'].T)               # (H, 3Hp)
        whh_list.append(jnp.pad(whh_t, ((0, Hp - H), (0, 0))))     # (Hp, 3Hp)
        bih_p = pad_gate_vec(p['b_ih'])
        bhh_p = pad_gate_vec(p['b_hh'])
        # r/z recurrent biases enter linearly -> fold into the input bias once.
        bgi = bih_p + jnp.concatenate([bhh_p[:2 * Hp],
                                       jnp.zeros((Hp,), jnp.float32)])
        bgi_list.append(bgi[None, :])                    # (1, 3Hp)
        bhn_list.append(bhh_p[2 * Hp:][None, :])         # (1, Hp)

    wih_r = (jnp.stack(wih_rest) if L > 1
             else jnp.zeros((1, Hp, 3 * Hp), jnp.float32))   # dummy, unread
    whh = jnp.stack(whh_list)                            # (L, Hp, 3Hp)
    bgi = jnp.stack(bgi_list)                            # (L, 1, 3Hp)
    bhn = jnp.stack(bhn_list)                            # (L, 1, Hp)

    # encoder fc: Linear(3H, H) -> transposed (3H, H); pad each H-row piece and
    # the output columns to Hp (zero pads keep padded lanes exactly 0).
    wfc_t = params['fc_w'].T
    wfc_t = jnp.pad(wfc_t.reshape(3, H, H),
                    ((0, 0), (0, Hp - H), (0, Hp - H))).reshape(3 * Hp, Hp)
    bfc = jnp.pad(params['fc_b'], (0, Hp - H))[None, :]  # (1, Hp)

    # classifier: (C, 4H) -> pre-transposed (4H, C); pad each H-row piece to Hp
    # and the class columns to Cp (zero columns stay zero after renorm).
    wcls_t = params['cls_w'].T
    wcls_t = jnp.pad(wcls_t.reshape(4, H, C),
                     ((0, 0), (0, Hp - H), (0, 0))).reshape(4 * Hp, C)
    wcls_t = jnp.pad(wcls_t, ((0, 0), (0, Cp - C)))

    return dict(wih0=wih0, wih_r=wih_r, whh=whh, bgi=bgi, bhn=bhn,
                wfc_t=wfc_t, bfc=bfc, wcls_t=wcls_t)


# ----------------------------------------------------------------------------
# Forward pass (wrapper: layout plumbing only; all math inside the kernel).
# ----------------------------------------------------------------------------
def fea_model_forward(x, prep, *, hidden, num_class, block_b=64):
    # x: (B, T, input_dims), batch-first like PyTorch
    x = x.astype(jnp.float32)
    B, T, Din = x.shape
    L, Hp, _ = prep['whh'].shape
    H, C = hidden, num_class

    # sublane multiple: 16 so bf16 per-step stores into seq_scr are full tiles
    sub = 8 * (4 // jnp.dtype(SEQ_DTYPE).itemsize)
    BB = min(_round_up(B, sub), _round_up(block_b, sub))   # batch chunk size
    B_pad = _round_up(B, BB)
    NB = B_pad // BB

    # pad batch, then per chunk: time-major flatten (row t*BB + b within chunk)
    xp = jnp.pad(x, ((0, B_pad - B), (0, 0), (0, 0)))
    x3 = xp.reshape(NB, BB, T, Din).transpose(0, 2, 1, 3).reshape(NB, T * BB, Din)

    # TODO(synk): GRU inter-layer dropout is training-mode-only in PyTorch; this
    # inference path correctly omits it (packing is a no-op: all lengths == T).
    feat_p, sim_p = fea_fused_call(x3, prep, BB=BB, T=T)

    # strip batch / lane / class padding (layout plumbing only)
    feat = feat_p[:B].reshape(B, L + 1, Hp)[:, :, :H].reshape(B, (L + 1) * H)
    sim = sim_p[:B, :C]
    return feat, sim


# ----------------------------------------------------------------------------
# Pure-JAX reference of the PyTorch forward (for the in-script sanity check).
# ----------------------------------------------------------------------------
def _ref_forward(x, params):
    prec = lax.Precision.HIGHEST
    x = x.astype(jnp.float32)
    B, T, _ = x.shape
    H = params['hidden']
    cur = jnp.transpose(x, (1, 0, 2))               # (T, B, Din)
    h_finals = []
    for lp in params['gru']:
        wih, whh = lp['w_ih'].T, lp['w_hh'].T
        bih, bhh = lp['b_ih'], lp['b_hh']

        def step(h, x_t, wih=wih, whh=whh, bih=bih, bhh=bhh):
            gi = jnp.dot(x_t, wih, precision=prec) + bih
            gh = jnp.dot(h, whh, precision=prec) + bhh
            r = jax.nn.sigmoid(gi[:, :H] + gh[:, :H])
            z = jax.nn.sigmoid(gi[:, H:2 * H] + gh[:, H:2 * H])
            n = jnp.tanh(gi[:, 2 * H:] + r * gh[:, 2 * H:])
            h_new = (1.0 - z) * n + z * h
            return h_new, h_new

        hN, out = lax.scan(step, jnp.zeros((B, H), jnp.float32), cur)
        h_finals.append(hN)
        cur = out
    h1 = jnp.max(cur, axis=0)
    h2 = jnp.mean(cur, axis=0)
    h3 = h_finals[-1]
    glob_in = jnp.concatenate([h1, h2, h3], axis=-1)
    glob = jnp.dot(glob_in, params['fc_w'].T, precision=prec) + params['fc_b']
    glob = jnp.where(glob > 0.0, glob, 0.2 * glob)
    feature = jnp.concatenate([glob] + h_finals, axis=-1)
    fnorm = jnp.sqrt(jnp.sum(feature * feature, axis=-1, keepdims=True))
    feature = feature * jnp.where(fnorm > 1e-5, 1e-5 / (fnorm + 1e-7), 1.0) * 1e5
    w = params['cls_w']
    wnorm = jnp.sqrt(jnp.sum(w * w, axis=-1, keepdims=True))
    ww = w * jnp.where(wnorm > 1e-5, 1e-5 / (wnorm + 1e-7), 1.0) * 1e5
    sim = jnp.dot(feature, ww.T, precision=prec)
    return feature, sim


if __name__ == "__main__":
    # layers must be 3 so that hidden*(1+layers) == hidden*4 (FeaModel.fc input dim)
    B, T, D_in, H, L, C = 2, 8, 8, 32, 3, 6

    key = jax.random.PRNGKey(0)
    kx, kp = jax.random.split(key)
    x = jax.random.normal(kx, (B, T, D_in), jnp.float32)
    params = init_params(kp, D_in, H, L, C)
    prep = prepare_params(params)

    fwd = jax.jit(functools.partial(fea_model_forward, hidden=H, num_class=C))
    feature, sim = fwd(x, prep)
    jax.block_until_ready((feature, sim))

    assert feature.shape == (B, 4 * H), feature.shape
    assert sim.shape == (B, C), sim.shape
    assert bool(jnp.all(jnp.isfinite(feature))) and bool(jnp.all(jnp.isfinite(sim)))

    # numerical sanity check vs. pure-JAX f32 reference of the PyTorch forward
    # (tolerance accounts for bf16 MXU operands inside the kernel)
    feat_r, sim_r = _ref_forward(x, params)
    assert jnp.allclose(feature, feat_r, rtol=5e-2, atol=5e-2), \
        float(jnp.max(jnp.abs(feature - feat_r)))
    assert jnp.allclose(sim, sim_r, rtol=5e-2, atol=5e-2), \
        float(jnp.max(jnp.abs(sim - sim_r)))

    print("KERNEL_OK")
</pallas_src>

<mosaic_0001>
module attributes {stable_mosaic.version = 11 : i64} {
  func.func @fea_fused_kernel(%arg0: i32, %arg1: memref<1x128x8xf32, #tpu.memory_space<vmem>>, %arg2: memref<8x384xf32, #tpu.memory_space<vmem>>, %arg3: memref<2x128x384xf32, #tpu.memory_space<vmem>>, %arg4: memref<3x128x384xf32, #tpu.memory_space<vmem>>, %arg5: memref<3x1x384xf32, #tpu.memory_space<vmem>>, %arg6: memref<3x1x128xf32, #tpu.memory_space<vmem>>, %arg7: memref<384x128xf32, #tpu.memory_space<vmem>>, %arg8: memref<1x128xf32, #tpu.memory_space<vmem>>, %arg9: memref<512x128xf32, #tpu.memory_space<vmem>>, %arg10: memref<16x512xf32, #tpu.memory_space<vmem>>, %arg11: memref<16x128xf32, #tpu.memory_space<vmem>>, %arg12: memref<128x128xbf16, #tpu.memory_space<vmem>>, %arg13: memref<128x384xf32, #tpu.memory_space<vmem>>, %arg14: memref<16x128xf32, #tpu.memory_space<vmem>>) attributes {dimension_semantics = [#tpu.dimension_semantics<parallel>], iteration_bounds = array<i64: 1>, scalar_prefetch = 0 : i64, scratch_operands = 3 : i64, tpu.core_type = #tpu.core_type<tc>, window_params = [{transform_indices = @transform_0, window_bounds = array<i64: 1, 128, 8>}, {pipeline_mode = #tpu.pipeline_mode<synchronous>, transform_indices = @transform_1, window_bounds = array<i64: 8, 384>}, {pipeline_mode = #tpu.pipeline_mode<synchronous>, transform_indices = @transform_2, window_bounds = array<i64: 2, 128, 384>}, {pipeline_mode = #tpu.pipeline_mode<synchronous>, transform_indices = @transform_3, window_bounds = array<i64: 3, 128, 384>}, {pipeline_mode = #tpu.pipeline_mode<synchronous>, transform_indices = @transform_4, window_bounds = array<i64: 3, 1, 384>}, {pipeline_mode = #tpu.pipeline_mode<synchronous>, transform_indices = @transform_5, window_bounds = array<i64: 3, 1, 128>}, {pipeline_mode = #tpu.pipeline_mode<synchronous>, transform_indices = @transform_6, window_bounds = array<i64: 384, 128>}, {pipeline_mode = #tpu.pipeline_mode<synchronous>, transform_indices = @transform_7, window_bounds = array<i64: 1, 128>}, {pipeline_mode = #tpu.pipeline_mode<synchronous>, transform_indices = @transform_8, window_bounds = array<i64: 512, 128>}, {transform_indices = @transform_9, window_bounds = array<i64: 16, 512>}, {transform_indices = @transform_10, window_bounds = array<i64: 16, 128>}]} {
    %c0 = arith.constant 0 : index
    %c0_0 = arith.constant 0 : index
    %c0_1 = arith.constant 0 : index
    %0 = vector.load %arg1[%c0, %c0_0, %c0_1] : memref<1x128x8xf32, #tpu.memory_space<vmem>>, vector<1x128x8xf32>
    %1 = vector.shape_cast %0 : vector<1x128x8xf32> to vector<128x8xf32>
    %2 = arith.truncf %1 : vector<128x8xf32> to vector<128x8xbf16>
    %c0_2 = arith.constant 0 : index
    %c0_3 = arith.constant 0 : index
    %3 = vector.load %arg2[%c0_2, %c0_3] : memref<8x384xf32, #tpu.memory_space<vmem>>, vector<8x384xf32>
    %4 = arith.truncf %3 : vector<8x384xf32> to vector<8x384xbf16>
    %cst = arith.constant dense<0.000000e+00> : vector<128x384xf32>
    %5 = tpu.matmul %2, %4, %cst {dimension_numbers = #tpu.dot_dimension_numbers<[1], [0], [0], [1], [0, 0, 1, 1], [], []>} : vector<128x8xbf16>, vector<8x384xbf16>, vector<128x384xf32> -> vector<128x384xf32>
    %c0_4 = arith.constant 0 : index
    %c0_5 = arith.constant 0 : index
    %c0_6 = arith.constant 0 : index
    %6 = vector.load %arg5[%c0_4, %c0_5, %c0_6] : memref<3x1x384xf32, #tpu.memory_space<vmem>>, vector<1x1x384xf32>
    %7 = vector.shape_cast %6 : vector<1x1x384xf32> to vector<1x384xf32>
    %8 = vector.broadcast %7 : vector<1x384xf32> to vector<128x384xf32>
    %9 = arith.addf %5, %8 : vector<128x384xf32>
    %c0_7 = arith.constant 0 : index
    %c0_8 = arith.constant 0 : index
    %10 = vector.load %arg13[%c0_7, %c0_8] : memref<128x384xf32, #tpu.memory_space<vmem>>, vector<128x384xf32>
    tpu.vector_store %arg13[%c0_7, %c0_8], %9 {strides = array<i32>} : memref<128x384xf32, #tpu.memory_space<vmem>>, vector<128x384xf32>,
    %c0_9 = arith.constant 0 : index
    %c0_10 = arith.constant 0 : index
    %c0_11 = arith.constant 0 : index
    %11 = vector.load %arg4[%c0_9, %c0_10, %c0_11] : memref<3x128x384xf32, #tpu.memory_space<vmem>>, vector<1x128x384xf32>
    %12 = vector.shape_cast %11 : vector<1x128x384xf32> to vector<128x384xf32>
    %13 = arith.truncf %12 : vector<128x384xf32> to vector<128x384xbf16>
    %c0_12 = arith.constant 0 : index
    %c0_13 = arith.constant 0 : index
    %c0_14 = arith.constant 0 : index
    %14 = vector.load %arg6[%c0_12, %c0_13, %c0_14] : memref<3x1x128xf32, #tpu.memory_space<vmem>>, vector<1x1x128xf32>
    %15 = vector.shape_cast %14 : vector<1x1x128xf32> to vector<1x128xf32>
    %16 = vector.shape_cast %15 : vector<1x128xf32> to vector<1x128xf32>
    %17 = vector.broadcast %16 : vector<1x128xf32> to vector<16x128xf32>
    %cst_15 = arith.constant 0.000000e+00 : f32
    %18 = vector.broadcast %cst_15 : f32 to vector<16x128xf32>
    %c0_16 = arith.constant 0 : index
    %c0_17 = arith.constant 0 : index
    %19 = vector.load %arg14[%c0_16, %c0_17] : memref<16x128xf32, #tpu.memory_space<vmem>>, vector<16x128xf32>
    tpu.vector_store %arg14[%c0_16, %c0_17], %18 {strides = array<i32>} : memref<16x128xf32, #tpu.memory_space<vmem>>, vector<16x128xf32>,
    %c0_i32 = arith.constant 0 : i32
    %c0_18 = arith.constant 0 : index
    %c0_19 = arith.constant 0 : index
    %20 = vector.load %arg14[%c0_18, %c0_19] : memref<16x128xf32, #tpu.memory_space<vmem>>, vector<16x128xf32>
    %21 = arith.truncf %20 : vector<16x128xf32> to vector<16x128xbf16>
    %cst_20 = arith.constant dense<0.000000e+00> : vector<16x384xf32>
    %22 = tpu.matmul %21, %13, %cst_20 {dimension_numbers = #tpu.dot_dimension_numbers<[1], [0], [0], [1], [0, 0, 1, 1], [], []>} : vector<16x128xbf16>, vector<128x384xbf16>, vector<16x384xf32> -> vector<16x384xf32>
    %c16_i32 = arith.constant 16 : i32
    %23 = arith.muli %c0_i32, %c16_i32 : i32
    %24 = tpu.assume_multiple %23, 16 : i32
    %25 = arith.index_cast %24 : i32 to index
    %c0_21 = arith.constant 0 : index
    %26 = vector.load %arg13[%25, %c0_21] : memref<128x384xf32, #tpu.memory_space<vmem>>, vector<16x384xf32>
    %27 = vector.extract_strided_slice %26 {offsets = [0, 0], sizes = [16, 128], strides = [1, 1]} : vector<16x384xf32> to vector<16x128xf32>
    %28 = vector.extract_strided_slice %22 {offsets = [0, 0], sizes = [16, 128], strides = [1, 1]} : vector<16x384xf32> to vector<16x128xf32>
    %29 = arith.addf %27, %28 : vector<16x128xf32>
    %30 = arith.negf %29 : vector<16x128xf32>
    %31 = math.exp %30 : vector<16x128xf32>
    %cst_22 = arith.constant 1.000000e+00 : f32
    %32 = vector.broadcast %cst_22 : f32 to vector<16x128xf32>
    %33 = arith.addf %32, %31 : vector<16x128xf32>
    %34 = arith.divf %32, %33 : vector<16x128xf32>
    %35 = vector.extract_strided_slice %26 {offsets = [0, 128], sizes = [16, 128], strides = [1, 1]} : vector<16x384xf32> to vector<16x128xf32>
    %36 = vector.extract_strided_slice %22 {offsets = [0, 128], sizes = [16, 128], strides = [1, 1]} : vector<16x384xf32> to vector<16x128xf32>
    %37 = arith.addf %35, %36 : vector<16x128xf32>
    %38 = arith.negf %37 : vector<16x128xf32>
    %39 = math.exp %38 : vector<16x128xf32>
    %cst_23 = arith.constant 1.000000e+00 : f32
    %40 = vector.broadcast %cst_23 : f32 to vector<16x128xf32>
    %41 = arith.addf %40, %39 : vector<16x128xf32>
    %42 = arith.divf %40, %41 : vector<16x128xf32>
    %43 = vector.extract_strided_slice %26 {offsets = [0, 256], sizes = [16, 128], strides = [1, 1]} : vector<16x384xf32> to vector<16x128xf32>
    %44 = vector.extract_strided_slice %22 {offsets = [0, 256], sizes = [16, 128], strides = [1, 1]} : vector<16x384xf32> to vector<16x128xf32>
    %45 = arith.addf %44, %17 : vector<16x128xf32>
    %46 = arith.mulf %34, %45 : vector<16x128xf32>
    %47 = arith.addf %43, %46 : vector<16x128xf32>
    %48 = math.tanh %47 : vector<16x128xf32>
    %cst_24 = arith.constant 1.000000e+00 : f32
    %49 = vector.broadcast %cst_24 : f32 to vector<16x128xf32>
    %50 = arith.subf %49, %42 : vector<16x128xf32>
    %51 = arith.mulf %50, %48 : vector<16x128xf32>
    %52 = arith.mulf %42, %20 : vector<16x128xf32>
    %53 = arith.addf %51, %52 : vector<16x128xf32>
    %c0_25 = arith.constant 0 : index
    %c0_26 = arith.constant 0 : index
    %54 = vector.load %arg14[%c0_25, %c0_26] : memref<16x128xf32, #tpu.memory_space<vmem>>, vector<16x128xf32>
    tpu.vector_store %arg14[%c0_25, %c0_26], %53 {strides = array<i32>} : memref<16x128xf32, #tpu.memory_space<vmem>>, vector<16x128xf32>,
    %55 = arith.truncf %53 : vector<16x128xf32> to vector<16x128xbf16>
    %56 = arith.index_cast %24 : i32 to index
    %c0_27 = arith.constant 0 : index
    %57 = vector.load %arg12[%56, %c0_27] : memref<128x128xbf16, #tpu.memory_space<vmem>>, vector<16x128xbf16>
    tpu.vector_store %arg12[%56, %c0_27], %55 {strides = array<i32>} : memref<128x128xbf16, #tpu.memory_space<vmem>>, vector<16x128xbf16>,
    %c1_i32 = arith.constant 1 : i32
    %c0_28 = arith.constant 0 : index
    %c0_29 = arith.constant 0 : index
    %58 = vector.load %arg14[%c0_28, %c0_29] : memref<16x128xf32, #tpu.memory_space<vmem>>, vector<16x128xf32>
    %59 = arith.truncf %58 : vector<16x128xf32> to vector<16x128xbf16>
    %cst_30 = arith.constant dense<0.000000e+00> : vector<16x384xf32>
    %60 = tpu.matmul %59, %13, %cst_30 {dimension_numbers = #tpu.dot_dimension_numbers<[1], [0], [0], [1], [0, 0, 1, 1], [], []>} : vector<16x128xbf16>, vector<128x384xbf16>, vector<16x384xf32> -> vector<16x384xf32>
    %c16_i32_31 = arith.constant 16 : i32
    %61 = arith.muli %c1_i32, %c16_i32_31 : i32
    %62 = tpu.assume_multiple %61, 16 : i32
    %63 = arith.index_cast %62 : i32 to index
    %c0_32 = arith.constant 0 : index
    %64 = vector.load %arg13[%63, %c0_32] : memref<128x384xf32, #tpu.memory_space<vmem>>, vector<16x384xf32>
    %65 = vector.extract_strided_slice %64 {offsets = [0, 0], sizes = [16, 128], strides = [1, 1]} : vector<16x384xf32> to vector<16x128xf32>
    %66 = vector.extract_strided_slice %60 {offsets = [0, 0], sizes = [16, 128], strides = [1, 1]} : vector<16x384xf32> to vector<16x128xf32>
    %67 = arith.addf %65, %66 : vector<16x128xf32>
    %68 = arith.negf %67 : vector<16x128xf32>
    %69 = math.exp %68 : vector<16x128xf32>
    %cst_33 = arith.constant 1.000000e+00 : f32
    %70 = vector.broadcast %cst_33 : f32 to vector<16x128xf32>
    %71 = arith.addf %70, %69 : vector<16x128xf32>
    %72 = arith.divf %70, %71 : vector<16x128xf32>
    %73 = vector.extract_strided_slice %64 {offsets = [0, 128], sizes = [16, 128], strides = [1, 1]} : vector<16x384xf32> to vector<16x128xf32>
    %74 = vector.extract_strided_slice %60 {offsets = [0, 128], sizes = [16, 128], strides = [1, 1]} : vector<16x384xf32> to vector<16x128xf32>
    %75 = arith.addf %73, %74 : vector<16x128xf32>
    %76 = arith.negf %75 : vector<16x128xf32>
    %77 = math.exp %76 : vector<16x128xf32>
    %cst_34 = arith.constant 1.000000e+00 : f32
    %78 = vector.broadcast %cst_34 : f32 to vector<16x128xf32>
    %79 = arith.addf %78, %77 : vector<16x128xf32>
    %80 = arith.divf %78, %79 : vector<16x128xf32>
    %81 = vector.extract_strided_slice %64 {offsets = [0, 256], sizes = [16, 128], strides = [1, 1]} : vector<16x384xf32> to vector<16x128xf32>
    %82 = vector.extract_strided_slice %60 {offsets = [0, 256], sizes = [16, 128], strides = [1, 1]} : vector<16x384xf32> to vector<16x128xf32>
    %83 = arith.addf %82, %17 : vector<16x128xf32>
    %84 = arith.mulf %72, %83 : vector<16x128xf32>
    %85 = arith.addf %81, %84 : vector<16x128xf32>
    %86 = math.tanh %85 : vector<16x128xf32>
    %cst_35 = arith.constant 1.000000e+00 : f32
    %87 = vector.broadcast %cst_35 : f32 to vector<16x128xf32>
    %88 = arith.subf %87, %80 : vector<16x128xf32>
    %89 = arith.mulf %88, %86 : vector<16x128xf32>
    %90 = arith.mulf %80, %58 : vector<16x128xf32>
    %91 = arith.addf %89, %90 : vector<16x128xf32>
    %c0_36 = arith.constant 0 : index
    %c0_37 = arith.constant 0 : index
    %92 = vector.load %arg14[%c0_36, %c0_37] : memref<16x128xf32, #tpu.memory_space<vmem>>, vector<16x128xf32>
    tpu.vector_store %arg14[%c0_36, %c0_37], %91 {strides = array<i32>} : memref<16x128xf32, #tpu.memory_space<vmem>>, vector<16x128xf32>,
    %93 = arith.truncf %91 : vector<16x128xf32> to vector<16x128xbf16>
    %94 = arith.index_cast %62 : i32 to index
    %c0_38 = arith.constant 0 : index
    %95 = vector.load %arg12[%94, %c0_38] : memref<128x128xbf16, #tpu.memory_space<vmem>>, vector<16x128xbf16>
    tpu.vector_store %arg12[%94, %c0_38], %93 {strides = array<i32>} : memref<128x128xbf16, #tpu.memory_space<vmem>>, vector<16x128xbf16>,
    %c2_i32 = arith.constant 2 : i32
    %c0_39 = arith.constant 0 : index
    %c0_40 = arith.constant 0 : index
    %96 = vector.load %arg14[%c0_39, %c0_40] : memref<16x128xf32, #tpu.memory_space<vmem>>, vector<16x128xf32>
    %97 = arith.truncf %96 : vector<16x128xf32> to vector<16x128xbf16>
    %cst_41 = arith.constant dense<0.000000e+00> : vector<16x384xf32>
    %98 = tpu.matmul %97, %13, %cst_41 {dimension_numbers = #tpu.dot_dimension_numbers<[1], [0], [0], [1], [0, 0, 1, 1], [], []>} : vector<16x128xbf16>, vector<128x384xbf16>, vector<16x384xf32> -> vector<16x384xf32>
    %c16_i32_42 = arith.constant 16 : i32
    %99 = arith.muli %c2_i32, %c16_i32_42 : i32
    %100 = tpu.assume_multiple %99, 16 : i32
    %101 = arith.index_cast %100 : i32 to index
    %c0_43 = arith.constant 0 : index
    %102 = vector.load %arg13[%101, %c0_43] : memref<128x384xf32, #tpu.memory_space<vmem>>, vector<16x384xf32>
    %103 = vector.extract_strided_slice %102 {offsets = [0, 0], sizes = [16, 128], strides = [1, 1]} : vector<16x384xf32> to vector<16x128xf32>
    %104 = vector.extract_strided_slice %98 {offsets = [0, 0], sizes = [16, 128], strides = [1, 1]} : vector<16x384xf32> to vector<16x128xf32>
    %105 = arith.addf %103, %104 : vector<16x128xf32>
    %106 = arith.negf %105 : vector<16x128xf32>
    %107 = math.exp %106 : vector<16x128xf32>
    %cst_44 = arith.constant 1.000000e+00 : f32
    %108 = vector.broadcast %cst_44 : f32 to vector<16x128xf32>
    %109 = arith.addf %108, %107 : vector<16x128xf32>
    %110 = arith.divf %108, %109 : vector<16x128xf32>
    %111 = vector.extract_strided_slice %102 {offsets = [0, 128], sizes = [16, 128], strides = [1, 1]} : vector<16x384xf32> to vector<16x128xf32>
    %112 = vector.extract_strided_slice %98 {offsets = [0, 128], sizes = [16, 128], strides = [1, 1]} : vector<16x384xf32> to vector<16x128xf32>
    %113 = arith.addf %111, %112 : vector<16x128xf32>
    %114 = arith.negf %113 : vector<16x128xf32>
    %115 = math.exp %114 : vector<16x128xf32>
    %cst_45 = arith.constant 1.000000e+00 : f32
    %116 = vector.broadcast %cst_45 : f32 to vector<16x128xf32>
    %117 = arith.addf %116, %115 : vector<16x128xf32>
    %118 = arith.divf %116, %117 : vector<16x128xf32>
    %119 = vector.extract_strided_slice %102 {offsets = [0, 256], sizes = [16, 128], strides = [1, 1]} : vector<16x384xf32> to vector<16x128xf32>
    %120 = vector.extract_strided_slice %98 {offsets = [0, 256], sizes = [16, 128], strides = [1, 1]} : vector<16x384xf32> to vector<16x128xf32>
    %121 = arith.addf %120, %17 : vector<16x128xf32>
    %122 = arith.mulf %110, %121 : vector<16x128xf32>
    %123 = arith.addf %119, %122 : vector<16x128xf32>
    %124 = math.tanh %123 : vector<16x128xf32>
    %cst_46 = arith.constant 1.000000e+00 : f32
    %125 = vector.broadcast %cst_46 : f32 to vector<16x128xf32>
    %126 = arith.subf %125, %118 : vector<16x128xf32>
    %127 = arith.mulf %126, %124 : vector<16x128xf32>
    %128 = arith.mulf %118, %96 : vector<16x128xf32>
    %129 = arith.addf %127, %128 : vector<16x128xf32>
    %c0_47 = arith.constant 0 : index
    %c0_48 = arith.constant 0 : index
    %130 = vector.load %arg14[%c0_47, %c0_48] : memref<16x128xf32, #tpu.memory_space<vmem>>, vector<16x128xf32>
    tpu.vector_store %arg14[%c0_47, %c0_48], %129 {strides = array<i32>} : memref<16x128xf32, #tpu.memory_space<vmem>>, vector<16x128xf32>,
    %131 = arith.truncf %129 : vector<16x128xf32> to vector<16x128xbf16>
    %132 = arith.index_cast %100 : i32 to index
    %c0_49 = arith.constant 0 : index
    %133 = vector.load %arg12[%132, %c0_49] : memref<128x128xbf16, #tpu.memory_space<vmem>>, vector<16x128xbf16>
    tpu.vector_store %arg12[%132, %c0_49], %131 {strides = array<i32>} : memref<128x128xbf16, #tpu.memory_space<vmem>>, vector<16x128xbf16>,
    %c3_i32 = arith.constant 3 : i32
    %c0_50 = arith.constant 0 : index
    %c0_51 = arith.constant 0 : index
    %134 = vector.load %arg14[%c0_50, %c0_51] : memref<16x128xf32, #tpu.memory_space<vmem>>, vector<16x128xf32>
    %135 = arith.truncf %134 : vector<16x128xf32> to vector<16x128xbf16>
    %cst_52 = arith.constant dense<0.000000e+00> : vector<16x384xf32>
    %136 = tpu.matmul %135, %13, %cst_52 {dimension_numbers = #tpu.dot_dimension_numbers<[1], [0], [0], [1], [0, 0, 1, 1], [], []>} : vector<16x128xbf16>, vector<128x384xbf16>, vector<16x384xf32> -> vector<16x384xf32>
    %c16_i32_53 = arith.constant 16 : i32
    %137 = arith.muli %c3_i32, %c16_i32_53 : i32
    %138 = tpu.assume_multiple %137, 16 : i32
    %139 = arith.index_cast %138 : i32 to index
    %c0_54 = arith.constant 0 : index
    %140 = vector.load %arg13[%139, %c0_54] : memref<128x384xf32, #tpu.memory_space<vmem>>, vector<16x384xf32>
    %141 = vector.extract_strided_slice %140 {offsets = [0, 0], sizes = [16, 128], strides = [1, 1]} : vector<16x384xf32> to vector<16x128xf32>
    %142 = vector.extract_strided_slice %136 {offsets = [0, 0], sizes = [16, 128], strides = [1, 1]} : vector<16x384xf32> to vector<16x128xf32>
    %143 = arith.addf %141, %142 : vector<16x128xf32>
    %144 = arith.negf %143 : vector<16x128xf32>
    %145 = math.exp %144 : vector<16x128xf32>
    %cst_55 = arith.constant 1.000000e+00 : f32
    %146 = vector.broadcast %cst_55 : f32 to vector<16x128xf32>
    %147 = arith.addf %146, %145 : vector<16x128xf32>
    %148 = arith.divf %146, %147 : vector<16x128xf32>
    %149 = vector.extract_strided_slice %140 {offsets = [0, 128], sizes = [16, 128], strides = [1, 1]} : vector<16x384xf32> to vector<16x128xf32>
    %150 = vector.extract_strided_slice %136 {offsets = [0, 128], sizes = [16, 128], strides = [1, 1]} : vector<16x384xf32> to vector<16x128xf32>
    %151 = arith.addf %149, %150 : vector<16x128xf32>
    %152 = arith.negf %151 : vector<16x128xf32>
    %153 = math.exp %152 : vector<16x128xf32>
    %cst_56 = arith.constant 1.000000e+00 : f32
    %154 = vector.broadcast %cst_56 : f32 to vector<16x128xf32>
    %155 = arith.addf %154, %153 : vector<16x128xf32>
    %156 = arith.divf %154, %155 : vector<16x128xf32>
    %157 = vector.extract_strided_slice %140 {offsets = [0, 256], sizes = [16, 128], strides = [1, 1]} : vector<16x384xf32> to vector<16x128xf32>
    %158 = vector.extract_strided_slice %136 {offsets = [0, 256], sizes = [16, 128], strides = [1, 1]} : vector<16x384xf32> to vector<16x128xf32>
    %159 = arith.addf %158, %17 : vector<16x128xf32>
    %160 = arith.mulf %148, %159 : vector<16x128xf32>
    %161 = arith.addf %157, %160 : vector<16x128xf32>
    %162 = math.tanh %161 : vector<16x128xf32>
    %cst_57 = arith.constant 1.000000e+00 : f32
    %163 = vector.broadcast %cst_57 : f32 to vector<16x128xf32>
    %164 = arith.subf %163, %156 : vector<16x128xf32>
    %165 = arith.mulf %164, %162 : vector<16x128xf32>
    %166 = arith.mulf %156, %134 : vector<16x128xf32>
    %167 = arith.addf %165, %166 : vector<16x128xf32>
    %c0_58 = arith.constant 0 : index
    %c0_59 = arith.constant 0 : index
    %168 = vector.load %arg14[%c0_58, %c0_59] : memref<16x128xf32, #tpu.memory_space<vmem>>, vector<16x128xf32>
    tpu.vector_store %arg14[%c0_58, %c0_59], %167 {strides = array<i32>} : memref<16x128xf32, #tpu.memory_space<vmem>>, vector<16x128xf32>,
    %169 = arith.truncf %167 : vector<16x128xf32> to vector<16x128xbf16>
    %170 = arith.index_cast %138 : i32 to index
    %c0_60 = arith.constant 0 : index
    %171 = vector.load %arg12[%170, %c0_60] : memref<128x128xbf16, #tpu.memory_space<vmem>>, vector<16x128xbf16>
    tpu.vector_store %arg12[%170, %c0_60], %169 {strides = array<i32>} : memref<128x128xbf16, #tpu.memory_space<vmem>>, vector<16x128xbf16>,
    %c4_i32 = arith.constant 4 : i32
    %c0_61 = arith.constant 0 : index
    %c0_62 = arith.constant 0 : index
    %172 = vector.load %arg14[%c0_61, %c0_62] : memref<16x128xf32, #tpu.memory_space<vmem>>, vector<16x128xf32>
    %173 = arith.truncf %172 : vector<16x128xf32> to vector<16x128xbf16>
    %cst_63 = arith.constant dense<0.000000e+00> : vector<16x384xf32>
    %174 = tpu.matmul %173, %13, %cst_63 {dimension_numbers = #tpu.dot_dimension_numbers<[1], [0], [0], [1], [0, 0, 1, 1], [], []>} : vector<16x128xbf16>, vector<128x384xbf16>, vector<16x384xf32> -> vector<16x384xf32>
    %c16_i32_64 = arith.constant 16 : i32
    %175 = arith.muli %c4_i32, %c16_i32_64 : i32
    %176 = tpu.assume_multiple %175, 16 : i32
    %177 = arith.index_cast %176 : i32 to index
    %c0_65 = arith.constant 0 : index
    %178 = vector.load %arg13[%177, %c0_65] : memref<128x384xf32, #tpu.memory_space<vmem>>, vector<16x384xf32>
    %179 = vector.extract_strided_slice %178 {offsets = [0, 0], sizes = [16, 128], strides = [1, 1]} : vector<16x384xf32> to vector<16x128xf32>
    %180 = vector.extract_strided_slice %174 {offsets = [0, 0], sizes = [16, 128], strides = [1, 1]} : vector<16x384xf32> to vector<16x128xf32>
    %181 = arith.addf %179, %180 : vector<16x128xf32>
    %182 = arith.negf %181 : vector<16x128xf32>
    %183 = math.exp %182 : vector<16x128xf32>
    %cst_66 = arith.constant 1.000000e+00 : f32
    %184 = vector.broadcast %cst_66 : f32 to vector<16x128xf32>
    %185 = arith.addf %184, %183 : vector<16x128xf32>
    %186 = arith.divf %184, %185 : vector<16x128xf32>
    %187 = vector.extract_strided_slice %178 {offsets = [0, 128], sizes = [16, 128], strides = [1, 1]} : vector<16x384xf32> to vector<16x128xf32>
    %188 = vector.extract_strided_slice %174 {offsets = [0, 128], sizes = [16, 128], strides = [1, 1]} : vector<16x384xf32> to vector<16x128xf32>
    %189 = arith.addf %187, %188 : vector<16x128xf32>
    %190 = arith.negf %189 : vector<16x128xf32>
    %191 = math.exp %190 : vector<16x128xf32>
    %cst_67 = arith.constant 1.000000e+00 : f32
    %192 = vector.broadcast %cst_67 : f32 to vector<16x128xf32>
    %193 = arith.addf %192, %191 : vector<16x128xf32>
    %194 = arith.divf %192, %193 : vector<16x128xf32>
    %195 = vector.extract_strided_slice %178 {offsets = [0, 256], sizes = [16, 128], strides = [1, 1]} : vector<16x384xf32> to vector<16x128xf32>
    %196 = vector.extract_strided_slice %174 {offsets = [0, 256], sizes = [16, 128], strides = [1, 1]} : vector<16x384xf32> to vector<16x128xf32>
    %197 = arith.addf %196, %17 : vector<16x128xf32>
    %198 = arith.mulf %186, %197 : vector<16x128xf32>
    %199 = arith.addf %195, %198 : vector<16x128xf32>
    %200 = math.tanh %199 : vector<16x128xf32>
    %cst_68 = arith.constant 1.000000e+00 : f32
    %201 = vector.broadcast %cst_68 : f32 to vector<16x128xf32>
    %202 = arith.subf %201, %194 : vector<16x128xf32>
    %203 = arith.mulf %202, %200 : vector<16x128xf32>
    %204 = arith.mulf %194, %172 : vector<16x128xf32>
    %205 = arith.addf %203, %204 : vector<16x128xf32>
    %c0_69 = arith.constant 0 : index
    %c0_70 = arith.constant 0 : index
    %206 = vector.load %arg14[%c0_69, %c0_70] : memref<16x128xf32, #tpu.memory_space<vmem>>, vector<16x128xf32>
    tpu.vector_store %arg14[%c0_69, %c0_70], %205 {strides = array<i32>} : memref<16x128xf32, #tpu.memory_space<vmem>>, vector<16x128xf32>,
    %207 = arith.truncf %205 : vector<16x128xf32> to vector<16x128xbf16>
    %208 = arith.index_cast %176 : i32 to index
    %c0_71 = arith.constant 0 : index
    %209 = vector.load %arg12[%208, %c0_71] : memref<128x128xbf16, #tpu.memory_space<vmem>>, vector<16x128xbf16>
    tpu.vector_store %arg12[%208, %c0_71], %207 {strides = array<i32>} : memref<128x128xbf16, #tpu.memory_space<vmem>>, vector<16x128xbf16>,
    %c5_i32 = arith.constant 5 : i32
    %c0_72 = arith.constant 0 : index
    %c0_73 = arith.constant 0 : index
    %210 = vector.load %arg14[%c0_72, %c0_73] : memref<16x128xf32, #tpu.memory_space<vmem>>, vector<16x128xf32>
    %211 = arith.truncf %210 : vector<16x128xf32> to vector<16x128xbf16>
    %cst_74 = arith.constant dense<0.000000e+00> : vector<16x384xf32>
    %212 = tpu.matmul %211, %13, %cst_74 {dimension_numbers = #tpu.dot_dimension_numbers<[1], [0], [0], [1], [0, 0, 1, 1], [], []>} : vector<16x128xbf16>, vector<128x384xbf16>, vector<16x384xf32> -> vector<16x384xf32>
    %c16_i32_75 = arith.constant 16 : i32
    %213 = arith.muli %c5_i32, %c16_i32_75 : i32
    %214 = tpu.assume_multiple %213, 16 : i32
    %215 = arith.index_cast %214 : i32 to index
    %c0_76 = arith.constant 0 : index
    %216 = vector.load %arg13[%215, %c0_76] : memref<128x384xf32, #tpu.memory_space<vmem>>, vector<16x384xf32>
    %217 = vector.extract_strided_slice %216 {offsets = [0, 0], sizes = [16, 128], strides = [1, 1]} : vector<16x384xf32> to vector<16x128xf32>
    %218 = vector.extract_strided_slice %212 {offsets = [0, 0], sizes = [16, 128], strides = [1, 1]} : vector<16x384xf32> to vector<16x128xf32>
    %219 = arith.addf %217, %218 : vector<16x128xf32>
    %220 = arith.negf %219 : vector<16x128xf32>
    %221 = math.exp %220 : vector<16x128xf32>
    %cst_77 = arith.constant 1.000000e+00 : f32
    %222 = vector.broadcast %cst_77 : f32 to vector<16x128xf32>
    %223 = arith.addf %222, %221 : vector<16x128xf32>
    %224 = arith.divf %222, %223 : vector<16x128xf32>
    %225 = vector.extract_strided_slice %216 {offsets = [0, 128], sizes = [16, 128], strides = [1, 1]} : vector<16x384xf32> to vector<16x128xf32>
    %226 = vector.extract_strided_slice %212 {offsets = [0, 128], sizes = [16, 128], strides = [1, 1]} : vector<16x384xf32> to vector<16x128xf32>
    %227 = arith.addf %225, %226 : vector<16x128xf32>
    %228 = arith.negf %227 : vector<16x128xf32>
    %229 = math.exp %228 : vector<16x128xf32>
    %cst_78 = arith.constant 1.000000e+00 : f32
    %230 = vector.broadcast %cst_78 : f32 to vector<16x128xf32>
    %231 = arith.addf %230, %229 : vector<16x128xf32>
    %232 = arith.divf %230, %231 : vector<16x128xf32>
    %233 = vector.extract_strided_slice %216 {offsets = [0, 256], sizes = [16, 128], strides = [1, 1]} : vector<16x384xf32> to vector<16x128xf32>
    %234 = vector.extract_strided_slice %212 {offsets = [0, 256], sizes = [16, 128], strides = [1, 1]} : vector<16x384xf32> to vector<16x128xf32>
    %235 = arith.addf %234, %17 : vector<16x128xf32>
    %236 = arith.mulf %224, %235 : vector<16x128xf32>
    %237 = arith.addf %233, %236 : vector<16x128xf32>
    %238 = math.tanh %237 : vector<16x128xf32>
    %cst_79 = arith.constant 1.000000e+00 : f32
    %239 = vector.broadcast %cst_79 : f32 to vector<16x128xf32>
    %240 = arith.subf %239, %232 : vector<16x128xf32>
    %241 = arith.mulf %240, %238 : vector<16x128xf32>
    %242 = arith.mulf %232, %210 : vector<16x128xf32>
    %243 = arith.addf %241, %242 : vector<16x128xf32>
    %c0_80 = arith.constant 0 : index
    %c0_81 = arith.constant 0 : index
    %244 = vector.load %arg14[%c0_80, %c0_81] : memref<16x128xf32, #tpu.memory_space<vmem>>, vector<16x128xf32>
    tpu.vector_store %arg14[%c0_80, %c0_81], %243 {strides = array<i32>} : memref<16x128xf32, #tpu.memory_space<vmem>>, vector<16x128xf32>,
    %245 = arith.truncf %243 : vector<16x128xf32> to vector<16x128xbf16>
    %246 = arith.index_cast %214 : i32 to index
    %c0_82 = arith.constant 0 : index
    %247 = vector.load %arg12[%246, %c0_82] : memref<128x128xbf16, #tpu.memory_space<vmem>>, vector<16x128xbf16>
    tpu.vector_store %arg12[%246, %c0_82], %245 {strides = array<i32>} : memref<128x128xbf16, #tpu.memory_space<vmem>>, vector<16x128xbf16>,
    %c6_i32 = arith.constant 6 : i32
    %c0_83 = arith.constant 0 : index
    %c0_84 = arith.constant 0 : index
    %248 = vector.load %arg14[%c0_83, %c0_84] : memref<16x128xf32, #tpu.memory_space<vmem>>, vector<16x128xf32>
    %249 = arith.truncf %248 : vector<16x128xf32> to vector<16x128xbf16>
    %cst_85 = arith.constant dense<0.000000e+00> : vector<16x384xf32>
    %250 = tpu.matmul %249, %13, %cst_85 {dimension_numbers = #tpu.dot_dimension_numbers<[1], [0], [0], [1], [0, 0, 1, 1], [], []>} : vector<16x128xbf16>, vector<128x384xbf16>, vector<16x384xf32> -> vector<16x384xf32>
    %c16_i32_86 = arith.constant 16 : i32
    %251 = arith.muli %c6_i32, %c16_i32_86 : i32
    %252 = tpu.assume_multiple %251, 16 : i32
    %253 = arith.index_cast %252 : i32 to index
    %c0_87 = arith.constant 0 : index
    %254 = vector.load %arg13[%253, %c0_87] : memref<128x384xf32, #tpu.memory_space<vmem>>, vector<16x384xf32>
    %255 = vector.extract_strided_slice %254 {offsets = [0, 0], sizes = [16, 128], strides = [1, 1]} : vector<16x384xf32> to vector<16x128xf32>
    %256 = vector.extract_strided_slice %250 {offsets = [0, 0], sizes = [16, 128], strides = [1, 1]} : vector<16x384xf32> to vector<16x128xf32>
    %257 = arith.addf %255, %256 : vector<16x128xf32>
    %258 = arith.negf %257 : vector<16x128xf32>
    %259 = math.exp %258 : vector<16x128xf32>
    %cst_88 = arith.constant 1.000000e+00 : f32
    %260 = vector.broadcast %cst_88 : f32 to vector<16x128xf32>
    %261 = arith.addf %260, %259 : vector<16x128xf32>
    %262 = arith.divf %260, %261 : vector<16x128xf32>
    %263 = vector.extract_strided_slice %254 {offsets = [0, 128], sizes = [16, 128], strides = [1, 1]} : vector<16x384xf32> to vector<16x128xf32>
    %264 = vector.extract_strided_slice %250 {offsets = [0, 128], sizes = [16, 128], strides = [1, 1]} : vector<16x384xf32> to vector<16x128xf32>
    %265 = arith.addf %263, %264 : vector<16x128xf32>
    %266 = arith.negf %265 : vector<16x128xf32>
    %267 = math.exp %266 : vector<16x128xf32>
    %cst_89 = arith.constant 1.000000e+00 : f32
    %268 = vector.broadcast %cst_89 : f32 to vector<16x128xf32>
    %269 = arith.addf %268, %267 : vector<16x128xf32>
    %270 = arith.divf %268, %269 : vector<16x128xf32>
    %271 = vector.extract_strided_slice %254 {offsets = [0, 256], sizes = [16, 128], strides = [1, 1]} : vector<16x384xf32> to vector<16x128xf32>
    %272 = vector.extract_strided_slice %250 {offsets = [0, 256], sizes = [16, 128], strides = [1, 1]} : vector<16x384xf32> to vector<16x128xf32>
    %273 = arith.addf %272, %17 : vector<16x128xf32>
    %274 = arith.mulf %262, %273 : vector<16x128xf32>
    %275 = arith.addf %271, %274 : vector<16x128xf32>
    %276 = math.tanh %275 : vector<16x128xf32>
    %cst_90 = arith.constant 1.000000e+00 : f32
    %277 = vector.broadcast %cst_90 : f32 to vector<16x128xf32>
    %278 = arith.subf %277, %270 : vector<16x128xf32>
    %279 = arith.mulf %278, %276 : vector<16x128xf32>
    %280 = arith.mulf %270, %248 : vector<16x128xf32>
    %281 = arith.addf %279, %280 : vector<16x128xf32>
    %c0_91 = arith.constant 0 : index
    %c0_92 = arith.constant 0 : index
    %282 = vector.load %arg14[%c0_91, %c0_92] : memref<16x128xf32, #tpu.memory_space<vmem>>, vector<16x128xf32>
    tpu.vector_store %arg14[%c0_91, %c0_92], %281 {strides = array<i32>} : memref<16x128xf32, #tpu.memory_space<vmem>>, vector<16x128xf32>,
    %283 = arith.truncf %281 : vector<16x128xf32> to vector<16x128xbf16>
    %284 = arith.index_cast %252 : i32 to index
    %c0_93 = arith.constant 0 : index
    %285 = vector.load %arg12[%284, %c0_93] : memref<128x128xbf16, #tpu.memory_space<vmem>>, vector<16x128xbf16>
    tpu.vector_store %arg12[%284, %c0_93], %283 {strides = array<i32>} : memref<128x128xbf16, #tpu.memory_space<vmem>>, vector<16x128xbf16>,
    %c7_i32 = arith.constant 7 : i32
    %c0_94 = arith.constant 0 : index
    %c0_95 = arith.constant 0 : index
    %286 = vector.load %arg14[%c0_94, %c0_95] : memref<16x128xf32, #tpu.memory_space<vmem>>, vector<16x128xf32>
    %287 = arith.truncf %286 : vector<16x128xf32> to vector<16x128xbf16>
    %cst_96 = arith.constant dense<0.000000e+00> : vector<16x384xf32>
    %288 = tpu.matmul %287, %13, %cst_96 {dimension_numbers = #tpu.dot_dimension_numbers<[1], [0], [0], [1], [0, 0, 1, 1], [], []>} : vector<16x128xbf16>, vector<128x384xbf16>, vector<16x384xf32> -> vector<16x384xf32>
    %c16_i32_97 = arith.constant 16 : i32
    %289 = arith.muli %c7_i32, %c16_i32_97 : i32
    %290 = tpu.assume_multiple %289, 16 : i32
    %291 = arith.index_cast %290 : i32 to index
    %c0_98 = arith.constant 0 : index
    %292 = vector.load %arg13[%291, %c0_98] : memref<128x384xf32, #tpu.memory_space<vmem>>, vector<16x384xf32>
    %293 = vector.extract_strided_slice %292 {offsets = [0, 0], sizes = [16, 128], strides = [1, 1]} : vector<16x384xf32> to vector<16x128xf32>
    %294 = vector.extract_strided_slice %288 {offsets = [0, 0], sizes = [16, 128], strides = [1, 1]} : vector<16x384xf32> to vector<16x128xf32>
    %295 = arith.addf %293, %294 : vector<16x128xf32>
    %296 = arith.negf %295 : vector<16x128xf32>
    %297 = math.exp %296 : vector<16x128xf32>
    %cst_99 = arith.constant 1.000000e+00 : f32
    %298 = vector.broadcast %cst_99 : f32 to vector<16x128xf32>
    %299 = arith.addf %298, %297 : vector<16x128xf32>
    %300 = arith.divf %298, %299 : vector<16x128xf32>
    %301 = vector.extract_strided_slice %292 {offsets = [0, 128], sizes = [16, 128], strides = [1, 1]} : vector<16x384xf32> to vector<16x128xf32>
    %302 = vector.extract_strided_slice %288 {offsets = [0, 128], sizes = [16, 128], strides = [1, 1]} : vector<16x384xf32> to vector<16x128xf32>
    %303 = arith.addf %301, %302 : vector<16x128xf32>
    %304 = arith.negf %303 : vector<16x128xf32>
    %305 = math.exp %304 : vector<16x128xf32>
    %cst_100 = arith.constant 1.000000e+00 : f32
    %306 = vector.broadcast %cst_100 : f32 to vector<16x128xf32>
    %307 = arith.addf %306, %305 : vector<16x128xf32>
    %308 = arith.divf %306, %307 : vector<16x128xf32>
    %309 = vector.extract_strided_slice %292 {offsets = [0, 256], sizes = [16, 128], strides = [1, 1]} : vector<16x384xf32> to vector<16x128xf32>
    %310 = vector.extract_strided_slice %288 {offsets = [0, 256], sizes = [16, 128], strides = [1, 1]} : vector<16x384xf32> to vector<16x128xf32>
    %311 = arith.addf %310, %17 : vector<16x128xf32>
    %312 = arith.mulf %300, %311 : vector<16x128xf32>
    %313 = arith.addf %309, %312 : vector<16x128xf32>
    %314 = math.tanh %313 : vector<16x128xf32>
    %cst_101 = arith.constant 1.000000e+00 : f32
    %315 = vector.broadcast %cst_101 : f32 to vector<16x128xf32>
    %316 = arith.subf %315, %308 : vector<16x128xf32>
    %317 = arith.mulf %316, %314 : vector<16x128xf32>
    %318 = arith.mulf %308, %286 : vector<16x128xf32>
    %319 = arith.addf %317, %318 : vector<16x128xf32>
    %c0_102 = arith.constant 0 : index
    %c0_103 = arith.constant 0 : index
    %320 = vector.load %arg14[%c0_102, %c0_103] : memref<16x128xf32, #tpu.memory_space<vmem>>, vector<16x128xf32>
    tpu.vector_store %arg14[%c0_102, %c0_103], %319 {strides = array<i32>} : memref<16x128xf32, #tpu.memory_space<vmem>>, vector<16x128xf32>,
    %321 = arith.truncf %319 : vector<16x128xf32> to vector<16x128xbf16>
    %322 = arith.index_cast %290 : i32 to index
    %c0_104 = arith.constant 0 : index
    %323 = vector.load %arg12[%322, %c0_104] : memref<128x128xbf16, #tpu.memory_space<vmem>>, vector<16x128xbf16>
    tpu.vector_store %arg12[%322, %c0_104], %321 {strides = array<i32>} : memref<128x128xbf16, #tpu.memory_space<vmem>>, vector<16x128xbf16>,
    %c8_i32 = arith.constant 8 : i32
    %c0_105 = arith.constant 0 : index
    %c0_106 = arith.constant 0 : index
    %324 = vector.load %arg14[%c0_105, %c0_106] : memref<16x128xf32, #tpu.memory_space<vmem>>, vector<16x128xf32>
    %c0_107 = arith.constant 0 : index
    %c0_108 = arith.constant 0 : index
    %325 = vector.load %arg12[%c0_107, %c0_108] : memref<128x128xbf16, #tpu.memory_space<vmem>>, vector<128x128xbf16>
    %c0_109 = arith.constant 0 : index
    %c0_110 = arith.constant 0 : index
    %c0_111 = arith.constant 0 : index
    %326 = vector.load %arg3[%c0_109, %c0_110, %c0_111] : memref<2x128x384xf32, #tpu.memory_space<vmem>>, vector<1x128x384xf32>
    %327 = vector.shape_cast %326 : vector<1x128x384xf32> to vector<128x384xf32>
    %328 = arith.truncf %327 : vector<128x384xf32> to vector<128x384xbf16>
    %cst_112 = arith.constant dense<0.000000e+00> : vector<128x384xf32>
    %329 = tpu.matmul %325, %328, %cst_112 {dimension_numbers = #tpu.dot_dimension_numbers<[1], [0], [0], [1], [0, 0, 1, 1], [], []>} : vector<128x128xbf16>, vector<128x384xbf16>, vector<128x384xf32> -> vector<128x384xf32>
    %c1 = arith.constant 1 : index
    %c0_113 = arith.constant 0 : index
    %c0_114 = arith.constant 0 : index
    %330 = vector.load %arg5[%c1, %c0_113, %c0_114] : memref<3x1x384xf32, #tpu.memory_space<vmem>>, vector<1x1x384xf32>
    %331 = vector.shape_cast %330 : vector<1x1x384xf32> to vector<1x384xf32>
    %332 = vector.broadcast %331 : vector<1x384xf32> to vector<128x384xf32>
    %333 = arith.addf %329, %332 : vector<128x384xf32>
    %c0_115 = arith.constant 0 : index
    %c0_116 = arith.constant 0 : index
    %334 = vector.load %arg13[%c0_115, %c0_116] : memref<128x384xf32, #tpu.memory_space<vmem>>, vector<128x384xf32>
    tpu.vector_store %arg13[%c0_115, %c0_116], %333 {strides = array<i32>} : memref<128x384xf32, #tpu.memory_space<vmem>>, vector<128x384xf32>,
    %c1_117 = arith.constant 1 : index
    %c0_118 = arith.constant 0 : index
    %c0_119 = arith.constant 0 : index
    %335 = vector.load %arg4[%c1_117, %c0_118, %c0_119] : memref<3x128x384xf32, #tpu.memory_space<vmem>>, vector<1x128x384xf32>
    %336 = vector.shape_cast %335 : vector<1x128x384xf32> to vector<128x384xf32>
    %337 = arith.truncf %336 : vector<128x384xf32> to vector<128x384xbf16>
    %c1_120 = arith.constant 1 : index
    %c0_121 = arith.constant 0 : index
    %c0_122 = arith.constant 0 : index
    %338 = vector.load %arg6[%c1_120, %c0_121, %c0_122] : memref<3x1x128xf32, #tpu.memory_space<vmem>>, vector<1x1x128xf32>
    %339 = vector.shape_cast %338 : vector<1x1x128xf32> to vector<1x128xf32>
    %340 = vector.shape_cast %339 : vector<1x128xf32> to vector<1x128xf32>
    %341 = vector.broadcast %340 : vector<1x128xf32> to vector<16x128xf32>
    %cst_123 = arith.constant 0.000000e+00 : f32
    %342 = vector.broadcast %cst_123 : f32 to vector<16x128xf32>
    %c0_124 = arith.constant 0 : index
    %c0_125 = arith.constant 0 : index
    %343 = vector.load %arg14[%c0_124, %c0_125] : memref<16x128xf32, #tpu.memory_space<vmem>>, vector<16x128xf32>
    tpu.vector_store %arg14[%c0_124, %c0_125], %342 {strides = array<i32>} : memref<16x128xf32, #tpu.memory_space<vmem>>, vector<16x128xf32>,
    %c0_i32_126 = arith.constant 0 : i32
    %c0_127 = arith.constant 0 : index
    %c0_128 = arith.constant 0 : index
    %344 = vector.load %arg14[%c0_127, %c0_128] : memref<16x128xf32, #tpu.memory_space<vmem>>, vector<16x128xf32>
    %345 = arith.truncf %344 : vector<16x128xf32> to vector<16x128xbf16>
    %cst_129 = arith.constant dense<0.000000e+00> : vector<16x384xf32>
    %346 = tpu.matmul %345, %337, %cst_129 {dimension_numbers = #tpu.dot_dimension_numbers<[1], [0], [0], [1], [0, 0, 1, 1], [], []>} : vector<16x128xbf16>, vector<128x384xbf16>, vector<16x384xf32> -> vector<16x384xf32>
    %c16_i32_130 = arith.constant 16 : i32
    %347 = arith.muli %c0_i32_126, %c16_i32_130 : i32
    %348 = tpu.assume_multiple %347, 16 : i32
    %349 = arith.index_cast %348 : i32 to index
    %c0_131 = arith.constant 0 : index
    %350 = vector.load %arg13[%349, %c0_131] : memref<128x384xf32, #tpu.memory_space<vmem>>, vector<16x384xf32>
    %351 = vector.extract_strided_slice %350 {offsets = [0, 0], sizes = [16, 128], strides = [1, 1]} : vector<16x384xf32> to vector<16x128xf32>
    %352 = vector.extract_strided_slice %346 {offsets = [0, 0], sizes = [16, 128], strides = [1, 1]} : vector<16x384xf32> to vector<16x128xf32>
    %353 = arith.addf %351, %352 : vector<16x128xf32>
    %354 = arith.negf %353 : vector<16x128xf32>
    %355 = math.exp %354 : vector<16x128xf32>
    %cst_132 = arith.constant 1.000000e+00 : f32
    %356 = vector.broadcast %cst_132 : f32 to vector<16x128xf32>
    %357 = arith.addf %356, %355 : vector<16x128xf32>
    %358 = arith.divf %356, %357 : vector<16x128xf32>
    %359 = vector.extract_strided_slice %350 {offsets = [0, 128], sizes = [16, 128], strides = [1, 1]} : vector<16x384xf32> to vector<16x128xf32>
    %360 = vector.extract_strided_slice %346 {offsets = [0, 128], sizes = [16, 128], strides = [1, 1]} : vector<16x384xf32> to vector<16x128xf32>
    %361 = arith.addf %359, %360 : vector<16x128xf32>
    %362 = arith.negf %361 : vector<16x128xf32>
    %363 = math.exp %362 : vector<16x128xf32>
    %cst_133 = arith.constant 1.000000e+00 : f32
    %364 = vector.broadcast %cst_133 : f32 to vector<16x128xf32>
    %365 = arith.addf %364, %363 : vector<16x128xf32>
    %366 = arith.divf %364, %365 : vector<16x128xf32>
    %367 = vector.extract_strided_slice %350 {offsets = [0, 256], sizes = [16, 128], strides = [1, 1]} : vector<16x384xf32> to vector<16x128xf32>
    %368 = vector.extract_strided_slice %346 {offsets = [0, 256], sizes = [16, 128], strides = [1, 1]} : vector<16x384xf32> to vector<16x128xf32>
    %369 = arith.addf %368, %341 : vector<16x128xf32>
    %370 = arith.mulf %358, %369 : vector<16x128xf32>
    %371 = arith.addf %367, %370 : vector<16x128xf32>
    %372 = math.tanh %371 : vector<16x128xf32>
    %cst_134 = arith.constant 1.000000e+00 : f32
    %373 = vector.broadcast %cst_134 : f32 to vector<16x128xf32>
    %374 = arith.subf %373, %366 : vector<16x128xf32>
    %375 = arith.mulf %374, %372 : vector<16x128xf32>
    %376 = arith.mulf %366, %344 : vector<16x128xf32>
    %377 = arith.addf %375, %376 : vector<16x128xf32>
    %c0_135 = arith.constant 0 : index
    %c0_136 = arith.constant 0 : index
    %378 = vector.load %arg14[%c0_135, %c0_136] : memref<16x128xf32, #tpu.memory_space<vmem>>, vector<16x128xf32>
    tpu.vector_store %arg14[%c0_135, %c0_136], %377 {strides = array<i32>} : memref<16x128xf32, #tpu.memory_space<vmem>>, vector<16x128xf32>,
    %379 = arith.truncf %377 : vector<16x128xf32> to vector<16x128xbf16>
    %380 = arith.index_cast %348 : i32 to index
    %c0_137 = arith.constant 0 : index
    %381 = vector.load %arg12[%380, %c0_137] : memref<128x128xbf16, #tpu.memory_space<vmem>>, vector<16x128xbf16>
    tpu.vector_store %arg12[%380, %c0_137], %379 {strides = array<i32>} : memref<128x128xbf16, #tpu.memory_space<vmem>>, vector<16x128xbf16>,
    %c1_i32_138 = arith.constant 1 : i32
    %c0_139 = arith.constant 0 : index
    %c0_140 = arith.constant 0 : index
    %382 = vector.load %arg14[%c0_139, %c0_140] : memref<16x128xf32, #tpu.memory_space<vmem>>, vector<16x128xf32>
    %383 = arith.truncf %382 : vector<16x128xf32> to vector<16x128xbf16>
    %cst_141 = arith.constant dense<0.000000e+00> : vector<16x384xf32>
    %384 = tpu.matmul %383, %337, %cst_141 {dimension_numbers = #tpu.dot_dimension_numbers<[1], [0], [0], [1], [0, 0, 1, 1], [], []>} : vector<16x128xbf16>, vector<128x384xbf16>, vector<16x384xf32> -> vector<16x384xf32>
    %c16_i32_142 = arith.constant 16 : i32
    %385 = arith.muli %c1_i32_138, %c16_i32_142 : i32
    %386 = tpu.assume_multiple %385, 16 : i32
    %387 = arith.index_cast %386 : i32 to index
    %c0_143 = arith.constant 0 : index
    %388 = vector.load %arg13[%387, %c0_143] : memref<128x384xf32, #tpu.memory_space<vmem>>, vector<16x384xf32>
    %389 = vector.extract_strided_slice %388 {offsets = [0, 0], sizes = [16, 128], strides = [1, 1]} : vector<16x384xf32> to vector<16x128xf32>
    %390 = vector.extract_strided_slice %384 {offsets = [0, 0], sizes = [16, 128], strides = [1, 1]} : vector<16x384xf32> to vector<16x128xf32>
    %391 = arith.addf %389, %390 : vector<16x128xf32>
    %392 = arith.negf %391 : vector<16x128xf32>
    %393 = math.exp %392 : vector<16x128xf32>
    %cst_144 = arith.constant 1.000000e+00 : f32
    %394 = vector.broadcast %cst_144 : f32 to vector<16x128xf32>
    %395 = arith.addf %394, %393 : vector<16x128xf32>
    %396 = arith.divf %394, %395 : vector<16x128xf32>
    %397 = vector.extract_strided_slice %388 {offsets = [0, 128], sizes = [16, 128], strides = [1, 1]} : vector<16x384xf32> to vector<16x128xf32>
    %398 = vector.extract_strided_slice %384 {offsets = [0, 128], sizes = [16, 128], strides = [1, 1]} : vector<16x384xf32> to vector<16x128xf32>
    %399 = arith.addf %397, %398 : vector<16x128xf32>
    %400 = arith.negf %399 : vector<16x128xf32>
    %401 = math.exp %400 : vector<16x128xf32>
    %cst_145 = arith.constant 1.000000e+00 : f32
    %402 = vector.broadcast %cst_145 : f32 to vector<16x128xf32>
    %403 = arith.addf %402, %401 : vector<16x128xf32>
    %404 = arith.divf %402, %403 : vector<16x128xf32>
    %405 = vector.extract_strided_slice %388 {offsets = [0, 256], sizes = [16, 128], strides = [1, 1]} : vector<16x384xf32> to vector<16x128xf32>
    %406 = vector.extract_strided_slice %384 {offsets = [0, 256], sizes = [16, 128], strides = [1, 1]} : vector<16x384xf32> to vector<16x128xf32>
    %407 = arith.addf %406, %341 : vector<16x128xf32>
    %408 = arith.mulf %396, %407 : vector<16x128xf32>
    %409 = arith.addf %405, %408 : vector<16x128xf32>
    %410 = math.tanh %409 : vector<16x128xf32>
    %cst_146 = arith.constant 1.000000e+00 : f32
    %411 = vector.broadcast %cst_146 : f32 to vector<16x128xf32>
    %412 = arith.subf %411, %404 : vector<16x128xf32>
    %413 = arith.mulf %412, %410 : vector<16x128xf32>
    %414 = arith.mulf %404, %382 : vector<16x128xf32>
    %415 = arith.addf %413, %414 : vector<16x128xf32>
    %c0_147 = arith.constant 0 : index
    %c0_148 = arith.constant 0 : index
    %416 = vector.load %arg14[%c0_147, %c0_148] : memref<16x128xf32, #tpu.memory_space<vmem>>, vector<16x128xf32>
    tpu.vector_store %arg14[%c0_147, %c0_148], %415 {strides = array<i32>} : memref<16x128xf32, #tpu.memory_space<vmem>>, vector<16x128xf32>,
    %417 = arith.truncf %415 : vector<16x128xf32> to vector<16x128xbf16>
    %418 = arith.index_cast %386 : i32 to index
    %c0_149 = arith.constant 0 : index
    %419 = vector.load %arg12[%418, %c0_149] : memref<128x128xbf16, #tpu.memory_space<vmem>>, vector<16x128xbf16>
    tpu.vector_store %arg12[%418, %c0_149], %417 {strides = array<i32>} : memref<128x128xbf16, #tpu.memory_space<vmem>>, vector<16x128xbf16>,
    %c2_i32_150 = arith.constant 2 : i32
    %c0_151 = arith.constant 0 : index
    %c0_152 = arith.constant 0 : index
    %420 = vector.load %arg14[%c0_151, %c0_152] : memref<16x128xf32, #tpu.memory_space<vmem>>, vector<16x128xf32>
    %421 = arith.truncf %420 : vector<16x128xf32> to vector<16x128xbf16>
    %cst_153 = arith.constant dense<0.000000e+00> : vector<16x384xf32>
    %422 = tpu.matmul %421, %337, %cst_153 {dimension_numbers = #tpu.dot_dimension_numbers<[1], [0], [0], [1], [0, 0, 1, 1], [], []>} : vector<16x128xbf16>, vector<128x384xbf16>, vector<16x384xf32> -> vector<16x384xf32>
    %c16_i32_154 = arith.constant 16 : i32
    %423 = arith.muli %c2_i32_150, %c16_i32_154 : i32
    %424 = tpu.assume_multiple %423, 16 : i32
    %425 = arith.index_cast %424 : i32 to index
    %c0_155 = arith.constant 0 : index
    %426 = vector.load %arg13[%425, %c0_155] : memref<128x384xf32, #tpu.memory_space<vmem>>, vector<16x384xf32>
    %427 = vector.extract_strided_slice %426 {offsets = [0, 0], sizes = [16, 128], strides = [1, 1]} : vector<16x384xf32> to vector<16x128xf32>
    %428 = vector.extract_strided_slice %422 {offsets = [0, 0], sizes = [16, 128], strides = [1, 1]} : vector<16x384xf32> to vector<16x128xf32>
    %429 = arith.addf %427, %428 : vector<16x128xf32>
    %430 = arith.negf %429 : vector<16x128xf32>
    %431 = math.exp %430 : vector<16x128xf32>
    %cst_156 = arith.constant 1.000000e+00 : f32
    %432 = vector.broadcast %cst_156 : f32 to vector<16x128xf32>
    %433 = arith.addf %432, %431 : vector<16x128xf32>
    %434 = arith.divf %432, %433 : vector<16x128xf32>
    %435 = vector.extract_strided_slice %426 {offsets = [0, 128], sizes = [16, 128], strides = [1, 1]} : vector<16x384xf32> to vector<16x128xf32>
    %436 = vector.extract_strided_slice %422 {offsets = [0, 128], sizes = [16, 128], strides = [1, 1]} : vector<16x384xf32> to vector<16x128xf32>
    %437 = arith.addf %435, %436 : vector<16x128xf32>
    %438 = arith.negf %437 : vector<16x128xf32>
    %439 = math.exp %438 : vector<16x128xf32>
    %cst_157 = arith.constant 1.000000e+00 : f32
    %440 = vector.broadcast %cst_157 : f32 to vector<16x128xf32>
    %441 = arith.addf %440, %439 : vector<16x128xf32>
    %442 = arith.divf %440, %441 : vector<16x128xf32>
    %443 = vector.extract_strided_slice %426 {offsets = [0, 256], sizes = [16, 128], strides = [1, 1]} : vector<16x384xf32> to vector<16x128xf32>
    %444 = vector.extract_strided_slice %422 {offsets = [0, 256], sizes = [16, 128], strides = [1, 1]} : vector<16x384xf32> to vector<16x128xf32>
    %445 = arith.addf %444, %341 : vector<16x128xf32>
    %446 = arith.mulf %434, %445 : vector<16x128xf32>
    %447 = arith.addf %443, %446 : vector<16x128xf32>
    %448 = math.tanh %447 : vector<16x128xf32>
    %cst_158 = arith.constant 1.000000e+00 : f32
    %449 = vector.broadcast %cst_158 : f32 to vector<16x128xf32>
    %450 = arith.subf %449, %442 : vector<16x128xf32>
    %451 = arith.mulf %450, %448 : vector<16x128xf32>
    %452 = arith.mulf %442, %420 : vector<16x128xf32>
    %453 = arith.addf %451, %452 : vector<16x128xf32>
    %c0_159 = arith.constant 0 : index
    %c0_160 = arith.constant 0 : index
    %454 = vector.load %arg14[%c0_159, %c0_160] : memref<16x128xf32, #tpu.memory_space<vmem>>, vector<16x128xf32>
    tpu.vector_store %arg14[%c0_159, %c0_160], %453 {strides = array<i32>} : memref<16x128xf32, #tpu.memory_space<vmem>>, vector<16x128xf32>,
    %455 = arith.truncf %453 : vector<16x128xf32> to vector<16x128xbf16>
    %456 = arith.index_cast %424 : i32 to index
    %c0_161 = arith.constant 0 : index
    %457 = vector.load %arg12[%456, %c0_161] : memref<128x128xbf16, #tpu.memory_space<vmem>>, vector<16x128xbf16>
    tpu.vector_store %arg12[%456, %c0_161], %455 {strides = array<i32>} : memref<128x128xbf16, #tpu.memory_space<vmem>>, vector<16x128xbf16>,
    %c3_i32_162 = arith.constant 3 : i32
    %c0_163 = arith.constant 0 : index
    %c0_164 = arith.constant 0 : index
    %458 = vector.load %arg14[%c0_163, %c0_164] : memref<16x128xf32, #tpu.memory_space<vmem>>, vector<16x128xf32>
    %459 = arith.truncf %458 : vector<16x128xf32> to vector<16x128xbf16>
    %cst_165 = arith.constant dense<0.000000e+00> : vector<16x384xf32>
    %460 = tpu.matmul %459, %337, %cst_165 {dimension_numbers = #tpu.dot_dimension_numbers<[1], [0], [0], [1], [0, 0, 1, 1], [], []>} : vector<16x128xbf16>, vector<128x384xbf16>, vector<16x384xf32> -> vector<16x384xf32>
    %c16_i32_166 = arith.constant 16 : i32
    %461 = arith.muli %c3_i32_162, %c16_i32_166 : i32
    %462 = tpu.assume_multiple %461, 16 : i32
    %463 = arith.index_cast %462 : i32 to index
    %c0_167 = arith.constant 0 : index
    %464 = vector.load %arg13[%463, %c0_167] : memref<128x384xf32, #tpu.memory_space<vmem>>, vector<16x384xf32>
    %465 = vector.extract_strided_slice %464 {offsets = [0, 0], sizes = [16, 128], strides = [1, 1]} : vector<16x384xf32> to vector<16x128xf32>
    %466 = vector.extract_strided_slice %460 {offsets = [0, 0], sizes = [16, 128], strides = [1, 1]} : vector<16x384xf32> to vector<16x128xf32>
    %467 = arith.addf %465, %466 : vector<16x128xf32>
    %468 = arith.negf %467 : vector<16x128xf32>
    %469 = math.exp %468 : vector<16x128xf32>
    %cst_168 = arith.constant 1.000000e+00 : f32
    %470 = vector.broadcast %cst_168 : f32 to vector<16x128xf32>
    %471 = arith.addf %470, %469 : vector<16x128xf32>
    %472 = arith.divf %470, %471 : vector<16x128xf32>
    %473 = vector.extract_strided_slice %464 {offsets = [0, 128], sizes = [16, 128], strides = [1, 1]} : vector<16x384xf32> to vector<16x128xf32>
    %474 = vector.extract_strided_slice %460 {offsets = [0, 128], sizes = [16, 128], strides = [1, 1]} : vector<16x384xf32> to vector<16x128xf32>
    %475 = arith.addf %473, %474 : vector<16x128xf32>
    %476 = arith.negf %475 : vector<16x128xf32>
    %477 = math.exp %476 : vector<16x128xf32>
    %cst_169 = arith.constant 1.000000e+00 : f32
    %478 = vector.broadcast %cst_169 : f32 to vector<16x128xf32>
    %479 = arith.addf %478, %477 : vector<16x128xf32>
    %480 = arith.divf %478, %479 : vector<16x128xf32>
    %481 = vector.extract_strided_slice %464 {offsets = [0, 256], sizes = [16, 128], strides = [1, 1]} : vector<16x384xf32> to vector<16x128xf32>
    %482 = vector.extract_strided_slice %460 {offsets = [0, 256], sizes = [16, 128], strides = [1, 1]} : vector<16x384xf32> to vector<16x128xf32>
    %483 = arith.addf %482, %341 : vector<16x128xf32>
    %484 = arith.mulf %472, %483 : vector<16x128xf32>
    %485 = arith.addf %481, %484 : vector<16x128xf32>
    %486 = math.tanh %485 : vector<16x128xf32>
    %cst_170 = arith.constant 1.000000e+00 : f32
    %487 = vector.broadcast %cst_170 : f32 to vector<16x128xf32>
    %488 = arith.subf %487, %480 : vector<16x128xf32>
    %489 = arith.mulf %488, %486 : vector<16x128xf32>
    %490 = arith.mulf %480, %458 : vector<16x128xf32>
    %491 = arith.addf %489, %490 : vector<16x128xf32>
    %c0_171 = arith.constant 0 : index
    %c0_172 = arith.constant 0 : index
    %492 = vector.load %arg14[%c0_171, %c0_172] : memref<16x128xf32, #tpu.memory_space<vmem>>, vector<16x128xf32>
    tpu.vector_store %arg14[%c0_171, %c0_172], %491 {strides = array<i32>} : memref<16x128xf32, #tpu.memory_space<vmem>>, vector<16x128xf32>,
    %493 = arith.truncf %491 : vector<16x128xf32> to vector<16x128xbf16>
    %494 = arith.index_cast %462 : i32 to index
    %c0_173 = arith.constant 0 : index
    %495 = vector.load %arg12[%494, %c0_173] : memref<128x128xbf16, #tpu.memory_space<vmem>>, vector<16x128xbf16>
    tpu.vector_store %arg12[%494, %c0_173], %493 {strides = array<i32>} : memref<128x128xbf16, #tpu.memory_space<vmem>>, vector<16x128xbf16>,
    %c4_i32_174 = arith.constant 4 : i32
    %c0_175 = arith.constant 0 : index
    %c0_176 = arith.constant 0 : index
    %496 = vector.load %arg14[%c0_175, %c0_176] : memref<16x128xf32, #tpu.memory_space<vmem>>, vector<16x128xf32>
    %497 = arith.truncf %496 : vector<16x128xf32> to vector<16x128xbf16>
    %cst_177 = arith.constant dense<0.000000e+00> : vector<16x384xf32>
    %498 = tpu.matmul %497, %337, %cst_177 {dimension_numbers = #tpu.dot_dimension_numbers<[1], [0], [0], [1], [0, 0, 1, 1], [], []>} : vector<16x128xbf16>, vector<128x384xbf16>, vector<16x384xf32> -> vector<16x384xf32>
    %c16_i32_178 = arith.constant 16 : i32
    %499 = arith.muli %c4_i32_174, %c16_i32_178 : i32
    %500 = tpu.assume_multiple %499, 16 : i32
    %501 = arith.index_cast %500 : i32 to index
    %c0_179 = arith.constant 0 : index
    %502 = vector.load %arg13[%501, %c0_179] : memref<128x384xf32, #tpu.memory_space<vmem>>, vector<16x384xf32>
    %503 = vector.extract_strided_slice %502 {offsets = [0, 0], sizes = [16, 128], strides = [1, 1]} : vector<16x384xf32> to vector<16x128xf32>
    %504 = vector.extract_strided_slice %498 {offsets = [0, 0], sizes = [16, 128], strides = [1, 1]} : vector<16x384xf32> to vector<16x128xf32>
    %505 = arith.addf %503, %504 : vector<16x128xf32>
    %506 = arith.negf %505 : vector<16x128xf32>
    %507 = math.exp %506 : vector<16x128xf32>
    %cst_180 = arith.constant 1.000000e+00 : f32
    %508 = vector.broadcast %cst_180 : f32 to vector<16x128xf32>
    %509 = arith.addf %508, %507 : vector<16x128xf32>
    %510 = arith.divf %508, %509 : vector<16x128xf32>
    %511 = vector.extract_strided_slice %502 {offsets = [0, 128], sizes = [16, 128], strides = [1, 1]} : vector<16x384xf32> to vector<16x128xf32>
    %512 = vector.extract_strided_slice %498 {offsets = [0, 128], sizes = [16, 128], strides = [1, 1]} : vector<16x384xf32> to vector<16x128xf32>
    %513 = arith.addf %511, %512 : vector<16x128xf32>
    %514 = arith.negf %513 : vector<16x128xf32>
    %515 = math.exp %514 : vector<16x128xf32>
    %cst_181 = arith.constant 1.000000e+00 : f32
    %516 = vector.broadcast %cst_181 : f32 to vector<16x128xf32>
    %517 = arith.addf %516, %515 : vector<16x128xf32>
    %518 = arith.divf %516, %517 : vector<16x128xf32>
    %519 = vector.extract_strided_slice %502 {offsets = [0, 256], sizes = [16, 128], strides = [1, 1]} : vector<16x384xf32> to vector<16x128xf32>
    %520 = vector.extract_strided_slice %498 {offsets = [0, 256], sizes = [16, 128], strides = [1, 1]} : vector<16x384xf32> to vector<16x128xf32>
    %521 = arith.addf %520, %341 : vector<16x128xf32>
    %522 = arith.mulf %510, %521 : vector<16x128xf32>
    %523 = arith.addf %519, %522 : vector<16x128xf32>
    %524 = math.tanh %523 : vector<16x128xf32>
    %cst_182 = arith.constant 1.000000e+00 : f32
    %525 = vector.broadcast %cst_182 : f32 to vector<16x128xf32>
    %526 = arith.subf %525, %518 : vector<16x128xf32>
    %527 = arith.mulf %526, %524 : vector<16x128xf32>
    %528 = arith.mulf %518, %496 : vector<16x128xf32>
    %529 = arith.addf %527, %528 : vector<16x128xf32>
    %c0_183 = arith.constant 0 : index
    %c0_184 = arith.constant 0 : index
    %530 = vector.load %arg14[%c0_183, %c0_184] : memref<16x128xf32, #tpu.memory_space<vmem>>, vector<16x128xf32>
    tpu.vector_store %arg14[%c0_183, %c0_184], %529 {strides = array<i32>} : memref<16x128xf32, #tpu.memory_space<vmem>>, vector<16x128xf32>,
    %531 = arith.truncf %529 : vector<16x128xf32> to vector<16x128xbf16>
    %532 = arith.index_cast %500 : i32 to index
    %c0_185 = arith.constant 0 : index
    %533 = vector.load %arg12[%532, %c0_185] : memref<128x128xbf16, #tpu.memory_space<vmem>>, vector<16x128xbf16>
    tpu.vector_store %arg12[%532, %c0_185], %531 {strides = array<i32>} : memref<128x128xbf16, #tpu.memory_space<vmem>>, vector<16x128xbf16>,
    %c5_i32_186 = arith.constant 5 : i32
    %c0_187 = arith.constant 0 : index
    %c0_188 = arith.constant 0 : index
    %534 = vector.load %arg14[%c0_187, %c0_188] : memref<16x128xf32, #tpu.memory_space<vmem>>, vector<16x128xf32>
    %535 = arith.truncf %534 : vector<16x128xf32> to vector<16x128xbf16>
    %cst_189 = arith.constant dense<0.000000e+00> : vector<16x384xf32>
    %536 = tpu.matmul %535, %337, %cst_189 {dimension_numbers = #tpu.dot_dimension_numbers<[1], [0], [0], [1], [0, 0, 1, 1], [], []>} : vector<16x128xbf16>, vector<128x384xbf16>, vector<16x384xf32> -> vector<16x384xf32>
    %c16_i32_190 = arith.constant 16 : i32
    %537 = arith.muli %c5_i32_186, %c16_i32_190 : i32
    %538 = tpu.assume_multiple %537, 16 : i32
    %539 = arith.index_cast %538 : i32 to index
    %c0_191 = arith.constant 0 : index
    %540 = vector.load %arg13[%539, %c0_191] : memref<128x384xf32, #tpu.memory_space<vmem>>, vector<16x384xf32>
    %541 = vector.extract_strided_slice %540 {offsets = [0, 0], sizes = [16, 128], strides = [1, 1]} : vector<16x384xf32> to vector<16x128xf32>
    %542 = vector.extract_strided_slice %536 {offsets = [0, 0], sizes = [16, 128], strides = [1, 1]} : vector<16x384xf32> to vector<16x128xf32>
    %543 = arith.addf %541, %542 : vector<16x128xf32>
    %544 = arith.negf %543 : vector<16x128xf32>
    %545 = math.exp %544 : vector<16x128xf32>
    %cst_192 = arith.constant 1.000000e+00 : f32
    %546 = vector.broadcast %cst_192 : f32 to vector<16x128xf32>
    %547 = arith.addf %546, %545 : vector<16x128xf32>
    %548 = arith.divf %546, %547 : vector<16x128xf32>
    %549 = vector.extract_strided_slice %540 {offsets = [0, 128], sizes = [16, 128], strides = [1, 1]} : vector<16x384xf32> to vector<16x128xf32>
    %550 = vector.extract_strided_slice %536 {offsets = [0, 128], sizes = [16, 128], strides = [1, 1]} : vector<16x384xf32> to vector<16x128xf32>
    %551 = arith.addf %549, %550 : vector<16x128xf32>
    %552 = arith.negf %551 : vector<16x128xf32>
    %553 = math.exp %552 : vector<16x128xf32>
    %cst_193 = arith.constant 1.000000e+00 : f32
    %554 = vector.broadcast %cst_193 : f32 to vector<16x128xf32>
    %555 = arith.addf %554, %553 : vector<16x128xf32>
    %556 = arith.divf %554, %555 : vector<16x128xf32>
    %557 = vector.extract_strided_slice %540 {offsets = [0, 256], sizes = [16, 128], strides = [1, 1]} : vector<16x384xf32> to vector<16x128xf32>
    %558 = vector.extract_strided_slice %536 {offsets = [0, 256], sizes = [16, 128], strides = [1, 1]} : vector<16x384xf32> to vector<16x128xf32>
    %559 = arith.addf %558, %341 : vector<16x128xf32>
    %560 = arith.mulf %548, %559 : vector<16x128xf32>
    %561 = arith.addf %557, %560 : vector<16x128xf32>
    %562 = math.tanh %561 : vector<16x128xf32>
    %cst_194 = arith.constant 1.000000e+00 : f32
    %563 = vector.broadcast %cst_194 : f32 to vector<16x128xf32>
    %564 = arith.subf %563, %556 : vector<16x128xf32>
    %565 = arith.mulf %564, %562 : vector<16x128xf32>
    %566 = arith.mulf %556, %534 : vector<16x128xf32>
    %567 = arith.addf %565, %566 : vector<16x128xf32>
    %c0_195 = arith.constant 0 : index
    %c0_196 = arith.constant 0 : index
    %568 = vector.load %arg14[%c0_195, %c0_196] : memref<16x128xf32, #tpu.memory_space<vmem>>, vector<16x128xf32>
    tpu.vector_store %arg14[%c0_195, %c0_196], %567 {strides = array<i32>} : memref<16x128xf32, #tpu.memory_space<vmem>>, vector<16x128xf32>,
    %569 = arith.truncf %567 : vector<16x128xf32> to vector<16x128xbf16>
    %570 = arith.index_cast %538 : i32 to index
    %c0_197 = arith.constant 0 : index
    %571 = vector.load %arg12[%570, %c0_197] : memref<128x128xbf16, #tpu.memory_space<vmem>>, vector<16x128xbf16>
    tpu.vector_store %arg12[%570, %c0_197], %569 {strides = array<i32>} : memref<128x128xbf16, #tpu.memory_space<vmem>>, vector<16x128xbf16>,
    %c6_i32_198 = arith.constant 6 : i32
    %c0_199 = arith.constant 0 : index
    %c0_200 = arith.constant 0 : index
    %572 = vector.load %arg14[%c0_199, %c0_200] : memref<16x128xf32, #tpu.memory_space<vmem>>, vector<16x128xf32>
    %573 = arith.truncf %572 : vector<16x128xf32> to vector<16x128xbf16>
    %cst_201 = arith.constant dense<0.000000e+00> : vector<16x384xf32>
    %574 = tpu.matmul %573, %337, %cst_201 {dimension_numbers = #tpu.dot_dimension_numbers<[1], [0], [0], [1], [0, 0, 1, 1], [], []>} : vector<16x128xbf16>, vector<128x384xbf16>, vector<16x384xf32> -> vector<16x384xf32>
    %c16_i32_202 = arith.constant 16 : i32
    %575 = arith.muli %c6_i32_198, %c16_i32_202 : i32
    %576 = tpu.assume_multiple %575, 16 : i32
    %577 = arith.index_cast %576 : i32 to index
    %c0_203 = arith.constant 0 : index
    %578 = vector.load %arg13[%577, %c0_203] : memref<128x384xf32, #tpu.memory_space<vmem>>, vector<16x384xf32>
    %579 = vector.extract_strided_slice %578 {offsets = [0, 0], sizes = [16, 128], strides = [1, 1]} : vector<16x384xf32> to vector<16x128xf32>
    %580 = vector.extract_strided_slice %574 {offsets = [0, 0], sizes = [16, 128], strides = [1, 1]} : vector<16x384xf32> to vector<16x128xf32>
    %581 = arith.addf %579, %580 : vector<16x128xf32>
    %582 = arith.negf %581 : vector<16x128xf32>
    %583 = math.exp %582 : vector<16x128xf32>
    %cst_204 = arith.constant 1.000000e+00 : f32
    %584 = vector.broadcast %cst_204 : f32 to vector<16x128xf32>
    %585 = arith.addf %584, %583 : vector<16x128xf32>
    %586 = arith.divf %584, %585 : vector<16x128xf32>
    %587 = vector.extract_strided_slice %578 {offsets = [0, 128], sizes = [16, 128], strides = [1, 1]} : vector<16x384xf32> to vector<16x128xf32>
    %588 = vector.extract_strided_slice %574 {offsets = [0, 128], sizes = [16, 128], strides = [1, 1]} : vector<16x384xf32> to vector<16x128xf32>
    %589 = arith.addf %587, %588 : vector<16x128xf32>
    %590 = arith.negf %589 : vector<16x128xf32>
    %591 = math.exp %590 : vector<16x128xf32>
    %cst_205 = arith.constant 1.000000e+00 : f32
    %592 = vector.broadcast %cst_205 : f32 to vector<16x128xf32>
    %593 = arith.addf %592, %591 : vector<16x128xf32>
    %594 = arith.divf %592, %593 : vector<16x128xf32>
    %595 = vector.extract_strided_slice %578 {offsets = [0, 256], sizes = [16, 128], strides = [1, 1]} : vector<16x384xf32> to vector<16x128xf32>
    %596 = vector.extract_strided_slice %574 {offsets = [0, 256], sizes = [16, 128], strides = [1, 1]} : vector<16x384xf32> to vector<16x128xf32>
    %597 = arith.addf %596, %341 : vector<16x128xf32>
    %598 = arith.mulf %586, %597 : vector<16x128xf32>
    %599 = arith.addf %595, %598 : vector<16x128xf32>
    %600 = math.tanh %599 : vector<16x128xf32>
    %cst_206 = arith.constant 1.000000e+00 : f32
    %601 = vector.broadcast %cst_206 : f32 to vector<16x128xf32>
    %602 = arith.subf %601, %594 : vector<16x128xf32>
    %603 = arith.mulf %602, %600 : vector<16x128xf32>
    %604 = arith.mulf %594, %572 : vector<16x128xf32>
    %605 = arith.addf %603, %604 : vector<16x128xf32>
    %c0_207 = arith.constant 0 : index
    %c0_208 = arith.constant 0 : index
    %606 = vector.load %arg14[%c0_207, %c0_208] : memref<16x128xf32, #tpu.memory_space<vmem>>, vector<16x128xf32>
    tpu.vector_store %arg14[%c0_207, %c0_208], %605 {strides = array<i32>} : memref<16x128xf32, #tpu.memory_space<vmem>>, vector<16x128xf32>,
    %607 = arith.truncf %605 : vector<16x128xf32> to vector<16x128xbf16>
    %608 = arith.index_cast %576 : i32 to index
    %c0_209 = arith.constant 0 : index
    %609 = vector.load %arg12[%608, %c0_209] : memref<128x128xbf16, #tpu.memory_space<vmem>>, vector<16x128xbf16>
    tpu.vector_store %arg12[%608, %c0_209], %607 {strides = array<i32>} : memref<128x128xbf16, #tpu.memory_space<vmem>>, vector<16x128xbf16>,
    %c7_i32_210 = arith.constant 7 : i32
    %c0_211 = arith.constant 0 : index
    %c0_212 = arith.constant 0 : index
    %610 = vector.load %arg14[%c0_211, %c0_212] : memref<16x128xf32, #tpu.memory_space<vmem>>, vector<16x128xf32>
    %611 = arith.truncf %610 : vector<16x128xf32> to vector<16x128xbf16>
    %cst_213 = arith.constant dense<0.000000e+00> : vector<16x384xf32>
    %612 = tpu.matmul %611, %337, %cst_213 {dimension_numbers = #tpu.dot_dimension_numbers<[1], [0], [0], [1], [0, 0, 1, 1], [], []>} : vector<16x128xbf16>, vector<128x384xbf16>, vector<16x384xf32> -> vector<16x384xf32>
    %c16_i32_214 = arith.constant 16 : i32
    %613 = arith.muli %c7_i32_210, %c16_i32_214 : i32
    %614 = tpu.assume_multiple %613, 16 : i32
    %615 = arith.index_cast %614 : i32 to index
    %c0_215 = arith.constant 0 : index
    %616 = vector.load %arg13[%615, %c0_215] : memref<128x384xf32, #tpu.memory_space<vmem>>, vector<16x384xf32>
    %617 = vector.extract_strided_slice %616 {offsets = [0, 0], sizes = [16, 128], strides = [1, 1]} : vector<16x384xf32> to vector<16x128xf32>
    %618 = vector.extract_strided_slice %612 {offsets = [0, 0], sizes = [16, 128], strides = [1, 1]} : vector<16x384xf32> to vector<16x128xf32>
    %619 = arith.addf %617, %618 : vector<16x128xf32>
    %620 = arith.negf %619 : vector<16x128xf32>
    %621 = math.exp %620 : vector<16x128xf32>
    %cst_216 = arith.constant 1.000000e+00 : f32
    %622 = vector.broadcast %cst_216 : f32 to vector<16x128xf32>
    %623 = arith.addf %622, %621 : vector<16x128xf32>
    %624 = arith.divf %622, %623 : vector<16x128xf32>
    %625 = vector.extract_strided_slice %616 {offsets = [0, 128], sizes = [16, 128], strides = [1, 1]} : vector<16x384xf32> to vector<16x128xf32>
    %626 = vector.extract_strided_slice %612 {offsets = [0, 128], sizes = [16, 128], strides = [1, 1]} : vector<16x384xf32> to vector<16x128xf32>
    %627 = arith.addf %625, %626 : vector<16x128xf32>
    %628 = arith.negf %627 : vector<16x128xf32>
    %629 = math.exp %628 : vector<16x128xf32>
    %cst_217 = arith.constant 1.000000e+00 : f32
    %630 = vector.broadcast %cst_217 : f32 to vector<16x128xf32>
    %631 = arith.addf %630, %629 : vector<16x128xf32>
    %632 = arith.divf %630, %631 : vector<16x128xf32>
    %633 = vector.extract_strided_slice %616 {offsets = [0, 256], sizes = [16, 128], strides = [1, 1]} : vector<16x384xf32> to vector<16x128xf32>
    %634 = vector.extract_strided_slice %612 {offsets = [0, 256], sizes = [16, 128], strides = [1, 1]} : vector<16x384xf32> to vector<16x128xf32>
    %635 = arith.addf %634, %341 : vector<16x128xf32>
    %636 = arith.mulf %624, %635 : vector<16x128xf32>
    %637 = arith.addf %633, %636 : vector<16x128xf32>
    %638 = math.tanh %637 : vector<16x128xf32>
    %cst_218 = arith.constant 1.000000e+00 : f32
    %639 = vector.broadcast %cst_218 : f32 to vector<16x128xf32>
    %640 = arith.subf %639, %632 : vector<16x128xf32>
    %641 = arith.mulf %640, %638 : vector<16x128xf32>
    %642 = arith.mulf %632, %610 : vector<16x128xf32>
    %643 = arith.addf %641, %642 : vector<16x128xf32>
    %c0_219 = arith.constant 0 : index
    %c0_220 = arith.constant 0 : index
    %644 = vector.load %arg14[%c0_219, %c0_220] : memref<16x128xf32, #tpu.memory_space<vmem>>, vector<16x128xf32>
    tpu.vector_store %arg14[%c0_219, %c0_220], %643 {strides = array<i32>} : memref<16x128xf32, #tpu.memory_space<vmem>>, vector<16x128xf32>,
    %645 = arith.truncf %643 : vector<16x128xf32> to vector<16x128xbf16>
    %646 = arith.index_cast %614 : i32 to index
    %c0_221 = arith.constant 0 : index
    %647 = vector.load %arg12[%646, %c0_221] : memref<128x128xbf16, #tpu.memory_space<vmem>>, vector<16x128xbf16>
    tpu.vector_store %arg12[%646, %c0_221], %645 {strides = array<i32>} : memref<128x128xbf16, #tpu.memory_space<vmem>>, vector<16x128xbf16>,
    %c8_i32_222 = arith.constant 8 : i32
    %c0_223 = arith.constant 0 : index
    %c0_224 = arith.constant 0 : index
    %648 = vector.load %arg14[%c0_223, %c0_224] : memref<16x128xf32, #tpu.memory_space<vmem>>, vector<16x128xf32>
    %c0_225 = arith.constant 0 : index
    %c0_226 = arith.constant 0 : index
    %649 = vector.load %arg12[%c0_225, %c0_226] : memref<128x128xbf16, #tpu.memory_space<vmem>>, vector<128x128xbf16>
    %c1_227 = arith.constant 1 : index
    %c0_228 = arith.constant 0 : index
    %c0_229 = arith.constant 0 : index
    %650 = vector.load %arg3[%c1_227, %c0_228, %c0_229] : memref<2x128x384xf32, #tpu.memory_space<vmem>>, vector<1x128x384xf32>
    %651 = vector.shape_cast %650 : vector<1x128x384xf32> to vector<128x384xf32>
    %652 = arith.truncf %651 : vector<128x384xf32> to vector<128x384xbf16>
    %cst_230 = arith.constant dense<0.000000e+00> : vector<128x384xf32>
    %653 = tpu.matmul %649, %652, %cst_230 {dimension_numbers = #tpu.dot_dimension_numbers<[1], [0], [0], [1], [0, 0, 1, 1], [], []>} : vector<128x128xbf16>, vector<128x384xbf16>, vector<128x384xf32> -> vector<128x384xf32>
    %c2 = arith.constant 2 : index
    %c0_231 = arith.constant 0 : index
    %c0_232 = arith.constant 0 : index
    %654 = vector.load %arg5[%c2, %c0_231, %c0_232] : memref<3x1x384xf32, #tpu.memory_space<vmem>>, vector<1x1x384xf32>
    %655 = vector.shape_cast %654 : vector<1x1x384xf32> to vector<1x384xf32>
    %656 = vector.broadcast %655 : vector<1x384xf32> to vector<128x384xf32>
    %657 = arith.addf %653, %656 : vector<128x384xf32>
    %c0_233 = arith.constant 0 : index
    %c0_234 = arith.constant 0 : index
    %658 = vector.load %arg13[%c0_233, %c0_234] : memref<128x384xf32, #tpu.memory_space<vmem>>, vector<128x384xf32>
    tpu.vector_store %arg13[%c0_233, %c0_234], %657 {strides = array<i32>} : memref<128x384xf32, #tpu.memory_space<vmem>>, vector<128x384xf32>,
    %c2_235 = arith.constant 2 : index
    %c0_236 = arith.constant 0 : index
    %c0_237 = arith.constant 0 : index
    %659 = vector.load %arg4[%c2_235, %c0_236, %c0_237] : memref<3x128x384xf32, #tpu.memory_space<vmem>>, vector<1x128x384xf32>
    %660 = vector.shape_cast %659 : vector<1x128x384xf32> to vector<128x384xf32>
    %661 = arith.truncf %660 : vector<128x384xf32> to vector<128x384xbf16>
    %c2_238 = arith.constant 2 : index
    %c0_239 = arith.constant 0 : index
    %c0_240 = arith.constant 0 : index
    %662 = vector.load %arg6[%c2_238, %c0_239, %c0_240] : memref<3x1x128xf32, #tpu.memory_space<vmem>>, vector<1x1x128xf32>
    %663 = vector.shape_cast %662 : vector<1x1x128xf32> to vector<1x128xf32>
    %664 = vector.shape_cast %663 : vector<1x128xf32> to vector<1x128xf32>
    %665 = vector.broadcast %664 : vector<1x128xf32> to vector<16x128xf32>
    %cst_241 = arith.constant 0.000000e+00 : f32
    %666 = vector.broadcast %cst_241 : f32 to vector<16x128xf32>
    %c0_242 = arith.constant 0 : index
    %c0_243 = arith.constant 0 : index
    %667 = vector.load %arg14[%c0_242, %c0_243] : memref<16x128xf32, #tpu.memory_space<vmem>>, vector<16x128xf32>
    tpu.vector_store %arg14[%c0_242, %c0_243], %666 {strides = array<i32>} : memref<16x128xf32, #tpu.memory_space<vmem>>, vector<16x128xf32>,
    %cst_244 = arith.constant 0xFF800000 : f32
    %668 = vector.broadcast %cst_244 : f32 to vector<16x128xf32>
    %cst_245 = arith.constant 0.000000e+00 : f32
    %669 = vector.broadcast %cst_245 : f32 to vector<16x128xf32>
    %c0_i32_246 = arith.constant 0 : i32
    %c0_247 = arith.constant 0 : index
    %c0_248 = arith.constant 0 : index
    %670 = vector.load %arg14[%c0_247, %c0_248] : memref<16x128xf32, #tpu.memory_space<vmem>>, vector<16x128xf32>
    %671 = arith.truncf %670 : vector<16x128xf32> to vector<16x128xbf16>
    %cst_249 = arith.constant dense<0.000000e+00> : vector<16x384xf32>
    %672 = tpu.matmul %671, %661, %cst_249 {dimension_numbers = #tpu.dot_dimension_numbers<[1], [0], [0], [1], [0, 0, 1, 1], [], []>} : vector<16x128xbf16>, vector<128x384xbf16>, vector<16x384xf32> -> vector<16x384xf32>
    %c16_i32_250 = arith.constant 16 : i32
    %673 = arith.muli %c0_i32_246, %c16_i32_250 : i32
    %674 = tpu.assume_multiple %673, 16 : i32
    %675 = arith.index_cast %674 : i32 to index
    %c0_251 = arith.constant 0 : index
    %676 = vector.load %arg13[%675, %c0_251] : memref<128x384xf32, #tpu.memory_space<vmem>>, vector<16x384xf32>
    %677 = vector.extract_strided_slice %676 {offsets = [0, 0], sizes = [16, 128], strides = [1, 1]} : vector<16x384xf32> to vector<16x128xf32>
    %678 = vector.extract_strided_slice %672 {offsets = [0, 0], sizes = [16, 128], strides = [1, 1]} : vector<16x384xf32> to vector<16x128xf32>
    %679 = arith.addf %677, %678 : vector<16x128xf32>
    %680 = arith.negf %679 : vector<16x128xf32>
    %681 = math.exp %680 : vector<16x128xf32>
    %cst_252 = arith.constant 1.000000e+00 : f32
    %682 = vector.broadcast %cst_252 : f32 to vector<16x128xf32>
    %683 = arith.addf %682, %681 : vector<16x128xf32>
    %684 = arith.divf %682, %683 : vector<16x128xf32>
    %685 = vector.extract_strided_slice %676 {offsets = [0, 128], sizes = [16, 128], strides = [1, 1]} : vector<16x384xf32> to vector<16x128xf32>
    %686 = vector.extract_strided_slice %672 {offsets = [0, 128], sizes = [16, 128], strides = [1, 1]} : vector<16x384xf32> to vector<16x128xf32>
    %687 = arith.addf %685, %686 : vector<16x128xf32>
    %688 = arith.negf %687 : vector<16x128xf32>
    %689 = math.exp %688 : vector<16x128xf32>
    %cst_253 = arith.constant 1.000000e+00 : f32
    %690 = vector.broadcast %cst_253 : f32 to vector<16x128xf32>
    %691 = arith.addf %690, %689 : vector<16x128xf32>
    %692 = arith.divf %690, %691 : vector<16x128xf32>
    %693 = vector.extract_strided_slice %676 {offsets = [0, 256], sizes = [16, 128], strides = [1, 1]} : vector<16x384xf32> to vector<16x128xf32>
    %694 = vector.extract_strided_slice %672 {offsets = [0, 256], sizes = [16, 128], strides = [1, 1]} : vector<16x384xf32> to vector<16x128xf32>
    %695 = arith.addf %694, %665 : vector<16x128xf32>
    %696 = arith.mulf %684, %695 : vector<16x128xf32>
    %697 = arith.addf %693, %696 : vector<16x128xf32>
    %698 = math.tanh %697 : vector<16x128xf32>
    %cst_254 = arith.constant 1.000000e+00 : f32
    %699 = vector.broadcast %cst_254 : f32 to vector<16x128xf32>
    %700 = arith.subf %699, %692 : vector<16x128xf32>
    %701 = arith.mulf %700, %698 : vector<16x128xf32>
    %702 = arith.mulf %692, %670 : vector<16x128xf32>
    %703 = arith.addf %701, %702 : vector<16x128xf32>
    %c0_255 = arith.constant 0 : index
    %c0_256 = arith.constant 0 : index
    %704 = vector.load %arg14[%c0_255, %c0_256] : memref<16x128xf32, #tpu.memory_space<vmem>>, vector<16x128xf32>
    tpu.vector_store %arg14[%c0_255, %c0_256], %703 {strides = array<i32>} : memref<16x128xf32, #tpu.memory_space<vmem>>, vector<16x128xf32>,
    %705 = arith.maximumf %668, %703 : vector<16x128xf32>
    %706 = arith.addf %669, %703 : vector<16x128xf32>
    %c1_i32_257 = arith.constant 1 : i32
    %c0_258 = arith.constant 0 : index
    %c0_259 = arith.constant 0 : index
    %707 = vector.load %arg14[%c0_258, %c0_259] : memref<16x128xf32, #tpu.memory_space<vmem>>, vector<16x128xf32>
    %708 = arith.truncf %707 : vector<16x128xf32> to vector<16x128xbf16>
    %cst_260 = arith.constant dense<0.000000e+00> : vector<16x384xf32>
    %709 = tpu.matmul %708, %661, %cst_260 {dimension_numbers = #tpu.dot_dimension_numbers<[1], [0], [0], [1], [0, 0, 1, 1], [], []>} : vector<16x128xbf16>, vector<128x384xbf16>, vector<16x384xf32> -> vector<16x384xf32>
    %c16_i32_261 = arith.constant 16 : i32
    %710 = arith.muli %c1_i32_257, %c16_i32_261 : i32
    %711 = tpu.assume_multiple %710, 16 : i32
    %712 = arith.index_cast %711 : i32 to index
    %c0_262 = arith.constant 0 : index
    %713 = vector.load %arg13[%712, %c0_262] : memref<128x384xf32, #tpu.memory_space<vmem>>, vector<16x384xf32>
    %714 = vector.extract_strided_slice %713 {offsets = [0, 0], sizes = [16, 128], strides = [1, 1]} : vector<16x384xf32> to vector<16x128xf32>
    %715 = vector.extract_strided_slice %709 {offsets = [0, 0], sizes = [16, 128], strides = [1, 1]} : vector<16x384xf32> to vector<16x128xf32>
    %716 = arith.addf %714, %715 : vector<16x128xf32>
    %717 = arith.negf %716 : vector<16x128xf32>
    %718 = math.exp %717 : vector<16x128xf32>
    %cst_263 = arith.constant 1.000000e+00 : f32
    %719 = vector.broadcast %cst_263 : f32 to vector<16x128xf32>
    %720 = arith.addf %719, %718 : vector<16x128xf32>
    %721 = arith.divf %719, %720 : vector<16x128xf32>
    %722 = vector.extract_strided_slice %713 {offsets = [0, 128], sizes = [16, 128], strides = [1, 1]} : vector<16x384xf32> to vector<16x128xf32>
    %723 = vector.extract_strided_slice %709 {offsets = [0, 128], sizes = [16, 128], strides = [1, 1]} : vector<16x384xf32> to vector<16x128xf32>
    %724 = arith.addf %722, %723 : vector<16x128xf32>
    %725 = arith.negf %724 : vector<16x128xf32>
    %726 = math.exp %725 : vector<16x128xf32>
    %cst_264 = arith.constant 1.000000e+00 : f32
    %727 = vector.broadcast %cst_264 : f32 to vector<16x128xf32>
    %728 = arith.addf %727, %726 : vector<16x128xf32>
    %729 = arith.divf %727, %728 : vector<16x128xf32>
    %730 = vector.extract_strided_slice %713 {offsets = [0, 256], sizes = [16, 128], strides = [1, 1]} : vector<16x384xf32> to vector<16x128xf32>
    %731 = vector.extract_strided_slice %709 {offsets = [0, 256], sizes = [16, 128], strides = [1, 1]} : vector<16x384xf32> to vector<16x128xf32>
    %732 = arith.addf %731, %665 : vector<16x128xf32>
    %733 = arith.mulf %721, %732 : vector<16x128xf32>
    %734 = arith.addf %730, %733 : vector<16x128xf32>
    %735 = math.tanh %734 : vector<16x128xf32>
    %cst_265 = arith.constant 1.000000e+00 : f32
    %736 = vector.broadcast %cst_265 : f32 to vector<16x128xf32>
    %737 = arith.subf %736, %729 : vector<16x128xf32>
    %738 = arith.mulf %737, %735 : vector<16x128xf32>
    %739 = arith.mulf %729, %707 : vector<16x128xf32>
    %740 = arith.addf %738, %739 : vector<16x128xf32>
    %c0_266 = arith.constant 0 : index
    %c0_267 = arith.constant 0 : index
    %741 = vector.load %arg14[%c0_266, %c0_267] : memref<16x128xf32, #tpu.memory_space<vmem>>, vector<16x128xf32>
    tpu.vector_store %arg14[%c0_266, %c0_267], %740 {strides = array<i32>} : memref<16x128xf32, #tpu.memory_space<vmem>>, vector<16x128xf32>,
    %742 = arith.maximumf %705, %740 : vector<16x128xf32>
    %743 = arith.addf %706, %740 : vector<16x128xf32>
    %c2_i32_268 = arith.constant 2 : i32
    %c0_269 = arith.constant 0 : index
    %c0_270 = arith.constant 0 : index
    %744 = vector.load %arg14[%c0_269, %c0_270] : memref<16x128xf32, #tpu.memory_space<vmem>>, vector<16x128xf32>
    %745 = arith.truncf %744 : vector<16x128xf32> to vector<16x128xbf16>
    %cst_271 = arith.constant dense<0.000000e+00> : vector<16x384xf32>
    %746 = tpu.matmul %745, %661, %cst_271 {dimension_numbers = #tpu.dot_dimension_numbers<[1], [0], [0], [1], [0, 0, 1, 1], [], []>} : vector<16x128xbf16>, vector<128x384xbf16>, vector<16x384xf32> -> vector<16x384xf32>
    %c16_i32_272 = arith.constant 16 : i32
    %747 = arith.muli %c2_i32_268, %c16_i32_272 : i32
    %748 = tpu.assume_multiple %747, 16 : i32
    %749 = arith.index_cast %748 : i32 to index
    %c0_273 = arith.constant 0 : index
    %750 = vector.load %arg13[%749, %c0_273] : memref<128x384xf32, #tpu.memory_space<vmem>>, vector<16x384xf32>
    %751 = vector.extract_strided_slice %750 {offsets = [0, 0], sizes = [16, 128], strides = [1, 1]} : vector<16x384xf32> to vector<16x128xf32>
    %752 = vector.extract_strided_slice %746 {offsets = [0, 0], sizes = [16, 128], strides = [1, 1]} : vector<16x384xf32> to vector<16x128xf32>
    %753 = arith.addf %751, %752 : vector<16x128xf32>
    %754 = arith.negf %753 : vector<16x128xf32>
    %755 = math.exp %754 : vector<16x128xf32>
    %cst_274 = arith.constant 1.000000e+00 : f32
    %756 = vector.broadcast %cst_274 : f32 to vector<16x128xf32>
    %757 = arith.addf %756, %755 : vector<16x128xf32>
    %758 = arith.divf %756, %757 : vector<16x128xf32>
    %759 = vector.extract_strided_slice %750 {offsets = [0, 128], sizes = [16, 128], strides = [1, 1]} : vector<16x384xf32> to vector<16x128xf32>
    %760 = vector.extract_strided_slice %746 {offsets = [0, 128], sizes = [16, 128], strides = [1, 1]} : vector<16x384xf32> to vector<16x128xf32>
    %761 = arith.addf %759, %760 : vector<16x128xf32>
    %762 = arith.negf %761 : vector<16x128xf32>
    %763 = math.exp %762 : vector<16x128xf32>
    %cst_275 = arith.constant 1.000000e+00 : f32
    %764 = vector.broadcast %cst_275 : f32 to vector<16x128xf32>
    %765 = arith.addf %764, %763 : vector<16x128xf32>
    %766 = arith.divf %764, %765 : vector<16x128xf32>
    %767 = vector.extract_strided_slice %750 {offsets = [0, 256], sizes = [16, 128], strides = [1, 1]} : vector<16x384xf32> to vector<16x128xf32>
    %768 = vector.extract_strided_slice %746 {offsets = [0, 256], sizes = [16, 128], strides = [1, 1]} : vector<16x384xf32> to vector<16x128xf32>
    %769 = arith.addf %768, %665 : vector<16x128xf32>
    %770 = arith.mulf %758, %769 : vector<16x128xf32>
    %771 = arith.addf %767, %770 : vector<16x128xf32>
    %772 = math.tanh %771 : vector<16x128xf32>
    %cst_276 = arith.constant 1.000000e+00 : f32
    %773 = vector.broadcast %cst_276 : f32 to vector<16x128xf32>
    %774 = arith.subf %773, %766 : vector<16x128xf32>
    %775 = arith.mulf %774, %772 : vector<16x128xf32>
    %776 = arith.mulf %766, %744 : vector<16x128xf32>
    %777 = arith.addf %775, %776 : vector<16x128xf32>
    %c0_277 = arith.constant 0 : index
    %c0_278 = arith.constant 0 : index
    %778 = vector.load %arg14[%c0_277, %c0_278] : memref<16x128xf32, #tpu.memory_space<vmem>>, vector<16x128xf32>
    tpu.vector_store %arg14[%c0_277, %c0_278], %777 {strides = array<i32>} : memref<16x128xf32, #tpu.memory_space<vmem>>, vector<16x128xf32>,
    %779 = arith.maximumf %742, %777 : vector<16x128xf32>
    %780 = arith.addf %743, %777 : vector<16x128xf32>
    %c3_i32_279 = arith.constant 3 : i32
    %c0_280 = arith.constant 0 : index
    %c0_281 = arith.constant 0 : index
    %781 = vector.load %arg14[%c0_280, %c0_281] : memref<16x128xf32, #tpu.memory_space<vmem>>, vector<16x128xf32>
    %782 = arith.truncf %781 : vector<16x128xf32> to vector<16x128xbf16>
    %cst_282 = arith.constant dense<0.000000e+00> : vector<16x384xf32>
    %783 = tpu.matmul %782, %661, %cst_282 {dimension_numbers = #tpu.dot_dimension_numbers<[1], [0], [0], [1], [0, 0, 1, 1], [], []>} : vector<16x128xbf16>, vector<128x384xbf16>, vector<16x384xf32> -> vector<16x384xf32>
    %c16_i32_283 = arith.constant 16 : i32
    %784 = arith.muli %c3_i32_279, %c16_i32_283 : i32
    %785 = tpu.assume_multiple %784, 16 : i32
    %786 = arith.index_cast %785 : i32 to index
    %c0_284 = arith.constant 0 : index
    %787 = vector.load %arg13[%786, %c0_284] : memref<128x384xf32, #tpu.memory_space<vmem>>, vector<16x384xf32>
    %788 = vector.extract_strided_slice %787 {offsets = [0, 0], sizes = [16, 128], strides = [1, 1]} : vector<16x384xf32> to vector<16x128xf32>
    %789 = vector.extract_strided_slice %783 {offsets = [0, 0], sizes = [16, 128], strides = [1, 1]} : vector<16x384xf32> to vector<16x128xf32>
    %790 = arith.addf %788, %789 : vector<16x128xf32>
    %791 = arith.negf %790 : vector<16x128xf32>
    %792 = math.exp %791 : vector<16x128xf32>
    %cst_285 = arith.constant 1.000000e+00 : f32
    %793 = vector.broadcast %cst_285 : f32 to vector<16x128xf32>
    %794 = arith.addf %793, %792 : vector<16x128xf32>
    %795 = arith.divf %793, %794 : vector<16x128xf32>
    %796 = vector.extract_strided_slice %787 {offsets = [0, 128], sizes = [16, 128], strides = [1, 1]} : vector<16x384xf32> to vector<16x128xf32>
    %797 = vector.extract_strided_slice %783 {offsets = [0, 128], sizes = [16, 128], strides = [1, 1]} : vector<16x384xf32> to vector<16x128xf32>
    %798 = arith.addf %796, %797 : vector<16x128xf32>
    %799 = arith.negf %798 : vector<16x128xf32>
    %800 = math.exp %799 : vector<16x128xf32>
    %cst_286 = arith.constant 1.000000e+00 : f32
    %801 = vector.broadcast %cst_286 : f32 to vector<16x128xf32>
    %802 = arith.addf %801, %800 : vector<16x128xf32>
    %803 = arith.divf %801, %802 : vector<16x128xf32>
    %804 = vector.extract_strided_slice %787 {offsets = [0, 256], sizes = [16, 128], strides = [1, 1]} : vector<16x384xf32> to vector<16x128xf32>
    %805 = vector.extract_strided_slice %783 {offsets = [0, 256], sizes = [16, 128], strides = [1, 1]} : vector<16x384xf32> to vector<16x128xf32>
    %806 = arith.addf %805, %665 : vector<16x128xf32>
    %807 = arith.mulf %795, %806 : vector<16x128xf32>
    %808 = arith.addf %804, %807 : vector<16x128xf32>
    %809 = math.tanh %808 : vector<16x128xf32>
    %cst_287 = arith.constant 1.000000e+00 : f32
    %810 = vector.broadcast %cst_287 : f32 to vector<16x128xf32>
    %811 = arith.subf %810, %803 : vector<16x128xf32>
    %812 = arith.mulf %811, %809 : vector<16x128xf32>
    %813 = arith.mulf %803, %781 : vector<16x128xf32>
    %814 = arith.addf %812, %813 : vector<16x128xf32>
    %c0_288 = arith.constant 0 : index
    %c0_289 = arith.constant 0 : index
    %815 = vector.load %arg14[%c0_288, %c0_289] : memref<16x128xf32, #tpu.memory_space<vmem>>, vector<16x128xf32>
    tpu.vector_store %arg14[%c0_288, %c0_289], %814 {strides = array<i32>} : memref<16x128xf32, #tpu.memory_space<vmem>>, vector<16x128xf32>,
    %816 = arith.maximumf %779, %814 : vector<16x128xf32>
    %817 = arith.addf %780, %814 : vector<16x128xf32>
    %c4_i32_290 = arith.constant 4 : i32
    %c0_291 = arith.constant 0 : index
    %c0_292 = arith.constant 0 : index
    %818 = vector.load %arg14[%c0_291, %c0_292] : memref<16x128xf32, #tpu.memory_space<vmem>>, vector<16x128xf32>
    %819 = arith.truncf %818 : vector<16x128xf32> to vector<16x128xbf16>
    %cst_293 = arith.constant dense<0.000000e+00> : vector<16x384xf32>
    %820 = tpu.matmul %819, %661, %cst_293 {dimension_numbers = #tpu.dot_dimension_numbers<[1], [0], [0], [1], [0, 0, 1, 1], [], []>} : vector<16x128xbf16>, vector<128x384xbf16>, vector<16x384xf32> -> vector<16x384xf32>
    %c16_i32_294 = arith.constant 16 : i32
    %821 = arith.muli %c4_i32_290, %c16_i32_294 : i32
    %822 = tpu.assume_multiple %821, 16 : i32
    %823 = arith.index_cast %822 : i32 to index
    %c0_295 = arith.constant 0 : index
    %824 = vector.load %arg13[%823, %c0_295] : memref<128x384xf32, #tpu.memory_space<vmem>>, vector<16x384xf32>
    %825 = vector.extract_strided_slice %824 {offsets = [0, 0], sizes = [16, 128], strides = [1, 1]} : vector<16x384xf32> to vector<16x128xf32>
    %826 = vector.extract_strided_slice %820 {offsets = [0, 0], sizes = [16, 128], strides = [1, 1]} : vector<16x384xf32> to vector<16x128xf32>
    %827 = arith.addf %825, %826 : vector<16x128xf32>
    %828 = arith.negf %827 : vector<16x128xf32>
    %829 = math.exp %828 : vector<16x128xf32>
    %cst_296 = arith.constant 1.000000e+00 : f32
    %830 = vector.broadcast %cst_296 : f32 to vector<16x128xf32>
    %831 = arith.addf %830, %829 : vector<16x128xf32>
    %832 = arith.divf %830, %831 : vector<16x128xf32>
    %833 = vector.extract_strided_slice %824 {offsets = [0, 128], sizes = [16, 128], strides = [1, 1]} : vector<16x384xf32> to vector<16x128xf32>
    %834 = vector.extract_strided_slice %820 {offsets = [0, 128], sizes = [16, 128], strides = [1, 1]} : vector<16x384xf32> to vector<16x128xf32>
    %835 = arith.addf %833, %834 : vector<16x128xf32>
    %836 = arith.negf %835 : vector<16x128xf32>
    %837 = math.exp %836 : vector<16x128xf32>
    %cst_297 = arith.constant 1.000000e+00 : f32
    %838 = vector.broadcast %cst_297 : f32 to vector<16x128xf32>
    %839 = arith.addf %838, %837 : vector<16x128xf32>
    %840 = arith.divf %838, %839 : vector<16x128xf32>
    %841 = vector.extract_strided_slice %824 {offsets = [0, 256], sizes = [16, 128], strides = [1, 1]} : vector<16x384xf32> to vector<16x128xf32>
    %842 = vector.extract_strided_slice %820 {offsets = [0, 256], sizes = [16, 128], strides = [1, 1]} : vector<16x384xf32> to vector<16x128xf32>
    %843 = arith.addf %842, %665 : vector<16x128xf32>
    %844 = arith.mulf %832, %843 : vector<16x128xf32>
    %845 = arith.addf %841, %844 : vector<16x128xf32>
    %846 = math.tanh %845 : vector<16x128xf32>
    %cst_298 = arith.constant 1.000000e+00 : f32
    %847 = vector.broadcast %cst_298 : f32 to vector<16x128xf32>
    %848 = arith.subf %847, %840 : vector<16x128xf32>
    %849 = arith.mulf %848, %846 : vector<16x128xf32>
    %850 = arith.mulf %840, %818 : vector<16x128xf32>
    %851 = arith.addf %849, %850 : vector<16x128xf32>
    %c0_299 = arith.constant 0 : index
    %c0_300 = arith.constant 0 : index
    %852 = vector.load %arg14[%c0_299, %c0_300] : memref<16x128xf32, #tpu.memory_space<vmem>>, vector<16x128xf32>
    tpu.vector_store %arg14[%c0_299, %c0_300], %851 {strides = array<i32>} : memref<16x128xf32, #tpu.memory_space<vmem>>, vector<16x128xf32>,
    %853 = arith.maximumf %816, %851 : vector<16x128xf32>
    %854 = arith.addf %817, %851 : vector<16x128xf32>
    %c5_i32_301 = arith.constant 5 : i32
    %c0_302 = arith.constant 0 : index
    %c0_303 = arith.constant 0 : index
    %855 = vector.load %arg14[%c0_302, %c0_303] : memref<16x128xf32, #tpu.memory_space<vmem>>, vector<16x128xf32>
    %856 = arith.truncf %855 : vector<16x128xf32> to vector<16x128xbf16>
    %cst_304 = arith.constant dense<0.000000e+00> : vector<16x384xf32>
    %857 = tpu.matmul %856, %661, %cst_304 {dimension_numbers = #tpu.dot_dimension_numbers<[1], [0], [0], [1], [0, 0, 1, 1], [], []>} : vector<16x128xbf16>, vector<128x384xbf16>, vector<16x384xf32> -> vector<16x384xf32>
    %c16_i32_305 = arith.constant 16 : i32
    %858 = arith.muli %c5_i32_301, %c16_i32_305 : i32
    %859 = tpu.assume_multiple %858, 16 : i32
    %860 = arith.index_cast %859 : i32 to index
    %c0_306 = arith.constant 0 : index
    %861 = vector.load %arg13[%860, %c0_306] : memref<128x384xf32, #tpu.memory_space<vmem>>, vector<16x384xf32>
    %862 = vector.extract_strided_slice %861 {offsets = [0, 0], sizes = [16, 128], strides = [1, 1]} : vector<16x384xf32> to vector<16x128xf32>
    %863 = vector.extract_strided_slice %857 {offsets = [0, 0], sizes = [16, 128], strides = [1, 1]} : vector<16x384xf32> to vector<16x128xf32>
    %864 = arith.addf %862, %863 : vector<16x128xf32>
    %865 = arith.negf %864 : vector<16x128xf32>
    %866 = math.exp %865 : vector<16x128xf32>
    %cst_307 = arith.constant 1.000000e+00 : f32
    %867 = vector.broadcast %cst_307 : f32 to vector<16x128xf32>
    %868 = arith.addf %867, %866 : vector<16x128xf32>
    %869 = arith.divf %867, %868 : vector<16x128xf32>
    %870 = vector.extract_strided_slice %861 {offsets = [0, 128], sizes = [16, 128], strides = [1, 1]} : vector<16x384xf32> to vector<16x128xf32>
    %871 = vector.extract_strided_slice %857 {offsets = [0, 128], sizes = [16, 128], strides = [1, 1]} : vector<16x384xf32> to vector<16x128xf32>
    %872 = arith.addf %870, %871 : vector<16x128xf32>
    %873 = arith.negf %872 : vector<16x128xf32>
    %874 = math.exp %873 : vector<16x128xf32>
    %cst_308 = arith.constant 1.000000e+00 : f32
    %875 = vector.broadcast %cst_308 : f32 to vector<16x128xf32>
    %876 = arith.addf %875, %874 : vector<16x128xf32>
    %877 = arith.divf %875, %876 : vector<16x128xf32>
    %878 = vector.extract_strided_slice %861 {offsets = [0, 256], sizes = [16, 128], strides = [1, 1]} : vector<16x384xf32> to vector<16x128xf32>
    %879 = vector.extract_strided_slice %857 {offsets = [0, 256], sizes = [16, 128], strides = [1, 1]} : vector<16x384xf32> to vector<16x128xf32>
    %880 = arith.addf %879, %665 : vector<16x128xf32>
    %881 = arith.mulf %869, %880 : vector<16x128xf32>
    %882 = arith.addf %878, %881 : vector<16x128xf32>
    %883 = math.tanh %882 : vector<16x128xf32>
    %cst_309 = arith.constant 1.000000e+00 : f32
    %884 = vector.broadcast %cst_309 : f32 to vector<16x128xf32>
    %885 = arith.subf %884, %877 : vector<16x128xf32>
    %886 = arith.mulf %885, %883 : vector<16x128xf32>
    %887 = arith.mulf %877, %855 : vector<16x128xf32>
    %888 = arith.addf %886, %887 : vector<16x128xf32>
    %c0_310 = arith.constant 0 : index
    %c0_311 = arith.constant 0 : index
    %889 = vector.load %arg14[%c0_310, %c0_311] : memref<16x128xf32, #tpu.memory_space<vmem>>, vector<16x128xf32>
    tpu.vector_store %arg14[%c0_310, %c0_311], %888 {strides = array<i32>} : memref<16x128xf32, #tpu.memory_space<vmem>>, vector<16x128xf32>,
    %890 = arith.maximumf %853, %888 : vector<16x128xf32>
    %891 = arith.addf %854, %888 : vector<16x128xf32>
    %c6_i32_312 = arith.constant 6 : i32
    %c0_313 = arith.constant 0 : index
    %c0_314 = arith.constant 0 : index
    %892 = vector.load %arg14[%c0_313, %c0_314] : memref<16x128xf32, #tpu.memory_space<vmem>>, vector<16x128xf32>
    %893 = arith.truncf %892 : vector<16x128xf32> to vector<16x128xbf16>
    %cst_315 = arith.constant dense<0.000000e+00> : vector<16x384xf32>
    %894 = tpu.matmul %893, %661, %cst_315 {dimension_numbers = #tpu.dot_dimension_numbers<[1], [0], [0], [1], [0, 0, 1, 1], [], []>} : vector<16x128xbf16>, vector<128x384xbf16>, vector<16x384xf32> -> vector<16x384xf32>
    %c16_i32_316 = arith.constant 16 : i32
    %895 = arith.muli %c6_i32_312, %c16_i32_316 : i32
    %896 = tpu.assume_multiple %895, 16 : i32
    %897 = arith.index_cast %896 : i32 to index
    %c0_317 = arith.constant 0 : index
    %898 = vector.load %arg13[%897, %c0_317] : memref<128x384xf32, #tpu.memory_space<vmem>>, vector<16x384xf32>
    %899 = vector.extract_strided_slice %898 {offsets = [0, 0], sizes = [16, 128], strides = [1, 1]} : vector<16x384xf32> to vector<16x128xf32>
    %900 = vector.extract_strided_slice %894 {offsets = [0, 0], sizes = [16, 128], strides = [1, 1]} : vector<16x384xf32> to vector<16x128xf32>
    %901 = arith.addf %899, %900 : vector<16x128xf32>
    %902 = arith.negf %901 : vector<16x128xf32>
    %903 = math.exp %902 : vector<16x128xf32>
    %cst_318 = arith.constant 1.000000e+00 : f32
    %904 = vector.broadcast %cst_318 : f32 to vector<16x128xf32>
    %905 = arith.addf %904, %903 : vector<16x128xf32>
    %906 = arith.divf %904, %905 : vector<16x128xf32>
    %907 = vector.extract_strided_slice %898 {offsets = [0, 128], sizes = [16, 128], strides = [1, 1]} : vector<16x384xf32> to vector<16x128xf32>
    %908 = vector.extract_strided_slice %894 {offsets = [0, 128], sizes = [16, 128], strides = [1, 1]} : vector<16x384xf32> to vector<16x128xf32>
    %909 = arith.addf %907, %908 : vector<16x128xf32>
    %910 = arith.negf %909 : vector<16x128xf32>
    %911 = math.exp %910 : vector<16x128xf32>
    %cst_319 = arith.constant 1.000000e+00 : f32
    %912 = vector.broadcast %cst_319 : f32 to vector<16x128xf32>
    %913 = arith.addf %912, %911 : vector<16x128xf32>
    %914 = arith.divf %912, %913 : vector<16x128xf32>
    %915 = vector.extract_strided_slice %898 {offsets = [0, 256], sizes = [16, 128], strides = [1, 1]} : vector<16x384xf32> to vector<16x128xf32>
    %916 = vector.extract_strided_slice %894 {offsets = [0, 256], sizes = [16, 128], strides = [1, 1]} : vector<16x384xf32> to vector<16x128xf32>
    %917 = arith.addf %916, %665 : vector<16x128xf32>
    %918 = arith.mulf %906, %917 : vector<16x128xf32>
    %919 = arith.addf %915, %918 : vector<16x128xf32>
    %920 = math.tanh %919 : vector<16x128xf32>
    %cst_320 = arith.constant 1.000000e+00 : f32
    %921 = vector.broadcast %cst_320 : f32 to vector<16x128xf32>
    %922 = arith.subf %921, %914 : vector<16x128xf32>
    %923 = arith.mulf %922, %920 : vector<16x128xf32>
    %924 = arith.mulf %914, %892 : vector<16x128xf32>
    %925 = arith.addf %923, %924 : vector<16x128xf32>
    %c0_321 = arith.constant 0 : index
    %c0_322 = arith.constant 0 : index
    %926 = vector.load %arg14[%c0_321, %c0_322] : memref<16x128xf32, #tpu.memory_space<vmem>>, vector<16x128xf32>
    tpu.vector_store %arg14[%c0_321, %c0_322], %925 {strides = array<i32>} : memref<16x128xf32, #tpu.memory_space<vmem>>, vector<16x128xf32>,
    %927 = arith.maximumf %890, %925 : vector<16x128xf32>
    %928 = arith.addf %891, %925 : vector<16x128xf32>
    %c7_i32_323 = arith.constant 7 : i32
    %c0_324 = arith.constant 0 : index
    %c0_325 = arith.constant 0 : index
    %929 = vector.load %arg14[%c0_324, %c0_325] : memref<16x128xf32, #tpu.memory_space<vmem>>, vector<16x128xf32>
    %930 = arith.truncf %929 : vector<16x128xf32> to vector<16x128xbf16>
    %cst_326 = arith.constant dense<0.000000e+00> : vector<16x384xf32>
    %931 = tpu.matmul %930, %661, %cst_326 {dimension_numbers = #tpu.dot_dimension_numbers<[1], [0], [0], [1], [0, 0, 1, 1], [], []>} : vector<16x128xbf16>, vector<128x384xbf16>, vector<16x384xf32> -> vector<16x384xf32>
    %c16_i32_327 = arith.constant 16 : i32
    %932 = arith.muli %c7_i32_323, %c16_i32_327 : i32
    %933 = tpu.assume_multiple %932, 16 : i32
    %934 = arith.index_cast %933 : i32 to index
    %c0_328 = arith.constant 0 : index
    %935 = vector.load %arg13[%934, %c0_328] : memref<128x384xf32, #tpu.memory_space<vmem>>, vector<16x384xf32>
    %936 = vector.extract_strided_slice %935 {offsets = [0, 0], sizes = [16, 128], strides = [1, 1]} : vector<16x384xf32> to vector<16x128xf32>
    %937 = vector.extract_strided_slice %931 {offsets = [0, 0], sizes = [16, 128], strides = [1, 1]} : vector<16x384xf32> to vector<16x128xf32>
    %938 = arith.addf %936, %937 : vector<16x128xf32>
    %939 = arith.negf %938 : vector<16x128xf32>
    %940 = math.exp %939 : vector<16x128xf32>
    %cst_329 = arith.constant 1.000000e+00 : f32
    %941 = vector.broadcast %cst_329 : f32 to vector<16x128xf32>
    %942 = arith.addf %941, %940 : vector<16x128xf32>
    %943 = arith.divf %941, %942 : vector<16x128xf32>
    %944 = vector.extract_strided_slice %935 {offsets = [0, 128], sizes = [16, 128], strides = [1, 1]} : vector<16x384xf32> to vector<16x128xf32>
    %945 = vector.extract_strided_slice %931 {offsets = [0, 128], sizes = [16, 128], strides = [1, 1]} : vector<16x384xf32> to vector<16x128xf32>
    %946 = arith.addf %944, %945 : vector<16x128xf32>
    %947 = arith.negf %946 : vector<16x128xf32>
    %948 = math.exp %947 : vector<16x128xf32>
    %cst_330 = arith.constant 1.000000e+00 : f32
    %949 = vector.broadcast %cst_330 : f32 to vector<16x128xf32>
    %950 = arith.addf %949, %948 : vector<16x128xf32>
    %951 = arith.divf %949, %950 : vector<16x128xf32>
    %952 = vector.extract_strided_slice %935 {offsets = [0, 256], sizes = [16, 128], strides = [1, 1]} : vector<16x384xf32> to vector<16x128xf32>
    %953 = vector.extract_strided_slice %931 {offsets = [0, 256], sizes = [16, 128], strides = [1, 1]} : vector<16x384xf32> to vector<16x128xf32>
    %954 = arith.addf %953, %665 : vector<16x128xf32>
    %955 = arith.mulf %943, %954 : vector<16x128xf32>
    %956 = arith.addf %952, %955 : vector<16x128xf32>
    %957 = math.tanh %956 : vector<16x128xf32>
    %cst_331 = arith.constant 1.000000e+00 : f32
    %958 = vector.broadcast %cst_331 : f32 to vector<16x128xf32>
    %959 = arith.subf %958, %951 : vector<16x128xf32>
    %960 = arith.mulf %959, %957 : vector<16x128xf32>
    %961 = arith.mulf %951, %929 : vector<16x128xf32>
    %962 = arith.addf %960, %961 : vector<16x128xf32>
    %c0_332 = arith.constant 0 : index
    %c0_333 = arith.constant 0 : index
    %963 = vector.load %arg14[%c0_332, %c0_333] : memref<16x128xf32, #tpu.memory_space<vmem>>, vector<16x128xf32>
    tpu.vector_store %arg14[%c0_332, %c0_333], %962 {strides = array<i32>} : memref<16x128xf32, #tpu.memory_space<vmem>>, vector<16x128xf32>,
    %964 = arith.maximumf %927, %962 : vector<16x128xf32>
    %965 = arith.addf %928, %962 : vector<16x128xf32>
    %c8_i32_334 = arith.constant 8 : i32
    %c0_335 = arith.constant 0 : index
    %c0_336 = arith.constant 0 : index
    %966 = vector.load %arg14[%c0_335, %c0_336] : memref<16x128xf32, #tpu.memory_space<vmem>>, vector<16x128xf32>
    %cst_337 = arith.constant 1.250000e-01 : f32
    %967 = vector.broadcast %cst_337 : f32 to vector<16x128xf32>
    %968 = arith.mulf %965, %967 : vector<16x128xf32>
    %c0_338 = arith.constant 0 : index
    %c0_339 = arith.constant 0 : index
    %969 = vector.load %arg7[%c0_338, %c0_339] : memref<384x128xf32, #tpu.memory_space<vmem>>, vector<384x128xf32>
    %970 = arith.truncf %964 : vector<16x128xf32> to vector<16x128xbf16>
    %971 = vector.extract_strided_slice %969 {offsets = [0, 0], sizes = [128, 128], strides = [1, 1]} : vector<384x128xf32> to vector<128x128xf32>
    %972 = arith.truncf %971 : vector<128x128xf32> to vector<128x128xbf16>
    %cst_340 = arith.constant dense<0.000000e+00> : vector<16x128xf32>
    %973 = tpu.matmul %970, %972, %cst_340 {dimension_numbers = #tpu.dot_dimension_numbers<[1], [0], [0], [1], [0, 0, 1, 1], [], []>} : vector<16x128xbf16>, vector<128x128xbf16>, vector<16x128xf32> -> vector<16x128xf32>
    %974 = arith.truncf %968 : vector<16x128xf32> to vector<16x128xbf16>
    %975 = vector.extract_strided_slice %969 {offsets = [128, 0], sizes = [128, 128], strides = [1, 1]} : vector<384x128xf32> to vector<128x128xf32>
    %976 = arith.truncf %975 : vector<128x128xf32> to vector<128x128xbf16>
    %cst_341 = arith.constant dense<0.000000e+00> : vector<16x128xf32>
    %977 = tpu.matmul %974, %976, %cst_341 {dimension_numbers = #tpu.dot_dimension_numbers<[1], [0], [0], [1], [0, 0, 1, 1], [], []>} : vector<16x128xbf16>, vector<128x128xbf16>, vector<16x128xf32> -> vector<16x128xf32>
    %978 = arith.addf %973, %977 : vector<16x128xf32>
    %979 = arith.truncf %966 : vector<16x128xf32> to vector<16x128xbf16>
    %980 = vector.extract_strided_slice %969 {offsets = [256, 0], sizes = [128, 128], strides = [1, 1]} : vector<384x128xf32> to vector<128x128xf32>
    %981 = arith.truncf %980 : vector<128x128xf32> to vector<128x128xbf16>
    %cst_342 = arith.constant dense<0.000000e+00> : vector<16x128xf32>
    %982 = tpu.matmul %979, %981, %cst_342 {dimension_numbers = #tpu.dot_dimension_numbers<[1], [0], [0], [1], [0, 0, 1, 1], [], []>} : vector<16x128xbf16>, vector<128x128xbf16>, vector<16x128xf32> -> vector<16x128xf32>
    %983 = arith.addf %978, %982 : vector<16x128xf32>
    %c0_343 = arith.constant 0 : index
    %c0_344 = arith.constant 0 : index
    %984 = vector.load %arg8[%c0_343, %c0_344] : memref<1x128xf32, #tpu.memory_space<vmem>>, vector<1x128xf32>
    %985 = vector.broadcast %984 : vector<1x128xf32> to vector<16x128xf32>
    %986 = arith.addf %983, %985 : vector<16x128xf32>
    %cst_345 = arith.constant 0.000000e+00 : f32
    %987 = vector.broadcast %cst_345 : f32 to vector<16x128xf32>
    %988 = arith.cmpf ogt, %986, %987 : vector<16x128xf32>
    %cst_346 = arith.constant 2.000000e-01 : f32
    %989 = vector.broadcast %cst_346 : f32 to vector<16x128xf32>
    %990 = arith.mulf %989, %986 : vector<16x128xf32>
    %991 = arith.select %988, %986, %990 : vector<16x128xi1>, vector<16x128xf32>
    %992 = arith.mulf %991, %991 : vector<16x128xf32>
    %cst_347 = arith.constant dense<0.000000e+00> : vector<16xf32>
    %993 = vector.multi_reduction <add>, %992, %cst_347 [1] : vector<16x128xf32> to vector<16xf32>
    %994 = vector.shape_cast %993 : vector<16xf32> to vector<16x1xf32>
    %995 = arith.mulf %324, %324 : vector<16x128xf32>
    %cst_348 = arith.constant dense<0.000000e+00> : vector<16xf32>
    %996 = vector.multi_reduction <add>, %995, %cst_348 [1] : vector<16x128xf32> to vector<16xf32>
    %997 = vector.shape_cast %996 : vector<16xf32> to vector<16x1xf32>
    %998 = arith.addf %994, %997 : vector<16x1xf32>
    %999 = arith.mulf %648, %648 : vector<16x128xf32>
    %cst_349 = arith.constant dense<0.000000e+00> : vector<16xf32>
    %1000 = vector.multi_reduction <add>, %999, %cst_349 [1] : vector<16x128xf32> to vector<16xf32>
    %1001 = vector.shape_cast %1000 : vector<16xf32> to vector<16x1xf32>
    %1002 = arith.addf %998, %1001 : vector<16x1xf32>
    %1003 = arith.mulf %966, %966 : vector<16x128xf32>
    %cst_350 = arith.constant dense<0.000000e+00> : vector<16xf32>
    %1004 = vector.multi_reduction <add>, %1003, %cst_350 [1] : vector<16x128xf32> to vector<16xf32>
    %1005 = vector.shape_cast %1004 : vector<16xf32> to vector<16x1xf32>
    %1006 = arith.addf %1002, %1005 : vector<16x1xf32>
    %1007 = math.sqrt %1006 : vector<16x1xf32>
    %cst_351 = arith.constant 9.99999974E-6 : f32
    %1008 = vector.broadcast %cst_351 : f32 to vector<16x1xf32>
    %1009 = arith.cmpf ogt, %1007, %1008 : vector<16x1xf32>
    %cst_352 = arith.constant 1.000000e-07 : f32
    %1010 = vector.broadcast %cst_352 : f32 to vector<16x1xf32>
    %1011 = arith.addf %1007, %1010 : vector<16x1xf32>
    %cst_353 = arith.constant 9.99999974E-6 : f32
    %1012 = vector.broadcast %cst_353 : f32 to vector<16x1xf32>
    %1013 = arith.divf %1012, %1011 : vector<16x1xf32>
    %cst_354 = arith.constant 1.000000e+00 : f32
    %1014 = vector.broadcast %cst_354 : f32 to vector<16x1xf32>
    %1015 = arith.select %1009, %1013, %1014 : vector<16x1xi1>, vector<16x1xf32>
    %cst_355 = arith.constant 1.000000e+05 : f32
    %1016 = vector.broadcast %cst_355 : f32 to vector<16x1xf32>
    %1017 = arith.mulf %1015, %1016 : vector<16x1xf32>
    %c0_356 = arith.constant 0 : index
    %c0_357 = arith.constant 0 : index
    %1018 = vector.load %arg9[%c0_356, %c0_357] : memref<512x128xf32, #tpu.memory_space<vmem>>, vector<512x128xf32>
    %1019 = arith.mulf %1018, %1018 : vector<512x128xf32>
    %cst_358 = arith.constant dense<0.000000e+00> : vector<128xf32>
    %1020 = vector.multi_reduction <add>, %1019, %cst_358 [0] : vector<512x128xf32> to vector<128xf32>
    %1021 = vector.shape_cast %1020 : vector<128xf32> to vector<1x128xf32>
    %1022 = math.sqrt %1021 : vector<1x128xf32>
    %cst_359 = arith.constant 9.99999974E-6 : f32
    %1023 = vector.broadcast %cst_359 : f32 to vector<1x128xf32>
    %1024 = arith.cmpf ogt, %1022, %1023 : vector<1x128xf32>
    %cst_360 = arith.constant 1.000000e-07 : f32
    %1025 = vector.broadcast %cst_360 : f32 to vector<1x128xf32>
    %1026 = arith.addf %1022, %1025 : vector<1x128xf32>
    %cst_361 = arith.constant 9.99999974E-6 : f32
    %1027 = vector.broadcast %cst_361 : f32 to vector<1x128xf32>
    %1028 = arith.divf %1027, %1026 : vector<1x128xf32>
    %cst_362 = arith.constant 1.000000e+00 : f32
    %1029 = vector.broadcast %cst_362 : f32 to vector<1x128xf32>
    %1030 = arith.select %1024, %1028, %1029 : vector<1x128xi1>, vector<1x128xf32>
    %cst_363 = arith.constant 1.000000e+05 : f32
    %1031 = vector.broadcast %cst_363 : f32 to vector<1x128xf32>
    %1032 = arith.mulf %1030, %1031 : vector<1x128xf32>
    %1033 = vector.broadcast %1017 : vector<16x1xf32> to vector<16x128xf32>
    %1034 = arith.mulf %991, %1033 : vector<16x128xf32>
    %c0_364 = arith.constant 0 : index
    %c0_365 = arith.constant 0 : index
    %1035 = vector.load %arg10[%c0_364, %c0_365] : memref<16x512xf32, #tpu.memory_space<vmem>>, vector<16x128xf32>
    tpu.vector_store %arg10[%c0_364, %c0_365], %1034 {strides = array<i32>} : memref<16x512xf32, #tpu.memory_space<vmem>>, vector<16x128xf32>,
    %1036 = arith.truncf %1034 : vector<16x128xf32> to vector<16x128xbf16>
    %1037 = vector.extract_strided_slice %1018 {offsets = [0, 0], sizes = [128, 128], strides = [1, 1]} : vector<512x128xf32> to vector<128x128xf32>
    %1038 = arith.truncf %1037 : vector<128x128xf32> to vector<128x128xbf16>
    %cst_366 = arith.constant dense<0.000000e+00> : vector<16x128xf32>
    %1039 = tpu.matmul %1036, %1038, %cst_366 {dimension_numbers = #tpu.dot_dimension_numbers<[1], [0], [0], [1], [0, 0, 1, 1], [], []>} : vector<16x128xbf16>, vector<128x128xbf16>, vector<16x128xf32> -> vector<16x128xf32>
    %1040 = vector.broadcast %1017 : vector<16x1xf32> to vector<16x128xf32>
    %1041 = arith.mulf %324, %1040 : vector<16x128xf32>
    %c0_367 = arith.constant 0 : index
    %c128 = arith.constant 128 : index
    %1042 = vector.load %arg10[%c0_367, %c128] : memref<16x512xf32, #tpu.memory_space<vmem>>, vector<16x128xf32>
    tpu.vector_store %arg10[%c0_367, %c128], %1041 {strides = array<i32>} : memref<16x512xf32, #tpu.memory_space<vmem>>, vector<16x128xf32>,
    %1043 = arith.truncf %1041 : vector<16x128xf32> to vector<16x128xbf16>
    %1044 = vector.extract_strided_slice %1018 {offsets = [128, 0], sizes = [128, 128], strides = [1, 1]} : vector<512x128xf32> to vector<128x128xf32>
    %1045 = arith.truncf %1044 : vector<128x128xf32> to vector<128x128xbf16>
    %cst_368 = arith.constant dense<0.000000e+00> : vector<16x128xf32>
    %1046 = tpu.matmul %1043, %1045, %cst_368 {dimension_numbers = #tpu.dot_dimension_numbers<[1], [0], [0], [1], [0, 0, 1, 1], [], []>} : vector<16x128xbf16>, vector<128x128xbf16>, vector<16x128xf32> -> vector<16x128xf32>
    %1047 = arith.addf %1039, %1046 : vector<16x128xf32>
    %1048 = vector.broadcast %1017 : vector<16x1xf32> to vector<16x128xf32>
    %1049 = arith.mulf %648, %1048 : vector<16x128xf32>
    %c0_369 = arith.constant 0 : index
    %c256 = arith.constant 256 : index
    %1050 = vector.load %arg10[%c0_369, %c256] : memref<16x512xf32, #tpu.memory_space<vmem>>, vector<16x128xf32>
    tpu.vector_store %arg10[%c0_369, %c256], %1049 {strides = array<i32>} : memref<16x512xf32, #tpu.memory_space<vmem>>, vector<16x128xf32>,
    %1051 = arith.truncf %1049 : vector<16x128xf32> to vector<16x128xbf16>
    %1052 = vector.extract_strided_slice %1018 {offsets = [256, 0], sizes = [128, 128], strides = [1, 1]} : vector<512x128xf32> to vector<128x128xf32>
    %1053 = arith.truncf %1052 : vector<128x128xf32> to vector<128x128xbf16>
    %cst_370 = arith.constant dense<0.000000e+00> : vector<16x128xf32>
    %1054 = tpu.matmul %1051, %1053, %cst_370 {dimension_numbers = #tpu.dot_dimension_numbers<[1], [0], [0], [1], [0, 0, 1, 1], [], []>} : vector<16x128xbf16>, vector<128x128xbf16>, vector<16x128xf32> -> vector<16x128xf32>
    %1055 = arith.addf %1047, %1054 : vector<16x128xf32>
    %1056 = vector.broadcast %1017 : vector<16x1xf32> to vector<16x128xf32>
    %1057 = arith.mulf %966, %1056 : vector<16x128xf32>
    %c0_371 = arith.constant 0 : index
    %c384 = arith.constant 384 : index
    %1058 = vector.load %arg10[%c0_371, %c384] : memref<16x512xf32, #tpu.memory_space<vmem>>, vector<16x128xf32>
    tpu.vector_store %arg10[%c0_371, %c384], %1057 {strides = array<i32>} : memref<16x512xf32, #tpu.memory_space<vmem>>, vector<16x128xf32>,
    %1059 = arith.truncf %1057 : vector<16x128xf32> to vector<16x128xbf16>
    %1060 = vector.extract_strided_slice %1018 {offsets = [384, 0], sizes = [128, 128], strides = [1, 1]} : vector<512x128xf32> to vector<128x128xf32>
    %1061 = arith.truncf %1060 : vector<128x128xf32> to vector<128x128xbf16>
    %cst_372 = arith.constant dense<0.000000e+00> : vector<16x128xf32>
    %1062 = tpu.matmul %1059, %1061, %cst_372 {dimension_numbers = #tpu.dot_dimension_numbers<[1], [0], [0], [1], [0, 0, 1, 1], [], []>} : vector<16x128xbf16>, vector<128x128xbf16>, vector<16x128xf32> -> vector<16x128xf32>
    %1063 = arith.addf %1055, %1062 : vector<16x128xf32>
    %1064 = vector.broadcast %1032 : vector<1x128xf32> to vector<16x128xf32>
    %1065 = arith.mulf %1063, %1064 : vector<16x128xf32>
    %c0_373 = arith.constant 0 : index
    %c0_374 = arith.constant 0 : index
    %1066 = vector.load %arg11[%c0_373, %c0_374] : memref<16x128xf32, #tpu.memory_space<vmem>>, vector<16x128xf32>
    tpu.vector_store %arg11[%c0_373, %c0_374], %1065 {strides = array<i32>} : memref<16x128xf32, #tpu.memory_space<vmem>>, vector<16x128xf32>,
    return
  }
  func.func @transform_0(%arg0: i32) -> (i32, i32, i32) {
    %c0_i32 = arith.constant 0 : i32
    %c0_i32_0 = arith.constant 0 : i32
    %c0_i32_1 = arith.constant 0 : i32
    return %arg0, %c0_i32, %c0_i32_0 : i32, i32, i32
  }
  func.func @transform_1(%arg0: i32) -> (i32, i32) {
    %c0_i32 = arith.constant 0 : i32
    %c0_i32_0 = arith.constant 0 : i32
    %c0_i32_1 = arith.constant 0 : i32
    return %c0_i32, %c0_i32_0 : i32, i32
  }
  func.func @transform_2(%arg0: i32) -> (i32, i32, i32) {
    %c0_i32 = arith.constant 0 : i32
    %c0_i32_0 = arith.constant 0 : i32
    %c0_i32_1 = arith.constant 0 : i32
    %c0_i32_2 = arith.constant 0 : i32
    return %c0_i32, %c0_i32_0, %c0_i32_1 : i32, i32, i32
  }
  func.func @transform_3(%arg0: i32) -> (i32, i32, i32) {
    %c0_i32 = arith.constant 0 : i32
    %c0_i32_0 = arith.constant 0 : i32
    %c0_i32_1 = arith.constant 0 : i32
    %c0_i32_2 = arith.constant 0 : i32
    return %c0_i32, %c0_i32_0, %c0_i32_1 : i32, i32, i32
  }
  func.func @transform_4(%arg0: i32) -> (i32, i32, i32) {
    %c0_i32 = arith.constant 0 : i32
    %c0_i32_0 = arith.constant 0 : i32
    %c0_i32_1 = arith.constant 0 : i32
    %c0_i32_2 = arith.constant 0 : i32
    return %c0_i32, %c0_i32_0, %c0_i32_1 : i32, i32, i32
  }
  func.func @transform_5(%arg0: i32) -> (i32, i32, i32) {
    %c0_i32 = arith.constant 0 : i32
    %c0_i32_0 = arith.constant 0 : i32
    %c0_i32_1 = arith.constant 0 : i32
    %c0_i32_2 = arith.constant 0 : i32
    return %c0_i32, %c0_i32_0, %c0_i32_1 : i32, i32, i32
  }
  func.func @transform_6(%arg0: i32) -> (i32, i32) {
    %c0_i32 = arith.constant 0 : i32
    %c0_i32_0 = arith.constant 0 : i32
    %c0_i32_1 = arith.constant 0 : i32
    return %c0_i32, %c0_i32_0 : i32, i32
  }
  func.func @transform_7(%arg0: i32) -> (i32, i32) {
    %c0_i32 = arith.constant 0 : i32
    %c0_i32_0 = arith.constant 0 : i32
    %c0_i32_1 = arith.constant 0 : i32
    return %c0_i32, %c0_i32_0 : i32, i32
  }
  func.func @transform_8(%arg0: i32) -> (i32, i32) {
    %c0_i32 = arith.constant 0 : i32
    %c0_i32_0 = arith.constant 0 : i32
    %c0_i32_1 = arith.constant 0 : i32
    return %c0_i32, %c0_i32_0 : i32, i32
  }
  func.func @transform_9(%arg0: i32) -> (i32, i32) {
    %c0_i32 = arith.constant 0 : i32
    %c0_i32_0 = arith.constant 0 : i32
    return %arg0, %c0_i32 : i32, i32
  }
  func.func @transform_10(%arg0: i32) -> (i32, i32) {
    %c0_i32 = arith.constant 0 : i32
    %c0_i32_0 = arith.constant 0 : i32
    return %arg0, %c0_i32 : i32, i32
  }
}

</mosaic_0001>

<bundles_post_ra>
// kernel: fea_model_forward.1
= control target key start
LH: loop header
LB: loop body
LE: loop exit
PB: predicated region body
PF: predicated region fallthrough
CT: control target
= control target key end

     0   :  { %16 = vsyncpa [#allocation6], 0  ;;  %s10354_s0 = inlined_call_operand.vmem [shape: f32[1,128,8], index: 0, kind: input, shape index: {}]   ;;  %s10355_s1 = inlined_call_operand.vmem [shape: f32[8,384], index: 1, kind: input, shape index: {}]   ;;  %s10356_s2 = inlined_call_operand.hbm [shape: f32[2,128,384], index: 2, kind: input, shape index: {}]   ;;  %s10357_s3 = inlined_call_operand.hbm [shape: f32[3,128,384], index: 3, kind: input, shape index: {}]   ;;  %s10358_s4 = inlined_call_operand.hbm [shape: f32[3,1,384], index: 4, kind: input, shape index: {}]   ;;  %s10359_s5 = inlined_call_operand.hbm [shape: f32[3,1,128], index: 5, kind: input, shape index: {}]   ;;  %s10360_s6 = inlined_call_operand.vmem [shape: f32[384,128], index: 6, kind: input, shape index: {}]   ;;  %s10361_s7 = inlined_call_operand.vmem [shape: f32[1,128], index: 7, kind: input, shape index: {}]   ;;  %s10362_s8 = inlined_call_operand.hbm [shape: f32[512,128], index: 8, kind: input, shape index: {}]   ;;  %s10363_s9 = inlined_call_operand.vmem [shape: f32[16,512], index: 9, kind: output, shape index: {0}]   ;;  %s10364_s10 = inlined_call_operand.vmem [shape: f32[16,128], index: 10, kind: output, shape index: {1}]  }
   0x1   :  { %17 = vsyncpa [#allocation8], 0 }
   0x2   :  { %18 = vsyncpa [#allocation11], 0  ;;  %s7737_s13 = smov [#allocation7]   ;;  %s7738_s15 = smov [#allocation10]  }
   0x3   :  { %s40_s14 = sshll.u32 %s7737_s13, 4  ;;  %s64_s16 = sshll.u32 %s7738_s15, 4  ;;  %s41_s14 = int_to_ptr.vmem [resolvable:$true] %s40_s14  ;;  %s65_s16 = int_to_ptr.vmem [resolvable:$true] %s64_s16 }
   0x4   :  { %s7639_s17 = scalar_lea.vmem %s41_s14, 18432  ;;  %p7644_p1 = scmp.lt.s32.totalorder %s41_s14, %s41_s14 }
   0x5   :  { %p7640_p0 = scmp.ne.s32.totalorder %s41_s14, %s7639_s17  ;;  %p7645_p2 = scmp.lt.s32.totalorder %s7639_s17, %s7639_s17 }
   0x7   :  { %p7646_p3 = por %p7645_p2, %p7644_p1 }
   0x9   :  { %p7647_p4 = pnand %p7646_p3, %p7640_p0 }
   0xb   :  { %7650 = shalt.err (!%p7647_p4)
}
   0xc   :  { %s7739_s18 = smov 384   ;;  %s7740_s19 = smov 24  }
   0xd   :  { %46 = dma.hbm_to_vmem [thread:$0]  %s10357_s3, 18432, %s41_s14, [#allocation8], %s7739_s18, %s7739_s18, %s7740_s19  }
   0xe   :  { %s7659_s22 = scalar_lea.vmem %s65_s16, 48  ;;  %s7663_s23 = scalar_lea.vmem %s65_s16, 64 }
   0xf   :  { %p7660_p5 = scmp.ne.s32.totalorder %s65_s16, %s7659_s22  ;;  %p7664_p6 = scmp.lt.s32.totalorder %s65_s16, %s65_s16 }
  0x10   :  { %p7665_p7 = scmp.lt.s32.totalorder %s7663_s23, %s7659_s22 }
  0x12   :  { %p7666_p8 = por %p7665_p7, %p7664_p6 }
  0x14   :  { %p7667_p9 = pnand %p7666_p8, %p7660_p5 }
  0x16   :  { %7670 = shalt.err (!%p7667_p9)
}
  0x17   :  { %s7741_s24 = smov 16   ;;  %s7742_s25 = smov 1  }
  0x18   :  { %70 = dma.hbm_to_vmem [thread:$0]  %s10359_s5, 48, %s65_s16, [#allocation11], %s7741_s24, %s7741_s24, %s7742_s25  }
  0x19   :  { %s7743_s28 = smov [#allocation5]   ;;  %s7744_s30 = smov [#allocation9]  }
  0x1a   :  { %s28_s29 = sshll.u32 %s7743_s28, 4  ;;  %s52_s11 = sshll.u32 %s7744_s30, 4  ;;  %s29_s29 = int_to_ptr.vmem [resolvable:$true] %s28_s29  ;;  %s53_s11 = int_to_ptr.vmem [resolvable:$true] %s52_s11 }
  0x1b   :  { %s7679_s3 = scalar_lea.vmem %s29_s29, 12288  ;;  %p7684_p11 = scmp.lt.s32.totalorder %s29_s29, %s29_s29 }
  0x1c   :  { %p7680_p10 = scmp.ne.s32.totalorder %s29_s29, %s7679_s3  ;;  %p7685_p12 = scmp.lt.s32.totalorder %s7679_s3, %s7679_s3 }
  0x1e   :  { %p7686_p13 = por %p7685_p12, %p7684_p11 }
  0x20   :  { %p7687_p0 = pnand %p7686_p13, %p7680_p10 }
  0x22   :  { %7690 = shalt.err (!%p7687_p0)
}
  0x23   :  { %34 = dma.hbm_to_vmem [thread:$0]  %s10356_s2, 12288, %s29_s29, [#allocation6], %s7739_s18, %s7739_s18, %s7740_s19  }
  0x24   :  { %s7699_s5 = scalar_lea.vmem %s53_s11, 144  ;;  %s7703_s14 = scalar_lea.vmem %s53_s11, 160 }
  0x25   :  { %p7700_p1 = scmp.ne.s32.totalorder %s53_s11, %s7699_s5  ;;  %p7704_p2 = scmp.lt.s32.totalorder %s53_s11, %s53_s11 }
  0x26   :  { %p7705_p3 = scmp.lt.s32.totalorder %s7703_s14, %s7699_s5 }
  0x28   :  { %p7706_p4 = por %p7705_p3, %p7704_p2 }
  0x2a   :  { %p7707_p5 = pnand %p7706_p4, %p7700_p1 }
  0x2c   :  { %7710 = shalt.err (!%p7707_p5)
}
  0x2d   :  { %s7745_s15 = smov 48   ;;  %s7746_s16 = smov 3  }
  0x2e   :  { %58 = dma.hbm_to_vmem [thread:$0]  %s10358_s4, 144, %s53_s11, [#allocation8], %s7745_s15, %s7745_s15, %s7746_s16  }
  0x2f   :  { %s7747_s21 = smov [#allocation12]  }
  0x30   :  { %s80_s22 = sshll.u32 %s7747_s21, 4  ;;  %s81_s22 = int_to_ptr.vmem [resolvable:$true] %s80_s22 }
  0x31   :  { %s7719_s23 = scalar_lea.vmem %s81_s22, 8192  ;;  %p7724_p7 = scmp.lt.s32.totalorder %s81_s22, %s81_s22 }
  0x32   :  { %p7720_p6 = scmp.ne.s32.totalorder %s81_s22, %s7719_s23  ;;  %p7725_p8 = scmp.lt.s32.totalorder %s7719_s23, %s7719_s23 }
  0x34   :  { %p7726_p9 = por %p7725_p8, %p7724_p7 }
  0x36   :  { %p7727_p10 = pnand %p7726_p9, %p7720_p6 }
  0x38   :  { %7730 = shalt.err (!%p7727_p10)
}
  0x39   :  { %s7748_s2 = smov 128   ;;  %s7749_s18 = smov 8  }
  0x3a   :  { %86 = dma.hbm_to_vmem [thread:$0]  %s10362_s8, 8192, %s81_s22, [#allocation11], %s7748_s2, %s7748_s2, %s7749_s18  }
  0x3b   :  { %7731 = dma.done.wait [#allocation6], 12288  }
  0x3c   :  { %7732 = vsyncadd [#allocation6], 4294955008 }
  0x3d   :  { %7733 = dma.done.wait [#allocation8], 18576  }
  0x3e   :  { %7734 = vsyncadd [#allocation8], 4294948720 }
  0x3f   :  { %7735 = dma.done.wait [#allocation11], 8240  }
  0x40   :  { %7736 = vsyncadd [#allocation11], 4294959056  ;;  %v10367_v0 = vmov 0   ;;  %v128_v1 = vld [vmem:[%s10355_s1 + $0x8] sm:$0xff]  ;;  %vm175_vm0 = vcmask 1043456   ;;  %v129_v2 = vld [vmem:[%s10355_s1 + $0x10] sm:$0xff] }
  0x41   :  { %217 = vmatprep.mubr.bf16.mxu0 %v10367_v0  ;;  %v127_v3 = vld [vmem:[%s10355_s1] sm:$0xff]  ;;  %v131_v4 = vpack.c.bf16 %v128_v1, %v128_v1  ;;  %v132_v5 = vpack.c.bf16 %v129_v2, %v129_v2  ;;  %v104_v8 = vld [vmem:[%s10354_s0 + $0x8] sm:$0xff]  ;;  %v105_v9 = vld [vmem:[%s10354_s0 + $0x10] sm:$0xff]  ;;  %vm150_vm1 = vcmask 64512   ;;  %v10369_v30 = vmov 0.0  }
  0x42   :  { %v130_v6 = vpack.c.bf16 %v127_v3, %v127_v3  ;;  %v103_v7 = vld [vmem:[%s10354_s0] sm:$0xff]  ;;  %v106_v11 = vld [vmem:[%s10354_s0 + $0x18] sm:$0xff]  ;;  %v489_v13 = vld [vmem:[#allocation7 + $0x170] sm:$0xff]  ;;  %vm7753_vm2 = vmmov 0  }
  0x43   :  { %v119_v10 = vpack.c.bf16 %v104_v8, %v103_v7  ;;  %v486_v12 = vld [vmem:[#allocation7 + $0x158] sm:$0xff]  ;;  %5803 = vmatprep.subr.msk.bf16.mxu0 %vm175_vm0, %v131_v4  ;;  %7102 = vmatprep.subr.msk.bf16.mxu1 %vm175_vm0, %v132_v5  ;;  %v183_v15 = vsel %vm175_vm0, %v132_v5, 0  ;;  %v120_v16 = vpack.c.bf16 %v106_v11, %v105_v9  ;;  %v485_v18 = vld [vmem:[#allocation7 + $0x150] sm:$0xff]  ;;  %v488_v19 = vld [vmem:[#allocation7 + $0x168] sm:$0xff] }
  0x44   :  { %v177_v14 = vsel %vm175_vm0, %v130_v6, 0  ;;  %v7856_v17 = vpack.c.bf16 %v489_v13, %v486_v12  ;;  %v487_v20 = vld [vmem:[#allocation7 + $0x160] sm:$0xff]  ;;  %6401 = vmatpush3.bf16.msra.mxu1 %v183_v15  ;;  %v7858_v21 = vpack.c.bf16 %v488_v19, %v485_v18  ;;  %v490_v22 = vld [vmem:[#allocation7 + $0x178] sm:$0xff]  ;;  %v480_v23 = vld [vmem:[#allocation7 + $0x128] sm:$0xff] }
  0x45   :  { %200 = vmatpush1.bf16.msra.mxu0 %v177_v14  ;;  %v483_v24 = vld [vmem:[#allocation7 + $0x140] sm:$0xff]  ;;  %6402 = vmatprep.mubr.msk.bf16.mxu1 %vm150_vm1, %v119_v10  ;;  %v7862_v25 = vpack.c.bf16 %v490_v22, %v487_v20  ;;  %v482_v28 = vld [vmem:[#allocation7 + $0x138] sm:$0xff]  ;;  %v108_v31 = vld [vmem:[%s10354_s0 + $0x28] sm:$0xff] }
  0x46   :  { %527 = vmatprep.subr.bf16.mxu1 %v7856_v17  ;;  %v7864_v26 = vpack.c.bf16 %v483_v24, %v480_v23  ;;  %v479_v27 = vld [vmem:[#allocation7 + $0x120] sm:$0xff]  ;;  %6418 = vmatprep.subr.bf16.mxu0 %v10369_v30  ;;  %v109_v33 = vld [vmem:[%s10354_s0 + $0x30] sm:$0xff]  ;;  %v474_v34 = vld [vmem:[#allocation7 + $0xf8] sm:$0xff] }
  0x47   :  { %v107_v29 = vld [vmem:[%s10354_s0 + $0x20] sm:$0xff]  ;;  %6403 = vmatmul.mubr.msk.bf16.vlgmr.msra.gmra.mxu1 %vm150_vm1, %v120_v16  ;;  %v477_v35 = vld [vmem:[#allocation7 + $0x110] sm:$0xff]  ;;  %v7882_v36 = vpack.c.bf16 %v482_v28, %v479_v27  ;;  %v110_v37 = vld [vmem:[%s10354_s0 + $0x38] sm:$0xff] }
  0x48   :  { %5804 = vmatmul.mubr.msk.bf16.vlgmr.msra.gmra.mxu0 %vm150_vm1, %v119_v10  ;;  %v7875_v32 = vpack.c.bf16 %v108_v31, %v107_v29  ;;  %528 = vmatpush1.bf16.msra.mxu1 %v7858_v21  ;;  %v481_v38 = vld [vmem:[#allocation7 + $0x130] sm:$0xff]  ;;  %v484_v39 = vld [vmem:[#allocation7 + $0x148] sm:$0xff]  ;;  %v7889_v40 = vpack.c.bf16 %v477_v35, %v474_v34  ;;  %v471_v45 = vld [vmem:[#allocation7 + $0xe0] sm:$0xff]  ;;  %v7902_v48 = vpack.c.bf16 %v110_v37, %v109_v33 }
  0x49   :  { %6419 = vmatpush3.bf16.msra.mxu0 %v7862_v25  ;;  %529 = vmatprep.subr.bf16.mxu1 %v7864_v26  ;;  %v473_v41 = vld [vmem:[#allocation7 + $0xf0] sm:$0xff]  ;;  %v476_v42 = vld [vmem:[#allocation7 + $0x108] sm:$0xff]  ;;  %v7891_v43 = vpack.c.bf16 %v484_v39, %v481_v38  ;;  %v111_v46 = vld [vmem:[%s10354_s0 + $0x40] sm:$0xff] }
  0x4a   :  { %227 = vmatprep.mubr.bf16.mxu0 %v10367_v0  ;;  %v468_v44 = vld [vmem:[#allocation7 + $0xc8] sm:$0xff]  ;;  %6406 = vmatprep.mubr.msk.bf16.mxu1 %vm150_vm1, %v7875_v32  ;;  %v7905_v49 = vpack.c.bf16 %v476_v42, %v473_v41  ;;  %v467_v50 = vld [vmem:[#allocation7 + $0xc0] sm:$0xff]  ;;  %v470_v52 = vld [vmem:[#allocation7 + $0xd8] sm:$0xff] }
  0x4b   :  { %6420 = vmatprep.subr.bf16.mxu0 %v10369_v30  ;;  %v112_v47 = vld [vmem:[%s10354_s0 + $0x48] sm:$0xff]  ;;  %v7909_v51 = vpack.c.bf16 %v471_v45, %v468_v44  ;;  %v475_v54 = vld [vmem:[#allocation7 + $0x100] sm:$0xff]  ;;  %v478_v55 = vld [vmem:[#allocation7 + $0x118] sm:$0xff]  ;;  %v7923_v60 = vpack.c.bf16 %v470_v52, %v467_v50 }
  0x4c   :  { %530 = vmatpush1.bf16.msra.mxu1 %v7882_v36  ;;  %v7911_v53 = vpack.c.bf16 %v112_v47, %v111_v46  ;;  %v462_v56 = vld [vmem:[#allocation7 + $0x98] sm:$0xff]  ;;  %v465_v57 = vld [vmem:[#allocation7 + $0xb0] sm:$0xff]  ;;  %v7914_v58 = vpack.c.bf16 %v478_v55, %v475_v54  ;;  %v464_v63 = vld [vmem:[#allocation7 + $0xa8] sm:$0xff]  ;;  %v10365_v54 = vmov 0.0|0.0  }
  0x4d   :  { %6421 = vmatpush3.bf16.msra.mxu0 %v7891_v43  ;;  %531 = vmatprep.subr.bf16.mxu1 %v7889_v40  ;;  %v113_v59 = vld [vmem:[%s10354_s0 + $0x50] sm:$0xff]  ;;  %v114_v61 = vld [vmem:[%s10354_s0 + $0x58] sm:$0xff]  ;;  %v7932_v1 = vpack.c.bf16 %v465_v57, %v462_v56  ;;  %v456_v2 = vld [vmem:[#allocation7 + $0x68] sm:$0xff] }
  0x4e   :  { %6422 = vmatprep.subr.bf16.mxu0 %v10369_v30  ;;  %v461_v62 = vld [vmem:[#allocation7 + $0x90] sm:$0xff]  ;;  %v459_v3 = vld [vmem:[#allocation7 + $0x80] sm:$0xff]  ;;  %v116_v6 = vld [vmem:[%s10354_s0 + $0x68] sm:$0xff]  ;;  %v7941_v8 = vpack.c.bf16 %v114_v61, %v113_v59 }
  0x4f   :  { %6407 = vmatmul.mubr.msk.bf16.gmra.mxu1 %vm150_vm1, %v7902_v48  ;;  %v469_v4 = vld [vmem:[#allocation7 + $0xd0] sm:$0xff]  ;;  %v115_v5 = vld [vmem:[%s10354_s0 + $0x60] sm:$0xff]  ;;  %v472_v7 = vld [vmem:[#allocation7 + $0xe8] sm:$0xff]  ;;  %v7947_v10 = vpack.c.bf16 %v464_v63, %v461_v62  ;;  %v7950_v13 = vpack.c.bf16 %v459_v3, %v456_v2 }
  0x50   :  { %5805 = vmatmul.mubr.msk.bf16.gmra.mxu0 %vm150_vm1, %v120_v16  ;;  %532 = vmatpush1.bf16.msra.mxu1 %v7905_v49  ;;  %v7944_v9 = vpack.c.bf16 %v472_v7, %v469_v4  ;;  %v463_v11 = vld [vmem:[#allocation7 + $0xa0] sm:$0xff]  ;;  %v466_v12 = vld [vmem:[#allocation7 + $0xb8] sm:$0xff]  ;;  %v7952_v16 = vpack.c.bf16 %v116_v6, %v115_v5  ;;  %v453_v19 = vld [vmem:[#allocation7 + $0x50] sm:$0xff] }
  0x51   :  { %237 = vmatprep.mubr.bf16.mxu0 %v10367_v0  ;;  %533 = vmatprep.subr.bf16.mxu1 %v7909_v51  ;;  %v455_v14 = vld [vmem:[#allocation7 + $0x60] sm:$0xff]  ;;  %v458_v15 = vld [vmem:[#allocation7 + $0x78] sm:$0xff]  ;;  %v7959_v20 = vpack.c.bf16 %v466_v12, %v463_v11  ;;  %v117_v23 = vld [vmem:[%s10354_s0 + $0x70] sm:$0xff] }
  0x52   :  { %6410 = vmatprep.mubr.msk.bf16.mxu1 %vm150_vm1, %v7911_v53  ;;  %6423 = vmatpush3.bf16.msra.mxu0 %v7914_v58  ;;  %v450_v18 = vld [vmem:[#allocation7 + $0x38] sm:$0xff]  ;;  %v7962_v22 = vpack.c.bf16 %v458_v15, %v455_v14  ;;  %v449_v28 = vld [vmem:[#allocation7 + $0x30] sm:$0xff]  ;;  %v452_v29 = vld [vmem:[#allocation7 + $0x48] sm:$0xff] }
  0x53   :  { %6424 = vmatprep.subr.bf16.mxu0 %v10369_v30  ;;  %v118_v24 = vld [vmem:[%s10354_s0 + $0x78] sm:$0xff]  ;;  %v7974_v27 = vpack.c.bf16 %v453_v19, %v450_v18  ;;  %v444_v31 = vld [vmem:[#allocation7 + $0x8] sm:$0xff]  ;;  %v457_v34 = vld [vmem:[#allocation7 + $0x70] sm:$0xff]  ;;  %v7979_v37 = vpack.c.bf16 %v452_v29, %v449_v28 }
  0x54   :  { %534 = vmatpush1.bf16.msra.mxu1 %v7923_v60  ;;  %v126_v33 = vpack.c.bf16 %v118_v24, %v117_v23  ;;  %v460_v35 = vld [vmem:[#allocation7 + $0x88] sm:$0xff]  ;;  %v443_v39 = vld [vmem:[#allocation7] sm:$0xff]  ;;  %v446_v41 = vld [vmem:[#allocation7 + $0x18] sm:$0xff] }
  0x55   :  { %535 = vmatprep.subr.bf16.mxu1 %v7932_v1  ;;  %v7985_v42 = vpack.c.bf16 %v460_v35, %v457_v34  ;;  %v451_v44 = vld [vmem:[#allocation7 + $0x40] sm:$0xff]  ;;  %v454_v45 = vld [vmem:[#allocation7 + $0x58] sm:$0xff]  ;;  %v7991_v46 = vpack.c.bf16 %v446_v41, %v443_v39  ;;  %v448_v50 = vld [vmem:[#allocation7 + $0x28] sm:$0xff] }
  0x56   :  { %6425 = vmatpush3.bf16.msra.mxu0 %v7944_v9  ;;  %v7997_v47 = vpack.c.bf16 %v454_v45, %v451_v44  ;;  %v133_v57 = vld [vmem:[#allocation9] sm:$0x7] }
  0x57   :  { %6411 = vmatmul.mubr.msk.bf16.gmra.mxu1 %vm150_vm1, %v7941_v8  ;;  %6426 = vmatprep.subr.bf16.mxu0 %v10369_v30 }
  0x58   :  { %5806 = vmatmul.mubr.msk.bf16.gmra.mxu0 %vm150_vm1, %v7875_v32  ;;  %536 = vmatpush1.bf16.msra.mxu1 %v7947_v10  ;;  %v447_v32 = vld [vmem:[#allocation7 + $0x20] sm:$0xff] }
  0x59   :  { %247 = vmatprep.mubr.bf16.mxu0 %v10367_v0  ;;  %537 = vmatprep.subr.bf16.mxu1 %v7950_v13  ;;  %v7983_v38 = vpack.c.bf16 %v447_v32, %v444_v31 }
  0x5a   :  { %6414 = vmatprep.mubr.msk.bf16.mxu1 %vm150_vm1, %v7952_v16  ;;  %6427 = vmatpush3.bf16.msra.mxu0 %v7959_v20 }
  0x5b   :  { %6428 = vmatprep.subr.bf16.mxu0 %v10369_v30 }
  0x5c   :  { %538 = vmatpush1.bf16.msra.mxu1 %v7962_v22 }
  0x5d   :  { %539 = vmatprep.subr.bf16.mxu1 %v7974_v27 }
  0x5e   :  { %6429 = vmatpush3.bf16.msra.mxu0 %v7985_v42 }
  0x5f   :  { %6415 = vmatmul.mubr.msk.bf16.gmra.mxu1 %vm150_vm1, %v126_v33  ;;  %6430 = vmatprep.subr.bf16.mxu0 %v10369_v30 }
  0x60   :  { %5807 = vmatmul.mubr.msk.bf16.gmra.mxu0 %vm150_vm1, %v7902_v48  ;;  %540 = vmatpush1.bf16.msra.mxu1 %v7979_v37  ;;  %v445_v48 = vld [vmem:[#allocation7 + $0x10] sm:$0xff] }
  0x61   :  { %257 = vmatprep.mubr.bf16.mxu0 %v10367_v0  ;;  %541 = vmatprep.subr.bf16.mxu1 %v7983_v38  ;;  %v8003_v52 = vpack.c.bf16 %v448_v50, %v445_v48 }
  0x62   :  { %559 = vmatprep.mubr.bf16.mxu1 %v10367_v0  ;;  %6431 = vmatpush3.bf16.msra.mxu0 %v7997_v47 }
  0x63   :  { %6432 = vmatprep.subr.bf16.mxu0 %v10369_v30 }
  0x64   :  { %542 = vmatpush1.bf16.msra.mxu1 %v7991_v46 }
  0x65   :  { %679 = vmatprep.subr.bf16.mxu1 %v7856_v17 }
  0x66   :  { %6433 = vmatpush3.bf16.msra.mxu0 %v8003_v52 }
  0x67   :  { %560 = vmatmul.mubr.bf16.vlgmr.msra.gmra.mxu1 %v10365_v54  ;;  %6438 = vmatprep.subr.bf16.mxu0 %v10369_v30 }
  0x68   :  { %5808 = vmatmul.mubr.msk.bf16.gmra.mxu0 %vm150_vm1, %v7911_v53  ;;  %680 = vmatpush1.bf16.msra.mxu1 %v7858_v21  ;;  %v135_v53 = vlaneseq }
  0x69   :  { %267 = vmatprep.mubr.bf16.mxu0 %v10367_v0  ;;  %711 = vmatprep.mubr.bf16.mxu1 %v10367_v0 }
  0x6a   :  { %681 = vmatprep.subr.bf16.mxu1 %v7864_v26  ;;  %v136_v55 = vshrl.u32 %v135_v53, 7 }
  0x6c   :  { %682 = vmatpush1.bf16.msra.mxu1 %v7882_v36  ;;  %v8057_v56 = vsub.s32 2, %v136_v55  ;;  %v8069_v4 = vsub.s32 0, %v136_v55  ;;  %v8071_v7 = vsub.s32 1, %v136_v55 }
  0x6d   :  { %683 = vmatprep.subr.bf16.mxu1 %v7889_v40 }
  0x6e   :  { %10382 = vst [vmem:[#allocation16_spill] sm:$0xff] %v8057_v56  ;;  %v8060_v59 = vrot.slane %v133_v57, %v8057_v56  ;;  %10383 = vst [vmem:[#allocation17_spill] sm:$0xff] %v8069_v4  ;;  %v8081_v14 = vrot.slane %v133_v57, %v8069_v4  ;;  %v8084_v18 = vrot.slane %v133_v57, %v8071_v7 }
  0x6f   :  { %10384 = vst [vmem:[#allocation18_spill] sm:$0xff] %v8071_v7 }
  0x70   :  { %5809 = vmatmul.mubr.msk.bf16.gmra.mxu0 %vm150_vm1, %v7941_v8  ;;  %684 = vmatpush1.bf16.msra.mxu1 %v7905_v49 }
  0x71   :  { %277 = vmatprep.mubr.bf16.mxu0 %v10367_v0  ;;  %685 = vmatprep.subr.bf16.mxu1 %v7909_v51 }
  0x74   :  { %686 = vmatpush1.bf16.msra.mxu1 %v7923_v60 }
  0x75   :  { %687 = vmatprep.subr.bf16.mxu1 %v7932_v1 }
  0x78   :  { %5810 = vmatmul.mubr.msk.bf16.gmra.mxu0 %vm150_vm1, %v7952_v16  ;;  %688 = vmatpush1.bf16.msra.mxu1 %v7947_v10 }
  0x79   :  { %287 = vmatprep.mubr.bf16.mxu0 %v10367_v0  ;;  %689 = vmatprep.subr.bf16.mxu1 %v7950_v13 }
  0x7c   :  { %690 = vmatpush1.bf16.msra.mxu1 %v7962_v22 }
  0x7d   :  { %691 = vmatprep.subr.bf16.mxu1 %v7974_v27 }
  0x80   :  { %5811 = vmatmul.mubr.msk.bf16.gmra.mxu0 %vm150_vm1, %v126_v33  ;;  %692 = vmatpush1.bf16.msra.mxu1 %v7979_v37 }
  0x81   :  { %6434 = vmatprep.mubr.msk.bf16.mxu0 %vm7753_vm2, %v10369_v30  ;;  %693 = vmatprep.subr.bf16.mxu1 %v7983_v38 }
  0x84   :  { %694 = vmatpush1.bf16.msra.mxu1 %v7991_v46 }
  0x85   :  { %832 = vmatprep.subr.bf16.mxu1 %v7856_v17 }
  0x88   :  { %6435 = vmatmul.mubr.bf16.vlgmr.msra.gmra.mxu0 %v10365_v54 }
  0x89   :  { %6439 = vmatpush3.bf16.msra.mxu0 %v7862_v25  ;;  %6454 = vmatprep.mubr.msk.bf16.mxu0 %vm7753_vm2, %v10369_v30 }
  0x8a   :  { %6440 = vmatprep.subr.bf16.mxu0 %v10369_v30 }
  0x8d   :  { %6441 = vmatpush3.bf16.msra.mxu0 %v7891_v43 }
  0x8e   :  { %6442 = vmatprep.subr.bf16.mxu0 %v10369_v30 }
  0x91   :  { %6443 = vmatpush3.bf16.msra.mxu0 %v7914_v58 }
  0x92   :  { %6444 = vmatprep.subr.bf16.mxu0 %v10369_v30 }
  0x95   :  { %6445 = vmatpush3.bf16.msra.mxu0 %v7944_v9 }
  0x96   :  { %6446 = vmatprep.subr.bf16.mxu0 %v10369_v30 }
  0x99   :  { %6447 = vmatpush3.bf16.msra.mxu0 %v7959_v20 }
  0x9a   :  { %6448 = vmatprep.subr.bf16.mxu0 %v10369_v30 }
  0x9d   :  { %6449 = vmatpush3.bf16.msra.mxu0 %v7985_v42 }
  0x9e   :  { %6450 = vmatprep.subr.bf16.mxu0 %v10369_v30 }
  0xa1   :  { %6451 = vmatpush3.bf16.msra.mxu0 %v7997_v47 }
  0xa2   :  { %6452 = vmatprep.subr.bf16.mxu0 %v10369_v30 }
  0xa5   :  { %6453 = vmatpush3.bf16.msra.mxu0 %v8003_v52 }
  0xa6   :  { %6458 = vmatprep.subr.bf16.mxu0 %v10369_v30 }
 0x107   :  { %v6404_v62 = vpop.f32.mrf.mxu1 }
 0x108   :  { %v219_v61 = vpop.f32.mrf.mxu0  ;;  %v8063_v63 = vadd.f32 %v6404_v62, %v8060_v59 }
 0x109   :  { %v8067_v3 = vpop.f32.mrf.mxu1  ;;  %v220_v4 = vadd.f32 %v219_v61, %v8081_v14 }
 0x10a   :  { %v8065_v2 = vpop.f32.mrf.mxu0 }
 0x10b   :  { %v6405_v6 = vpop.f32.mrf.mxu1 }
 0x10c   :  { %v223_v5 = vpop.f32.mrf.mxu0  ;;  %v8074_v8 = vadd.f32 %v6405_v6, %v8060_v59 }
 0x10d   :  { %v8078_v12 = vpop.f32.mrf.mxu1 }
 0x10e   :  { %v8076_v11 = vpop.f32.mrf.mxu0 }
 0x10f   :  { %v6408_v16 = vpop.f32.mrf.mxu1 }
 0x110   :  { %v229_v15 = vpop.f32.mrf.mxu0  ;;  %v8090_v23 = vadd.f32 %v6408_v16, %v8060_v59 }
 0x111   :  { %v8087_v19 = vadd.f32 %v229_v15, %v8081_v14  ;;  %v348_v28 = vpop.f32.mrf.mxu1 }
 0x112   :  { %v231_v24 = vpop.f32.mrf.mxu0  ;;  %v8096_v31 = vadd.f32 %v348_v28, %v8060_v59 }
 0x113   :  { %v8093_v29 = vadd.f32 %v231_v24, %v8084_v18  ;;  %v6409_v33 = vpop.f32.mrf.mxu1 }
 0x114   :  { %v233_v32 = vpop.f32.mrf.mxu0  ;;  %v8102_v35 = vadd.f32 %v6409_v33, %v8060_v59 }
 0x115   :  { %v8099_v34 = vadd.f32 %v233_v32, %v8081_v14  ;;  %v8106_v41 = vpop.f32.mrf.mxu1 }
 0x116   :  { %10385 = vst [vmem:[#allocation19_spill] sm:$0xff] %v8102_v35  ;;  %v8104_v39 = vpop.f32.mrf.mxu0 }
 0x117   :  { %v6412_v45 = vpop.f32.mrf.mxu1 }
 0x118   :  { %v239_v44 = vpop.f32.mrf.mxu0  ;;  %v8112_v50 = vadd.f32 %v6412_v45, %v8060_v59 }
 0x119   :  { %v8109_v48 = vadd.f32 %v239_v44, %v8081_v14  ;;  %v364_v55 = vpop.f32.mrf.mxu1 }
 0x11a   :  { %10386 = vst [vmem:[#allocation20_spill] sm:$0xff] %v8112_v50  ;;  %v241_v53 = vpop.f32.mrf.mxu0  ;;  %v8118_v62 = vadd.f32 %v364_v55, %v8060_v59 }
 0x11b   :  { %v8115_v57 = vadd.f32 %v241_v53, %v8084_v18  ;;  %v6413_v15 = vpop.f32.mrf.mxu1 }
 0x11c   :  { %10387 = vst [vmem:[#allocation21_spill] sm:$0xff] %v8118_v62  ;;  %v243_v6 = vpop.f32.mrf.mxu0  ;;  %v8124_v24 = vadd.f32 %v6413_v15, %v8060_v59 }
 0x11d   :  { %v8121_v16 = vadd.f32 %v243_v6, %v8081_v14  ;;  %v8128_v32 = vpop.f32.mrf.mxu1 }
 0x11e   :  { %10388 = vst [vmem:[#allocation22_spill] sm:$0xff] %v8124_v24  ;;  %v8126_v28 = vpop.f32.mrf.mxu0  ;;  %10389 = vst [vmem:[#allocation23_spill] sm:$0xff] %v8128_v32 }
 0x11f   :  { %v6416_v44 = vpop.f32.mrf.mxu1 }
 0x120   :  { %v249_v33 = vpop.f32.mrf.mxu0  ;;  %v8134_v53 = vadd.f32 %v6416_v44, %v8060_v59 }
 0x121   :  { %v8131_v45 = vadd.f32 %v249_v33, %v8081_v14  ;;  %v380_v54 = vpop.f32.mrf.mxu1 }
 0x122   :  { %10390 = vst [vmem:[#allocation24_spill] sm:$0xff] %v8134_v53  ;;  %v251_v55 = vpop.f32.mrf.mxu0  ;;  %v8140_v15 = vadd.f32 %v380_v54, %v8060_v59 }
 0x123   :  { %v8137_v6 = vadd.f32 %v251_v55, %v8084_v18  ;;  %v6417_v30 = vpop.f32.mrf.mxu1 }
 0x124   :  { %10391 = vst [vmem:[#allocation25_spill] sm:$0xff] %v8140_v15  ;;  %v253_v0 = vpop.f32.mrf.mxu0  ;;  %v8146_v7 = vadd.f32 %v6417_v30, %v8060_v59 }
 0x125   :  { %v8143_v56 = vadd.f32 %v253_v0, %v8081_v14  ;;  %v8150_v44 = vpop.f32.mrf.mxu1  ;;  %v224_v0 = vadd.f32 %v223_v5, %v8081_v14  ;;  %v226_v5 = vadd.f32 %v8076_v11, %v8084_v18 }
 0x126   :  { %10392 = vst [vmem:[#allocation26_spill] sm:$0xff] %v8146_v7  ;;  %v8148_v33 = vpop.f32.mrf.mxu0  ;;  %10393 = vst [vmem:[#allocation27_spill] sm:$0xff] %v8150_v44 }
 0x127   :  { %v561_v55 = vpop.f32.mrf.mxu1 }
 0x128   :  { %v259_v53 = vpop.f32.mrf.mxu0  ;;  %v620_v54 = vadd.f32 %v561_v55, %v220_v4  ;;  %v222_v4 = vadd.f32 %v8065_v2, %v8084_v18 }
 0x129   :  { %v8154_v24 = vadd.f32 %v259_v53, %v8081_v14  ;;  %v563_v50 = vpop.f32.mrf.mxu1 }
 0x12a   :  { %v261_v15 = vpop.f32.mrf.mxu0  ;;  %v5821_v32 = vmul.f32 -1.442695, %v620_v54 }
 0x12b   :  { %10394 = vst [vmem:[#allocation28_spill] sm:$0xff] %v8154_v24  ;;  %v8158_v30 = vadd.f32 %v261_v15, %v8084_v18  ;;  %v565_v62 = vpop.f32.mrf.mxu1  ;;  %v634_v15 = vadd.f32 %v563_v50, %v222_v4 }
 0x12c   :  { %v263_v7 = vpop.f32.mrf.mxu0  ;;  %7136 = vpow2.f32 %v5821_v32  ;;  %v621_v61 = vadd.f32 %v565_v62, %v224_v0 }
 0x12d   :  { %10395 = vst [vmem:[#allocation29_spill] sm:$0xff] %v8158_v30  ;;  %v8161_v44 = vadd.f32 %v263_v7, %v8081_v14  ;;  %v567_v55 = vpop.f32.mrf.mxu1 }
 0x12e   :  { %v8163_v35 = vpop.f32.mrf.mxu0  ;;  %v5822_v53 = vmul.f32 -1.442695, %v621_v61  ;;  %v635_v32 = vadd.f32 %v567_v55, %v226_v5 }
 0x12f   :  { %10396 = vst [vmem:[#allocation30_spill] sm:$0xff] %v8161_v44  ;;  %10397 = vst [vmem:[#allocation31_spill] sm:$0xff] %v8163_v35  ;;  %v5823_v35 = vmul.f32 -1.442695, %v634_v15 }
 0x130   :  { %v269_v54 = vpop.f32.mrf.mxu0  ;;  %7138 = vpow2.f32 %v5822_v53  ;;  %v5824_v61 = vmul.f32 -1.442695, %v635_v32 }
 0x131   :  { %v8170_v30 = vadd.f32 %v269_v54, %v8081_v14  ;;  %7140 = vpow2.f32 %v5823_v35 }
 0x132   :  { %v271_v7 = vpop.f32.mrf.mxu0  ;;  %7142 = vpow2.f32 %v5824_v61 }
 0x133   :  { %10398 = vst [vmem:[#allocation32_spill] sm:$0xff] %v8170_v30  ;;  %v8173_v62 = vadd.f32 %v271_v7, %v8084_v18 }
 0x134   :  { %v273_v0 = vpop.f32.mrf.mxu0 }
 0x135   :  { %10399 = vst [vmem:[#allocation33_spill] sm:$0xff] %v8173_v62  ;;  %v8176_v2 = vadd.f32 %v273_v0, %v8081_v14 }
 0x136   :  { %v8178_v44 = vpop.f32.mrf.mxu0 }
 0x137   :  { %10400 = vst [vmem:[#allocation34_spill] sm:$0xff] %v8176_v2  ;;  %10401 = vst [vmem:[#allocation35_spill] sm:$0xff] %v8178_v44 }
 0x138   :  { %v279_v11 = vpop.f32.mrf.mxu0 }
 0x139   :  { %v8181_v50 = vadd.f32 %v279_v11, %v8081_v14  ;;  %v7137_v4 = vpop.eup %7136 }
 0x13a   :  { %v281_v53 = vpop.f32.mrf.mxu0  ;;  %v628_v55 = vadd.f32 1.0, %v7137_v4 }
 0x13b   :  { %10402 = vst [vmem:[#allocation36_spill] sm:$0xff] %v8181_v50  ;;  %v8184_v5 = vadd.f32 %v281_v53, %v8084_v18 }
 0x13c   :  { %v283_v54 = vpop.f32.mrf.mxu0  ;;  %7144 = vrcp.f32 %v628_v55 }
 0x13d   :  { %10403 = vst [vmem:[#allocation37_spill] sm:$0xff] %v8184_v5  ;;  %v8187_v15 = vadd.f32 %v283_v54, %v8081_v14  ;;  %v7139_v32 = vpop.eup %7138 }
 0x13e   :  { %v8189_v7 = vpop.f32.mrf.mxu0  ;;  %v629_v0 = vadd.f32 1.0, %v7139_v32  ;;  %v7141_v55 = vpop.eup %7140 }
 0x13f   :  { %10404 = vst [vmem:[#allocation38_spill] sm:$0xff] %v8187_v15  ;;  %10405 = vst [vmem:[#allocation39_spill] sm:$0xff] %v8189_v7  ;;  %v8202_v15 = vld [vmem:[#allocation10] ss:$0 sm:$0xff]  ;;  %v7143_v7 = vpop.eup %7142  ;;  %v642_v50 = vadd.f32 1.0, %v7141_v55  ;;  %v336_v55 = vadd.f32 %v8078_v12, %v8060_v59 }
 0x140   :  { %v289_v35 = vpop.f32.mrf.mxu0  ;;  %7146 = vrcp.f32 %v629_v0 }
 0x141   :  { %v8192_v11 = vadd.f32 %v289_v35, %v8081_v14  ;;  %7148 = vrcp.f32 %v642_v50 }
 0x142   :  { %v291_v61 = vpop.f32.mrf.mxu0 }
 0x143   :  { %10406 = vst [vmem:[#allocation40_spill] sm:$0xff] %v8192_v11  ;;  %v8195_v4 = vadd.f32 %v291_v61, %v8084_v18  ;;  %v643_v11 = vadd.f32 1.0, %v7143_v7  ;;  %v333_v61 = vadd.f32 %v8067_v3, %v8060_v59 }
 0x144   :  { %v293_v53 = vpop.f32.mrf.mxu0 }
 0x145   :  { %10407 = vst [vmem:[#allocation41_spill] sm:$0xff] %v8195_v4  ;;  %v8198_v5 = vadd.f32 %v293_v53, %v8081_v14  ;;  %7150 = vrcp.f32 %v643_v11 }
 0x146   :  { %v8200_v54 = vpop.f32.mrf.mxu0 }
 0x147   :  { %10408 = vst [vmem:[#allocation42_spill] sm:$0xff] %v8198_v5  ;;  %10409 = vst [vmem:[#allocation43_spill] sm:$0xff] %v8200_v54 }
 0x148   :  { %v604_v32 = vpop.f32.mrf.mxu0 }
 0x149   :  { %v648_v0 = vadd.f32 %v8202_v15, %v604_v32  ;;  %v7145_v35 = vpop.eup %7144 }
 0x14a   :  { %v6436_v44 = vpop.f32.mrf.mxu0 }
 0x14b   :  { %v650_v4 = vmul.f32 %v7145_v35, %v648_v0 }
 0x14c   :  { %v607_v62 = vpop.f32.mrf.mxu0 }
 0x14d   :  { %v652_v14 = vadd.f32 %v650_v4, %v333_v61  ;;  %v649_v53 = vadd.f32 %v8202_v15, %v607_v62  ;;  %v7147_v54 = vpop.eup %7146 }
 0x14e   :  { %v6437_v5 = vpop.f32.mrf.mxu0  ;;  %v7149_v44 = vpop.eup %7148 }
 0x14f   :  { %7152 = vtanh.f32 %v652_v14  ;;  %v651_v32 = vmul.f32 %v7147_v54, %v649_v53  ;;  %v656_v3 = vsub.f32 1.0, %v7149_v44  ;;  %v660_v61 = vmul.f32 0.0, %v7149_v44 }
 0x151   :  { %v653_v2 = vadd.f32 %v651_v32, %v336_v55 }
 0x152   :  { %v7151_v7 = vpop.eup %7150 }
 0x153   :  { %7154 = vtanh.f32 %v653_v2  ;;  %v657_v0 = vsub.f32 1.0, %v7151_v7  ;;  %v661_v62 = vmul.f32 0.0, %v7151_v7  ;;  %v10411_v2 = vmov 0  }
 0x15c   :  { %v7153_v30 = vpop.eup %7152 }
 0x15d   :  { %v658_v35 = vmul.f32 %v7153_v30, %v656_v3  ;;  %v10410_v30 = vmov 0.0  }
 0x15f   :  { %v8210_v24 = vadd.f32 %v660_v61, %v658_v35  ;;  %v236_v61 = vadd.f32 %v8104_v39, %v8084_v18 }
 0x160   :  { %v7155_v50 = vpop.eup %7154 }
 0x161   :  { %v659_v4 = vmul.f32 %v7155_v50, %v657_v0 }
 0x163   :  { %v8212_v5 = vadd.f32 %v661_v62, %v659_v4 }
 0x165   :  { %v6003_v12 = vpack.c.bf16 %v8212_v5, %v8210_v24 }
 0x167   :  { %6004 = vst [vmem:[#allocation2] sm:$0xff] %v6003_v12   ;;  %712 = vmatmul.mubr.bf16.vlgmr.msra.gmra.mxu1 %v6003_v12  ;;  %6455 = vmatmul.mubr.bf16.vlgmr.msra.gmra.mxu0 %v6003_v12 }
 0x168   :  { %833 = vmatpush1.bf16.msra.mxu1 %v7858_v21  ;;  %6459 = vmatpush3.bf16.msra.mxu0 %v7862_v25 }
 0x169   :  { %834 = vmatprep.subr.bf16.mxu1 %v7864_v26  ;;  %6460 = vmatprep.subr.bf16.mxu0 %v10410_v30 }
 0x16a   :  { %864 = vmatprep.mubr.bf16.mxu1 %v10411_v2  ;;  %6474 = vmatprep.mubr.msk.bf16.mxu0 %vm7753_vm2, %v10410_v30 }
 0x16c   :  { %835 = vmatpush1.bf16.msra.mxu1 %v7882_v36  ;;  %6461 = vmatpush3.bf16.msra.mxu0 %v7891_v43 }
 0x16d   :  { %836 = vmatprep.subr.bf16.mxu1 %v7889_v40  ;;  %6462 = vmatprep.subr.bf16.mxu0 %v10410_v30 }
 0x170   :  { %837 = vmatpush1.bf16.msra.mxu1 %v7905_v49  ;;  %6463 = vmatpush3.bf16.msra.mxu0 %v7914_v58 }
 0x171   :  { %838 = vmatprep.subr.bf16.mxu1 %v7909_v51  ;;  %6464 = vmatprep.subr.bf16.mxu0 %v10410_v30 }
 0x174   :  { %839 = vmatpush1.bf16.msra.mxu1 %v7923_v60  ;;  %6465 = vmatpush3.bf16.msra.mxu0 %v7944_v9 }
 0x175   :  { %840 = vmatprep.subr.bf16.mxu1 %v7932_v1  ;;  %6466 = vmatprep.subr.bf16.mxu0 %v10410_v30 }
 0x178   :  { %841 = vmatpush1.bf16.msra.mxu1 %v7947_v10  ;;  %6467 = vmatpush3.bf16.msra.mxu0 %v7959_v20 }
 0x179   :  { %842 = vmatprep.subr.bf16.mxu1 %v7950_v13  ;;  %6468 = vmatprep.subr.bf16.mxu0 %v10410_v30 }
 0x17c   :  { %843 = vmatpush1.bf16.msra.mxu1 %v7962_v22  ;;  %6469 = vmatpush3.bf16.msra.mxu0 %v7985_v42 }
 0x17d   :  { %844 = vmatprep.subr.bf16.mxu1 %v7974_v27  ;;  %6470 = vmatprep.subr.bf16.mxu0 %v10410_v30 }
 0x180   :  { %845 = vmatpush1.bf16.msra.mxu1 %v7979_v37  ;;  %6471 = vmatpush3.bf16.msra.mxu0 %v7997_v47 }
 0x181   :  { %846 = vmatprep.subr.bf16.mxu1 %v7983_v38  ;;  %6472 = vmatprep.subr.bf16.mxu0 %v10410_v30 }
 0x184   :  { %847 = vmatpush1.bf16.msra.mxu1 %v7991_v46  ;;  %6473 = vmatpush3.bf16.msra.mxu0 %v8003_v52 }
 0x185   :  { %985 = vmatprep.subr.bf16.mxu1 %v7856_v17  ;;  %6478 = vmatprep.subr.bf16.mxu0 %v10410_v30 }
 0x227   :  { %v713_v11 = vpop.f32.mrf.mxu1  ;;  %v756_v54 = vpop.f32.mrf.mxu0 }
 0x228   :  { %v772_v14 = vadd.f32 %v713_v11, %v8087_v19 }
 0x229   :  { %v715_v53 = vpop.f32.mrf.mxu1  ;;  %v6456_v55 = vpop.f32.mrf.mxu0 }
 0x22a   :  { %v5827_v32 = vmul.f32 -1.442695, %v772_v14  ;;  %v786_v35 = vadd.f32 %v715_v53, %v8093_v29  ;;  %v800_v53 = vadd.f32 %v8202_v15, %v756_v54 }
 0x22b   :  { %v717_v44 = vpop.f32.mrf.mxu1  ;;  %v759_v7 = vpop.f32.mrf.mxu0 }
 0x22c   :  { %7156 = vpow2.f32 %v5827_v32  ;;  %v773_v3 = vadd.f32 %v717_v44, %v8099_v34  ;;  %v5829_v12 = vmul.f32 -1.442695, %v786_v35 }
 0x22d   :  { %v6457_v0 = vpop.f32.mrf.mxu0  ;;  %v719_v4 = vpop.f32.mrf.mxu1 }
 0x22e   :  { %v5828_v50 = vmul.f32 -1.442695, %v773_v3  ;;  %v787_v62 = vadd.f32 %v719_v4, %v236_v61 }
 0x230   :  { %7158 = vpow2.f32 %v5828_v50  ;;  %v5830_v19 = vmul.f32 -1.442695, %v787_v62  ;;  %v801_v50 = vadd.f32 %v8202_v15, %v759_v7 }
 0x231   :  { %7160 = vpow2.f32 %v5829_v12 }
 0x232   :  { %7162 = vpow2.f32 %v5830_v19 }
 0x239   :  { %v7157_v11 = vpop.eup %7156 }
 0x23a   :  { %v780_v14 = vadd.f32 1.0, %v7157_v11 }
 0x23c   :  { %7164 = vrcp.f32 %v780_v14 }
 0x23d   :  { %v7159_v55 = vpop.eup %7158 }
 0x23e   :  { %v781_v32 = vadd.f32 1.0, %v7159_v55  ;;  %v7161_v34 = vpop.eup %7160 }
 0x23f   :  { %v7163_v44 = vpop.eup %7162  ;;  %v794_v29 = vadd.f32 1.0, %v7161_v34 }
 0x240   :  { %7166 = vrcp.f32 %v781_v32  ;;  %v795_v0 = vadd.f32 1.0, %v7163_v44 }
 0x241   :  { %7168 = vrcp.f32 %v794_v29 }
 0x242   :  { %7170 = vrcp.f32 %v795_v0 }
 0x249   :  { %v7165_v3 = vpop.eup %7164 }
 0x24a   :  { %v802_v39 = vmul.f32 %v7165_v3, %v800_v53 }
 0x24c   :  { %v804_v35 = vadd.f32 %v802_v39, %v8063_v63 }
 0x24d   :  { %v7167_v4 = vpop.eup %7166 }
 0x24e   :  { %7172 = vtanh.f32 %v804_v35  ;;  %v803_v61 = vmul.f32 %v7167_v4, %v801_v50  ;;  %v7169_v12 = vpop.eup %7168 }
 0x24f   :  { %v7171_v19 = vpop.eup %7170  ;;  %v808_v11 = vsub.f32 1.0, %v7169_v12  ;;  %v812_v55 = vmul.f32 %v7169_v12, %v8210_v24 }
 0x250   :  { %v805_v62 = vadd.f32 %v803_v61, %v8074_v8  ;;  %v809_v32 = vsub.f32 1.0, %v7171_v19  ;;  %v813_v7 = vmul.f32 %v7171_v19, %v8212_v5 }
 0x252   :  { %7174 = vtanh.f32 %v805_v62 }
 0x25b   :  { %v7173_v14 = vpop.eup %7172 }
 0x25c   :  { %v810_v54 = vmul.f32 %v7173_v14, %v808_v11  ;;  %v246_v11 = vadd.f32 %v8126_v28, %v8084_v18 }
 0x25e   :  { %v8261_v34 = vadd.f32 %v812_v55, %v810_v54 }
 0x25f   :  { %v7175_v63 = vpop.eup %7174 }
 0x260   :  { %v811_v44 = vmul.f32 %v7175_v63, %v809_v32 }
 0x262   :  { %v8264_v29 = vadd.f32 %v813_v7, %v811_v44 }
 0x264   :  { %v6008_v8 = vpack.c.bf16 %v8264_v29, %v8261_v34 }
 0x266   :  { %6009 = vst [vmem:[#allocation2 + $0x8] sm:$0xff] %v6008_v8   ;;  %865 = vmatmul.mubr.bf16.vlgmr.msra.gmra.mxu1 %v6008_v8  ;;  %6475 = vmatmul.mubr.bf16.vlgmr.msra.gmra.mxu0 %v6008_v8 }
 0x267   :  { %986 = vmatpush1.bf16.msra.mxu1 %v7858_v21  ;;  %6479 = vmatpush3.bf16.msra.mxu0 %v7862_v25 }
 0x268   :  { %987 = vmatprep.subr.bf16.mxu1 %v7864_v26  ;;  %6480 = vmatprep.subr.bf16.mxu0 %v10410_v30 }
 0x269   :  { %1017 = vmatprep.mubr.bf16.mxu1 %v10411_v2  ;;  %6494 = vmatprep.mubr.msk.bf16.mxu0 %vm7753_vm2, %v10410_v30 }
 0x26b   :  { %988 = vmatpush1.bf16.msra.mxu1 %v7882_v36  ;;  %6481 = vmatpush3.bf16.msra.mxu0 %v7891_v43 }
 0x26c   :  { %989 = vmatprep.subr.bf16.mxu1 %v7889_v40  ;;  %6482 = vmatprep.subr.bf16.mxu0 %v10410_v30 }
 0x26f   :  { %990 = vmatpush1.bf16.msra.mxu1 %v7905_v49  ;;  %6483 = vmatpush3.bf16.msra.mxu0 %v7914_v58 }
 0x270   :  { %991 = vmatprep.subr.bf16.mxu1 %v7909_v51  ;;  %6484 = vmatprep.subr.bf16.mxu0 %v10410_v30 }
 0x273   :  { %992 = vmatpush1.bf16.msra.mxu1 %v7923_v60  ;;  %6485 = vmatpush3.bf16.msra.mxu0 %v7944_v9 }
 0x274   :  { %993 = vmatprep.subr.bf16.mxu1 %v7932_v1  ;;  %6486 = vmatprep.subr.bf16.mxu0 %v10410_v30 }
 0x277   :  { %994 = vmatpush1.bf16.msra.mxu1 %v7947_v10  ;;  %6487 = vmatpush3.bf16.msra.mxu0 %v7959_v20 }
 0x278   :  { %995 = vmatprep.subr.bf16.mxu1 %v7950_v13  ;;  %6488 = vmatprep.subr.bf16.mxu0 %v10410_v30 }
 0x27b   :  { %996 = vmatpush1.bf16.msra.mxu1 %v7962_v22  ;;  %6489 = vmatpush3.bf16.msra.mxu0 %v7985_v42 }
 0x27c   :  { %997 = vmatprep.subr.bf16.mxu1 %v7974_v27  ;;  %6490 = vmatprep.subr.bf16.mxu0 %v10410_v30 }
 0x27f   :  { %998 = vmatpush1.bf16.msra.mxu1 %v7979_v37  ;;  %6491 = vmatpush3.bf16.msra.mxu0 %v7997_v47 }
 0x280   :  { %999 = vmatprep.subr.bf16.mxu1 %v7983_v38  ;;  %6492 = vmatprep.subr.bf16.mxu0 %v10410_v30 }
 0x283   :  { %1000 = vmatpush1.bf16.msra.mxu1 %v7991_v46  ;;  %6493 = vmatpush3.bf16.msra.mxu0 %v8003_v52 }
 0x284   :  { %1138 = vmatprep.subr.bf16.mxu1 %v7856_v17  ;;  %6498 = vmatprep.subr.bf16.mxu0 %v10410_v30 }
 0x326   :  { %v866_v24 = vpop.f32.mrf.mxu1  ;;  %v909_v5 = vpop.f32.mrf.mxu0 }
 0x327   :  { %v925_v53 = vadd.f32 %v866_v24, %v8109_v48  ;;  %v953_v8 = vadd.f32 %v8202_v15, %v909_v5 }
 0x328   :  { %v868_v3 = vpop.f32.mrf.mxu1  ;;  %v6476_v0 = vpop.f32.mrf.mxu0 }
 0x329   :  { %v5833_v39 = vmul.f32 -1.442695, %v925_v53  ;;  %v939_v62 = vadd.f32 %v868_v3, %v8115_v57 }
 0x32a   :  { %v870_v35 = vpop.f32.mrf.mxu1  ;;  %v912_v50 = vpop.f32.mrf.mxu0 }
 0x32b   :  { %7176 = vpow2.f32 %v5833_v39  ;;  %v926_v4 = vadd.f32 %v870_v35, %v8121_v16  ;;  %v5835_v54 = vmul.f32 -1.442695, %v939_v62  ;;  %v954_v0 = vadd.f32 %v8202_v15, %v912_v50 }
 0x32c   :  { %v6477_v61 = vpop.f32.mrf.mxu0  ;;  %v872_v19 = vpop.f32.mrf.mxu1  ;;  %v352_v35 = vadd.f32 %v8106_v41, %v8060_v59 }
 0x32d   :  { %v5834_v12 = vmul.f32 -1.442695, %v926_v4  ;;  %v940_v14 = vadd.f32 %v872_v19, %v246_v11 }
 0x32f   :  { %7178 = vpow2.f32 %v5834_v12  ;;  %v5836_v48 = vmul.f32 -1.442695, %v940_v14 }
 0x330   :  { %7180 = vpow2.f32 %v5835_v54 }
 0x331   :  { %7182 = vpow2.f32 %v5836_v48 }
 0x338   :  { %v7177_v55 = vpop.eup %7176 }
 0x339   :  { %v933_v32 = vadd.f32 1.0, %v7177_v55 }
 0x33b   :  { %7184 = vrcp.f32 %v933_v32 }
 0x33c   :  { %v7179_v63 = vpop.eup %7178 }
 0x33d   :  { %v934_v44 = vadd.f32 1.0, %v7179_v63  ;;  %v7181_v16 = vpop.eup %7180 }
 0x33e   :  { %v7183_v7 = vpop.eup %7182  ;;  %v947_v57 = vadd.f32 1.0, %v7181_v16 }
 0x33f   :  { %7186 = vrcp.f32 %v934_v44  ;;  %v948_v53 = vadd.f32 1.0, %v7183_v7 }
 0x340   :  { %7188 = vrcp.f32 %v947_v57 }
 0x341   :  { %7190 = vrcp.f32 %v948_v53 }
 0x348   :  { %v7185_v24 = vpop.eup %7184 }
 0x349   :  { %v955_v28 = vmul.f32 %v7185_v24, %v953_v8 }
 0x34b   :  { %v957_v3 = vadd.f32 %v955_v28, %v8096_v31 }
 0x34c   :  { %v7187_v39 = vpop.eup %7186 }
 0x34d   :  { %7192 = vtanh.f32 %v957_v3  ;;  %v956_v4 = vmul.f32 %v7187_v39, %v954_v0  ;;  %v7189_v62 = vpop.eup %7188  ;;  %v256_v39 = vadd.f32 %v8148_v33, %v8084_v18 }
 0x34e   :  { %v7191_v12 = vpop.eup %7190  ;;  %v961_v5 = vsub.f32 1.0, %v7189_v62  ;;  %v965_v14 = vmul.f32 %v7189_v62, %v8261_v34 }
 0x34f   :  { %v958_v61 = vadd.f32 %v956_v4, %v352_v35  ;;  %v962_v54 = vsub.f32 1.0, %v7191_v12  ;;  %v966_v55 = vmul.f32 %v7191_v12, %v8264_v29 }
 0x351   :  { %7194 = vtanh.f32 %v958_v61 }
 0x35a   :  { %v7193_v19 = vpop.eup %7192 }
 0x35b   :  { %v963_v11 = vmul.f32 %v7193_v19, %v961_v5 }
 0x35d   :  { %v8314_v31 = vadd.f32 %v965_v14, %v963_v11 }
 0x35e   :  { %v7195_v50 = vpop.eup %7194 }
 0x35f   :  { %v964_v48 = vmul.f32 %v7195_v50, %v962_v54 }
 0x361   :  { %v8317_v32 = vadd.f32 %v966_v55, %v964_v48 }
 0x363   :  { %v6013_v41 = vpack.c.bf16 %v8317_v32, %v8314_v31 }
 0x365   :  { %6014 = vst [vmem:[#allocation2 + $0x10] sm:$0xff] %v6013_v41   ;;  %1018 = vmatmul.mubr.bf16.vlgmr.msra.gmra.mxu1 %v6013_v41  ;;  %6495 = vmatmul.mubr.bf16.vlgmr.msra.gmra.mxu0 %v6013_v41 }
 0x366   :  { %1139 = vmatpush1.bf16.msra.mxu1 %v7858_v21  ;;  %6499 = vmatpush3.bf16.msra.mxu0 %v7862_v25 }
 0x367   :  { %1140 = vmatprep.subr.bf16.mxu1 %v7864_v26  ;;  %6500 = vmatprep.subr.bf16.mxu0 %v10410_v30 }
 0x368   :  { %1170 = vmatprep.mubr.bf16.mxu1 %v10411_v2  ;;  %6514 = vmatprep.mubr.msk.bf16.mxu0 %vm7753_vm2, %v10410_v30 }
 0x36a   :  { %1141 = vmatpush1.bf16.msra.mxu1 %v7882_v36  ;;  %6501 = vmatpush3.bf16.msra.mxu0 %v7891_v43 }
 0x36b   :  { %1142 = vmatprep.subr.bf16.mxu1 %v7889_v40  ;;  %6502 = vmatprep.subr.bf16.mxu0 %v10410_v30 }
 0x36e   :  { %1143 = vmatpush1.bf16.msra.mxu1 %v7905_v49  ;;  %6503 = vmatpush3.bf16.msra.mxu0 %v7914_v58 }
 0x36f   :  { %1144 = vmatprep.subr.bf16.mxu1 %v7909_v51  ;;  %6504 = vmatprep.subr.bf16.mxu0 %v10410_v30 }
 0x372   :  { %1145 = vmatpush1.bf16.msra.mxu1 %v7923_v60  ;;  %6505 = vmatpush3.bf16.msra.mxu0 %v7944_v9 }
 0x373   :  { %1146 = vmatprep.subr.bf16.mxu1 %v7932_v1  ;;  %6506 = vmatprep.subr.bf16.mxu0 %v10410_v30 }
 0x376   :  { %1147 = vmatpush1.bf16.msra.mxu1 %v7947_v10  ;;  %6507 = vmatpush3.bf16.msra.mxu0 %v7959_v20 }
 0x377   :  { %1148 = vmatprep.subr.bf16.mxu1 %v7950_v13  ;;  %6508 = vmatprep.subr.bf16.mxu0 %v10410_v30 }
 0x37a   :  { %1149 = vmatpush1.bf16.msra.mxu1 %v7962_v22  ;;  %6509 = vmatpush3.bf16.msra.mxu0 %v7985_v42 }
 0x37b   :  { %1150 = vmatprep.subr.bf16.mxu1 %v7974_v27  ;;  %6510 = vmatprep.subr.bf16.mxu0 %v10410_v30 }
 0x37e   :  { %1151 = vmatpush1.bf16.msra.mxu1 %v7979_v37  ;;  %6511 = vmatpush3.bf16.msra.mxu0 %v7997_v47 }
 0x37f   :  { %1152 = vmatprep.subr.bf16.mxu1 %v7983_v38  ;;  %6512 = vmatprep.subr.bf16.mxu0 %v10410_v30 }
 0x382   :  { %1153 = vmatpush1.bf16.msra.mxu1 %v7991_v46  ;;  %6513 = vmatpush3.bf16.msra.mxu0 %v8003_v52 }
 0x383   :  { %1291 = vmatprep.subr.bf16.mxu1 %v7856_v17  ;;  %6518 = vmatprep.subr.bf16.mxu0 %v10410_v30 }
 0x425   :  { %v1019_v34 = vpop.f32.mrf.mxu1  ;;  %v1062_v29 = vpop.f32.mrf.mxu0 }
 0x426   :  { %v1078_v63 = vadd.f32 %v1019_v34, %v8131_v45  ;;  %v1106_v11 = vadd.f32 %v8202_v15, %v1062_v29  ;;  %v10412_v34 = vld [vmem:[#allocation19_spill] sm:$0xff] }
 0x427   :  { %v1021_v44 = vpop.f32.mrf.mxu1  ;;  %v6496_v16 = vpop.f32.mrf.mxu0 }
 0x428   :  { %v5839_v7 = vmul.f32 -1.442695, %v1078_v63  ;;  %v1092_v28 = vadd.f32 %v1021_v44, %v8137_v6 }
 0x429   :  { %v1023_v57 = vpop.f32.mrf.mxu1  ;;  %v1065_v8 = vpop.f32.mrf.mxu0 }
 0x42a   :  { %7196 = vpow2.f32 %v5839_v7  ;;  %v1079_v24 = vadd.f32 %v1023_v57, %v8143_v56  ;;  %v5841_v4 = vmul.f32 -1.442695, %v1092_v28  ;;  %v1107_v48 = vadd.f32 %v8202_v15, %v1065_v8 }
 0x42b   :  { %v6497_v53 = vpop.f32.mrf.mxu0  ;;  %v1025_v0 = vpop.f32.mrf.mxu1 }
 0x42c   :  { %v5840_v3 = vmul.f32 -1.442695, %v1079_v24  ;;  %v1093_v35 = vadd.f32 %v1025_v0, %v256_v39 }
 0x42e   :  { %7198 = vpow2.f32 %v5840_v3  ;;  %v5842_v45 = vmul.f32 -1.442695, %v1093_v35  ;;  %v10413_v35 = vld [vmem:[#allocation28_spill] sm:$0xff] }
 0x42f   :  { %7200 = vpow2.f32 %v5841_v4 }
 0x430   :  { %7202 = vpow2.f32 %v5842_v45 }
 0x437   :  { %v7197_v61 = vpop.eup %7196 }
 0x438   :  { %v1086_v62 = vadd.f32 1.0, %v7197_v61 }
 0x43a   :  { %7204 = vrcp.f32 %v1086_v62 }
 0x43b   :  { %v7199_v12 = vpop.eup %7198 }
 0x43c   :  { %v1087_v5 = vadd.f32 1.0, %v7199_v12  ;;  %v7201_v56 = vpop.eup %7200 }
 0x43d   :  { %v7203_v19 = vpop.eup %7202  ;;  %v1100_v6 = vadd.f32 1.0, %v7201_v56  ;;  %v10414_v56 = vld [vmem:[#allocation30_spill] sm:$0xff] }
 0x43e   :  { %7206 = vrcp.f32 %v1087_v5  ;;  %v1101_v54 = vadd.f32 1.0, %v7203_v19 }
 0x43f   :  { %7208 = vrcp.f32 %v1100_v6 }
 0x440   :  { %7210 = vrcp.f32 %v1101_v54 }
 0x447   :  { %v7205_v14 = vpop.eup %7204 }
 0x448   :  { %v1108_v33 = vmul.f32 %v7205_v14, %v1106_v11  ;;  %v10415_v11 = vld [vmem:[#allocation29_spill] sm:$0xff] }
 0x44a   :  { %v1110_v50 = vadd.f32 %v1108_v33, %v8090_v23 }
 0x44b   :  { %v7207_v55 = vpop.eup %7206 }
 0x44c   :  { %7212 = vtanh.f32 %v1110_v50  ;;  %v1109_v41 = vmul.f32 %v7207_v55, %v1107_v48  ;;  %v7209_v44 = vpop.eup %7208  ;;  %v10416_v50 = vld [vmem:[#allocation31_spill] sm:$0xff] }
 0x44d   :  { %v7211_v16 = vpop.eup %7210  ;;  %v1114_v7 = vsub.f32 1.0, %v7209_v44  ;;  %v1118_v24 = vmul.f32 %v7209_v44, %v8314_v31  ;;  %v266_v48 = vadd.f32 %v10416_v50, %v8084_v18 }
 0x44e   :  { %v1111_v63 = vadd.f32 %v1109_v41, %v10412_v34  ;;  %v1115_v53 = vsub.f32 1.0, %v7211_v16  ;;  %v1119_v8 = vmul.f32 %v7211_v16, %v8317_v32 }
 0x450   :  { %7214 = vtanh.f32 %v1111_v63 }
 0x459   :  { %v7213_v57 = vpop.eup %7212 }
 0x45a   :  { %v1116_v29 = vmul.f32 %v7213_v57, %v1114_v7 }
 0x45c   :  { %v8366_v28 = vadd.f32 %v1118_v24, %v1116_v29 }
 0x45d   :  { %v7215_v23 = vpop.eup %7214 }
 0x45e   :  { %v1117_v3 = vmul.f32 %v7215_v23, %v1115_v53 }
 0x460   :  { %v8369_v0 = vadd.f32 %v1119_v8, %v1117_v3 }
 0x462   :  { %v6018_v39 = vpack.c.bf16 %v8369_v0, %v8366_v28 }
 0x464   :  { %6019 = vst [vmem:[#allocation2 + $0x18] sm:$0xff] %v6018_v39   ;;  %1171 = vmatmul.mubr.bf16.vlgmr.msra.gmra.mxu1 %v6018_v39  ;;  %6515 = vmatmul.mubr.bf16.vlgmr.msra.gmra.mxu0 %v6018_v39  ;;  %v10417_v39 = vld [vmem:[#allocation21_spill] sm:$0xff] }
 0x465   :  { %1292 = vmatpush1.bf16.msra.mxu1 %v7858_v21  ;;  %6519 = vmatpush3.bf16.msra.mxu0 %v7862_v25 }
 0x466   :  { %1293 = vmatprep.subr.bf16.mxu1 %v7864_v26  ;;  %6520 = vmatprep.subr.bf16.mxu0 %v10410_v30 }
 0x467   :  { %1323 = vmatprep.mubr.bf16.mxu1 %v10411_v2  ;;  %6534 = vmatprep.mubr.msk.bf16.mxu0 %vm7753_vm2, %v10410_v30 }
 0x469   :  { %1294 = vmatpush1.bf16.msra.mxu1 %v7882_v36  ;;  %6521 = vmatpush3.bf16.msra.mxu0 %v7891_v43 }
 0x46a   :  { %1295 = vmatprep.subr.bf16.mxu1 %v7889_v40  ;;  %6522 = vmatprep.subr.bf16.mxu0 %v10410_v30 }
 0x46d   :  { %1296 = vmatpush1.bf16.msra.mxu1 %v7905_v49  ;;  %6523 = vmatpush3.bf16.msra.mxu0 %v7914_v58 }
 0x46e   :  { %1297 = vmatprep.subr.bf16.mxu1 %v7909_v51  ;;  %6524 = vmatprep.subr.bf16.mxu0 %v10410_v30 }
 0x471   :  { %1298 = vmatpush1.bf16.msra.mxu1 %v7923_v60  ;;  %6525 = vmatpush3.bf16.msra.mxu0 %v7944_v9 }
 0x472   :  { %1299 = vmatprep.subr.bf16.mxu1 %v7932_v1  ;;  %6526 = vmatprep.subr.bf16.mxu0 %v10410_v30 }
 0x475   :  { %1300 = vmatpush1.bf16.msra.mxu1 %v7947_v10  ;;  %6527 = vmatpush3.bf16.msra.mxu0 %v7959_v20 }
 0x476   :  { %1301 = vmatprep.subr.bf16.mxu1 %v7950_v13  ;;  %6528 = vmatprep.subr.bf16.mxu0 %v10410_v30 }
 0x479   :  { %1302 = vmatpush1.bf16.msra.mxu1 %v7962_v22  ;;  %6529 = vmatpush3.bf16.msra.mxu0 %v7985_v42 }
 0x47a   :  { %1303 = vmatprep.subr.bf16.mxu1 %v7974_v27  ;;  %6530 = vmatprep.subr.bf16.mxu0 %v10410_v30 }
 0x47d   :  { %1304 = vmatpush1.bf16.msra.mxu1 %v7979_v37  ;;  %6531 = vmatpush3.bf16.msra.mxu0 %v7997_v47 }
 0x47e   :  { %1305 = vmatprep.subr.bf16.mxu1 %v7983_v38  ;;  %6532 = vmatprep.subr.bf16.mxu0 %v10410_v30 }
 0x481   :  { %1306 = vmatpush1.bf16.msra.mxu1 %v7991_v46  ;;  %6533 = vmatpush3.bf16.msra.mxu0 %v8003_v52 }
 0x482   :  { %1444 = vmatprep.subr.bf16.mxu1 %v7856_v17  ;;  %6538 = vmatprep.subr.bf16.mxu0 %v10410_v30 }
 0x524   :  { %v1172_v31 = vpop.f32.mrf.mxu1  ;;  %v1215_v32 = vpop.f32.mrf.mxu0 }
 0x525   :  { %v1231_v4 = vadd.f32 %v1172_v31, %v10413_v35  ;;  %v1259_v53 = vadd.f32 %v8202_v15, %v1215_v32 }
 0x526   :  { %v1174_v45 = vpop.f32.mrf.mxu1  ;;  %v6516_v61 = vpop.f32.mrf.mxu0 }
 0x527   :  { %v5845_v62 = vmul.f32 -1.442695, %v1231_v4  ;;  %v1245_v14 = vadd.f32 %v1174_v45, %v10415_v11  ;;  %v10418_v45 = vld [vmem:[#allocation23_spill] sm:$0xff] }
 0x528   :  { %v1176_v12 = vpop.f32.mrf.mxu1  ;;  %v1218_v5 = vpop.f32.mrf.mxu0  ;;  %v368_v61 = vadd.f32 %v10418_v45, %v8060_v59 }
 0x529   :  { %7216 = vpow2.f32 %v5845_v62  ;;  %v1232_v19 = vadd.f32 %v1176_v12, %v10414_v56  ;;  %v5847_v41 = vmul.f32 -1.442695, %v1245_v14  ;;  %v1260_v35 = vadd.f32 %v8202_v15, %v1218_v5 }
 0x52a   :  { %v6517_v6 = vpop.f32.mrf.mxu0  ;;  %v1178_v33 = vpop.f32.mrf.mxu1 }
 0x52b   :  { %v5846_v54 = vmul.f32 -1.442695, %v1232_v19  ;;  %v1246_v55 = vadd.f32 %v1178_v33, %v266_v48 }
 0x52d   :  { %7218 = vpow2.f32 %v5846_v54  ;;  %v5848_v34 = vmul.f32 -1.442695, %v1246_v55 }
 0x52e   :  { %7220 = vpow2.f32 %v5847_v41 }
 0x52f   :  { %7222 = vpow2.f32 %v5848_v34  ;;  %v10419_v34 = vld [vmem:[#allocation32_spill] sm:$0xff] }
 0x536   :  { %v7217_v63 = vpop.eup %7216 }
 0x537   :  { %v1239_v44 = vadd.f32 1.0, %v7217_v63 }
 0x539   :  { %7224 = vrcp.f32 %v1239_v44 }
 0x53a   :  { %v7219_v16 = vpop.eup %7218 }
 0x53b   :  { %v1240_v7 = vadd.f32 1.0, %v7219_v16  ;;  %v7221_v57 = vpop.eup %7220 }
 0x53c   :  { %v7223_v29 = vpop.eup %7222  ;;  %v1253_v24 = vadd.f32 1.0, %v7221_v57 }
 0x53d   :  { %7226 = vrcp.f32 %v1240_v7  ;;  %v1254_v3 = vadd.f32 1.0, %v7223_v29 }
 0x53e   :  { %7228 = vrcp.f32 %v1253_v24  ;;  %v10420_v24 = vld [vmem:[#allocation34_spill] sm:$0xff] }
 0x53f   :  { %7230 = vrcp.f32 %v1254_v3  ;;  %v10421_v3 = vld [vmem:[#allocation33_spill] sm:$0xff] }
 0x546   :  { %v7225_v23 = vpop.eup %7224 }
 0x547   :  { %v1261_v8 = vmul.f32 %v7225_v23, %v1259_v53 }
 0x549   :  { %v1263_v31 = vadd.f32 %v1261_v8, %v10417_v39 }
 0x54a   :  { %v7227_v4 = vpop.eup %7226 }
 0x54b   :  { %7232 = vtanh.f32 %v1263_v31  ;;  %v1262_v62 = vmul.f32 %v7227_v4, %v1260_v35  ;;  %v7229_v56 = vpop.eup %7228 }
 0x54c   :  { %v7231_v19 = vpop.eup %7230  ;;  %v1267_v32 = vsub.f32 1.0, %v7229_v56  ;;  %v1271_v14 = vmul.f32 %v7229_v56, %v8366_v28 }
 0x54d   :  { %v1264_v12 = vadd.f32 %v1262_v62, %v368_v61  ;;  %v1268_v54 = vsub.f32 1.0, %v7231_v19  ;;  %v1272_v48 = vmul.f32 %v7231_v19, %v8369_v0 }
 0x54f   :  { %7234 = vtanh.f32 %v1264_v12 }
 0x558   :  { %v7233_v6 = vpop.eup %7232 }
 0x559   :  { %v1269_v11 = vmul.f32 %v7233_v6, %v1267_v32 }
 0x55b   :  { %v8419_v33 = vadd.f32 %v1271_v14, %v1269_v11 }
 0x55c   :  { %v7235_v5 = vpop.eup %7234 }
 0x55d   :  { %v1270_v50 = vmul.f32 %v7235_v5, %v1268_v54 }
 0x55f   :  { %v8422_v55 = vadd.f32 %v1272_v48, %v1270_v50  ;;  %v10423_v48 = vld [vmem:[#allocation20_spill] sm:$0xff] }
 0x561   :  { %v6023_v41 = vpack.c.bf16 %v8422_v55, %v8419_v33 }
 0x563   :  { %6024 = vst [vmem:[#allocation2 + $0x20] sm:$0xff] %v6023_v41   ;;  %1324 = vmatmul.mubr.bf16.vlgmr.msra.gmra.mxu1 %v6023_v41  ;;  %6535 = vmatmul.mubr.bf16.vlgmr.msra.gmra.mxu0 %v6023_v41 }
 0x564   :  { %1445 = vmatpush1.bf16.msra.mxu1 %v7858_v21  ;;  %6539 = vmatpush3.bf16.msra.mxu0 %v7862_v25 }
 0x565   :  { %1446 = vmatprep.subr.bf16.mxu1 %v7864_v26  ;;  %6540 = vmatprep.subr.bf16.mxu0 %v10410_v30 }
 0x566   :  { %1476 = vmatprep.mubr.bf16.mxu1 %v10411_v2  ;;  %6554 = vmatprep.mubr.msk.bf16.mxu0 %vm7753_vm2, %v10410_v30 }
 0x568   :  { %1447 = vmatpush1.bf16.msra.mxu1 %v7882_v36  ;;  %6541 = vmatpush3.bf16.msra.mxu0 %v7891_v43 }
 0x569   :  { %1448 = vmatprep.subr.bf16.mxu1 %v7889_v40  ;;  %6542 = vmatprep.subr.bf16.mxu0 %v10410_v30 }
 0x56c   :  { %1449 = vmatpush1.bf16.msra.mxu1 %v7905_v49  ;;  %6543 = vmatpush3.bf16.msra.mxu0 %v7914_v58 }
 0x56d   :  { %1450 = vmatprep.subr.bf16.mxu1 %v7909_v51  ;;  %6544 = vmatprep.subr.bf16.mxu0 %v10410_v30 }
 0x570   :  { %1451 = vmatpush1.bf16.msra.mxu1 %v7923_v60  ;;  %6545 = vmatpush3.bf16.msra.mxu0 %v7944_v9 }
 0x571   :  { %1452 = vmatprep.subr.bf16.mxu1 %v7932_v1  ;;  %6546 = vmatprep.subr.bf16.mxu0 %v10410_v30 }
 0x574   :  { %1453 = vmatpush1.bf16.msra.mxu1 %v7947_v10  ;;  %6547 = vmatpush3.bf16.msra.mxu0 %v7959_v20 }
 0x575   :  { %1454 = vmatprep.subr.bf16.mxu1 %v7950_v13  ;;  %6548 = vmatprep.subr.bf16.mxu0 %v10410_v30 }
 0x578   :  { %1455 = vmatpush1.bf16.msra.mxu1 %v7962_v22  ;;  %6549 = vmatpush3.bf16.msra.mxu0 %v7985_v42 }
 0x579   :  { %1456 = vmatprep.subr.bf16.mxu1 %v7974_v27  ;;  %6550 = vmatprep.subr.bf16.mxu0 %v10410_v30 }
 0x57c   :  { %1457 = vmatpush1.bf16.msra.mxu1 %v7979_v37  ;;  %6551 = vmatpush3.bf16.msra.mxu0 %v7997_v47 }
 0x57d   :  { %1458 = vmatprep.subr.bf16.mxu1 %v7983_v38  ;;  %6552 = vmatprep.subr.bf16.mxu0 %v10410_v30 }
 0x580   :  { %1459 = vmatpush1.bf16.msra.mxu1 %v7991_v46  ;;  %6553 = vmatpush3.bf16.msra.mxu0 %v8003_v52 }
 0x581   :  { %1597 = vmatprep.subr.bf16.mxu1 %v7856_v17  ;;  %6558 = vmatprep.subr.bf16.mxu0 %v10410_v30  ;;  %v10422_v17 = vld [vmem:[#allocation35_spill] sm:$0xff] }
 0x582   :  { %v276_v35 = vadd.f32 %v10422_v17, %v8084_v18 }
 0x623   :  { %v1325_v28 = vpop.f32.mrf.mxu1  ;;  %v1368_v0 = vpop.f32.mrf.mxu0 }
 0x624   :  { %v1384_v63 = vadd.f32 %v1325_v28, %v10419_v34  ;;  %v1412_v14 = vadd.f32 %v8202_v15, %v1368_v0 }
 0x625   :  { %v1327_v44 = vpop.f32.mrf.mxu1  ;;  %v6536_v16 = vpop.f32.mrf.mxu0 }
 0x626   :  { %v5851_v7 = vmul.f32 -1.442695, %v1384_v63  ;;  %v1398_v8 = vadd.f32 %v1327_v44, %v10421_v3  ;;  %v10424_v44 = vld [vmem:[#allocation22_spill] sm:$0xff] }
 0x627   :  { %v1329_v57 = vpop.f32.mrf.mxu1  ;;  %v1371_v29 = vpop.f32.mrf.mxu0 }
 0x628   :  { %7236 = vpow2.f32 %v5851_v7  ;;  %v1385_v53 = vadd.f32 %v1329_v57, %v10420_v24  ;;  %v5853_v45 = vmul.f32 -1.442695, %v1398_v8  ;;  %v1413_v28 = vadd.f32 %v8202_v15, %v1371_v29 }
 0x629   :  { %v6537_v23 = vpop.f32.mrf.mxu0  ;;  %v1331_v31 = vpop.f32.mrf.mxu1 }
 0x62a   :  { %v5852_v39 = vmul.f32 -1.442695, %v1385_v53  ;;  %v1399_v4 = vadd.f32 %v1331_v31, %v276_v35 }
 0x62c   :  { %7238 = vpow2.f32 %v5852_v39  ;;  %v5854_v61 = vmul.f32 -1.442695, %v1399_v4 }
 0x62d   :  { %7240 = vpow2.f32 %v5853_v45 }
 0x62e   :  { %7242 = vpow2.f32 %v5854_v61 }
 0x635   :  { %v7237_v62 = vpop.eup %7236 }
 0x636   :  { %v1392_v12 = vadd.f32 1.0, %v7237_v62 }
 0x638   :  { %7244 = vrcp.f32 %v1392_v12 }
 0x639   :  { %v7239_v56 = vpop.eup %7238 }
 0x63a   :  { %v1393_v19 = vadd.f32 1.0, %v7239_v56  ;;  %v7241_v32 = vpop.eup %7240 }
 0x63b   :  { %v7243_v6 = vpop.eup %7242  ;;  %v1406_v11 = vadd.f32 1.0, %v7241_v32 }
 0x63c   :  { %7246 = vrcp.f32 %v1393_v19  ;;  %v1407_v5 = vadd.f32 1.0, %v7243_v6  ;;  %v8519_v6 = vld [vmem:[#allocation10] ss:$0 sm:$0xff] }
 0x63d   :  { %7248 = vrcp.f32 %v1406_v11 }
 0x63e   :  { %7250 = vrcp.f32 %v1407_v5 }
 0x645   :  { %v7245_v54 = vpop.eup %7244 }
 0x646   :  { %v1414_v50 = vmul.f32 %v7245_v54, %v1412_v14 }
 0x648   :  { %v1416_v41 = vadd.f32 %v1414_v50, %v10423_v48  ;;  %v10429_v50 = vld [vmem:[#allocation25_spill] sm:$0xff] }
 0x649   :  { %v7247_v34 = vpop.eup %7246 }
 0x64a   :  { %7252 = vtanh.f32 %v1416_v41  ;;  %v1415_v63 = vmul.f32 %v7247_v34, %v1413_v28  ;;  %v7249_v7 = vpop.eup %7248  ;;  %v10430_v34 = vld [vmem:[#allocation27_spill] sm:$0xff] }
 0x64b   :  { %v7251_v57 = vpop.eup %7250  ;;  %v1420_v24 = vsub.f32 1.0, %v7249_v7  ;;  %v1424_v23 = vmul.f32 %v7249_v7, %v8419_v33 }
 0x64c   :  { %v1417_v16 = vadd.f32 %v1415_v63, %v10424_v44  ;;  %v1421_v3 = vsub.f32 1.0, %v7251_v57  ;;  %v1425_v15 = vmul.f32 %v7251_v57, %v8422_v55  ;;  %v384_v63 = vadd.f32 %v10430_v34, %v8060_v59  ;;  %v1810_v59 = vld [vmem:[#allocation5 + $0x168] sm:$0xff] }
 0x64e   :  { %7254 = vtanh.f32 %v1417_v16 }
 0x657   :  { %v7253_v53 = vpop.eup %7252 }
 0x658   :  { %v1422_v0 = vmul.f32 %v7253_v53, %v1420_v24 }
 0x65a   :  { %v8471_v8 = vadd.f32 %v1424_v23, %v1422_v0 }
 0x65b   :  { %v7255_v39 = vpop.eup %7254 }
 0x65c   :  { %v1423_v31 = vmul.f32 %v7255_v39, %v1421_v3 }
 0x65e   :  { %v8474_v29 = vadd.f32 %v1425_v15, %v1423_v31 }
 0x660   :  { %v6028_v17 = vpack.c.bf16 %v8474_v29, %v8471_v8 }
 0x662   :  { %6029 = vst [vmem:[#allocation2 + $0x28] sm:$0xff] %v6028_v17   ;;  %1477 = vmatmul.mubr.bf16.vlgmr.msra.gmra.mxu1 %v6028_v17  ;;  %6555 = vmatmul.mubr.bf16.vlgmr.msra.gmra.mxu0 %v6028_v17 }
 0x663   :  { %1598 = vmatpush1.bf16.msra.mxu1 %v7858_v21  ;;  %6559 = vmatpush3.bf16.msra.mxu0 %v7862_v25  ;;  %v1808_v21 = vld [vmem:[#allocation5 + $0x158] sm:$0xff]  ;;  %v1811_v25 = vld [vmem:[#allocation5 + $0x170] sm:$0xff] }
 0x664   :  { %1599 = vmatprep.subr.bf16.mxu1 %v7864_v26  ;;  %6560 = vmatprep.subr.bf16.mxu0 %v10410_v30  ;;  %v1809_v26 = vld [vmem:[#allocation5 + $0x160] sm:$0xff] }
 0x665   :  { %1629 = vmatprep.mubr.bf16.mxu1 %v10411_v2  ;;  %6574 = vmatprep.mubr.msk.bf16.mxu0 %vm7753_vm2, %v10410_v30 }
 0x667   :  { %1600 = vmatpush1.bf16.msra.mxu1 %v7882_v36  ;;  %6561 = vmatpush3.bf16.msra.mxu0 %v7891_v43  ;;  %v1835_v36 = vpack.c.bf16 %v1811_v25, %v1808_v21  ;;  %v1807_v21 = vld [vmem:[#allocation5 + $0x150] sm:$0xff]  ;;  %v1802_v25 = vld [vmem:[#allocation5 + $0x128] sm:$0xff] }
 0x668   :  { %1601 = vmatprep.subr.bf16.mxu1 %v7889_v40  ;;  %6562 = vmatprep.subr.bf16.mxu0 %v10410_v30  ;;  %v1812_v40 = vld [vmem:[#allocation5 + $0x178] sm:$0xff] }
 0x669   :  { %v8511_v43 = vpack.c.bf16 %v1812_v40, %v1809_v26  ;;  %v1805_v26 = vld [vmem:[#allocation5 + $0x140] sm:$0xff]  ;;  %v1803_v40 = vld [vmem:[#allocation5 + $0x130] sm:$0xff] }
 0x66b   :  { %1602 = vmatpush1.bf16.msra.mxu1 %v7905_v49  ;;  %6563 = vmatpush3.bf16.msra.mxu0 %v7914_v58  ;;  %v10425_v58 = vld [vmem:[#allocation36_spill] sm:$0xff] }
 0x66c   :  { %1603 = vmatprep.subr.bf16.mxu1 %v7909_v51  ;;  %6564 = vmatprep.subr.bf16.mxu0 %v10410_v30 }
 0x66f   :  { %1604 = vmatpush1.bf16.msra.mxu1 %v7923_v60  ;;  %6565 = vmatpush3.bf16.msra.mxu0 %v7944_v9 }
 0x670   :  { %1605 = vmatprep.subr.bf16.mxu1 %v7932_v1  ;;  %6566 = vmatprep.subr.bf16.mxu0 %v10410_v30 }
 0x673   :  { %1606 = vmatpush1.bf16.msra.mxu1 %v7947_v10  ;;  %6567 = vmatpush3.bf16.msra.mxu0 %v7959_v20 }
 0x674   :  { %1607 = vmatprep.subr.bf16.mxu1 %v7950_v13  ;;  %6568 = vmatprep.subr.bf16.mxu0 %v10410_v30 }
 0x677   :  { %1608 = vmatpush1.bf16.msra.mxu1 %v7962_v22  ;;  %6569 = vmatpush3.bf16.msra.mxu0 %v7985_v42  ;;  %v10426_v22 = vld [vmem:[#allocation38_spill] sm:$0xff] }
 0x678   :  { %1609 = vmatprep.subr.bf16.mxu1 %v7974_v27  ;;  %6570 = vmatprep.subr.bf16.mxu0 %v10410_v30 }
 0x67b   :  { %1610 = vmatpush1.bf16.msra.mxu1 %v7979_v37  ;;  %6571 = vmatpush3.bf16.msra.mxu0 %v7997_v47 }
 0x67c   :  { %1611 = vmatprep.subr.bf16.mxu1 %v7983_v38  ;;  %6572 = vmatprep.subr.bf16.mxu0 %v10410_v30  ;;  %v10427_v38 = vld [vmem:[#allocation37_spill] sm:$0xff] }
 0x67f   :  { %1612 = vmatpush1.bf16.msra.mxu1 %v7991_v46  ;;  %6573 = vmatpush3.bf16.msra.mxu0 %v8003_v52  ;;  %v10428_v52 = vld [vmem:[#allocation39_spill] sm:$0xff] }
 0x680   :  { %1903 = vmatprep.subr.bf16.mxu1 %v1835_v36  ;;  %6578 = vmatprep.subr.bf16.mxu0 %v8511_v43  ;;  %v286_v33 = vadd.f32 %v10428_v52, %v8084_v18  ;;  %v1793_v52 = vld [vmem:[#allocation5 + $0xe0] sm:$0xff] }
 0x722   :  { %v1478_v49 = vpop.f32.mrf.mxu1  ;;  %v1521_v51 = vpop.f32.mrf.mxu0 }
 0x723   :  { %v1537_v60 = vadd.f32 %v1478_v49, %v10425_v58  ;;  %v1565_v11 = vadd.f32 %v8519_v6, %v1521_v51  ;;  %v1806_v49 = vld [vmem:[#allocation5 + $0x148] sm:$0xff]  ;;  %v1834_v51 = vpack.c.bf16 %v1810_v59, %v1807_v21  ;;  %v1769_v59 = vld [vmem:[#allocation5 + $0x20] sm:$0xff] }
 0x724   :  { %v1480_v1 = vpop.f32.mrf.mxu1  ;;  %v6556_v9 = vpop.f32.mrf.mxu0  ;;  %v1766_v21 = vld [vmem:[#allocation5 + $0x8] sm:$0xff] }
 0x725   :  { %v5857_v10 = vmul.f32 -1.442695, %v1537_v60  ;;  %v1551_v42 = vadd.f32 %v1480_v1, %v10427_v38  ;;  %v1801_v60 = vld [vmem:[#allocation5 + $0x120] sm:$0xff]  ;;  %v1804_v1 = vld [vmem:[#allocation5 + $0x138] sm:$0xff] }
 0x726   :  { %v1482_v13 = vpop.f32.mrf.mxu1  ;;  %v1524_v20 = vpop.f32.mrf.mxu0  ;;  %v1796_v9 = vld [vmem:[#allocation5 + $0xf8] sm:$0xff] }
 0x727   :  { %7256 = vpow2.f32 %v5857_v10  ;;  %v1538_v27 = vadd.f32 %v1482_v13, %v10426_v22  ;;  %v5859_v35 = vmul.f32 -1.442695, %v1551_v42  ;;  %v1566_v41 = vadd.f32 %v8519_v6, %v1524_v20  ;;  %v1799_v13 = vld [vmem:[#allocation5 + $0x110] sm:$0xff]  ;;  %v1797_v20 = vld [vmem:[#allocation5 + $0x100] sm:$0xff] }
 0x728   :  { %v6557_v37 = vpop.f32.mrf.mxu0  ;;  %v1484_v47 = vpop.f32.mrf.mxu1  ;;  %v1833_v10 = vpack.c.bf16 %v1806_v49, %v1803_v40  ;;  %v8534_v22 = vld [vmem:[#allocation2] sm:$0xff]   ;;  %v1795_v42 = vld [vmem:[#allocation5 + $0xf0] sm:$0xff]  ;;  %v1814_v49 = vpack.c.bf16 %v1769_v59, %v1766_v21  ;;  %v2177_v59 = vld [vmem:[#allocation7 + $0x1f8] sm:$0xff] }
 0x729   :  { %v5858_v46 = vmul.f32 -1.442695, %v1538_v27  ;;  %v1552_v55 = vadd.f32 %v1484_v47, %v286_v33  ;;  %v1831_v27 = vpack.c.bf16 %v1804_v1, %v1801_v60  ;;  %v1829_v37 = vpack.c.bf16 %v1799_v13, %v1796_v9  ;;  %v1790_v47 = vld [vmem:[#allocation5 + $0xc8] sm:$0xff]  ;;  %v1791_v33 = vld [vmem:[#allocation5 + $0xd0] sm:$0xff]  ;;  %v7124_v13 = vld [vmem:[#allocation2 + $0x20] sm:$0xff]  }
 0x72a   :  { %v7121_v1 = vld [vmem:[#allocation2 + $0x8] sm:$0xff]   ;;  %v7122_v9 = vld [vmem:[#allocation2 + $0x10] sm:$0xff]  }
 0x72b   :  { %7258 = vpow2.f32 %v5858_v46  ;;  %v5860_v4 = vmul.f32 -1.442695, %v1552_v55  ;;  %v1798_v46 = vld [vmem:[#allocation5 + $0x108] sm:$0xff] }
 0x72c   :  { %7260 = vpow2.f32 %v5859_v35  ;;  %v1794_v55 = vld [vmem:[#allocation5 + $0xe8] sm:$0xff]  ;;  %v1828_v35 = vpack.c.bf16 %v1798_v46, %v1795_v42 }
 0x72d   :  { %7262 = vpow2.f32 %v5860_v4  ;;  %v1789_v4 = vld [vmem:[#allocation5 + $0xc0] sm:$0xff]  ;;  %v2207_v42 = vld [vmem:[#allocation7 + $0x2e8] sm:$0xff] }
 0x734   :  { %v7257_v45 = vpop.eup %7256 }
 0x735   :  { %v1545_v61 = vadd.f32 1.0, %v7257_v45  ;;  %v1826_v45 = vpack.c.bf16 %v1793_v52, %v1790_v47  ;;  %v2199_v47 = vld [vmem:[#allocation7 + $0x2a8] sm:$0xff]  ;;  %v2202_v52 = vld [vmem:[#allocation7 + $0x2c0] sm:$0xff] }
 0x737   :  { %7264 = vrcp.f32 %v1545_v61  ;;  %v1827_v61 = vpack.c.bf16 %v1794_v55, %v1791_v33  ;;  %v2206_v33 = vld [vmem:[#allocation7 + $0x2e0] sm:$0xff]  ;;  %v2209_v55 = vld [vmem:[#allocation7 + $0x2f8] sm:$0xff] }
 0x738   :  { %v7259_v62 = vpop.eup %7258 }
 0x739   :  { %v1546_v12 = vadd.f32 1.0, %v7259_v62  ;;  %v7261_v56 = vpop.eup %7260  ;;  %v1784_v62 = vld [vmem:[#allocation5 + $0x98] sm:$0xff] }
 0x73a   :  { %v7263_v19 = vpop.eup %7262  ;;  %v1559_v32 = vadd.f32 1.0, %v7261_v56  ;;  %v1785_v56 = vld [vmem:[#allocation5 + $0xa0] sm:$0xff] }
 0x73b   :  { %7266 = vrcp.f32 %v1546_v12  ;;  %v1560_v54 = vadd.f32 1.0, %v7263_v19  ;;  %v1787_v12 = vld [vmem:[#allocation5 + $0xb0] sm:$0xff]  ;;  %v1788_v19 = vld [vmem:[#allocation5 + $0xb8] sm:$0xff] }
 0x73c   :  { %7268 = vrcp.f32 %v1559_v32 }
 0x73d   :  { %7270 = vrcp.f32 %v1560_v54  ;;  %v1783_v54 = vld [vmem:[#allocation5 + $0x90] sm:$0xff] }
 0x744   :  { %v7265_v14 = vpop.eup %7264 }
 0x745   :  { %v1567_v5 = vmul.f32 %v7265_v14, %v1565_v11  ;;  %v1823_v11 = vpack.c.bf16 %v1787_v12, %v1784_v62  ;;  %v1824_v14 = vpack.c.bf16 %v1788_v19, %v1785_v56  ;;  %v2193_v62 = vld [vmem:[#allocation7 + $0x278] sm:$0xff]  ;;  %v2196_v12 = vld [vmem:[#allocation7 + $0x290] sm:$0xff] }
 0x746   :  { %v8563_v56 = vpack.c.bf16 %v2196_v12, %v2193_v62  ;;  %v2192_v19 = vld [vmem:[#allocation7 + $0x270] sm:$0xff] }
 0x747   :  { %v1569_v48 = vadd.f32 %v1567_v5, %v10429_v50  ;;  %v1786_v5 = vld [vmem:[#allocation5 + $0xa8] sm:$0xff]  ;;  %v2164_v12 = vld [vmem:[#allocation7 + $0x190] sm:$0xff] }
 0x748   :  { %v7267_v28 = vpop.eup %7266  ;;  %v1778_v50 = vld [vmem:[#allocation5 + $0x68] sm:$0xff]  ;;  %v1822_v34 = vpack.c.bf16 %v1786_v5, %v1783_v54  ;;  %v2190_v54 = vld [vmem:[#allocation7 + $0x260] sm:$0xff]  ;;  %v2200_v5 = vld [vmem:[#allocation7 + $0x2b0] sm:$0xff] }
 0x749   :  { %7272 = vtanh.f32 %v1569_v48  ;;  %v1568_v44 = vmul.f32 %v7267_v28, %v1566_v41  ;;  %v7269_v7 = vpop.eup %7268  ;;  %v1781_v48 = vld [vmem:[#allocation5 + $0x80] sm:$0xff]  ;;  %v1779_v41 = vld [vmem:[#allocation5 + $0x70] sm:$0xff]  ;;  %v1782_v28 = vld [vmem:[#allocation5 + $0x88] sm:$0xff] }
 0x74a   :  { %v7271_v57 = vpop.eup %7270  ;;  %v1573_v24 = vsub.f32 1.0, %v7269_v7  ;;  %v1577_v23 = vmul.f32 %v7269_v7, %v8471_v8  ;;  %v1832_v8 = vpack.c.bf16 %v1805_v26, %v1802_v25  ;;  %v1780_v7 = vld [vmem:[#allocation5 + $0x78] sm:$0xff]  ;;  %v1767_v25 = vld [vmem:[#allocation5 + $0x10] sm:$0xff]  ;;  %v1770_v26 = vld [vmem:[#allocation5 + $0x28] sm:$0xff] }
 0x74b   :  { %v1570_v16 = vadd.f32 %v1568_v44, %v384_v63  ;;  %v1574_v3 = vsub.f32 1.0, %v7271_v57  ;;  %v1578_v17 = vmul.f32 %v7271_v57, %v8474_v29  ;;  %v1800_v29 = vld [vmem:[#allocation5 + $0x118] sm:$0xff]  ;;  %v1820_v63 = vpack.c.bf16 %v1781_v48, %v1778_v50  ;;  %v2203_v50 = vld [vmem:[#allocation7 + $0x2c8] sm:$0xff] }
 0x74c   :  { %v1830_v38 = vpack.c.bf16 %v1800_v29, %v1797_v20  ;;  %v1821_v44 = vpack.c.bf16 %v1782_v28, %v1779_v41  ;;  %v1772_v57 = vld [vmem:[#allocation5 + $0x38] sm:$0xff]  ;;  %v7125_v20 = vld [vmem:[#allocation2 + $0x28] sm:$0xff]   ;;  %v2186_v41 = vld [vmem:[#allocation7 + $0x240] sm:$0xff]  ;;  %v8572_v28 = vpack.c.bf16 %v2203_v50, %v2200_v5 }
 0x74d   :  { %7274 = vtanh.f32 %v1570_v16  ;;  %v1777_v16 = vld [vmem:[#allocation5 + $0x60] sm:$0xff]  ;;  %v10431_v5 = vld [vmem:[#allocation40_spill] sm:$0xff] }
 0x756   :  { %v7273_v53 = vpop.eup %7272 }
 0x757   :  { %v1575_v0 = vmul.f32 %v7273_v53, %v1573_v24  ;;  %v1775_v24 = vld [vmem:[#allocation5 + $0x50] sm:$0xff]  ;;  %v1773_v53 = vld [vmem:[#allocation5 + $0x40] sm:$0xff] }
 0x759   :  { %v8527_v39 = vadd.f32 %v1577_v23, %v1575_v0  ;;  %v1776_v0 = vld [vmem:[#allocation5 + $0x58] sm:$0xff]  ;;  %v1819_v23 = vpack.c.bf16 %v1780_v7, %v1777_v16  ;;  %v2184_v16 = vld [vmem:[#allocation7 + $0x230] sm:$0xff] }
 0x75a   :  { %v7275_v31 = vpop.eup %7274 }
 0x75b   :  { %v1576_v15 = vmul.f32 %v7275_v31, %v1574_v3  ;;  %v1817_v3 = vpack.c.bf16 %v1775_v24, %v1772_v57  ;;  %v1818_v31 = vpack.c.bf16 %v1776_v0, %v1773_v53  ;;  %v2180_v57 = vld [vmem:[#allocation7 + $0x210] sm:$0xff]  ;;  %v2183_v24 = vld [vmem:[#allocation7 + $0x228] sm:$0xff] }
 0x75c   :  { %v8582_v53 = vpack.c.bf16 %v2183_v24, %v2180_v57  ;;  %v2175_v0 = vld [vmem:[#allocation7 + $0x1e8] sm:$0xff]  ;;  %v10432_v24 = vld [vmem:[#allocation42_spill] sm:$0xff] }
 0x75d   :  { %v8530_v36 = vadd.f32 %v1578_v17, %v1576_v15  ;;  %v1771_v15 = vld [vmem:[#allocation5 + $0x30] sm:$0xff]  ;;  %v1774_v17 = vld [vmem:[#allocation5 + $0x48] sm:$0xff] }
 0x75e   :  { %v1816_v40 = vpack.c.bf16 %v1774_v17, %v1771_v15  ;;  %v2174_v17 = vld [vmem:[#allocation7 + $0x1e0] sm:$0xff] }
 0x75f   :  { %v6033_v58 = vpack.c.bf16 %v8530_v36, %v8527_v39 }
 0x761   :  { %6034 = vst [vmem:[#allocation2 + $0x30] sm:$0xff] %v6033_v58   ;;  %1630 = vmatmul.mubr.bf16.vlgmr.msra.gmra.mxu1 %v6033_v58  ;;  %6575 = vmatmul.mubr.bf16.vlgmr.msra.gmra.mxu0 %v6033_v58  ;;  %v1765_v58 = vld [vmem:[#allocation5] sm:$0xff] }
 0x762   :  { %1904 = vmatpush1.bf16.msra.mxu1 %v1834_v51  ;;  %6579 = vmatpush3.bf16.msra.mxu0 %v8511_v43  ;;  %v1792_v43 = vld [vmem:[#allocation5 + $0xd8] sm:$0xff]  ;;  %v1815_v51 = vpack.c.bf16 %v1770_v26, %v1767_v25  ;;  %v8591_v25 = vpack.c.bf16 %v2177_v59, %v2174_v17 }
 0x763   :  { %6594 = vmatprep.mubr.bf16.mxu0 %v8534_v22  ;;  %1905 = vmatprep.subr.bf16.mxu1 %v1832_v8  ;;  %v1825_v32 = vpack.c.bf16 %v1792_v43, %v1789_v4  ;;  %v1768_v8 = vld [vmem:[#allocation5 + $0x18] sm:$0xff]  ;;  %v2198_v4 = vld [vmem:[#allocation7 + $0x2a0] sm:$0xff]  ;;  %v8556_v43 = vpack.c.bf16 %v2209_v55, %v2206_v33  ;;  %v2179_v33 = vld [vmem:[#allocation7 + $0x208] sm:$0xff] }
 0x764   :  { %6580 = vmatprep.subr.bf16.mxu0 %v1833_v10  ;;  %1935 = vmatprep.mubr.bf16.mxu1 %v10411_v2  ;;  %v1813_v60 = vpack.c.bf16 %v1768_v8, %v1765_v58  ;;  %v2169_v26 = vld [vmem:[#allocation7 + $0x1b8] sm:$0xff]  ;;  %v2171_v58 = vld [vmem:[#allocation7 + $0x1c8] sm:$0xff]  ;;  %v2170_v55 = vld [vmem:[#allocation7 + $0x1c0] sm:$0xff] }
 0x766   :  { %1906 = vmatpush1.bf16.msra.mxu1 %v1831_v27  ;;  %6581 = vmatpush3.bf16.msra.mxu0 %v1833_v10  ;;  %v7123_v10 = vld [vmem:[#allocation2 + $0x18] sm:$0xff]   ;;  %v2208_v27 = vld [vmem:[#allocation7 + $0x2f0] sm:$0xff] }
 0x767   :  { %1907 = vmatprep.subr.bf16.mxu1 %v1829_v37  ;;  %6582 = vmatprep.subr.bf16.mxu0 %v1830_v38 }
 0x768   :  { %v7126_v29 = vld [vmem:[#allocation2 + $0x30] sm:$0xff]  }
 0x76a   :  { %1908 = vmatpush1.bf16.msra.mxu1 %v1828_v35  ;;  %6583 = vmatpush3.bf16.msra.mxu0 %v1830_v38  ;;  %v2204_v38 = vld [vmem:[#allocation7 + $0x2d0] sm:$0xff]  ;;  %v8554_v35 = vpack.c.bf16 %v2202_v52, %v2199_v47 }
 0x76b   :  { %1909 = vmatprep.subr.bf16.mxu1 %v1826_v45  ;;  %6584 = vmatprep.subr.bf16.mxu0 %v1827_v61  ;;  %v8550_v46 = vpack.c.bf16 %v2207_v42, %v2204_v38  ;;  %v2201_v45 = vld [vmem:[#allocation7 + $0x2b8] sm:$0xff]  ;;  %v2182_v38 = vld [vmem:[#allocation7 + $0x220] sm:$0xff]  ;;  %v2176_v52 = vld [vmem:[#allocation7 + $0x1f0] sm:$0xff] }
 0x76c   :  { %v2185_v42 = vld [vmem:[#allocation7 + $0x238] sm:$0xff] }
 0x76d   :  { %v8613_v47 = vpack.c.bf16 %v2185_v42, %v2182_v38 }
 0x76e   :  { %1910 = vmatpush1.bf16.msra.mxu1 %v1825_v32  ;;  %6585 = vmatpush3.bf16.msra.mxu0 %v1827_v61  ;;  %v8559_v61 = vpack.c.bf16 %v2201_v45, %v2198_v4  ;;  %v2195_v32 = vld [vmem:[#allocation7 + $0x288] sm:$0xff]  ;;  %v8617_v4 = vpack.c.bf16 %v2179_v33, %v2176_v52  ;;  %v2173_v45 = vld [vmem:[#allocation7 + $0x1d8] sm:$0xff] }
 0x76f   :  { %1911 = vmatprep.subr.bf16.mxu1 %v1823_v11  ;;  %6586 = vmatprep.subr.bf16.mxu0 %v1824_v14  ;;  %v8566_v11 = vpack.c.bf16 %v2195_v32, %v2192_v19  ;;  %v8620_v62 = vpack.c.bf16 %v2173_v45, %v2170_v55  ;;  %v2167_v19 = vld [vmem:[#allocation7 + $0x1a8] sm:$0xff] }
 0x770   :  { %v8624_v32 = vpack.c.bf16 %v2167_v19, %v2164_v12  ;;  %v10435_v45 = vld [vmem:[#allocation24_spill] sm:$0xff] }
 0x772   :  { %1912 = vmatpush1.bf16.msra.mxu1 %v1822_v34  ;;  %6587 = vmatpush3.bf16.msra.mxu0 %v1824_v14  ;;  %v2187_v14 = vld [vmem:[#allocation7 + $0x248] sm:$0xff]  ;;  %v2189_v34 = vld [vmem:[#allocation7 + $0x258] sm:$0xff] }
 0x773   :  { %1913 = vmatprep.subr.bf16.mxu1 %v1820_v63  ;;  %6588 = vmatprep.subr.bf16.mxu0 %v1821_v44  ;;  %v8570_v48 = vpack.c.bf16 %v2190_v54, %v2187_v14  ;;  %v8575_v63 = vpack.c.bf16 %v2189_v34, %v2186_v41 }
 0x776   :  { %1914 = vmatpush1.bf16.msra.mxu1 %v1819_v23  ;;  %6589 = vmatpush3.bf16.msra.mxu0 %v1821_v44  ;;  %v2181_v44 = vld [vmem:[#allocation7 + $0x218] sm:$0xff]  ;;  %v2178_v23 = vld [vmem:[#allocation7 + $0x200] sm:$0xff] }
 0x777   :  { %1915 = vmatprep.subr.bf16.mxu1 %v1817_v3  ;;  %6590 = vmatprep.subr.bf16.mxu0 %v1818_v31  ;;  %v8579_v7 = vpack.c.bf16 %v2184_v16, %v2181_v44  ;;  %v2194_v3 = vld [vmem:[#allocation7 + $0x280] sm:$0xff]  ;;  %v8586_v15 = vpack.c.bf16 %v2178_v23, %v2175_v0 }
 0x77a   :  { %1916 = vmatpush1.bf16.msra.mxu1 %v1816_v40  ;;  %6591 = vmatpush3.bf16.msra.mxu0 %v1818_v31  ;;  %v2197_v31 = vld [vmem:[#allocation7 + $0x298] sm:$0xff]  ;;  %v2172_v40 = vld [vmem:[#allocation7 + $0x1d0] sm:$0xff] }
 0x77b   :  { %1917 = vmatprep.subr.bf16.mxu1 %v1814_v49  ;;  %6592 = vmatprep.subr.bf16.mxu0 %v1815_v51  ;;  %v8588_v21 = vpack.c.bf16 %v2197_v31, %v2194_v3  ;;  %v8595_v49 = vpack.c.bf16 %v2172_v40, %v2169_v26  ;;  %v10433_v3 = vld [vmem:[#allocation41_spill] sm:$0xff]  ;;  %v10434_v26 = vld [vmem:[#allocation43_spill] sm:$0xff] }
 0x77c   :  { %v296_v40 = vadd.f32 %v10434_v26, %v8084_v18 }
 0x77e   :  { %1918 = vmatpush1.bf16.msra.mxu1 %v1813_v60  ;;  %6593 = vmatpush3.bf16.msra.mxu0 %v1815_v51  ;;  %v2168_v51 = vld [vmem:[#allocation7 + $0x1b0] sm:$0xff]  ;;  %v2163_v60 = vld [vmem:[#allocation7 + $0x188] sm:$0xff] }
 0x77f   :  { %6610 = vmatprep.subr.bf16.mxu1 %v10410_v30  ;;  %v8598_v8 = vpack.c.bf16 %v2171_v58, %v2168_v51 }
 0x781   :  { %1936 = vmatmul.mubr.bf16.vlgmr.msra.gmra.mxu1 %v8534_v22  ;;  %6595 = vmatmul.mubr.bf16.vlgmr.msra.gmra.mxu0 %v7121_v1  ;;  %v2205_v22 = vld [vmem:[#allocation7 + $0x2d8] sm:$0xff] }
 0x782   :  { %6598 = vmatprep.mubr.bf16.mxu0 %v7122_v9  ;;  %1945 = vmatprep.mubr.bf16.mxu1 %v10411_v2  ;;  %v8548_v37 = vpack.c.bf16 %v2208_v27, %v2205_v22  ;;  %v2165_v22 = vld [vmem:[#allocation7 + $0x198] sm:$0xff] }
 0x783   :  { %6611 = vmatpush3.bf16.msra.mxu1 %v8556_v43 }
 0x784   :  { %2247 = vmatprep.subr.bf16.mxu0 %v8548_v37  ;;  %6612 = vmatprep.subr.bf16.mxu1 %v10410_v30 }
 0x785   :  { %2248 = vmatpush1.bf16.msra.mxu0 %v8550_v46 }
 0x786   :  { %2249 = vmatprep.subr.bf16.mxu0 %v8554_v35 }
 0x787   :  { %6613 = vmatpush3.bf16.msra.mxu1 %v8572_v28 }
 0x788   :  { %6614 = vmatprep.subr.bf16.mxu1 %v10410_v30 }
 0x789   :  { %1946 = vmatmul.mubr.bf16.gmra.mxu1 %v7121_v1  ;;  %6599 = vmatmul.mubr.bf16.gmra.mxu0 %v7123_v10  ;;  %v2166_v1 = vld [vmem:[#allocation7 + $0x1a0] sm:$0xff] }
 0x78a   :  { %6602 = vmatprep.mubr.bf16.mxu0 %v7124_v13  ;;  %1955 = vmatprep.mubr.bf16.mxu1 %v10411_v2 }
 0x78b   :  { %2250 = vmatpush1.bf16.msra.mxu0 %v8559_v61  ;;  %6615 = vmatpush3.bf16.msra.mxu1 %v8588_v21 }
 0x78c   :  { %2251 = vmatprep.subr.bf16.mxu0 %v8563_v56  ;;  %6616 = vmatprep.subr.bf16.mxu1 %v10410_v30 }
 0x78f   :  { %2252 = vmatpush1.bf16.msra.mxu0 %v8566_v11 }
 0x790   :  { %2253 = vmatprep.subr.bf16.mxu0 %v8570_v48 }
 0x791   :  { %1956 = vmatmul.mubr.bf16.gmra.mxu1 %v7122_v9  ;;  %6603 = vmatmul.mubr.bf16.gmra.mxu0 %v7125_v20  ;;  %v2188_v9 = vld [vmem:[#allocation7 + $0x250] sm:$0xff] }
 0x792   :  { %6606 = vmatprep.mubr.bf16.mxu0 %v7126_v29  ;;  %1965 = vmatprep.mubr.bf16.mxu1 %v10411_v2 }
 0x793   :  { %2254 = vmatpush1.bf16.msra.mxu0 %v8575_v63 }
 0x794   :  { %2255 = vmatprep.subr.bf16.mxu0 %v8579_v7 }
 0x797   :  { %2256 = vmatpush1.bf16.msra.mxu0 %v8582_v53 }
 0x798   :  { %2257 = vmatprep.subr.bf16.mxu0 %v8586_v15 }
 0x799   :  { %1966 = vmatmul.mubr.bf16.gmra.mxu1 %v7123_v10  ;;  %v2191_v10 = vld [vmem:[#allocation7 + $0x268] sm:$0xff] }
 0x79a   :  { %1975 = vmatprep.mubr.bf16.mxu1 %v10411_v2 }
 0x79b   :  { %2258 = vmatpush1.bf16.msra.mxu0 %v8591_v25 }
 0x79c   :  { %2259 = vmatprep.subr.bf16.mxu0 %v8595_v49 }
 0x79f   :  { %2260 = vmatpush1.bf16.msra.mxu0 %v8598_v8 }
 0x7a1   :  { %1976 = vmatmul.mubr.bf16.gmra.mxu1 %v7124_v13  ;;  %v8602_v13 = vpack.c.bf16 %v2166_v1, %v2163_v60 }
 0x7a2   :  { %1985 = vmatprep.mubr.bf16.mxu1 %v10411_v2 }
 0x7a3   :  { %2261 = vmatprep.subr.bf16.mxu0 %v8602_v13 }
 0x7a9   :  { %1986 = vmatmul.mubr.bf16.gmra.mxu1 %v7125_v20  ;;  %v2162_v20 = vld [vmem:[#allocation7 + $0x180] sm:$0xff] }
 0x7aa   :  { %1995 = vmatprep.mubr.bf16.mxu1 %v10411_v2  ;;  %v8607_v27 = vpack.c.bf16 %v2165_v22, %v2162_v20 }
 0x7ac   :  { %2262 = vmatpush1.bf16.msra.mxu0 %v8607_v27 }
 0x7ad   :  { %2396 = vmatprep.subr.bf16.mxu0 %v8548_v37 }
 0x7b1   :  { %1996 = vmatmul.mubr.bf16.gmra.mxu1 %v7126_v29  ;;  %v8604_v29 = vpack.c.bf16 %v2191_v10, %v2188_v9 }
 0x7b2   :  { %2005 = vmatprep.mubr.bf16.mxu1 %v10411_v2 }
 0x7b3   :  { %6617 = vmatpush3.bf16.msra.mxu1 %v8604_v29 }
 0x7b4   :  { %6618 = vmatprep.subr.bf16.mxu1 %v10410_v30 }
 0x7b7   :  { %6619 = vmatpush3.bf16.msra.mxu1 %v8613_v47 }
 0x7b8   :  { %6620 = vmatprep.subr.bf16.mxu1 %v10410_v30 }
 0x7bb   :  { %6621 = vmatpush3.bf16.msra.mxu1 %v8617_v4 }
 0x7bc   :  { %6622 = vmatprep.subr.bf16.mxu1 %v10410_v30 }
 0x7bf   :  { %6623 = vmatpush3.bf16.msra.mxu1 %v8620_v62 }
 0x7c0   :  { %6624 = vmatprep.subr.bf16.mxu1 %v10410_v30 }
 0x7c3   :  { %6625 = vmatpush3.bf16.msra.mxu1 %v8624_v32 }
 0x7c4   :  { %6630 = vmatprep.subr.bf16.mxu1 %v10410_v30 }
 0x821   :  { %v1631_v14 = vpop.f32.mrf.mxu1  ;;  %v1674_v54 = vpop.f32.mrf.mxu0 }
 0x822   :  { %v1690_v50 = vadd.f32 %v1631_v14, %v10431_v5  ;;  %v1718_v52 = vadd.f32 %v8519_v6, %v1674_v54 }
 0x823   :  { %v1633_v41 = vpop.f32.mrf.mxu1  ;;  %v6576_v34 = vpop.f32.mrf.mxu0 }
 0x824   :  { %v5863_v44 = vmul.f32 -1.442695, %v1690_v50  ;;  %v1704_v31 = vadd.f32 %v1633_v41, %v10433_v3  ;;  %v10436_v50 = vld [vmem:[#allocation26_spill] sm:$0xff] }
 0x825   :  { %v1635_v16 = vpop.f32.mrf.mxu1  ;;  %v1677_v57 = vpop.f32.mrf.mxu0 }
 0x826   :  { %7276 = vpow2.f32 %v5863_v44  ;;  %v1691_v0 = vadd.f32 %v1635_v16, %v10432_v24  ;;  %v5865_v58 = vmul.f32 -1.442695, %v1704_v31  ;;  %v1719_v19 = vadd.f32 %v8519_v6, %v1677_v57 }
 0x827   :  { %v6577_v23 = vpop.f32.mrf.mxu0  ;;  %v1637_v59 = vpop.f32.mrf.mxu1 }
 0x828   :  { %v5864_v17 = vmul.f32 -1.442695, %v1691_v0  ;;  %v1705_v51 = vadd.f32 %v1637_v59, %v296_v40 }
 0x82a   :  { %7278 = vpow2.f32 %v5864_v17  ;;  %v5866_v60 = vmul.f32 -1.442695, %v1705_v51 }
 0x82b   :  { %7280 = vpow2.f32 %v5865_v58 }
 0x82c   :  { %7282 = vpow2.f32 %v5866_v60 }
 0x833   :  { %v7277_v1 = vpop.eup %7276 }
 0x834   :  { %v1698_v9 = vadd.f32 1.0, %v7277_v1 }
 0x836   :  { %7284 = vrcp.f32 %v1698_v9 }
 0x837   :  { %v7279_v10 = vpop.eup %7278 }
 0x838   :  { %v1699_v20 = vadd.f32 1.0, %v7279_v10  ;;  %v7281_v22 = vpop.eup %7280 }
 0x839   :  { %v7283_v38 = vpop.eup %7282  ;;  %v1712_v42 = vadd.f32 1.0, %v7281_v22 }
 0x83a   :  { %7286 = vrcp.f32 %v1699_v20  ;;  %v1713_v55 = vadd.f32 1.0, %v7283_v38 }
 0x83b   :  { %7288 = vrcp.f32 %v1712_v42 }
 0x83c   :  { %7290 = vrcp.f32 %v1713_v55 }
 0x841   :  { %v1937_v51 = vpop.f32.mrf.mxu1 }
 0x843   :  { %v7285_v33 = vpop.eup %7284  ;;  %v1939_v58 = vpop.f32.mrf.mxu1 }
 0x844   :  { %v1720_v18 = vmul.f32 %v7285_v33, %v1718_v52 }
 0x845   :  { %v1941_v60 = vpop.f32.mrf.mxu1 }
 0x846   :  { %v1722_v12 = vadd.f32 %v1720_v18, %v10435_v45 }
 0x847   :  { %v7287_v14 = vpop.eup %7286  ;;  %v8690_v1 = vpop.f32.mrf.mxu1 }
 0x848   :  { %7292 = vtanh.f32 %v1722_v12  ;;  %v1721_v5 = vmul.f32 %v7287_v14, %v1719_v19  ;;  %v7289_v34 = vpop.eup %7288  ;;  %v8716_v19 = vpop.f32.mrf.mxu0 }
 0x849   :  { %v7291_v44 = vpop.eup %7290  ;;  %v1726_v16 = vsub.f32 1.0, %v7289_v34  ;;  %v1730_v0 = vmul.f32 %v7289_v34, %v8527_v39  ;;  %v8692_v9 = vpop.f32.mrf.mxu1 }
 0x84a   :  { %v1723_v41 = vadd.f32 %v1721_v5, %v10436_v50  ;;  %v1727_v3 = vsub.f32 1.0, %v7291_v44  ;;  %v1731_v17 = vmul.f32 %v7291_v44, %v8530_v36  ;;  %v10439_v36 = vmov 0.0|0.0   ;;  %v8720_v5 = vpop.f32.mrf.mxu0 }
 0x84b   :  { %v8694_v10 = vpop.f32.mrf.mxu1 }
 0x84c   :  { %7294 = vtanh.f32 %v1723_v41  ;;  %v8724_v41 = vpop.f32.mrf.mxu0 }
 0x84d   :  { %v8696_v20 = vpop.f32.mrf.mxu1 }
 0x84e   :  { %v8728_v44 = vpop.f32.mrf.mxu0 }
 0x84f   :  { %v8698_v22 = vpop.f32.mrf.mxu1 }
 0x851   :  { %v8700_v38 = vpop.f32.mrf.mxu1 }
 0x853   :  { %v8702_v42 = vpop.f32.mrf.mxu1 }
 0x855   :  { %v7293_v24 = vpop.eup %7292  ;;  %v8704_v52 = vpop.f32.mrf.mxu1 }
 0x856   :  { %v1728_v54 = vmul.f32 %v7293_v24, %v1726_v16  ;;  %v8732_v24 = vpop.f32.mrf.mxu0 }
 0x857   :  { %v8706_v33 = vpop.f32.mrf.mxu1  ;;  %10448 = vst [vmem:[#allocation35_spill] sm:$0xff] %v8732_v24 }
 0x858   :  { %v8639_v23 = vadd.f32 %v1730_v0, %v1728_v54  ;;  %v8736_v0 = vpop.f32.mrf.mxu0 }
 0x859   :  { %v7295_v31 = vpop.eup %7294  ;;  %v8708_v55 = vpop.f32.mrf.mxu1 }
 0x85a   :  { %10437 = vst [vmem:[#allocation19_spill] sm:$0xff] %v8639_v23  ;;  %v5301_v6 = vmul.f32 %v8639_v23, %v8639_v23  ;;  %v1729_v57 = vmul.f32 %v7295_v31, %v1727_v3  ;;  %10440 = vst [vmem:[#allocation30_spill] sm:$0xff] %v8708_v55  ;;  %v8740_v31 = vpop.f32.mrf.mxu0 }
 0x85b   :  { %v8710_v18 = vpop.f32.mrf.mxu1  ;;  %10451 = vst [vmem:[#allocation36_spill] sm:$0xff] %v8740_v31 }
 0x85c   :  { %5303 = vadd.xlane.f32.xlu1 %v5301_v6  ;;  %v8644_v59 = vadd.f32 %v1731_v17, %v1729_v57  ;;  %10441 = vst [vmem:[#allocation29_spill] sm:$0xff] %v8710_v18  ;;  %v8744_v57 = vpop.f32.mrf.mxu0 }
 0x85d   :  { %v8712_v45 = vpop.f32.mrf.mxu1 }
 0x85e   :  { %10438 = vst [vmem:[#allocation28_spill] sm:$0xff] %v8644_v59  ;;  %v5302_v26 = vmul.f32 %v8644_v59, %v8644_v59  ;;  %v6038_v40 = vpack.c.bf16 %v8644_v59, %v8639_v23  ;;  %10442 = vst [vmem:[#allocation31_spill] sm:$0xff] %v8712_v45 }
 0x85f   :  { %v8714_v12 = vpop.f32.mrf.mxu1 }
 0x860   :  { %5305 = vadd.xlane.f32.xlu1 %v5302_v26  ;;  %6039 = vst [vmem:[#allocation2 + $0x38] sm:$0xff] %v6038_v40   ;;  %10443 = vst [vmem:[#allocation21_spill] sm:$0xff] %v8714_v12  ;;  %v8748_v26 = vpop.f32.mrf.mxu0 }
 0x861   :  { %v8718_v14 = vpop.f32.mrf.mxu1  ;;  %10454 = vst [vmem:[#allocation39_spill] sm:$0xff] %v8748_v26 }
 0x862   :  { %10444 = vst [vmem:[#allocation23_spill] sm:$0xff] %v8718_v14 }
 0x863   :  { %v8722_v50 = vpop.f32.mrf.mxu1 }
 0x864   :  { %10445 = vst [vmem:[#allocation32_spill] sm:$0xff] %v8722_v50 }
 0x865   :  { %v8726_v34 = vpop.f32.mrf.mxu1 }
 0x866   :  { %10446 = vst [vmem:[#allocation34_spill] sm:$0xff] %v8726_v34 }
 0x867   :  { %v7127_v39 = vld [vmem:[#allocation2 + $0x38] sm:$0xff]   ;;  %v8730_v16 = vpop.f32.mrf.mxu1 }
 0x868   :  { %2006 = vmatmul.mubr.bf16.gmra.mxu1 %v7127_v39  ;;  %6607 = vmatmul.mubr.bf16.gmra.mxu0 %v7127_v39  ;;  %10447 = vst [vmem:[#allocation33_spill] sm:$0xff] %v8730_v16  ;;  %v8752_v39 = vpop.f32.mrf.mxu0 }
 0x869   :  { %2279 = vmatprep.mubr.bf16.mxu0 %v10411_v2  ;;  %6626 = vmatprep.mubr.msk.bf16.mxu1 %vm7753_vm2, %v10410_v30  ;;  %v8734_v54 = vpop.f32.mrf.mxu1  ;;  %10456 = vst [vmem:[#allocation27_spill] sm:$0xff] %v8752_v39  ;;  %v10466_v39 = vld [vmem:[#allocation17_spill] sm:$0xff] }
 0x86a   :  { %10449 = vst [vmem:[#allocation20_spill] sm:$0xff] %v8734_v54  ;;  %v8756_v59 = vpop.f32.mrf.mxu0 }
 0x86b   :  { %v8738_v3 = vpop.f32.mrf.mxu1  ;;  %10458 = vst [vmem:[#allocation42_spill] sm:$0xff] %v8756_v59 }
 0x86c   :  { %10450 = vst [vmem:[#allocation22_spill] sm:$0xff] %v8738_v3  ;;  %v8760_v3 = vpop.f32.mrf.mxu0 }
 0x86d   :  { %v8742_v6 = vpop.f32.mrf.mxu1  ;;  %10460 = vst [vmem:[#allocation43_spill] sm:$0xff] %v8760_v3 }
 0x86e   :  { %10452 = vst [vmem:[#allocation38_spill] sm:$0xff] %v8742_v6  ;;  %v1838_v6 = vld [vmem:[#allocation9 + $0x3] sm:$0x7] }
 0x86f   :  { %v8746_v17 = vpop.f32.mrf.mxu1  ;;  %v8773_v50 = vrot.slane %v1838_v6, %v10466_v39 }
 0x870   :  { %2280 = vmatmul.mubr.bf16.vlgmr.msra.gmra.mxu0 %v10439_v36  ;;  %6627 = vmatmul.mubr.bf16.vlgmr.msra.gmra.mxu1 %v10439_v36  ;;  %10453 = vst [vmem:[#allocation37_spill] sm:$0xff] %v8746_v17 }
 0x871   :  { %2397 = vmatpush1.bf16.msra.mxu0 %v8550_v46  ;;  %6631 = vmatpush3.bf16.msra.mxu1 %v8556_v43  ;;  %v8750_v40 = vpop.f32.mrf.mxu1  ;;  %v1942_v39 = vadd.f32 %v1941_v60, %v8773_v50 }
 0x872   :  { %2398 = vmatprep.subr.bf16.mxu0 %v8554_v35  ;;  %6632 = vmatprep.subr.bf16.mxu1 %v10410_v30  ;;  %10455 = vst [vmem:[#allocation25_spill] sm:$0xff] %v8750_v40 }
 0x873   :  { %2428 = vmatprep.mubr.bf16.mxu0 %v10411_v2  ;;  %6646 = vmatprep.mubr.msk.bf16.mxu1 %vm7753_vm2, %v10410_v30  ;;  %v8754_v23 = vpop.f32.mrf.mxu1 }
 0x874   :  { %10457 = vst [vmem:[#allocation40_spill] sm:$0xff] %v8754_v23 }
 0x875   :  { %2399 = vmatpush1.bf16.msra.mxu0 %v8559_v61  ;;  %6633 = vmatpush3.bf16.msra.mxu1 %v8572_v28  ;;  %v8758_v36 = vpop.f32.mrf.mxu1 }
 0x876   :  { %2400 = vmatprep.subr.bf16.mxu0 %v8563_v56  ;;  %6634 = vmatprep.subr.bf16.mxu1 %v10410_v30  ;;  %10459 = vst [vmem:[#allocation41_spill] sm:$0xff] %v8758_v36 }
 0x877   :  { %v8762_v54 = vpop.f32.mrf.mxu1 }
 0x878   :  { %10461 = vst [vmem:[#allocation24_spill] sm:$0xff] %v8762_v54  ;;  %v1938_v54 = vadd.f32 %v1937_v51, %v8773_v50 }
 0x879   :  { %2401 = vmatpush1.bf16.msra.mxu0 %v8566_v11  ;;  %6635 = vmatpush3.bf16.msra.mxu1 %v8588_v21 }
 0x87a   :  { %2402 = vmatprep.subr.bf16.mxu0 %v8570_v48  ;;  %6636 = vmatprep.subr.bf16.mxu1 %v10410_v30 }
 0x87d   :  { %2403 = vmatpush1.bf16.msra.mxu0 %v8575_v63  ;;  %6637 = vmatpush3.bf16.msra.mxu1 %v8604_v29 }
 0x87e   :  { %2404 = vmatprep.subr.bf16.mxu0 %v8579_v7  ;;  %6638 = vmatprep.subr.bf16.mxu1 %v10410_v30 }
 0x881   :  { %2405 = vmatpush1.bf16.msra.mxu0 %v8582_v53  ;;  %6639 = vmatpush3.bf16.msra.mxu1 %v8613_v47 }
 0x882   :  { %2406 = vmatprep.subr.bf16.mxu0 %v8586_v15  ;;  %6640 = vmatprep.subr.bf16.mxu1 %v10410_v30 }
 0x885   :  { %2407 = vmatpush1.bf16.msra.mxu0 %v8591_v25  ;;  %6641 = vmatpush3.bf16.msra.mxu1 %v8617_v4 }
 0x886   :  { %2408 = vmatprep.subr.bf16.mxu0 %v8595_v49  ;;  %6642 = vmatprep.subr.bf16.mxu1 %v10410_v30 }
 0x889   :  { %2409 = vmatpush1.bf16.msra.mxu0 %v8598_v8  ;;  %6643 = vmatpush3.bf16.msra.mxu1 %v8620_v62 }
 0x88a   :  { %2410 = vmatprep.subr.bf16.mxu0 %v8602_v13  ;;  %6644 = vmatprep.subr.bf16.mxu1 %v10410_v30 }
 0x88d   :  { %2411 = vmatpush1.bf16.msra.mxu0 %v8607_v27  ;;  %6645 = vmatpush3.bf16.msra.mxu1 %v8624_v32 }
 0x88e   :  { %2545 = vmatprep.subr.bf16.mxu0 %v8548_v37  ;;  %6650 = vmatprep.subr.bf16.mxu1 %v10410_v30 }
 0x928   :  { %v8764_v16 = vpop.f32.mrf.mxu1  ;;  %v8766_v17 = vpop.f32.mrf.mxu0 }
 0x929   :  { %10462 = vst [vmem:[#allocation26_spill] sm:$0xff] %v8764_v16  ;;  %10463 = vst [vmem:[#allocation44_spill] sm:$0xff] %v8766_v17  ;;  %v10471_v17 = vld [vmem:[#allocation18_spill] sm:$0xff] }
 0x92a   :  { %v8768_v26 = vpop.f32.mrf.mxu1  ;;  %v8770_v40 = vpop.f32.mrf.mxu0  ;;  %v8785_v14 = vrot.slane %v1838_v6, %v10471_v17 }
 0x92b   :  { %10464 = vst [vmem:[#allocation45_spill] sm:$0xff] %v8768_v26  ;;  %10465 = vst [vmem:[#allocation46_spill] sm:$0xff] %v8770_v40 }
 0x92c   :  { %v8775_v23 = vpop.f32.mrf.mxu1  ;;  %v8777_v59 = vpop.f32.mrf.mxu0  ;;  %v1944_v17 = vadd.f32 %v8690_v1, %v8785_v14  ;;  %v10472_v1 = vld [vmem:[#allocation16_spill] sm:$0xff] }
 0x92d   :  { %10467 = vst [vmem:[#allocation47_spill] sm:$0xff] %v8775_v23  ;;  %10468 = vst [vmem:[#allocation48_spill] sm:$0xff] %v8777_v59  ;;  %v1940_v59 = vadd.f32 %v1939_v58, %v8785_v14 }
 0x92e   :  { %v8779_v36 = vpop.f32.mrf.mxu1  ;;  %v8781_v3 = vpop.f32.mrf.mxu0 }
 0x92f   :  { %10469 = vst [vmem:[#allocation49_spill] sm:$0xff] %v8779_v36  ;;  %10470 = vst [vmem:[#allocation50_spill] sm:$0xff] %v8781_v3 }
 0x930   :  { %v2281_v16 = vpop.f32.mrf.mxu0  ;;  %v2324_v34 = vpop.f32.mrf.mxu1 }
 0x931   :  { %v2337_v26 = vadd.f32 %v2281_v16, %v1938_v54 }
 0x932   :  { %v2283_v40 = vpop.f32.mrf.mxu0  ;;  %v6628_v31 = vpop.f32.mrf.mxu1 }
 0x933   :  { %v5878_v24 = vmul.f32 -1.442695, %v2337_v26  ;;  %v2351_v18 = vadd.f32 %v2283_v40, %v1940_v59  ;;  %v8795_v40 = vrot.slane %v1838_v6, %v10472_v1 }
 0x934   :  { %v2285_v23 = vpop.f32.mrf.mxu0  ;;  %v2327_v12 = vpop.f32.mrf.mxu1 }
 0x935   :  { %7296 = vpow2.f32 %v5878_v24  ;;  %v2338_v36 = vadd.f32 %v2285_v23, %v1942_v39  ;;  %v5880_v54 = vmul.f32 -1.442695, %v2351_v18  ;;  %v8791_v24 = vld [vmem:[#allocation10 + $0x1] ss:$0 sm:$0xff] }
 0x936   :  { %v6629_v3 = vpop.f32.mrf.mxu1  ;;  %v2287_v45 = vpop.f32.mrf.mxu0 }
 0x937   :  { %v5879_v51 = vmul.f32 -1.442695, %v2338_v36  ;;  %v2352_v16 = vadd.f32 %v2287_v45, %v1944_v17  ;;  %v2365_v3 = vadd.f32 %v8791_v24, %v2324_v34  ;;  %v2051_v17 = vadd.f32 %v8720_v5, %v8795_v40 }
 0x939   :  { %7298 = vpow2.f32 %v5879_v51  ;;  %v5881_v31 = vmul.f32 -1.442695, %v2352_v16 }
 0x93a   :  { %7300 = vpow2.f32 %v5880_v54  ;;  %v2054_v54 = vadd.f32 %v8728_v44, %v8795_v40 }
 0x93b   :  { %7302 = vpow2.f32 %v5881_v31 }
 0x942   :  { %v7297_v60 = vpop.eup %7296 }
 0x943   :  { %v2345_v26 = vadd.f32 1.0, %v7297_v60 }
 0x945   :  { %7304 = vrcp.f32 %v2345_v26 }
 0x946   :  { %v7299_v55 = vpop.eup %7298 }
 0x947   :  { %v2346_v58 = vadd.f32 1.0, %v7299_v55  ;;  %v7301_v23 = vpop.eup %7300  ;;  %v2366_v55 = vadd.f32 %v8791_v24, %v2327_v12 }
 0x948   :  { %v7303_v59 = vpop.eup %7302  ;;  %v2359_v36 = vadd.f32 1.0, %v7301_v23 }
 0x949   :  { %7306 = vrcp.f32 %v2346_v58  ;;  %v2360_v45 = vadd.f32 1.0, %v7303_v59 }
 0x94a   :  { %7308 = vrcp.f32 %v2359_v36 }
 0x94b   :  { %7310 = vrcp.f32 %v2360_v45 }
 0x952   :  { %v7305_v18 = vpop.eup %7304 }
 0x953   :  { %v2367_v39 = vmul.f32 %v7305_v18, %v2365_v3 }
 0x955   :  { %v2369_v51 = vadd.f32 %v2367_v39, %v2051_v17  ;;  %v1948_v17 = vadd.f32 %v8692_v9, %v8773_v50 }
 0x956   :  { %v7307_v16 = vpop.eup %7306 }
 0x957   :  { %7312 = vtanh.f32 %v2369_v51  ;;  %v2368_v34 = vmul.f32 %v7307_v16, %v2366_v55  ;;  %v7309_v6 = vpop.eup %7308 }
 0x958   :  { %v7311_v60 = vpop.eup %7310  ;;  %v2373_v26 = vsub.f32 1.0, %v7309_v6  ;;  %v2377_v5 = vmul.f32 0.0, %v7309_v6 }
 0x959   :  { %v2370_v31 = vadd.f32 %v2368_v34, %v2054_v54  ;;  %v2374_v59 = vsub.f32 1.0, %v7311_v60  ;;  %v2378_v18 = vmul.f32 0.0, %v7311_v60  ;;  %v1952_v34 = vadd.f32 %v8696_v20, %v8773_v50 }
 0x95b   :  { %7314 = vtanh.f32 %v2370_v31 }
 0x964   :  { %v7313_v58 = vpop.eup %7312 }
 0x965   :  { %v2375_v23 = vmul.f32 %v7313_v58, %v2373_v26  ;;  %v1950_v26 = vadd.f32 %v8694_v10, %v8785_v14 }
 0x967   :  { %v8802_v36 = vadd.f32 %v2377_v5, %v2375_v23 }
 0x968   :  { %v7315_v3 = vpop.eup %7314 }
 0x969   :  { %v2376_v12 = vmul.f32 %v7315_v3, %v2374_v59  ;;  %v1954_v3 = vadd.f32 %v8698_v22, %v8785_v14  ;;  %v2059_v22 = vadd.f32 %v8716_v19, %v8795_v40 }
 0x96b   :  { %v8804_v45 = vadd.f32 %v2378_v18, %v2376_v12 }
 0x96d   :  { %v6043_v44 = vpack.c.bf16 %v8804_v45, %v8802_v36 }
 0x96f   :  { %6044 = vst [vmem:[#allocation2] sm:$0xff] %v6043_v44   ;;  %2429 = vmatmul.mubr.bf16.vlgmr.msra.gmra.mxu0 %v6043_v44  ;;  %6647 = vmatmul.mubr.bf16.vlgmr.msra.gmra.mxu1 %v6043_v44 }
 0x970   :  { %2546 = vmatpush1.bf16.msra.mxu0 %v8550_v46  ;;  %6651 = vmatpush3.bf16.msra.mxu1 %v8556_v43 }
 0x971   :  { %2547 = vmatprep.subr.bf16.mxu0 %v8554_v35  ;;  %6652 = vmatprep.subr.bf16.mxu1 %v10410_v30 }
 0x972   :  { %2577 = vmatprep.mubr.bf16.mxu0 %v10411_v2  ;;  %6666 = vmatprep.mubr.msk.bf16.mxu1 %vm7753_vm2, %v10410_v30 }
 0x974   :  { %2548 = vmatpush1.bf16.msra.mxu0 %v8559_v61  ;;  %6653 = vmatpush3.bf16.msra.mxu1 %v8572_v28 }
 0x975   :  { %2549 = vmatprep.subr.bf16.mxu0 %v8563_v56  ;;  %6654 = vmatprep.subr.bf16.mxu1 %v10410_v30 }
 0x978   :  { %2550 = vmatpush1.bf16.msra.mxu0 %v8566_v11  ;;  %6655 = vmatpush3.bf16.msra.mxu1 %v8588_v21 }
 0x979   :  { %2551 = vmatprep.subr.bf16.mxu0 %v8570_v48  ;;  %6656 = vmatprep.subr.bf16.mxu1 %v10410_v30 }
 0x97c   :  { %2552 = vmatpush1.bf16.msra.mxu0 %v8575_v63  ;;  %6657 = vmatpush3.bf16.msra.mxu1 %v8604_v29 }
 0x97d   :  { %2553 = vmatprep.subr.bf16.mxu0 %v8579_v7  ;;  %6658 = vmatprep.subr.bf16.mxu1 %v10410_v30 }
 0x980   :  { %2554 = vmatpush1.bf16.msra.mxu0 %v8582_v53  ;;  %6659 = vmatpush3.bf16.msra.mxu1 %v8613_v47 }
 0x981   :  { %2555 = vmatprep.subr.bf16.mxu0 %v8586_v15  ;;  %6660 = vmatprep.subr.bf16.mxu1 %v10410_v30 }
 0x984   :  { %2556 = vmatpush1.bf16.msra.mxu0 %v8591_v25  ;;  %6661 = vmatpush3.bf16.msra.mxu1 %v8617_v4 }
 0x985   :  { %2557 = vmatprep.subr.bf16.mxu0 %v8595_v49  ;;  %6662 = vmatprep.subr.bf16.mxu1 %v10410_v30 }
 0x988   :  { %2558 = vmatpush1.bf16.msra.mxu0 %v8598_v8  ;;  %6663 = vmatpush3.bf16.msra.mxu1 %v8620_v62 }
 0x989   :  { %2559 = vmatprep.subr.bf16.mxu0 %v8602_v13  ;;  %6664 = vmatprep.subr.bf16.mxu1 %v10410_v30 }
 0x98c   :  { %2560 = vmatpush1.bf16.msra.mxu0 %v8607_v27  ;;  %6665 = vmatpush3.bf16.msra.mxu1 %v8624_v32 }
 0x98d   :  { %2694 = vmatprep.subr.bf16.mxu0 %v8548_v37  ;;  %6670 = vmatprep.subr.bf16.mxu1 %v10410_v30 }
 0xa2f   :  { %v2430_v39 = vpop.f32.mrf.mxu0  ;;  %v2473_v51 = vpop.f32.mrf.mxu1 }
 0xa30   :  { %v2486_v55 = vadd.f32 %v2430_v39, %v1948_v17 }
 0xa31   :  { %v2432_v16 = vpop.f32.mrf.mxu0  ;;  %v6648_v54 = vpop.f32.mrf.mxu1 }
 0xa32   :  { %v5884_v31 = vmul.f32 -1.442695, %v2486_v55  ;;  %v2500_v5 = vadd.f32 %v2432_v16, %v1950_v26 }
 0xa33   :  { %v2434_v6 = vpop.f32.mrf.mxu0  ;;  %v2476_v60 = vpop.f32.mrf.mxu1 }
 0xa34   :  { %7316 = vpow2.f32 %v5884_v31  ;;  %v2487_v58 = vadd.f32 %v2434_v6, %v1952_v34  ;;  %v5886_v18 = vmul.f32 -1.442695, %v2500_v5  ;;  %v2514_v34 = vadd.f32 %v8791_v24, %v2473_v51 }
 0xa35   :  { %v6649_v23 = vpop.f32.mrf.mxu1  ;;  %v2436_v9 = vpop.f32.mrf.mxu0 }
 0xa36   :  { %v5885_v59 = vmul.f32 -1.442695, %v2487_v58  ;;  %v2501_v12 = vadd.f32 %v2436_v9, %v1954_v3  ;;  %v2515_v23 = vadd.f32 %v8791_v24, %v2476_v60 }
 0xa38   :  { %7318 = vpow2.f32 %v5885_v59  ;;  %v5887_v44 = vmul.f32 -1.442695, %v2501_v12  ;;  %v2062_v59 = vadd.f32 %v8724_v41, %v8795_v40 }
 0xa39   :  { %7320 = vpow2.f32 %v5886_v18 }
 0xa3a   :  { %7322 = vpow2.f32 %v5887_v44 }
 0xa41   :  { %v7317_v20 = vpop.eup %7316 }
 0xa42   :  { %v2494_v17 = vadd.f32 1.0, %v7317_v20 }
 0xa44   :  { %7324 = vrcp.f32 %v2494_v17 }
 0xa45   :  { %v7319_v39 = vpop.eup %7318 }
 0xa46   :  { %v2495_v10 = vadd.f32 1.0, %v7319_v39  ;;  %v7321_v55 = vpop.eup %7320 }
 0xa47   :  { %v7323_v54 = vpop.eup %7322  ;;  %v2508_v16 = vadd.f32 1.0, %v7321_v55 }
 0xa48   :  { %7326 = vrcp.f32 %v2495_v10  ;;  %v2509_v6 = vadd.f32 1.0, %v7323_v54 }
 0xa49   :  { %7328 = vrcp.f32 %v2508_v16 }
 0xa4a   :  { %7330 = vrcp.f32 %v2509_v6 }
 0xa51   :  { %v7325_v31 = vpop.eup %7324 }
 0xa52   :  { %v2516_v26 = vmul.f32 %v7325_v31, %v2514_v34 }
 0xa54   :  { %v2518_v58 = vadd.f32 %v2516_v26, %v2059_v22  ;;  %v1962_v22 = vadd.f32 %v8704_v52, %v8773_v50 }
 0xa55   :  { %v7327_v5 = vpop.eup %7326 }
 0xa56   :  { %7332 = vtanh.f32 %v2518_v58  ;;  %v2517_v9 = vmul.f32 %v7327_v5, %v2515_v23  ;;  %v7329_v51 = vpop.eup %7328  ;;  %v1960_v5 = vadd.f32 %v8702_v42, %v8785_v14 }
 0xa57   :  { %v7331_v12 = vpop.eup %7330  ;;  %v2522_v18 = vsub.f32 1.0, %v7329_v51  ;;  %v2526_v19 = vmul.f32 %v7329_v51, %v8802_v36  ;;  %v1958_v36 = vadd.f32 %v8700_v38, %v8773_v50 }
 0xa58   :  { %v2519_v3 = vadd.f32 %v2517_v9, %v2062_v59  ;;  %v2523_v17 = vsub.f32 1.0, %v7331_v12  ;;  %v2527_v55 = vmul.f32 %v7331_v12, %v8804_v45  ;;  %v1964_v12 = vadd.f32 %v8706_v33, %v8785_v14 }
 0xa59   :  { %v2067_v33 = vadd.f32 %v8736_v0, %v8795_v40 }
 0xa5a   :  { %7334 = vtanh.f32 %v2519_v3 }
 0xa63   :  { %v7333_v44 = vpop.eup %7332 }
 0xa64   :  { %v2524_v20 = vmul.f32 %v7333_v44, %v2522_v18 }
 0xa66   :  { %v8858_v39 = vadd.f32 %v2526_v19, %v2524_v20 }
 0xa67   :  { %v7335_v60 = vpop.eup %7334 }
 0xa68   :  { %v2525_v10 = vmul.f32 %v7335_v60, %v2523_v17 }
 0xa6a   :  { %v8861_v54 = vadd.f32 %v2527_v55, %v2525_v10 }
 0xa6c   :  { %v6048_v41 = vpack.c.bf16 %v8861_v54, %v8858_v39 }
 0xa6e   :  { %6049 = vst [vmem:[#allocation2 + $0x8] sm:$0xff] %v6048_v41   ;;  %2578 = vmatmul.mubr.bf16.vlgmr.msra.gmra.mxu0 %v6048_v41  ;;  %6667 = vmatmul.mubr.bf16.vlgmr.msra.gmra.mxu1 %v6048_v41 }
 0xa6f   :  { %2695 = vmatpush1.bf16.msra.mxu0 %v8550_v46  ;;  %6671 = vmatpush3.bf16.msra.mxu1 %v8556_v43 }
 0xa70   :  { %2696 = vmatprep.subr.bf16.mxu0 %v8554_v35  ;;  %6672 = vmatprep.subr.bf16.mxu1 %v10410_v30 }
 0xa71   :  { %2726 = vmatprep.mubr.bf16.mxu0 %v10411_v2  ;;  %6686 = vmatprep.mubr.msk.bf16.mxu1 %vm7753_vm2, %v10410_v30 }
 0xa73   :  { %2697 = vmatpush1.bf16.msra.mxu0 %v8559_v61  ;;  %6673 = vmatpush3.bf16.msra.mxu1 %v8572_v28 }
 0xa74   :  { %2698 = vmatprep.subr.bf16.mxu0 %v8563_v56  ;;  %6674 = vmatprep.subr.bf16.mxu1 %v10410_v30 }
 0xa77   :  { %2699 = vmatpush1.bf16.msra.mxu0 %v8566_v11  ;;  %6675 = vmatpush3.bf16.msra.mxu1 %v8588_v21 }
 0xa78   :  { %2700 = vmatprep.subr.bf16.mxu0 %v8570_v48  ;;  %6676 = vmatprep.subr.bf16.mxu1 %v10410_v30 }
 0xa7b   :  { %2701 = vmatpush1.bf16.msra.mxu0 %v8575_v63  ;;  %6677 = vmatpush3.bf16.msra.mxu1 %v8604_v29 }
 0xa7c   :  { %2702 = vmatprep.subr.bf16.mxu0 %v8579_v7  ;;  %6678 = vmatprep.subr.bf16.mxu1 %v10410_v30 }
 0xa7f   :  { %2703 = vmatpush1.bf16.msra.mxu0 %v8582_v53  ;;  %6679 = vmatpush3.bf16.msra.mxu1 %v8613_v47 }
 0xa80   :  { %2704 = vmatprep.subr.bf16.mxu0 %v8586_v15  ;;  %6680 = vmatprep.subr.bf16.mxu1 %v10410_v30 }
 0xa83   :  { %2705 = vmatpush1.bf16.msra.mxu0 %v8591_v25  ;;  %6681 = vmatpush3.bf16.msra.mxu1 %v8617_v4 }
 0xa84   :  { %2706 = vmatprep.subr.bf16.mxu0 %v8595_v49  ;;  %6682 = vmatprep.subr.bf16.mxu1 %v10410_v30 }
 0xa87   :  { %2707 = vmatpush1.bf16.msra.mxu0 %v8598_v8  ;;  %6683 = vmatpush3.bf16.msra.mxu1 %v8620_v62 }
 0xa88   :  { %2708 = vmatprep.subr.bf16.mxu0 %v8602_v13  ;;  %6684 = vmatprep.subr.bf16.mxu1 %v10410_v30 }
 0xa8b   :  { %2709 = vmatpush1.bf16.msra.mxu0 %v8607_v27  ;;  %6685 = vmatpush3.bf16.msra.mxu1 %v8624_v32 }
 0xa8c   :  { %2843 = vmatprep.subr.bf16.mxu0 %v8548_v37  ;;  %6690 = vmatprep.subr.bf16.mxu1 %v10410_v30 }
 0xb2e   :  { %v2579_v45 = vpop.f32.mrf.mxu0  ;;  %v2622_v16 = vpop.f32.mrf.mxu1 }
 0xb2f   :  { %v2635_v34 = vadd.f32 %v2579_v45, %v1958_v36  ;;  %v2663_v41 = vadd.f32 %v8791_v24, %v2622_v16 }
 0xb30   :  { %v2581_v31 = vpop.f32.mrf.mxu0  ;;  %v6668_v6 = vpop.f32.mrf.mxu1 }
 0xb31   :  { %v5890_v26 = vmul.f32 -1.442695, %v2635_v34  ;;  %v2649_v3 = vadd.f32 %v2581_v31, %v1960_v5 }
 0xb32   :  { %v2583_v58 = vpop.f32.mrf.mxu0  ;;  %v2625_v23 = vpop.f32.mrf.mxu1 }
 0xb33   :  { %7336 = vpow2.f32 %v5890_v26  ;;  %v2636_v59 = vadd.f32 %v2583_v58, %v1962_v22  ;;  %v5892_v44 = vmul.f32 -1.442695, %v2649_v3  ;;  %v2664_v6 = vadd.f32 %v8791_v24, %v2625_v23 }
 0xb34   :  { %v6669_v9 = vpop.f32.mrf.mxu1  ;;  %v2585_v38 = vpop.f32.mrf.mxu0  ;;  %v2070_v26 = vadd.f32 %v8744_v57, %v8795_v40 }
 0xb35   :  { %v5891_v51 = vmul.f32 -1.442695, %v2636_v59  ;;  %v2650_v18 = vadd.f32 %v2585_v38, %v1964_v12 }
 0xb37   :  { %7338 = vpow2.f32 %v5891_v51  ;;  %v5893_v20 = vmul.f32 -1.442695, %v2650_v18 }
 0xb38   :  { %7340 = vpow2.f32 %v5892_v44 }
 0xb39   :  { %7342 = vpow2.f32 %v5893_v20 }
 0xb40   :  { %v7337_v52 = vpop.eup %7336 }
 0xb41   :  { %v2643_v19 = vadd.f32 1.0, %v7337_v52 }
 0xb43   :  { %7344 = vrcp.f32 %v2643_v19 }
 0xb44   :  { %v7339_v17 = vpop.eup %7338 }
 0xb45   :  { %v2644_v42 = vadd.f32 1.0, %v7339_v17  ;;  %v7341_v60 = vpop.eup %7340 }
 0xb46   :  { %v7343_v10 = vpop.eup %7342  ;;  %v2657_v55 = vadd.f32 1.0, %v7341_v60 }
 0xb47   :  { %7346 = vrcp.f32 %v2644_v42  ;;  %v2658_v45 = vadd.f32 1.0, %v7343_v10  ;;  %v10474_v10 = vld [vmem:[#allocation31_spill] sm:$0xff] }
 0xb48   :  { %7348 = vrcp.f32 %v2657_v55  ;;  %v1972_v55 = vadd.f32 %v10474_v10, %v8773_v50 }
 0xb49   :  { %7350 = vrcp.f32 %v2658_v45 }
 0xb50   :  { %v7345_v36 = vpop.eup %7344 }
 0xb51   :  { %v2665_v34 = vmul.f32 %v7345_v36, %v2663_v41 }
 0xb53   :  { %v2667_v31 = vadd.f32 %v2665_v34, %v2067_v33  ;;  %v10475_v33 = vld [vmem:[#allocation29_spill] sm:$0xff] }
 0xb54   :  { %v7347_v22 = vpop.eup %7346  ;;  %v1970_v34 = vadd.f32 %v10475_v33, %v8785_v14 }
 0xb55   :  { %7352 = vtanh.f32 %v2667_v31  ;;  %v2666_v58 = vmul.f32 %v7347_v22, %v2664_v6  ;;  %v7349_v16 = vpop.eup %7348 }
 0xb56   :  { %v7351_v59 = vpop.eup %7350  ;;  %v2671_v9 = vsub.f32 1.0, %v7349_v16  ;;  %v2675_v0 = vmul.f32 %v7349_v16, %v8858_v39  ;;  %v10473_v39 = vld [vmem:[#allocation30_spill] sm:$0xff] }
 0xb57   :  { %v2668_v5 = vadd.f32 %v2666_v58, %v2070_v26  ;;  %v2672_v38 = vsub.f32 1.0, %v7351_v59  ;;  %v2676_v44 = vmul.f32 %v7351_v59, %v8861_v54  ;;  %v1968_v54 = vadd.f32 %v10473_v39, %v8773_v50 }
 0xb59   :  { %7354 = vtanh.f32 %v2668_v5  ;;  %v10476_v5 = vld [vmem:[#allocation21_spill] sm:$0xff] }
 0xb5a   :  { %v1974_v16 = vadd.f32 %v10476_v5, %v8785_v14 }
 0xb62   :  { %v7353_v3 = vpop.eup %7352 }
 0xb63   :  { %v2673_v51 = vmul.f32 %v7353_v3, %v2671_v9 }
 0xb65   :  { %v8915_v12 = vadd.f32 %v2675_v0, %v2673_v51 }
 0xb66   :  { %v7355_v23 = vpop.eup %7354 }
 0xb67   :  { %v2674_v18 = vmul.f32 %v7355_v23, %v2672_v38 }
 0xb69   :  { %v8918_v20 = vadd.f32 %v2676_v44, %v2674_v18 }
 0xb6b   :  { %v6053_v57 = vpack.c.bf16 %v8918_v20, %v8915_v12 }
 0xb6d   :  { %6054 = vst [vmem:[#allocation2 + $0x10] sm:$0xff] %v6053_v57   ;;  %2727 = vmatmul.mubr.bf16.vlgmr.msra.gmra.mxu0 %v6053_v57  ;;  %6687 = vmatmul.mubr.bf16.vlgmr.msra.gmra.mxu1 %v6053_v57 }
 0xb6e   :  { %2844 = vmatpush1.bf16.msra.mxu0 %v8550_v46  ;;  %6691 = vmatpush3.bf16.msra.mxu1 %v8556_v43 }
 0xb6f   :  { %2845 = vmatprep.subr.bf16.mxu0 %v8554_v35  ;;  %6692 = vmatprep.subr.bf16.mxu1 %v10410_v30 }
 0xb70   :  { %2875 = vmatprep.mubr.bf16.mxu0 %v10411_v2  ;;  %6706 = vmatprep.mubr.msk.bf16.mxu1 %vm7753_vm2, %v10410_v30 }
 0xb72   :  { %2846 = vmatpush1.bf16.msra.mxu0 %v8559_v61  ;;  %6693 = vmatpush3.bf16.msra.mxu1 %v8572_v28 }
 0xb73   :  { %2847 = vmatprep.subr.bf16.mxu0 %v8563_v56  ;;  %6694 = vmatprep.subr.bf16.mxu1 %v10410_v30 }
 0xb76   :  { %2848 = vmatpush1.bf16.msra.mxu0 %v8566_v11  ;;  %6695 = vmatpush3.bf16.msra.mxu1 %v8588_v21 }
 0xb77   :  { %2849 = vmatprep.subr.bf16.mxu0 %v8570_v48  ;;  %6696 = vmatprep.subr.bf16.mxu1 %v10410_v30 }
 0xb7a   :  { %2850 = vmatpush1.bf16.msra.mxu0 %v8575_v63  ;;  %6697 = vmatpush3.bf16.msra.mxu1 %v8604_v29 }
 0xb7b   :  { %2851 = vmatprep.subr.bf16.mxu0 %v8579_v7  ;;  %6698 = vmatprep.subr.bf16.mxu1 %v10410_v30 }
 0xb7e   :  { %2852 = vmatpush1.bf16.msra.mxu0 %v8582_v53  ;;  %6699 = vmatpush3.bf16.msra.mxu1 %v8613_v47 }
 0xb7f   :  { %2853 = vmatprep.subr.bf16.mxu0 %v8586_v15  ;;  %6700 = vmatprep.subr.bf16.mxu1 %v10410_v30 }
 0xb82   :  { %2854 = vmatpush1.bf16.msra.mxu0 %v8591_v25  ;;  %6701 = vmatpush3.bf16.msra.mxu1 %v8617_v4 }
 0xb83   :  { %2855 = vmatprep.subr.bf16.mxu0 %v8595_v49  ;;  %6702 = vmatprep.subr.bf16.mxu1 %v10410_v30 }
 0xb86   :  { %2856 = vmatpush1.bf16.msra.mxu0 %v8598_v8  ;;  %6703 = vmatpush3.bf16.msra.mxu1 %v8620_v62 }
 0xb87   :  { %2857 = vmatprep.subr.bf16.mxu0 %v8602_v13  ;;  %6704 = vmatprep.subr.bf16.mxu1 %v10410_v30 }
 0xb8a   :  { %2858 = vmatpush1.bf16.msra.mxu0 %v8607_v27  ;;  %6705 = vmatpush3.bf16.msra.mxu1 %v8624_v32 }
 0xb8b   :  { %2992 = vmatprep.subr.bf16.mxu0 %v8548_v37  ;;  %6710 = vmatprep.subr.bf16.mxu1 %v10410_v30 }
 0xc2d   :  { %v2728_v52 = vpop.f32.mrf.mxu0  ;;  %v2771_v19 = vpop.f32.mrf.mxu1 }
 0xc2e   :  { %v2784_v17 = vadd.f32 %v2728_v52, %v1968_v54  ;;  %v2812_v39 = vadd.f32 %v8791_v24, %v2771_v19 }
 0xc2f   :  { %v2730_v42 = vpop.f32.mrf.mxu0  ;;  %v6688_v60 = vpop.f32.mrf.mxu1 }
 0xc30   :  { %v5896_v41 = vmul.f32 -1.442695, %v2784_v17  ;;  %v2798_v22 = vadd.f32 %v2730_v42, %v1970_v34  ;;  %v10477_v17 = vld [vmem:[#allocation35_spill] sm:$0xff] }
 0xc31   :  { %v2732_v36 = vpop.f32.mrf.mxu0  ;;  %v2774_v45 = vpop.f32.mrf.mxu1  ;;  %v2075_v42 = vadd.f32 %v10477_v17, %v8795_v40 }
 0xc32   :  { %7356 = vpow2.f32 %v5896_v41  ;;  %v2785_v31 = vadd.f32 %v2732_v36, %v1972_v55  ;;  %v5898_v9 = vmul.f32 -1.442695, %v2798_v22  ;;  %v2813_v55 = vadd.f32 %v8791_v24, %v2774_v45  ;;  %v10478_v36 = vld [vmem:[#allocation36_spill] sm:$0xff] }
 0xc33   :  { %v6689_v6 = vpop.f32.mrf.mxu1  ;;  %v2734_v58 = vpop.f32.mrf.mxu0  ;;  %v2078_v33 = vadd.f32 %v10478_v36, %v8795_v40 }
 0xc34   :  { %v5897_v26 = vmul.f32 -1.442695, %v2785_v31  ;;  %v2799_v59 = vadd.f32 %v2734_v58, %v1974_v16 }
 0xc36   :  { %7358 = vpow2.f32 %v5897_v26  ;;  %v5899_v3 = vmul.f32 -1.442695, %v2799_v59 }
 0xc37   :  { %7360 = vpow2.f32 %v5898_v9 }
 0xc38   :  { %7362 = vpow2.f32 %v5899_v3 }
 0xc3f   :  { %v7357_v51 = vpop.eup %7356 }
 0xc40   :  { %v2792_v0 = vadd.f32 1.0, %v7357_v51 }
 0xc42   :  { %7364 = vrcp.f32 %v2792_v0 }
 0xc43   :  { %v7359_v38 = vpop.eup %7358 }
 0xc44   :  { %v2793_v23 = vadd.f32 1.0, %v7359_v38  ;;  %v7361_v18 = vpop.eup %7360 }
 0xc45   :  { %v7363_v44 = vpop.eup %7362  ;;  %v2806_v57 = vadd.f32 1.0, %v7361_v18 }
 0xc46   :  { %7366 = vrcp.f32 %v2793_v23  ;;  %v2807_v52 = vadd.f32 1.0, %v7363_v44 }
 0xc47   :  { %7368 = vrcp.f32 %v2806_v57 }
 0xc48   :  { %7370 = vrcp.f32 %v2807_v52 }
 0xc4f   :  { %v7365_v54 = vpop.eup %7364 }
 0xc50   :  { %v2814_v60 = vmul.f32 %v7365_v54, %v2812_v39  ;;  %v10480_v39 = vld [vmem:[#allocation34_spill] sm:$0xff] }
 0xc51   :  { %v1982_v54 = vadd.f32 %v10480_v39, %v8773_v50 }
 0xc52   :  { %v2816_v10 = vadd.f32 %v2814_v60, %v2075_v42  ;;  %v10481_v60 = vld [vmem:[#allocation32_spill] sm:$0xff] }
 0xc53   :  { %v7367_v41 = vpop.eup %7366 }
 0xc54   :  { %7372 = vtanh.f32 %v2816_v10  ;;  %v2815_v34 = vmul.f32 %v7367_v41, %v2813_v55  ;;  %v7369_v19 = vpop.eup %7368  ;;  %v1980_v10 = vadd.f32 %v10481_v60, %v8785_v14 }
 0xc55   :  { %v7371_v6 = vpop.eup %7370  ;;  %v2820_v22 = vsub.f32 1.0, %v7369_v19  ;;  %v2824_v5 = vmul.f32 %v7369_v19, %v8915_v12  ;;  %v10479_v12 = vld [vmem:[#allocation23_spill] sm:$0xff] }
 0xc56   :  { %v2817_v31 = vadd.f32 %v2815_v34, %v2078_v33  ;;  %v2821_v16 = vsub.f32 1.0, %v7371_v6  ;;  %v2825_v3 = vmul.f32 %v7371_v6, %v8918_v20  ;;  %v1978_v20 = vadd.f32 %v10479_v12, %v8773_v50 }
 0xc58   :  { %7374 = vtanh.f32 %v2817_v31  ;;  %v10482_v31 = vld [vmem:[#allocation33_spill] sm:$0xff] }
 0xc59   :  { %v1984_v19 = vadd.f32 %v10482_v31, %v8785_v14 }
 0xc61   :  { %v7373_v26 = vpop.eup %7372 }
 0xc62   :  { %v2822_v58 = vmul.f32 %v7373_v26, %v2820_v22 }
 0xc64   :  { %v8972_v59 = vadd.f32 %v2824_v5, %v2822_v58 }
 0xc65   :  { %v7375_v45 = vpop.eup %7374 }
 0xc66   :  { %v2823_v9 = vmul.f32 %v7375_v45, %v2821_v16 }
 0xc68   :  { %v8975_v51 = vadd.f32 %v2825_v3, %v2823_v9 }
 0xc6a   :  { %v6058_v0 = vpack.c.bf16 %v8975_v51, %v8972_v59 }
 0xc6c   :  { %6059 = vst [vmem:[#allocation2 + $0x18] sm:$0xff] %v6058_v0   ;;  %2876 = vmatmul.mubr.bf16.vlgmr.msra.gmra.mxu0 %v6058_v0  ;;  %6707 = vmatmul.mubr.bf16.vlgmr.msra.gmra.mxu1 %v6058_v0 }
 0xc6d   :  { %2993 = vmatpush1.bf16.msra.mxu0 %v8550_v46  ;;  %6711 = vmatpush3.bf16.msra.mxu1 %v8556_v43 }
 0xc6e   :  { %2994 = vmatprep.subr.bf16.mxu0 %v8554_v35  ;;  %6712 = vmatprep.subr.bf16.mxu1 %v10410_v30 }
 0xc6f   :  { %3024 = vmatprep.mubr.bf16.mxu0 %v10411_v2  ;;  %6726 = vmatprep.mubr.msk.bf16.mxu1 %vm7753_vm2, %v10410_v30 }
 0xc71   :  { %2995 = vmatpush1.bf16.msra.mxu0 %v8559_v61  ;;  %6713 = vmatpush3.bf16.msra.mxu1 %v8572_v28 }
 0xc72   :  { %2996 = vmatprep.subr.bf16.mxu0 %v8563_v56  ;;  %6714 = vmatprep.subr.bf16.mxu1 %v10410_v30 }
 0xc75   :  { %2997 = vmatpush1.bf16.msra.mxu0 %v8566_v11  ;;  %6715 = vmatpush3.bf16.msra.mxu1 %v8588_v21 }
 0xc76   :  { %2998 = vmatprep.subr.bf16.mxu0 %v8570_v48  ;;  %6716 = vmatprep.subr.bf16.mxu1 %v10410_v30 }
 0xc79   :  { %2999 = vmatpush1.bf16.msra.mxu0 %v8575_v63  ;;  %6717 = vmatpush3.bf16.msra.mxu1 %v8604_v29 }
 0xc7a   :  { %3000 = vmatprep.subr.bf16.mxu0 %v8579_v7  ;;  %6718 = vmatprep.subr.bf16.mxu1 %v10410_v30 }
 0xc7d   :  { %3001 = vmatpush1.bf16.msra.mxu0 %v8582_v53  ;;  %6719 = vmatpush3.bf16.msra.mxu1 %v8613_v47 }
 0xc7e   :  { %3002 = vmatprep.subr.bf16.mxu0 %v8586_v15  ;;  %6720 = vmatprep.subr.bf16.mxu1 %v10410_v30 }
 0xc81   :  { %3003 = vmatpush1.bf16.msra.mxu0 %v8591_v25  ;;  %6721 = vmatpush3.bf16.msra.mxu1 %v8617_v4 }
 0xc82   :  { %3004 = vmatprep.subr.bf16.mxu0 %v8595_v49  ;;  %6722 = vmatprep.subr.bf16.mxu1 %v10410_v30 }
 0xc85   :  { %3005 = vmatpush1.bf16.msra.mxu0 %v8598_v8  ;;  %6723 = vmatpush3.bf16.msra.mxu1 %v8620_v62 }
 0xc86   :  { %3006 = vmatprep.subr.bf16.mxu0 %v8602_v13  ;;  %6724 = vmatprep.subr.bf16.mxu1 %v10410_v30 }
 0xc89   :  { %3007 = vmatpush1.bf16.msra.mxu0 %v8607_v27  ;;  %6725 = vmatpush3.bf16.msra.mxu1 %v8624_v32 }
 0xc8a   :  { %3141 = vmatprep.subr.bf16.mxu0 %v8548_v37  ;;  %6730 = vmatprep.subr.bf16.mxu1 %v10410_v30 }
 0xd2c   :  { %v2877_v38 = vpop.f32.mrf.mxu0  ;;  %v2920_v23 = vpop.f32.mrf.mxu1 }
 0xd2d   :  { %v2933_v18 = vadd.f32 %v2877_v38, %v1978_v20  ;;  %v2961_v12 = vadd.f32 %v8791_v24, %v2920_v23 }
 0xd2e   :  { %v2879_v44 = vpop.f32.mrf.mxu0  ;;  %v6708_v57 = vpop.f32.mrf.mxu1 }
 0xd2f   :  { %v5902_v52 = vmul.f32 -1.442695, %v2933_v18  ;;  %v2947_v36 = vadd.f32 %v2879_v44, %v1980_v10  ;;  %v10483_v18 = vld [vmem:[#allocation27_spill] sm:$0xff] }
 0xd30   :  { %v2881_v17 = vpop.f32.mrf.mxu0  ;;  %v2923_v42 = vpop.f32.mrf.mxu1  ;;  %v2083_v44 = vadd.f32 %v10483_v18, %v8795_v40 }
 0xd31   :  { %7376 = vpow2.f32 %v5902_v52  ;;  %v2934_v55 = vadd.f32 %v2881_v17, %v1982_v54  ;;  %v5904_v22 = vmul.f32 -1.442695, %v2947_v36  ;;  %v2962_v54 = vadd.f32 %v8791_v24, %v2923_v42  ;;  %v10484_v17 = vld [vmem:[#allocation43_spill] sm:$0xff] }
 0xd32   :  { %v6709_v41 = vpop.f32.mrf.mxu1  ;;  %v2883_v34 = vpop.f32.mrf.mxu0  ;;  %v2086_v60 = vadd.f32 %v10484_v17, %v8795_v40 }
 0xd33   :  { %v5903_v33 = vmul.f32 -1.442695, %v2934_v55  ;;  %v2948_v6 = vadd.f32 %v2883_v34, %v1984_v19 }
 0xd35   :  { %7378 = vpow2.f32 %v5903_v33  ;;  %v5905_v26 = vmul.f32 -1.442695, %v2948_v6 }
 0xd36   :  { %7380 = vpow2.f32 %v5904_v22 }
 0xd37   :  { %7382 = vpow2.f32 %v5905_v26 }
 0xd3e   :  { %v7377_v58 = vpop.eup %7376 }
 0xd3f   :  { %v2941_v5 = vadd.f32 1.0, %v7377_v58 }
 0xd41   :  { %7384 = vrcp.f32 %v2941_v5 }
 0xd42   :  { %v7379_v16 = vpop.eup %7378 }
 0xd43   :  { %v2942_v45 = vadd.f32 1.0, %v7379_v16  ;;  %v7381_v9 = vpop.eup %7380 }
 0xd44   :  { %v7383_v3 = vpop.eup %7382  ;;  %v2955_v0 = vadd.f32 1.0, %v7381_v9 }
 0xd45   :  { %7386 = vrcp.f32 %v2942_v45  ;;  %v2956_v38 = vadd.f32 1.0, %v7383_v3 }
 0xd46   :  { %7388 = vrcp.f32 %v2955_v0 }
 0xd47   :  { %7390 = vrcp.f32 %v2956_v38 }
 0xd4e   :  { %v7385_v20 = vpop.eup %7384 }
 0xd4f   :  { %v2963_v57 = vmul.f32 %v7385_v20, %v2961_v12  ;;  %v10486_v12 = vld [vmem:[#allocation38_spill] sm:$0xff] }
 0xd50   :  { %v1992_v20 = vadd.f32 %v10486_v12, %v8773_v50 }
 0xd51   :  { %v2965_v39 = vadd.f32 %v2963_v57, %v2083_v44  ;;  %v10487_v57 = vld [vmem:[#allocation22_spill] sm:$0xff] }
 0xd52   :  { %v7387_v52 = vpop.eup %7386 }
 0xd53   :  { %7392 = vtanh.f32 %v2965_v39  ;;  %v2964_v10 = vmul.f32 %v7387_v52, %v2962_v54  ;;  %v7389_v23 = vpop.eup %7388  ;;  %v1990_v39 = vadd.f32 %v10487_v57, %v8785_v14 }
 0xd54   :  { %v7391_v41 = vpop.eup %7390  ;;  %v2969_v36 = vsub.f32 1.0, %v7389_v23  ;;  %v2973_v31 = vmul.f32 %v7389_v23, %v8972_v59  ;;  %v10485_v59 = vld [vmem:[#allocation20_spill] sm:$0xff] }
 0xd55   :  { %v2966_v55 = vadd.f32 %v2964_v10, %v2086_v60  ;;  %v2970_v19 = vsub.f32 1.0, %v7391_v41  ;;  %v2974_v26 = vmul.f32 %v7391_v41, %v8975_v51  ;;  %v1988_v51 = vadd.f32 %v10485_v59, %v8773_v50  ;;  %v10488_v10 = vld [vmem:[#allocation37_spill] sm:$0xff] }
 0xd57   :  { %7394 = vtanh.f32 %v2966_v55  ;;  %v1994_v55 = vadd.f32 %v10488_v10, %v8785_v14 }
 0xd60   :  { %v7393_v33 = vpop.eup %7392 }
 0xd61   :  { %v2971_v34 = vmul.f32 %v7393_v33, %v2969_v36 }
 0xd63   :  { %v9029_v6 = vadd.f32 %v2973_v31, %v2971_v34 }
 0xd64   :  { %v7395_v42 = vpop.eup %7394 }
 0xd65   :  { %v2972_v22 = vmul.f32 %v7395_v42, %v2970_v19 }
 0xd67   :  { %v9032_v58 = vadd.f32 %v2974_v26, %v2972_v22 }
 0xd69   :  { %v6063_v5 = vpack.c.bf16 %v9032_v58, %v9029_v6 }
 0xd6b   :  { %6064 = vst [vmem:[#allocation2 + $0x20] sm:$0xff] %v6063_v5   ;;  %3025 = vmatmul.mubr.bf16.vlgmr.msra.gmra.mxu0 %v6063_v5  ;;  %6727 = vmatmul.mubr.bf16.vlgmr.msra.gmra.mxu1 %v6063_v5 }
 0xd6c   :  { %3142 = vmatpush1.bf16.msra.mxu0 %v8550_v46  ;;  %6731 = vmatpush3.bf16.msra.mxu1 %v8556_v43 }
 0xd6d   :  { %3143 = vmatprep.subr.bf16.mxu0 %v8554_v35  ;;  %6732 = vmatprep.subr.bf16.mxu1 %v10410_v30 }
 0xd6e   :  { %3173 = vmatprep.mubr.bf16.mxu0 %v10411_v2  ;;  %6746 = vmatprep.mubr.msk.bf16.mxu1 %vm7753_vm2, %v10410_v30 }
 0xd70   :  { %3144 = vmatpush1.bf16.msra.mxu0 %v8559_v61  ;;  %6733 = vmatpush3.bf16.msra.mxu1 %v8572_v28 }
 0xd71   :  { %3145 = vmatprep.subr.bf16.mxu0 %v8563_v56  ;;  %6734 = vmatprep.subr.bf16.mxu1 %v10410_v30 }
 0xd74   :  { %3146 = vmatpush1.bf16.msra.mxu0 %v8566_v11  ;;  %6735 = vmatpush3.bf16.msra.mxu1 %v8588_v21 }
 0xd75   :  { %3147 = vmatprep.subr.bf16.mxu0 %v8570_v48  ;;  %6736 = vmatprep.subr.bf16.mxu1 %v10410_v30 }
 0xd78   :  { %3148 = vmatpush1.bf16.msra.mxu0 %v8575_v63  ;;  %6737 = vmatpush3.bf16.msra.mxu1 %v8604_v29 }
 0xd79   :  { %3149 = vmatprep.subr.bf16.mxu0 %v8579_v7  ;;  %6738 = vmatprep.subr.bf16.mxu1 %v10410_v30 }
 0xd7c   :  { %3150 = vmatpush1.bf16.msra.mxu0 %v8582_v53  ;;  %6739 = vmatpush3.bf16.msra.mxu1 %v8613_v47 }
 0xd7d   :  { %3151 = vmatprep.subr.bf16.mxu0 %v8586_v15  ;;  %6740 = vmatprep.subr.bf16.mxu1 %v10410_v30 }
 0xd80   :  { %3152 = vmatpush1.bf16.msra.mxu0 %v8591_v25  ;;  %6741 = vmatpush3.bf16.msra.mxu1 %v8617_v4 }
 0xd81   :  { %3153 = vmatprep.subr.bf16.mxu0 %v8595_v49  ;;  %6742 = vmatprep.subr.bf16.mxu1 %v10410_v30 }
 0xd84   :  { %3154 = vmatpush1.bf16.msra.mxu0 %v8598_v8  ;;  %6743 = vmatpush3.bf16.msra.mxu1 %v8620_v62 }
 0xd85   :  { %3155 = vmatprep.subr.bf16.mxu0 %v8602_v13  ;;  %6744 = vmatprep.subr.bf16.mxu1 %v10410_v30 }
 0xd88   :  { %3156 = vmatpush1.bf16.msra.mxu0 %v8607_v27  ;;  %6745 = vmatpush3.bf16.msra.mxu1 %v8624_v32 }
 0xd89   :  { %3290 = vmatprep.subr.bf16.mxu0 %v8548_v37  ;;  %6750 = vmatprep.subr.bf16.mxu1 %v10410_v30 }
 0xe2b   :  { %v3026_v16 = vpop.f32.mrf.mxu0  ;;  %v3069_v45 = vpop.f32.mrf.mxu1 }
 0xe2c   :  { %v3082_v9 = vadd.f32 %v3026_v16, %v1988_v51  ;;  %v3110_v5 = vadd.f32 %v8791_v24, %v3069_v45  ;;  %v10489_v16 = vld [vmem:[#allocation39_spill] sm:$0xff] }
 0xe2d   :  { %v3028_v3 = vpop.f32.mrf.mxu0  ;;  %v6728_v0 = vpop.f32.mrf.mxu1 }
 0xe2e   :  { %v5908_v38 = vmul.f32 -1.442695, %v3082_v9  ;;  %v3096_v52 = vadd.f32 %v3028_v3, %v1990_v39  ;;  %v2091_v9 = vadd.f32 %v10489_v16, %v8795_v40 }
 0xe2f   :  { %v3030_v18 = vpop.f32.mrf.mxu0  ;;  %v3072_v44 = vpop.f32.mrf.mxu1 }
 0xe30   :  { %7396 = vpow2.f32 %v5908_v38  ;;  %v3083_v37 = vadd.f32 %v3030_v18, %v1992_v20  ;;  %v5910_v41 = vmul.f32 -1.442695, %v3096_v52  ;;  %v3111_v12 = vadd.f32 %v8791_v24, %v3072_v44  ;;  %v10490_v38 = vld [vmem:[#allocation42_spill] sm:$0xff] }
 0xe31   :  { %v6729_v54 = vpop.f32.mrf.mxu1  ;;  %v3032_v60 = vpop.f32.mrf.mxu0  ;;  %v2094_v18 = vadd.f32 %v10490_v38, %v8795_v40  ;;  %v10495_v38 = vld [vmem:[#allocation46_spill] sm:$0xff] }
 0xe32   :  { %v5909_v17 = vmul.f32 -1.442695, %v3083_v37  ;;  %v3097_v23 = vadd.f32 %v3032_v60, %v1994_v55 }
 0xe34   :  { %7398 = vpow2.f32 %v5909_v17  ;;  %v5911_v36 = vmul.f32 -1.442695, %v3097_v23 }
 0xe35   :  { %7400 = vpow2.f32 %v5910_v41 }
 0xe36   :  { %7402 = vpow2.f32 %v5911_v36 }
 0xe3d   :  { %v7397_v33 = vpop.eup %7396 }
 0xe3e   :  { %v3090_v34 = vadd.f32 1.0, %v7397_v33  ;;  %v10494_v33 = vld [vmem:[#allocation24_spill] sm:$0xff] }
 0xe40   :  { %7404 = vrcp.f32 %v3090_v34  ;;  %v2004_v34 = vadd.f32 %v10494_v33, %v8785_v14 }
 0xe41   :  { %v7399_v31 = vpop.eup %7398 }
 0xe42   :  { %v3091_v19 = vadd.f32 1.0, %v7399_v31  ;;  %v7401_v42 = vpop.eup %7400 }
 0xe43   :  { %v7403_v22 = vpop.eup %7402  ;;  %v3104_v26 = vadd.f32 1.0, %v7401_v42 }
 0xe44   :  { %7406 = vrcp.f32 %v3091_v19  ;;  %v3105_v51 = vadd.f32 1.0, %v7403_v22 }
 0xe45   :  { %7408 = vrcp.f32 %v3104_v26 }
 0xe46   :  { %7410 = vrcp.f32 %v3105_v51 }
 0xe4d   :  { %v7405_v59 = vpop.eup %7404 }
 0xe4e   :  { %v3112_v3 = vmul.f32 %v7405_v59, %v3110_v5 }
 0xe50   :  { %v3114_v0 = vadd.f32 %v3112_v3, %v2091_v9  ;;  %v9137_v3 = vld [vmem:[#allocation10 + $0x1] ss:$0 sm:$0xff] }
 0xe51   :  { %v7407_v20 = vpop.eup %7406 }
 0xe52   :  { %7412 = vtanh.f32 %v3114_v0  ;;  %v3113_v57 = vmul.f32 %v7407_v20, %v3111_v12  ;;  %v7409_v45 = vpop.eup %7408 }
 0xe53   :  { %v7411_v37 = vpop.eup %7410  ;;  %v3118_v54 = vsub.f32 1.0, %v7409_v45  ;;  %v3122_v60 = vmul.f32 %v7409_v45, %v9029_v6 }
 0xe54   :  { %v3115_v39 = vadd.f32 %v3113_v57, %v2094_v18  ;;  %v3119_v10 = vsub.f32 1.0, %v7411_v37  ;;  %v3123_v23 = vmul.f32 %v7411_v37, %v9032_v58  ;;  %v2099_v18 = vadd.f32 %v10495_v38, %v8795_v40 }
 0xe56   :  { %7414 = vtanh.f32 %v3115_v39 }
 0xe5f   :  { %v7413_v52 = vpop.eup %7412 }
 0xe60   :  { %v3120_v17 = vmul.f32 %v7413_v52, %v3118_v54  ;;  %v10496_v54 = vld [vmem:[#allocation50_spill] sm:$0xff] }
 0xe61   :  { %v2102_v52 = vadd.f32 %v10496_v54, %v8795_v40  ;;  %v3471_v54 = vld [vmem:[#allocation5 + $0x200] sm:$0xff] }
 0xe62   :  { %v9086_v55 = vadd.f32 %v3122_v60, %v3120_v17 }
 0xe63   :  { %v7415_v24 = vpop.eup %7414 }
 0xe64   :  { %v3121_v44 = vmul.f32 %v7415_v24, %v3119_v10 }
 0xe66   :  { %v9089_v41 = vadd.f32 %v3123_v23, %v3121_v44 }
 0xe68   :  { %v6068_v36 = vpack.c.bf16 %v9089_v41, %v9086_v55 }
 0xe6a   :  { %6069 = vst [vmem:[#allocation2 + $0x28] sm:$0xff] %v6068_v36   ;;  %3174 = vmatmul.mubr.bf16.vlgmr.msra.gmra.mxu0 %v6068_v36  ;;  %6747 = vmatmul.mubr.bf16.vlgmr.msra.gmra.mxu1 %v6068_v36 }
 0xe6b   :  { %3291 = vmatpush1.bf16.msra.mxu0 %v8550_v46  ;;  %6751 = vmatpush3.bf16.msra.mxu1 %v8556_v43  ;;  %v3498_v46 = vld [vmem:[#allocation5 + $0x2d8] sm:$0xff]  ;;  %v3499_v43 = vld [vmem:[#allocation5 + $0x2e0] sm:$0xff] }
 0xe6c   :  { %3292 = vmatprep.subr.bf16.mxu0 %v8554_v35  ;;  %6752 = vmatprep.subr.bf16.mxu1 %v10410_v30  ;;  %v3501_v35 = vld [vmem:[#allocation5 + $0x2f0] sm:$0xff] }
 0xe6d   :  { %3322 = vmatprep.mubr.bf16.mxu0 %v10411_v2  ;;  %6766 = vmatprep.mubr.msk.bf16.mxu1 %vm7753_vm2, %v10410_v30 }
 0xe6f   :  { %3293 = vmatpush1.bf16.msra.mxu0 %v8559_v61  ;;  %6753 = vmatpush3.bf16.msra.mxu1 %v8572_v28  ;;  %v3525_v61 = vpack.c.bf16 %v3501_v35, %v3498_v46 }
 0xe70   :  { %3294 = vmatprep.subr.bf16.mxu0 %v8563_v56  ;;  %6754 = vmatprep.subr.bf16.mxu1 %v10410_v30  ;;  %v3502_v56 = vld [vmem:[#allocation5 + $0x2f8] sm:$0xff] }
 0xe73   :  { %3295 = vmatpush1.bf16.msra.mxu0 %v8566_v11  ;;  %6755 = vmatpush3.bf16.msra.mxu1 %v8588_v21  ;;  %v9126_v11 = vpack.c.bf16 %v3502_v56, %v3499_v43 }
 0xe74   :  { %3296 = vmatprep.subr.bf16.mxu0 %v8570_v48  ;;  %6756 = vmatprep.subr.bf16.mxu1 %v10410_v30  ;;  %v10491_v48 = vld [vmem:[#allocation25_spill] sm:$0xff] }
 0xe75   :  { %v1998_v28 = vadd.f32 %v10491_v48, %v8773_v50 }
 0xe77   :  { %3297 = vmatpush1.bf16.msra.mxu0 %v8575_v63  ;;  %6757 = vmatpush3.bf16.msra.mxu1 %v8604_v29 }
 0xe78   :  { %3298 = vmatprep.subr.bf16.mxu0 %v8579_v7  ;;  %6758 = vmatprep.subr.bf16.mxu1 %v10410_v30 }
 0xe7b   :  { %3299 = vmatpush1.bf16.msra.mxu0 %v8582_v53  ;;  %6759 = vmatpush3.bf16.msra.mxu1 %v8613_v47 }
 0xe7c   :  { %3300 = vmatprep.subr.bf16.mxu0 %v8586_v15  ;;  %6760 = vmatprep.subr.bf16.mxu1 %v10410_v30 }
 0xe7f   :  { %3301 = vmatpush1.bf16.msra.mxu0 %v8591_v25  ;;  %6761 = vmatpush3.bf16.msra.mxu1 %v8617_v4  ;;  %v10492_v25 = vld [vmem:[#allocation41_spill] sm:$0xff] }
 0xe80   :  { %3302 = vmatprep.subr.bf16.mxu0 %v8595_v49  ;;  %6762 = vmatprep.subr.bf16.mxu1 %v10410_v30  ;;  %v2002_v49 = vadd.f32 %v10492_v25, %v8773_v50  ;;  %v3496_v25 = vld [vmem:[#allocation5 + $0x2c8] sm:$0xff] }
 0xe83   :  { %3303 = vmatpush1.bf16.msra.mxu0 %v8598_v8  ;;  %6763 = vmatpush3.bf16.msra.mxu1 %v8620_v62 }
 0xe84   :  { %3304 = vmatprep.subr.bf16.mxu0 %v8602_v13  ;;  %6764 = vmatprep.subr.bf16.mxu1 %v10410_v30 }
 0xe87   :  { %3305 = vmatpush1.bf16.msra.mxu0 %v8607_v27  ;;  %6765 = vmatpush3.bf16.msra.mxu1 %v8624_v32  ;;  %v10493_v27 = vld [vmem:[#allocation40_spill] sm:$0xff] }
 0xe88   :  { %3593 = vmatprep.subr.bf16.mxu0 %v3525_v61  ;;  %6770 = vmatprep.subr.bf16.mxu1 %v9126_v11  ;;  %v2000_v47 = vadd.f32 %v10493_v27, %v8785_v14  ;;  %v3486_v27 = vld [vmem:[#allocation5 + $0x278] sm:$0xff] }
 0xf2a   :  { %v3175_v63 = vpop.f32.mrf.mxu0  ;;  %v3218_v7 = vpop.f32.mrf.mxu1 }
 0xf2b   :  { %v3231_v53 = vadd.f32 %v3175_v63, %v1998_v28  ;;  %v3259_v0 = vadd.f32 %v9137_v3, %v3218_v7  ;;  %v3497_v28 = vld [vmem:[#allocation5 + $0x2d0] sm:$0xff]  ;;  %v3500_v63 = vld [vmem:[#allocation5 + $0x2e8] sm:$0xff] }
 0xf2c   :  { %v3177_v15 = vpop.f32.mrf.mxu0  ;;  %v6748_v21 = vpop.f32.mrf.mxu1  ;;  %v3492_v7 = vld [vmem:[#allocation5 + $0x2a8] sm:$0xff] }
 0xf2d   :  { %v5914_v8 = vmul.f32 -1.442695, %v3231_v53  ;;  %v3245_v32 = vadd.f32 %v3177_v15, %v2000_v47  ;;  %v3495_v53 = vld [vmem:[#allocation5 + $0x2c0] sm:$0xff]  ;;  %v3493_v21 = vld [vmem:[#allocation5 + $0x2b0] sm:$0xff] }
 0xf2e   :  { %v3179_v13 = vpop.f32.mrf.mxu0  ;;  %v3221_v29 = vpop.f32.mrf.mxu1  ;;  %v3523_v47 = vpack.c.bf16 %v3496_v25, %v3493_v21  ;;  %v3459_v21 = vld [vmem:[#allocation5 + $0x1a0] sm:$0xff]  ;;  %v3457_v25 = vld [vmem:[#allocation5 + $0x190] sm:$0xff] }
 0xf2f   :  { %7416 = vpow2.f32 %v5914_v8  ;;  %v3232_v4 = vadd.f32 %v3179_v13, %v2002_v49  ;;  %v5916_v19 = vmul.f32 -1.442695, %v3245_v32  ;;  %v3260_v45 = vadd.f32 %v9137_v3, %v3221_v29  ;;  %v3491_v13 = vld [vmem:[#allocation5 + $0x2a0] sm:$0xff]  ;;  %v3494_v29 = vld [vmem:[#allocation5 + $0x2b8] sm:$0xff] }
 0xf30   :  { %v6749_v62 = vpop.f32.mrf.mxu1  ;;  %v3181_v58 = vpop.f32.mrf.mxu0  ;;  %v3524_v49 = vpack.c.bf16 %v3500_v63, %v3497_v28  ;;  %v9153_v32 = vld [vmem:[#allocation2] sm:$0xff]   ;;  %v3461_v63 = vld [vmem:[#allocation5 + $0x1b0] sm:$0xff] }
 0xf31   :  { %v5915_v6 = vmul.f32 -1.442695, %v3232_v4  ;;  %v3246_v31 = vadd.f32 %v3181_v58, %v2004_v34  ;;  %v3489_v4 = vld [vmem:[#allocation5 + $0x290] sm:$0xff]  ;;  %v3487_v62 = vld [vmem:[#allocation5 + $0x280] sm:$0xff] }
 0xf32   :  { %v3519_v58 = vpack.c.bf16 %v3489_v4, %v3486_v27  ;;  %v3485_v34 = vld [vmem:[#allocation5 + $0x270] sm:$0xff]  ;;  %v3458_v27 = vld [vmem:[#allocation5 + $0x198] sm:$0xff]  ;;  %v7129_v4 = vld [vmem:[#allocation2 + $0x8] sm:$0xff]  }
 0xf33   :  { %7418 = vpow2.f32 %v5915_v6  ;;  %v5917_v42 = vmul.f32 -1.442695, %v3246_v31  ;;  %v3521_v6 = vpack.c.bf16 %v3494_v29, %v3491_v13  ;;  %v3488_v31 = vld [vmem:[#allocation5 + $0x288] sm:$0xff]  ;;  %v3455_v29 = vld [vmem:[#allocation5 + $0x180] sm:$0xff] }
 0xf34   :  { %7420 = vpow2.f32 %v5916_v19  ;;  %v3480_v19 = vld [vmem:[#allocation5 + $0x248] sm:$0xff] }
 0xf35   :  { %7422 = vpow2.f32 %v5917_v42  ;;  %v3483_v42 = vld [vmem:[#allocation5 + $0x260] sm:$0xff] }
 0xf3c   :  { %v7417_v22 = vpop.eup %7416 }
 0xf3d   :  { %v3239_v26 = vadd.f32 1.0, %v7417_v22  ;;  %v3481_v22 = vld [vmem:[#allocation5 + $0x250] sm:$0xff] }
 0xf3f   :  { %7424 = vrcp.f32 %v3239_v26  ;;  %v3484_v26 = vld [vmem:[#allocation5 + $0x268] sm:$0xff] }
 0xf40   :  { %v7419_v5 = vpop.eup %7418 }
 0xf41   :  { %v3240_v59 = vadd.f32 1.0, %v7419_v5  ;;  %v7421_v51 = vpop.eup %7420  ;;  %v3518_v5 = vpack.c.bf16 %v3488_v31, %v3485_v34  ;;  %v3898_v34 = vld [vmem:[#allocation7 + $0x470] sm:$0xff] }
 0xf42   :  { %v7423_v16 = vpop.eup %7422  ;;  %v3253_v9 = vadd.f32 1.0, %v7421_v51  ;;  %v3516_v51 = vpack.c.bf16 %v3483_v42, %v3480_v19  ;;  %v3894_v19 = vld [vmem:[#allocation7 + $0x450] sm:$0xff]  ;;  %v3897_v42 = vld [vmem:[#allocation7 + $0x468] sm:$0xff] }
 0xf43   :  { %7426 = vrcp.f32 %v3240_v59  ;;  %v3254_v20 = vadd.f32 1.0, %v7423_v16  ;;  %v3479_v59 = vld [vmem:[#allocation5 + $0x240] sm:$0xff]  ;;  %v3517_v16 = vpack.c.bf16 %v3484_v26, %v3481_v22  ;;  %v9169_v22 = vpack.c.bf16 %v3897_v42, %v3894_v19  ;;  %v3889_v26 = vld [vmem:[#allocation7 + $0x428] sm:$0xff]  ;;  %v3855_v42 = vld [vmem:[#allocation7 + $0x318] sm:$0xff] }
 0xf44   :  { %7428 = vrcp.f32 %v3253_v9  ;;  %v3474_v9 = vld [vmem:[#allocation5 + $0x218] sm:$0xff] }
 0xf45   :  { %7430 = vrcp.f32 %v3254_v20  ;;  %v3478_v20 = vld [vmem:[#allocation5 + $0x238] sm:$0xff] }
 0xf4c   :  { %v7425_v12 = vpop.eup %7424 }
 0xf4d   :  { %v3261_v57 = vmul.f32 %v7425_v12, %v3259_v0  ;;  %v3477_v0 = vld [vmem:[#allocation5 + $0x230] sm:$0xff]  ;;  %v3475_v12 = vld [vmem:[#allocation5 + $0x220] sm:$0xff] }
 0xf4f   :  { %v3263_v39 = vadd.f32 %v3261_v57, %v2099_v18  ;;  %v3513_v18 = vpack.c.bf16 %v3477_v0, %v3474_v9  ;;  %v3514_v57 = vpack.c.bf16 %v3478_v20, %v3475_v12  ;;  %v3891_v0 = vld [vmem:[#allocation7 + $0x438] sm:$0xff] }
 0xf50   :  { %v7427_v37 = vpop.eup %7426  ;;  %v3883_v20 = vld [vmem:[#allocation7 + $0x3f8] sm:$0xff] }
 0xf51   :  { %7432 = vtanh.f32 %v3263_v39  ;;  %v3262_v17 = vmul.f32 %v7427_v37, %v3260_v45  ;;  %v7429_v10 = vpop.eup %7428  ;;  %v3473_v39 = vld [vmem:[#allocation5 + $0x210] sm:$0xff]  ;;  %v3476_v45 = vld [vmem:[#allocation5 + $0x228] sm:$0xff] }
 0xf52   :  { %v7431_v24 = vpop.eup %7430  ;;  %v3267_v44 = vsub.f32 1.0, %v7429_v10  ;;  %v3271_v46 = vmul.f32 %v7429_v10, %v9086_v55  ;;  %v3522_v55 = vpack.c.bf16 %v3495_v53, %v3492_v7  ;;  %v3468_v37 = vld [vmem:[#allocation5 + $0x1e8] sm:$0xff] }
 0xf53   :  { %v3264_v60 = vadd.f32 %v3262_v17, %v2102_v52  ;;  %v3268_v35 = vsub.f32 1.0, %v7431_v24  ;;  %v3272_v48 = vmul.f32 %v7431_v24, %v9089_v41  ;;  %v3490_v41 = vld [vmem:[#allocation5 + $0x298] sm:$0xff]  ;;  %v3469_v52 = vld [vmem:[#allocation5 + $0x1f0] sm:$0xff]  ;;  %v3472_v17 = vld [vmem:[#allocation5 + $0x208] sm:$0xff]  ;;  %v3510_v10 = vpack.c.bf16 %v3471_v54, %v3468_v37 }
 0xf54   :  { %v3520_v33 = vpack.c.bf16 %v3490_v41, %v3487_v62  ;;  %v3511_v24 = vpack.c.bf16 %v3472_v17, %v3469_v52  ;;  %v3464_v7 = vld [vmem:[#allocation5 + $0x1c8] sm:$0xff]  ;;  %v7130_v62 = vld [vmem:[#allocation2 + $0x10] sm:$0xff]   ;;  %v7131_v41 = vld [vmem:[#allocation2 + $0x18] sm:$0xff]  }
 0xf55   :  { %7434 = vtanh.f32 %v3264_v60  ;;  %v3512_v60 = vpack.c.bf16 %v3476_v45, %v3473_v39  ;;  %v3456_v53 = vld [vmem:[#allocation5 + $0x188] sm:$0xff]  ;;  %v3880_v54 = vld [vmem:[#allocation7 + $0x3e0] sm:$0xff]  ;;  %v3890_v52 = vld [vmem:[#allocation7 + $0x430] sm:$0xff] }
 0xf56   :  { %v3885_v39 = vld [vmem:[#allocation7 + $0x408] sm:$0xff] }
 0xf57   :  { %v3877_v37 = vld [vmem:[#allocation7 + $0x3c8] sm:$0xff] }
 0xf58   :  { %v3893_v17 = vld [vmem:[#allocation7 + $0x448] sm:$0xff] }
 0xf5e   :  { %v7433_v23 = vpop.eup %7432 }
 0xf5f   :  { %v3269_v36 = vmul.f32 %v7433_v23, %v3267_v44  ;;  %v3467_v44 = vld [vmem:[#allocation5 + $0x1e0] sm:$0xff]  ;;  %v3470_v23 = vld [vmem:[#allocation5 + $0x1f8] sm:$0xff] }
 0xf61   :  { %v9146_v43 = vadd.f32 %v3271_v46, %v3269_v36  ;;  %v3462_v36 = vld [vmem:[#allocation5 + $0x1b8] sm:$0xff]  ;;  %v3465_v46 = vld [vmem:[#allocation5 + $0x1d0] sm:$0xff] }
 0xf62   :  { %v7435_v61 = vpop.eup %7434 }
 0xf63   :  { %v3270_v56 = vmul.f32 %v7435_v61, %v3268_v35  ;;  %v3463_v35 = vld [vmem:[#allocation5 + $0x1c0] sm:$0xff]  ;;  %v3466_v61 = vld [vmem:[#allocation5 + $0x1d8] sm:$0xff] }
 0xf64   :  { %v3508_v28 = vpack.c.bf16 %v3466_v61, %v3463_v35  ;;  %v3870_v61 = vld [vmem:[#allocation7 + $0x390] sm:$0xff] }
 0xf65   :  { %v9149_v15 = vadd.f32 %v3272_v48, %v3270_v56  ;;  %v3509_v56 = vpack.c.bf16 %v3470_v23, %v3467_v44  ;;  %v3507_v48 = vpack.c.bf16 %v3465_v46, %v3462_v36  ;;  %v3879_v44 = vld [vmem:[#allocation7 + $0x3d8] sm:$0xff]  ;;  %v3874_v46 = vld [vmem:[#allocation7 + $0x3b0] sm:$0xff] }
 0xf66   :  { %v3871_v36 = vld [vmem:[#allocation7 + $0x398] sm:$0xff] }
 0xf67   :  { %v6073_v8 = vpack.c.bf16 %v9149_v15, %v9146_v43  ;;  %v9198_v35 = vpack.c.bf16 %v3874_v46, %v3871_v36 }
 0xf69   :  { %6074 = vst [vmem:[#allocation2 + $0x30] sm:$0xff] %v6073_v8   ;;  %3323 = vmatmul.mubr.bf16.vlgmr.msra.gmra.mxu0 %v6073_v8  ;;  %6767 = vmatmul.mubr.bf16.vlgmr.msra.gmra.mxu1 %v6073_v8  ;;  %v3506_v8 = vpack.c.bf16 %v3464_v7, %v3461_v63  ;;  %v3868_v63 = vld [vmem:[#allocation7 + $0x380] sm:$0xff] }
 0xf6a   :  { %3594 = vmatpush1.bf16.msra.mxu0 %v3524_v49  ;;  %6771 = vmatpush3.bf16.msra.mxu1 %v9126_v11  ;;  %v3482_v11 = vld [vmem:[#allocation5 + $0x258] sm:$0xff]  ;;  %v3460_v49 = vld [vmem:[#allocation5 + $0x1a8] sm:$0xff]  ;;  %v3884_v7 = vld [vmem:[#allocation7 + $0x400] sm:$0xff] }
 0xf6b   :  { %6786 = vmatprep.mubr.bf16.mxu1 %v9153_v32  ;;  %3595 = vmatprep.subr.bf16.mxu0 %v3522_v55  ;;  %v3515_v38 = vpack.c.bf16 %v3482_v11, %v3479_v59  ;;  %v3504_v55 = vpack.c.bf16 %v3459_v21, %v3456_v53  ;;  %v3505_v13 = vpack.c.bf16 %v3460_v49, %v3457_v25  ;;  %v3896_v59 = vld [vmem:[#allocation7 + $0x460] sm:$0xff]  ;;  %v3899_v11 = vld [vmem:[#allocation7 + $0x478] sm:$0xff] }
 0xf6c   :  { %6772 = vmatprep.subr.bf16.mxu1 %v3523_v47  ;;  %3625 = vmatprep.mubr.bf16.mxu0 %v10411_v2  ;;  %v9175_v9 = vpack.c.bf16 %v3899_v11, %v3896_v59  ;;  %v3887_v53 = vld [vmem:[#allocation7 + $0x418] sm:$0xff]  ;;  %v3864_v25 = vld [vmem:[#allocation7 + $0x360] sm:$0xff] }
 0xf6d   :  { %v9207_v49 = vpack.c.bf16 %v3887_v53, %v3884_v7  ;;  %v3875_v59 = vld [vmem:[#allocation7 + $0x3b8] sm:$0xff] }
 0xf6e   :  { %3596 = vmatpush1.bf16.msra.mxu0 %v3521_v6  ;;  %6773 = vmatpush3.bf16.msra.mxu1 %v3523_v47  ;;  %v3503_v47 = vpack.c.bf16 %v3458_v27, %v3455_v29  ;;  %v7132_v6 = vld [vmem:[#allocation2 + $0x20] sm:$0xff]   ;;  %v3862_v29 = vld [vmem:[#allocation7 + $0x350] sm:$0xff] }
 0xf6f   :  { %3597 = vmatprep.subr.bf16.mxu0 %v3519_v58  ;;  %6774 = vmatprep.subr.bf16.mxu1 %v3520_v33  ;;  %v7133_v58 = vld [vmem:[#allocation2 + $0x28] sm:$0xff]  }
 0xf72   :  { %3598 = vmatpush1.bf16.msra.mxu0 %v3518_v5  ;;  %6775 = vmatpush3.bf16.msra.mxu1 %v3520_v33  ;;  %v7134_v33 = vld [vmem:[#allocation2 + $0x30] sm:$0xff]   ;;  %v3892_v5 = vld [vmem:[#allocation7 + $0x440] sm:$0xff] }
 0xf73   :  { %3599 = vmatprep.subr.bf16.mxu0 %v3516_v51  ;;  %6776 = vmatprep.subr.bf16.mxu1 %v3517_v16  ;;  %v9173_v51 = vpack.c.bf16 %v3892_v5, %v3889_v26  ;;  %v3872_v5 = vld [vmem:[#allocation7 + $0x3a0] sm:$0xff] }
 0xf74   :  { %v9232_v11 = vpack.c.bf16 %v3875_v59, %v3872_v5 }
 0xf76   :  { %3600 = vmatpush1.bf16.msra.mxu0 %v3515_v38  ;;  %6777 = vmatpush3.bf16.msra.mxu1 %v3517_v16  ;;  %v3888_v16 = vld [vmem:[#allocation7 + $0x420] sm:$0xff]  ;;  %v3886_v38 = vld [vmem:[#allocation7 + $0x410] sm:$0xff] }
 0xf77   :  { %3601 = vmatprep.subr.bf16.mxu0 %v3513_v18  ;;  %6778 = vmatprep.subr.bf16.mxu1 %v3514_v57  ;;  %v9178_v12 = vpack.c.bf16 %v3891_v0, %v3888_v16  ;;  %v9182_v18 = vpack.c.bf16 %v3886_v38, %v3883_v20  ;;  %v3866_v16 = vld [vmem:[#allocation7 + $0x370] sm:$0xff]  ;;  %v3869_v0 = vld [vmem:[#allocation7 + $0x388] sm:$0xff]  ;;  %v3860_v20 = vld [vmem:[#allocation7 + $0x340] sm:$0xff] }
 0xf78   :  { %v9236_v38 = vpack.c.bf16 %v3869_v0, %v3866_v16 }
 0xf7a   :  { %3602 = vmatpush1.bf16.msra.mxu0 %v3512_v60  ;;  %6779 = vmatpush3.bf16.msra.mxu1 %v3514_v57  ;;  %v3882_v57 = vld [vmem:[#allocation7 + $0x3f0] sm:$0xff]  ;;  %v9189_v60 = vpack.c.bf16 %v3880_v54, %v3877_v37  ;;  %v3857_v54 = vld [vmem:[#allocation7 + $0x328] sm:$0xff] }
 0xf7b   :  { %3603 = vmatprep.subr.bf16.mxu0 %v3510_v10  ;;  %6780 = vmatprep.subr.bf16.mxu1 %v3511_v24  ;;  %v9185_v45 = vpack.c.bf16 %v3885_v39, %v3882_v57  ;;  %v3876_v10 = vld [vmem:[#allocation7 + $0x3c0] sm:$0xff]  ;;  %v3863_v57 = vld [vmem:[#allocation7 + $0x358] sm:$0xff]  ;;  %v3854_v37 = vld [vmem:[#allocation7 + $0x310] sm:$0xff] }
 0xf7c   :  { %v9194_v23 = vpack.c.bf16 %v3879_v44, %v3876_v10  ;;  %v9239_v39 = vpack.c.bf16 %v3863_v57, %v3860_v20 }
 0xf7e   :  { %3604 = vmatpush1.bf16.msra.mxu0 %v3509_v56  ;;  %6781 = vmatpush3.bf16.msra.mxu1 %v3511_v24  ;;  %v9191_v24 = vpack.c.bf16 %v3893_v17, %v3890_v52  ;;  %v3873_v56 = vld [vmem:[#allocation7 + $0x3a8] sm:$0xff]  ;;  %v9243_v52 = vpack.c.bf16 %v3857_v54, %v3854_v37  ;;  %v10497_v17 = vld [vmem:[#allocation26_spill] sm:$0xff] }
 0xf7f   :  { %3605 = vmatprep.subr.bf16.mxu0 %v3507_v48  ;;  %6782 = vmatprep.subr.bf16.mxu1 %v3508_v28  ;;  %v9201_v48 = vpack.c.bf16 %v3873_v56, %v3870_v61  ;;  %v2008_v10 = vadd.f32 %v10497_v17, %v8773_v50 }
 0xf82   :  { %3606 = vmatpush1.bf16.msra.mxu0 %v3506_v8  ;;  %6783 = vmatpush3.bf16.msra.mxu1 %v3508_v28  ;;  %v3865_v28 = vld [vmem:[#allocation7 + $0x368] sm:$0xff]  ;;  %v3867_v8 = vld [vmem:[#allocation7 + $0x378] sm:$0xff] }
 0xf83   :  { %3607 = vmatprep.subr.bf16.mxu0 %v3504_v55  ;;  %6784 = vmatprep.subr.bf16.mxu1 %v3505_v13  ;;  %v9205_v21 = vpack.c.bf16 %v3868_v63, %v3865_v28  ;;  %v9210_v55 = vpack.c.bf16 %v3867_v8, %v3864_v25  ;;  %v10498_v28 = vld [vmem:[#allocation47_spill] sm:$0xff]  ;;  %v10499_v8 = vld [vmem:[#allocation45_spill] sm:$0xff] }
 0xf84   :  { %v2012_v63 = vadd.f32 %v10498_v28, %v8773_v50 }
 0xf86   :  { %3608 = vmatpush1.bf16.msra.mxu0 %v3503_v47  ;;  %6785 = vmatpush3.bf16.msra.mxu1 %v3505_v13  ;;  %v3859_v13 = vld [vmem:[#allocation7 + $0x338] sm:$0xff]  ;;  %v3858_v47 = vld [vmem:[#allocation7 + $0x330] sm:$0xff] }
 0xf87   :  { %6802 = vmatprep.subr.bf16.mxu0 %v10410_v30  ;;  %v9214_v27 = vpack.c.bf16 %v3862_v29, %v3859_v13  ;;  %v2010_v13 = vadd.f32 %v10499_v8, %v8785_v14 }
 0xf89   :  { %3626 = vmatmul.mubr.bf16.vlgmr.msra.gmra.mxu0 %v9153_v32  ;;  %6787 = vmatmul.mubr.bf16.vlgmr.msra.gmra.mxu1 %v7129_v4  ;;  %v3895_v32 = vld [vmem:[#allocation7 + $0x458] sm:$0xff] }
 0xf8a   :  { %6790 = vmatprep.mubr.bf16.mxu1 %v7130_v62  ;;  %3635 = vmatprep.mubr.bf16.mxu0 %v10411_v2  ;;  %v9167_v31 = vpack.c.bf16 %v3898_v34, %v3895_v32  ;;  %v3852_v34 = vld [vmem:[#allocation7 + $0x300] sm:$0xff] }
 0xf8b   :  { %6803 = vmatpush3.bf16.msra.mxu0 %v9175_v9  ;;  %v9226_v26 = vpack.c.bf16 %v3855_v42, %v3852_v34 }
 0xf8c   :  { %3937 = vmatprep.subr.bf16.mxu1 %v9167_v31  ;;  %6804 = vmatprep.subr.bf16.mxu0 %v10410_v30 }
 0xf8d   :  { %3938 = vmatpush1.bf16.msra.mxu1 %v9169_v22 }
 0xf8e   :  { %3939 = vmatprep.subr.bf16.mxu1 %v9173_v51 }
 0xf8f   :  { %6805 = vmatpush3.bf16.msra.mxu0 %v9191_v24 }
 0xf90   :  { %6806 = vmatprep.subr.bf16.mxu0 %v10410_v30 }
 0xf91   :  { %3636 = vmatmul.mubr.bf16.gmra.mxu0 %v7129_v4  ;;  %6791 = vmatmul.mubr.bf16.gmra.mxu1 %v7131_v41  ;;  %v3861_v4 = vld [vmem:[#allocation7 + $0x348] sm:$0xff] }
 0xf92   :  { %6794 = vmatprep.mubr.bf16.mxu1 %v7132_v6  ;;  %3645 = vmatprep.mubr.bf16.mxu0 %v10411_v2 }
 0xf93   :  { %3940 = vmatpush1.bf16.msra.mxu1 %v9178_v12  ;;  %6807 = vmatpush3.bf16.msra.mxu0 %v9207_v49 }
 0xf94   :  { %3941 = vmatprep.subr.bf16.mxu1 %v9182_v18  ;;  %6808 = vmatprep.subr.bf16.mxu0 %v10410_v30 }
 0xf97   :  { %3942 = vmatpush1.bf16.msra.mxu1 %v9185_v45 }
 0xf98   :  { %3943 = vmatprep.subr.bf16.mxu1 %v9189_v60 }
 0xf99   :  { %3646 = vmatmul.mubr.bf16.gmra.mxu0 %v7130_v62  ;;  %6795 = vmatmul.mubr.bf16.gmra.mxu1 %v7133_v58  ;;  %v9217_v62 = vpack.c.bf16 %v3861_v4, %v3858_v47 }
 0xf9a   :  { %6798 = vmatprep.mubr.bf16.mxu1 %v7134_v33  ;;  %3655 = vmatprep.mubr.bf16.mxu0 %v10411_v2 }
 0xf9b   :  { %3944 = vmatpush1.bf16.msra.mxu1 %v9194_v23 }
 0xf9c   :  { %3945 = vmatprep.subr.bf16.mxu1 %v9198_v35 }
 0xf9f   :  { %3946 = vmatpush1.bf16.msra.mxu1 %v9201_v48 }
 0xfa0   :  { %3947 = vmatprep.subr.bf16.mxu1 %v9205_v21 }
 0xfa1   :  { %3656 = vmatmul.mubr.bf16.gmra.mxu0 %v7131_v41  ;;  %v3853_v41 = vld [vmem:[#allocation7 + $0x308] sm:$0xff] }
 0xfa2   :  { %3665 = vmatprep.mubr.bf16.mxu0 %v10411_v2 }
 0xfa3   :  { %3948 = vmatpush1.bf16.msra.mxu1 %v9210_v55 }
 0xfa4   :  { %3949 = vmatprep.subr.bf16.mxu1 %v9214_v27 }
 0xfa7   :  { %3950 = vmatpush1.bf16.msra.mxu1 %v9217_v62 }
 0xfa9   :  { %3666 = vmatmul.mubr.bf16.gmra.mxu0 %v7132_v6  ;;  %v3856_v6 = vld [vmem:[#allocation7 + $0x320] sm:$0xff] }
 0xfaa   :  { %3675 = vmatprep.mubr.bf16.mxu0 %v10411_v2  ;;  %v9221_v32 = vpack.c.bf16 %v3856_v6, %v3853_v41 }
 0xfac   :  { %3951 = vmatprep.subr.bf16.mxu1 %v9221_v32 }
 0xfad   :  { %3952 = vmatpush1.bf16.msra.mxu1 %v9226_v26 }
 0xfae   :  { %4078 = vmatprep.subr.bf16.mxu1 %v9167_v31 }
 0xfb1   :  { %3676 = vmatmul.mubr.bf16.gmra.mxu0 %v7133_v58  ;;  %v3878_v58 = vld [vmem:[#allocation7 + $0x3d0] sm:$0xff] }
 0xfb2   :  { %3685 = vmatprep.mubr.bf16.mxu0 %v10411_v2 }
 0xfb9   :  { %3686 = vmatmul.mubr.bf16.gmra.mxu0 %v7134_v33  ;;  %v3881_v33 = vld [vmem:[#allocation7 + $0x3e8] sm:$0xff] }
 0xfba   :  { %3695 = vmatprep.mubr.bf16.mxu0 %v10411_v2  ;;  %v9223_v19 = vpack.c.bf16 %v3881_v33, %v3878_v58  ;;  %v10500_v58 = vld [vmem:[#allocation49_spill] sm:$0xff] }
 0xfbb   :  { %v2014_v33 = vadd.f32 %v10500_v58, %v8785_v14  ;;  %v10501_v14 = vld [vmem:[#allocation44_spill] sm:$0xff] }
 0xfbc   :  { %6809 = vmatpush3.bf16.msra.mxu0 %v9223_v19 }
 0xfbd   :  { %6810 = vmatprep.subr.bf16.mxu0 %v10410_v30 }
 0xfc0   :  { %6811 = vmatpush3.bf16.msra.mxu0 %v9232_v11 }
 0xfc1   :  { %6812 = vmatprep.subr.bf16.mxu0 %v10410_v30 }
 0xfc4   :  { %6813 = vmatpush3.bf16.msra.mxu0 %v9236_v38 }
 0xfc5   :  { %6814 = vmatprep.subr.bf16.mxu0 %v10410_v30 }
 0xfc8   :  { %6815 = vmatpush3.bf16.msra.mxu0 %v9239_v39 }
 0xfc9   :  { %6816 = vmatprep.subr.bf16.mxu0 %v10410_v30 }
 0xfcc   :  { %6817 = vmatpush3.bf16.msra.mxu0 %v9243_v52 }
 0xfcd   :  { %6822 = vmatprep.subr.bf16.mxu0 %v10410_v30 }
0x1029   :  { %v3324_v44 = vpop.f32.mrf.mxu0  ;;  %v3367_v36 = vpop.f32.mrf.mxu1 }
0x102a   :  { %v3380_v46 = vadd.f32 %v3324_v44, %v2008_v10  ;;  %v3408_v54 = vadd.f32 %v9137_v3, %v3367_v36  ;;  %v2107_v44 = vadd.f32 %v10501_v14, %v8795_v40 }
0x102b   :  { %v3326_v61 = vpop.f32.mrf.mxu0  ;;  %v6768_v56 = vpop.f32.mrf.mxu1 }
0x102c   :  { %v5920_v7 = vmul.f32 -1.442695, %v3380_v46  ;;  %v3394_v4 = vadd.f32 %v3326_v61, %v2010_v13 }
0x102d   :  { %v3328_v53 = vpop.f32.mrf.mxu0  ;;  %v3370_v25 = vpop.f32.mrf.mxu1 }
0x102e   :  { %7436 = vpow2.f32 %v5920_v7  ;;  %v3381_v29 = vadd.f32 %v3328_v53, %v2012_v63  ;;  %v5922_v42 = vmul.f32 -1.442695, %v3394_v4  ;;  %v3409_v56 = vadd.f32 %v9137_v3, %v3370_v25  ;;  %v10502_v63 = vld [vmem:[#allocation48_spill] sm:$0xff] }
0x102f   :  { %v6769_v47 = vpop.f32.mrf.mxu1  ;;  %v3330_v6 = vpop.f32.mrf.mxu0  ;;  %v2110_v7 = vadd.f32 %v10502_v63, %v8795_v40 }
0x1030   :  { %v5921_v41 = vmul.f32 -1.442695, %v3381_v29  ;;  %v3395_v34 = vadd.f32 %v3330_v6, %v2014_v33 }
0x1032   :  { %7438 = vpow2.f32 %v5921_v41  ;;  %v5923_v5 = vmul.f32 -1.442695, %v3395_v34 }
0x1033   :  { %7440 = vpow2.f32 %v5922_v42 }
0x1034   :  { %7442 = vpow2.f32 %v5923_v5 }
0x103b   :  { %v7437_v50 = vpop.eup %7436 }
0x103c   :  { %v3388_v59 = vadd.f32 1.0, %v7437_v50 }
0x103e   :  { %7444 = vrcp.f32 %v3388_v59 }
0x103f   :  { %v7439_v16 = vpop.eup %7438 }
0x1040   :  { %v3389_v0 = vadd.f32 1.0, %v7439_v16  ;;  %v7441_v20 = vpop.eup %7440 }
0x1041   :  { %v7443_v57 = vpop.eup %7442  ;;  %v3402_v37 = vadd.f32 1.0, %v7441_v20 }
0x1042   :  { %7446 = vrcp.f32 %v3389_v0  ;;  %v3403_v10 = vadd.f32 1.0, %v7443_v57 }
0x1043   :  { %7448 = vrcp.f32 %v3402_v37 }
0x1044   :  { %7450 = vrcp.f32 %v3403_v10 }
0x1049   :  { %v3627_v50 = vpop.f32.mrf.mxu0  ;;  %v9340_v63 = vpop.f32.mrf.mxu1 }
0x104b   :  { %v7445_v17 = vpop.eup %7444  ;;  %v3629_v59 = vpop.f32.mrf.mxu0 }
0x104c   :  { %v3410_v46 = vmul.f32 %v7445_v17, %v3408_v54 }
0x104d   :  { %v3631_v16 = vpop.f32.mrf.mxu0 }
0x104e   :  { %v3412_v61 = vadd.f32 %v3410_v46, %v2107_v44 }
0x104f   :  { %v7447_v28 = vpop.eup %7446  ;;  %v9314_v0 = vpop.f32.mrf.mxu0 }
0x1050   :  { %7452 = vtanh.f32 %v3412_v61  ;;  %v3411_v53 = vmul.f32 %v7447_v28, %v3409_v56  ;;  %v7449_v36 = vpop.eup %7448 }
0x1051   :  { %v7451_v13 = vpop.eup %7450  ;;  %v3416_v29 = vsub.f32 1.0, %v7449_v36  ;;  %v3420_v41 = vmul.f32 %v7449_v36, %v9146_v43  ;;  %v9316_v20 = vpop.f32.mrf.mxu0 }
0x1052   :  { %v3413_v8 = vadd.f32 %v3411_v53, %v2110_v7  ;;  %v3417_v58 = vsub.f32 1.0, %v7451_v13  ;;  %v3421_v40 = vmul.f32 %v7451_v13, %v9149_v15  ;;  %v10505_v15 = vmov 0.0|0.0   ;;  %v9344_v53 = vpop.f32.mrf.mxu1 }
0x1053   :  { %v9318_v57 = vpop.f32.mrf.mxu0 }
0x1054   :  { %7454 = vtanh.f32 %v3413_v8  ;;  %v9348_v36 = vpop.f32.mrf.mxu1 }
0x1055   :  { %v9320_v37 = vpop.f32.mrf.mxu0 }
0x1057   :  { %v9322_v54 = vpop.f32.mrf.mxu0 }
0x1059   :  { %v9324_v17 = vpop.f32.mrf.mxu0 }
0x105b   :  { %v9326_v10 = vpop.f32.mrf.mxu0 }
0x105d   :  { %v7453_v47 = vpop.eup %7452  ;;  %v9328_v14 = vpop.f32.mrf.mxu0 }
0x105e   :  { %v3418_v4 = vmul.f32 %v7453_v47, %v3416_v29  ;;  %v9352_v29 = vpop.f32.mrf.mxu1 }
0x105f   :  { %v9330_v44 = vpop.f32.mrf.mxu0 }
0x1060   :  { %v9263_v6 = vadd.f32 %v3420_v41, %v3418_v4  ;;  %v9356_v4 = vpop.f32.mrf.mxu1 }
0x1061   :  { %v7455_v3 = vpop.eup %7454  ;;  %v9332_v46 = vpop.f32.mrf.mxu0  ;;  %10514 = vst [vmem:[#allocation33_spill] sm:$0xff] %v9356_v4 }
0x1062   :  { %10503 = vst [vmem:[#allocation16_spill] sm:$0xff] %v9263_v6  ;;  %v5309_v25 = vmul.f32 %v9263_v6, %v9263_v6  ;;  %v3419_v33 = vmul.f32 %v7455_v3, %v3417_v58  ;;  %10506 = vst [vmem:[#allocation31_spill] sm:$0xff] %v9332_v46  ;;  %v9360_v58 = vpop.f32.mrf.mxu1 }
0x1063   :  { %v9334_v61 = vpop.f32.mrf.mxu0 }
0x1064   :  { %5311 = vadd.xlane.f32.xlu0 %v5309_v25  ;;  %v9268_v34 = vadd.f32 %v3421_v40, %v3419_v33  ;;  %10507 = vst [vmem:[#allocation29_spill] sm:$0xff] %v9334_v61  ;;  %v9364_v25 = vpop.f32.mrf.mxu1 }
0x1065   :  { %v9336_v56 = vpop.f32.mrf.mxu0  ;;  %10517 = vst [vmem:[#allocation20_spill] sm:$0xff] %v9364_v25 }
0x1066   :  { %10504 = vst [vmem:[#allocation30_spill] sm:$0xff] %v9268_v34  ;;  %v5310_v42 = vmul.f32 %v9268_v34, %v9268_v34  ;;  %v6078_v5 = vpack.c.bf16 %v9268_v34, %v9263_v6  ;;  %10508 = vst [vmem:[#allocation21_spill] sm:$0xff] %v9336_v56  ;;  %v9368_v40 = vpop.f32.mrf.mxu1 }
0x1067   :  { %v9338_v28 = vpop.f32.mrf.mxu0  ;;  %10519 = vst [vmem:[#allocation22_spill] sm:$0xff] %v9368_v40 }
0x1068   :  { %5313 = vadd.xlane.f32.xlu1 %v5310_v42  ;;  %6079 = vst [vmem:[#allocation2 + $0x38] sm:$0xff] %v6078_v5   ;;  %10509 = vst [vmem:[#allocation35_spill] sm:$0xff] %v9338_v28  ;;  %v9372_v5 = vpop.f32.mrf.mxu1 }
0x1069   :  { %v9342_v7 = vpop.f32.mrf.mxu0  ;;  %10521 = vst [vmem:[#allocation39_spill] sm:$0xff] %v9372_v5 }
0x106a   :  { %10510 = vst [vmem:[#allocation36_spill] sm:$0xff] %v9342_v7 }
0x106b   :  { %v9346_v8 = vpop.f32.mrf.mxu0 }
0x106c   :  { %10511 = vst [vmem:[#allocation23_spill] sm:$0xff] %v9346_v8 }
0x106d   :  { %v9350_v13 = vpop.f32.mrf.mxu0 }
0x106e   :  { %10512 = vst [vmem:[#allocation34_spill] sm:$0xff] %v9350_v13 }
0x106f   :  { %v7135_v43 = vld [vmem:[#allocation2 + $0x38] sm:$0xff]   ;;  %v9354_v47 = vpop.f32.mrf.mxu0 }
0x1070   :  { %3696 = vmatmul.mubr.bf16.gmra.mxu0 %v7135_v43  ;;  %6799 = vmatmul.mubr.bf16.gmra.mxu1 %v7135_v43  ;;  %10513 = vst [vmem:[#allocation32_spill] sm:$0xff] %v9354_v47 }
0x1071   :  { %3969 = vmatprep.mubr.bf16.mxu1 %v10411_v2  ;;  %6818 = vmatprep.mubr.msk.bf16.mxu0 %vm7753_vm2, %v10410_v30  ;;  %v9358_v41 = vpop.f32.mrf.mxu0 }
0x1072   :  { %10515 = vst [vmem:[#allocation27_spill] sm:$0xff] %v9358_v41 }
0x1073   :  { %v9362_v3 = vpop.f32.mrf.mxu0 }
0x1074   :  { %10516 = vst [vmem:[#allocation43_spill] sm:$0xff] %v9362_v3 }
0x1075   :  { %v9366_v33 = vpop.f32.mrf.mxu0 }
0x1076   :  { %10518 = vst [vmem:[#allocation38_spill] sm:$0xff] %v9366_v33  ;;  %v3528_v33 = vld [vmem:[#allocation9 + $0x6] sm:$0x7] }
0x1077   :  { %v9370_v42 = vpop.f32.mrf.mxu0 }
0x1078   :  { %3970 = vmatmul.mubr.bf16.vlgmr.msra.gmra.mxu1 %v10505_v15  ;;  %6819 = vmatmul.mubr.bf16.vlgmr.msra.gmra.mxu0 %v10505_v15  ;;  %10520 = vst [vmem:[#allocation37_spill] sm:$0xff] %v9370_v42  ;;  %v9376_v15 = vpop.f32.mrf.mxu1 }
0x1079   :  { %4079 = vmatpush1.bf16.msra.mxu1 %v9169_v22  ;;  %6823 = vmatpush3.bf16.msra.mxu0 %v9175_v9  ;;  %v9374_v43 = vpop.f32.mrf.mxu0  ;;  %10523 = vst [vmem:[#allocation25_spill] sm:$0xff] %v9376_v15  ;;  %v10533_v15 = vld [vmem:[#allocation17_spill] sm:$0xff] }
0x107a   :  { %4080 = vmatprep.subr.bf16.mxu1 %v9173_v51  ;;  %6824 = vmatprep.subr.bf16.mxu0 %v10410_v30  ;;  %10522 = vst [vmem:[#allocation42_spill] sm:$0xff] %v9374_v43  ;;  %v9380_v34 = vpop.f32.mrf.mxu1  ;;  %v9397_v13 = vrot.slane %v3528_v33, %v10533_v15 }
0x107b   :  { %4110 = vmatprep.mubr.bf16.mxu1 %v10411_v2  ;;  %6838 = vmatprep.mubr.msk.bf16.mxu0 %vm7753_vm2, %v10410_v30  ;;  %v9378_v6 = vpop.f32.mrf.mxu0  ;;  %10525 = vst [vmem:[#allocation40_spill] sm:$0xff] %v9380_v34 }
0x107c   :  { %10524 = vst [vmem:[#allocation41_spill] sm:$0xff] %v9378_v6  ;;  %v9384_v3 = vpop.f32.mrf.mxu1  ;;  %v3632_v15 = vadd.f32 %v3631_v16, %v9397_v13 }
0x107d   :  { %4081 = vmatpush1.bf16.msra.mxu1 %v9178_v12  ;;  %6825 = vmatpush3.bf16.msra.mxu0 %v9191_v24  ;;  %v9382_v41 = vpop.f32.mrf.mxu0  ;;  %10527 = vst [vmem:[#allocation46_spill] sm:$0xff] %v9384_v3 }
0x107e   :  { %4082 = vmatprep.subr.bf16.mxu1 %v9182_v18  ;;  %6826 = vmatprep.subr.bf16.mxu0 %v10410_v30  ;;  %10526 = vst [vmem:[#allocation24_spill] sm:$0xff] %v9382_v41 }
0x107f   :  { %v9386_v47 = vpop.f32.mrf.mxu0 }
0x1080   :  { %10528 = vst [vmem:[#allocation50_spill] sm:$0xff] %v9386_v47  ;;  %v3628_v47 = vadd.f32 %v3627_v50, %v9397_v13 }
0x1081   :  { %4083 = vmatpush1.bf16.msra.mxu1 %v9185_v45  ;;  %6827 = vmatpush3.bf16.msra.mxu0 %v9207_v49 }
0x1082   :  { %4084 = vmatprep.subr.bf16.mxu1 %v9189_v60  ;;  %6828 = vmatprep.subr.bf16.mxu0 %v10410_v30 }
0x1085   :  { %4085 = vmatpush1.bf16.msra.mxu1 %v9194_v23  ;;  %6829 = vmatpush3.bf16.msra.mxu0 %v9223_v19 }
0x1086   :  { %4086 = vmatprep.subr.bf16.mxu1 %v9198_v35  ;;  %6830 = vmatprep.subr.bf16.mxu0 %v10410_v30 }
0x1089   :  { %4087 = vmatpush1.bf16.msra.mxu1 %v9201_v48  ;;  %6831 = vmatpush3.bf16.msra.mxu0 %v9232_v11 }
0x108a   :  { %4088 = vmatprep.subr.bf16.mxu1 %v9205_v21  ;;  %6832 = vmatprep.subr.bf16.mxu0 %v10410_v30 }
0x108d   :  { %4089 = vmatpush1.bf16.msra.mxu1 %v9210_v55  ;;  %6833 = vmatpush3.bf16.msra.mxu0 %v9236_v38 }
0x108e   :  { %4090 = vmatprep.subr.bf16.mxu1 %v9214_v27  ;;  %6834 = vmatprep.subr.bf16.mxu0 %v10410_v30 }
0x1091   :  { %4091 = vmatpush1.bf16.msra.mxu1 %v9217_v62  ;;  %6835 = vmatpush3.bf16.msra.mxu0 %v9239_v39 }
0x1092   :  { %4092 = vmatprep.subr.bf16.mxu1 %v9221_v32  ;;  %6836 = vmatprep.subr.bf16.mxu0 %v10410_v30 }
0x1095   :  { %4093 = vmatpush1.bf16.msra.mxu1 %v9226_v26  ;;  %6837 = vmatpush3.bf16.msra.mxu0 %v9243_v52 }
0x1096   :  { %4221 = vmatprep.subr.bf16.mxu1 %v9167_v31  ;;  %6842 = vmatprep.subr.bf16.mxu0 %v10410_v30 }
0x1130   :  { %v9388_v8 = vpop.f32.mrf.mxu0  ;;  %v9390_v42 = vpop.f32.mrf.mxu1 }
0x1131   :  { %10529 = vst [vmem:[#allocation26_spill] sm:$0xff] %v9388_v8  ;;  %10530 = vst [vmem:[#allocation47_spill] sm:$0xff] %v9390_v42  ;;  %v10538_v42 = vld [vmem:[#allocation18_spill] sm:$0xff] }
0x1132   :  { %v9392_v5 = vpop.f32.mrf.mxu0  ;;  %v9394_v43 = vpop.f32.mrf.mxu1  ;;  %v9409_v25 = vrot.slane %v3528_v33, %v10538_v42 }
0x1133   :  { %10531 = vst [vmem:[#allocation45_spill] sm:$0xff] %v9392_v5  ;;  %10532 = vst [vmem:[#allocation49_spill] sm:$0xff] %v9394_v43 }
0x1134   :  { %v9399_v6 = vpop.f32.mrf.mxu0  ;;  %v9401_v34 = vpop.f32.mrf.mxu1  ;;  %v3634_v42 = vadd.f32 %v9314_v0, %v9409_v25  ;;  %v9419_v0 = vrot.slane %v3528_v33, %v10472_v1 }
0x1135   :  { %10534 = vst [vmem:[#allocation44_spill] sm:$0xff] %v9399_v6  ;;  %10535 = vst [vmem:[#allocation48_spill] sm:$0xff] %v9401_v34  ;;  %v3630_v34 = vadd.f32 %v3629_v59, %v9409_v25 }
0x1136   :  { %v9403_v41 = vpop.f32.mrf.mxu0  ;;  %v9405_v3 = vpop.f32.mrf.mxu1 }
0x1137   :  { %10536 = vst [vmem:[#allocation17_spill] sm:$0xff] %v9403_v41  ;;  %10537 = vst [vmem:[#allocation51_spill] sm:$0xff] %v9405_v3 }
0x1138   :  { %v3971_v8 = vpop.f32.mrf.mxu1  ;;  %v4014_v7 = vpop.f32.mrf.mxu0 }
0x1139   :  { %v4027_v5 = vadd.f32 %v3971_v8, %v3628_v47 }
0x113a   :  { %v3973_v43 = vpop.f32.mrf.mxu1  ;;  %v6820_v4 = vpop.f32.mrf.mxu0 }
0x113b   :  { %v5935_v28 = vmul.f32 -1.442695, %v4027_v5  ;;  %v4041_v56 = vadd.f32 %v3973_v43, %v3630_v34  ;;  %v3741_v43 = vadd.f32 %v9344_v53, %v9419_v0 }
0x113c   :  { %v3975_v6 = vpop.f32.mrf.mxu1  ;;  %v4017_v61 = vpop.f32.mrf.mxu0 }
0x113d   :  { %7456 = vpow2.f32 %v5935_v28  ;;  %v4028_v41 = vadd.f32 %v3975_v6, %v3632_v15  ;;  %v5937_v47 = vmul.f32 -1.442695, %v4041_v56  ;;  %v9415_v28 = vld [vmem:[#allocation10 + $0x2] ss:$0 sm:$0xff] }
0x113e   :  { %v6821_v3 = vpop.f32.mrf.mxu0  ;;  %v3977_v46 = vpop.f32.mrf.mxu1 }
0x113f   :  { %v5936_v50 = vmul.f32 -1.442695, %v4028_v41  ;;  %v4042_v8 = vadd.f32 %v3977_v46, %v3634_v42  ;;  %v4055_v3 = vadd.f32 %v9415_v28, %v4014_v7 }
0x1141   :  { %7458 = vpow2.f32 %v5936_v50  ;;  %v5938_v4 = vmul.f32 -1.442695, %v4042_v8  ;;  %v3744_v8 = vadd.f32 %v9352_v29, %v9419_v0 }
0x1142   :  { %7460 = vpow2.f32 %v5937_v47 }
0x1143   :  { %7462 = vpow2.f32 %v5938_v4 }
0x114a   :  { %v7457_v16 = vpop.eup %7456 }
0x114b   :  { %v4035_v5 = vadd.f32 1.0, %v7457_v16 }
0x114d   :  { %7464 = vrcp.f32 %v4035_v5 }
0x114e   :  { %v7459_v40 = vpop.eup %7458 }
0x114f   :  { %v4036_v59 = vadd.f32 1.0, %v7459_v40  ;;  %v7461_v6 = vpop.eup %7460  ;;  %v4056_v40 = vadd.f32 %v9415_v28, %v4017_v61 }
0x1150   :  { %v7463_v34 = vpop.eup %7462  ;;  %v4049_v41 = vadd.f32 1.0, %v7461_v6 }
0x1151   :  { %7466 = vrcp.f32 %v4036_v59  ;;  %v4050_v56 = vadd.f32 1.0, %v7463_v34 }
0x1152   :  { %7468 = vrcp.f32 %v4049_v41 }
0x1153   :  { %7470 = vrcp.f32 %v4050_v56 }
0x115a   :  { %v7465_v46 = vpop.eup %7464 }
0x115b   :  { %v4057_v15 = vmul.f32 %v7465_v46, %v4055_v3  ;;  %v3638_v46 = vadd.f32 %v9316_v20, %v9397_v13 }
0x115d   :  { %v4059_v50 = vadd.f32 %v4057_v15, %v3741_v43 }
0x115e   :  { %v7467_v42 = vpop.eup %7466 }
0x115f   :  { %7472 = vtanh.f32 %v4059_v50  ;;  %v4058_v7 = vmul.f32 %v7467_v42, %v4056_v40  ;;  %v7469_v1 = vpop.eup %7468  ;;  %v3642_v42 = vadd.f32 %v9320_v37, %v9397_v13 }
0x1160   :  { %v7471_v33 = vpop.eup %7470  ;;  %v4063_v4 = vsub.f32 1.0, %v7469_v1  ;;  %v4067_v5 = vmul.f32 0.0, %v7469_v1  ;;  %v3640_v1 = vadd.f32 %v9318_v57, %v9409_v25 }
0x1161   :  { %v4060_v47 = vadd.f32 %v4058_v7, %v3744_v8  ;;  %v4064_v59 = vsub.f32 1.0, %v7471_v33  ;;  %v4068_v61 = vmul.f32 0.0, %v7471_v33 }
0x1163   :  { %7474 = vtanh.f32 %v4060_v47 }
0x116c   :  { %v7473_v16 = vpop.eup %7472 }
0x116d   :  { %v4065_v53 = vmul.f32 %v7473_v16, %v4063_v4 }
0x116f   :  { %v9426_v6 = vadd.f32 %v4067_v5, %v4065_v53  ;;  %v3644_v53 = vadd.f32 %v9322_v54, %v9409_v25  ;;  %v3749_v54 = vadd.f32 %v9340_v63, %v9419_v0 }
0x1170   :  { %v7475_v34 = vpop.eup %7474 }
0x1171   :  { %v4066_v41 = vmul.f32 %v7475_v34, %v4064_v59 }
0x1173   :  { %v9428_v3 = vadd.f32 %v4068_v61, %v4066_v41 }
0x1175   :  { %v4077_v29 = vpack.c.bf16 %v9428_v3, %v9426_v6 }
0x1177   :  { %4111 = vmatmul.mubr.bf16.vlgmr.msra.gmra.mxu1 %v4077_v29  ;;  %6839 = vmatmul.mubr.bf16.vlgmr.msra.gmra.mxu0 %v4077_v29 }
0x1178   :  { %4222 = vmatpush1.bf16.msra.mxu1 %v9169_v22  ;;  %6843 = vmatpush3.bf16.msra.mxu0 %v9175_v9 }
0x1179   :  { %4223 = vmatprep.subr.bf16.mxu1 %v9173_v51  ;;  %6844 = vmatprep.subr.bf16.mxu0 %v10410_v30 }
0x117a   :  { %4253 = vmatprep.mubr.bf16.mxu1 %v10411_v2  ;;  %6858 = vmatprep.mubr.msk.bf16.mxu0 %vm7753_vm2, %v10410_v30 }
0x117c   :  { %4224 = vmatpush1.bf16.msra.mxu1 %v9178_v12  ;;  %6845 = vmatpush3.bf16.msra.mxu0 %v9191_v24 }
0x117d   :  { %4225 = vmatprep.subr.bf16.mxu1 %v9182_v18  ;;  %6846 = vmatprep.subr.bf16.mxu0 %v10410_v30 }
0x1180   :  { %4226 = vmatpush1.bf16.msra.mxu1 %v9185_v45  ;;  %6847 = vmatpush3.bf16.msra.mxu0 %v9207_v49 }
0x1181   :  { %4227 = vmatprep.subr.bf16.mxu1 %v9189_v60  ;;  %6848 = vmatprep.subr.bf16.mxu0 %v10410_v30 }
0x1184   :  { %4228 = vmatpush1.bf16.msra.mxu1 %v9194_v23  ;;  %6849 = vmatpush3.bf16.msra.mxu0 %v9223_v19 }
0x1185   :  { %4229 = vmatprep.subr.bf16.mxu1 %v9198_v35  ;;  %6850 = vmatprep.subr.bf16.mxu0 %v10410_v30 }
0x1188   :  { %4230 = vmatpush1.bf16.msra.mxu1 %v9201_v48  ;;  %6851 = vmatpush3.bf16.msra.mxu0 %v9232_v11 }
0x1189   :  { %4231 = vmatprep.subr.bf16.mxu1 %v9205_v21  ;;  %6852 = vmatprep.subr.bf16.mxu0 %v10410_v30 }
0x118c   :  { %4232 = vmatpush1.bf16.msra.mxu1 %v9210_v55  ;;  %6853 = vmatpush3.bf16.msra.mxu0 %v9236_v38 }
0x118d   :  { %4233 = vmatprep.subr.bf16.mxu1 %v9214_v27  ;;  %6854 = vmatprep.subr.bf16.mxu0 %v10410_v30 }
0x1190   :  { %4234 = vmatpush1.bf16.msra.mxu1 %v9217_v62  ;;  %6855 = vmatpush3.bf16.msra.mxu0 %v9239_v39 }
0x1191   :  { %4235 = vmatprep.subr.bf16.mxu1 %v9221_v32  ;;  %6856 = vmatprep.subr.bf16.mxu0 %v10410_v30 }
0x1194   :  { %4236 = vmatpush1.bf16.msra.mxu1 %v9226_v26  ;;  %6857 = vmatpush3.bf16.msra.mxu0 %v9243_v52 }
0x1195   :  { %4364 = vmatprep.subr.bf16.mxu1 %v9167_v31  ;;  %6862 = vmatprep.subr.bf16.mxu0 %v10410_v30 }
0x1237   :  { %v4112_v56 = vpop.f32.mrf.mxu1  ;;  %v4155_v43 = vpop.f32.mrf.mxu0 }
0x1238   :  { %v4168_v15 = vadd.f32 %v4112_v56, %v3638_v46 }
0x1239   :  { %v4114_v50 = vpop.f32.mrf.mxu1  ;;  %v6840_v40 = vpop.f32.mrf.mxu0 }
0x123a   :  { %v5939_v8 = vmul.f32 -1.442695, %v4168_v15  ;;  %v4182_v16 = vadd.f32 %v4114_v50, %v3640_v1  ;;  %v4196_v50 = vadd.f32 %v9415_v28, %v4155_v43 }
0x123b   :  { %v4116_v7 = vpop.f32.mrf.mxu1  ;;  %v4158_v47 = vpop.f32.mrf.mxu0 }
0x123c   :  { %7476 = vpow2.f32 %v5939_v8  ;;  %v4169_v33 = vadd.f32 %v4116_v7, %v3642_v42  ;;  %v5941_v34 = vmul.f32 -1.442695, %v4182_v16  ;;  %v4197_v1 = vadd.f32 %v9415_v28, %v4158_v47 }
0x123d   :  { %v6841_v4 = vpop.f32.mrf.mxu0  ;;  %v4118_v20 = vpop.f32.mrf.mxu1 }
0x123e   :  { %v5940_v5 = vmul.f32 -1.442695, %v4169_v33  ;;  %v4183_v59 = vadd.f32 %v4118_v20, %v3644_v53  ;;  %v3752_v4 = vadd.f32 %v9348_v36, %v9419_v0 }
0x1240   :  { %7478 = vpow2.f32 %v5940_v5  ;;  %v5942_v61 = vmul.f32 -1.442695, %v4183_v59 }
0x1241   :  { %7480 = vpow2.f32 %v5941_v34 }
0x1242   :  { %7482 = vpow2.f32 %v5942_v61 }
0x1249   :  { %v7477_v37 = vpop.eup %7476 }
0x124a   :  { %v4176_v41 = vadd.f32 1.0, %v7477_v37 }
0x124c   :  { %7484 = vrcp.f32 %v4176_v41 }
0x124d   :  { %v7479_v29 = vpop.eup %7478 }
0x124e   :  { %v4177_v57 = vadd.f32 1.0, %v7479_v29  ;;  %v7481_v46 = vpop.eup %7480 }
0x124f   :  { %v7483_v56 = vpop.eup %7482  ;;  %v4190_v15 = vadd.f32 1.0, %v7481_v46  ;;  %v3648_v46 = vadd.f32 %v9324_v17, %v9397_v13 }
0x1250   :  { %7486 = vrcp.f32 %v4177_v57  ;;  %v4191_v42 = vadd.f32 1.0, %v7483_v56 }
0x1251   :  { %7488 = vrcp.f32 %v4190_v15 }
0x1252   :  { %7490 = vrcp.f32 %v4191_v42 }
0x1259   :  { %v7485_v40 = vpop.eup %7484 }
0x125a   :  { %v4198_v8 = vmul.f32 %v7485_v40, %v4196_v50 }
0x125c   :  { %v4200_v7 = vadd.f32 %v4198_v8, %v3749_v54  ;;  %v3652_v54 = vadd.f32 %v9328_v14, %v9397_v13 }
0x125d   :  { %v7487_v33 = vpop.eup %7486 }
0x125e   :  { %7492 = vtanh.f32 %v4200_v7  ;;  %v4199_v16 = vmul.f32 %v7487_v33, %v4197_v1  ;;  %v7489_v43 = vpop.eup %7488  ;;  %v3650_v33 = vadd.f32 %v9326_v10, %v9409_v25 }
0x125f   :  { %v7491_v20 = vpop.eup %7490  ;;  %v4204_v53 = vsub.f32 1.0, %v7489_v43  ;;  %v4208_v63 = vmul.f32 %v7489_v43, %v9426_v6 }
0x1260   :  { %v4201_v5 = vadd.f32 %v4199_v16, %v3752_v4  ;;  %v4205_v61 = vsub.f32 1.0, %v7491_v20  ;;  %v4209_v29 = vmul.f32 %v7491_v20, %v9428_v3  ;;  %v3654_v20 = vadd.f32 %v9330_v44, %v9409_v25 }
0x1261   :  { %v3757_v44 = vadd.f32 %v9360_v58, %v9419_v0 }
0x1262   :  { %7494 = vtanh.f32 %v4201_v5 }
0x126b   :  { %v7493_v59 = vpop.eup %7492 }
0x126c   :  { %v4206_v34 = vmul.f32 %v7493_v59, %v4204_v53 }
0x126e   :  { %v9482_v37 = vadd.f32 %v4208_v63, %v4206_v34 }
0x126f   :  { %v7495_v47 = vpop.eup %7494 }
0x1270   :  { %v4207_v41 = vmul.f32 %v7495_v47, %v4205_v61 }
0x1272   :  { %v9485_v57 = vadd.f32 %v4209_v29, %v4207_v41 }
0x1274   :  { %v4220_v36 = vpack.c.bf16 %v9485_v57, %v9482_v37 }
0x1276   :  { %4254 = vmatmul.mubr.bf16.vlgmr.msra.gmra.mxu1 %v4220_v36  ;;  %6859 = vmatmul.mubr.bf16.vlgmr.msra.gmra.mxu0 %v4220_v36 }
0x1277   :  { %4365 = vmatpush1.bf16.msra.mxu1 %v9169_v22  ;;  %6863 = vmatpush3.bf16.msra.mxu0 %v9175_v9 }
0x1278   :  { %4366 = vmatprep.subr.bf16.mxu1 %v9173_v51  ;;  %6864 = vmatprep.subr.bf16.mxu0 %v10410_v30 }
0x1279   :  { %4396 = vmatprep.mubr.bf16.mxu1 %v10411_v2  ;;  %6878 = vmatprep.mubr.msk.bf16.mxu0 %vm7753_vm2, %v10410_v30 }
0x127b   :  { %4367 = vmatpush1.bf16.msra.mxu1 %v9178_v12  ;;  %6865 = vmatpush3.bf16.msra.mxu0 %v9191_v24 }
0x127c   :  { %4368 = vmatprep.subr.bf16.mxu1 %v9182_v18  ;;  %6866 = vmatprep.subr.bf16.mxu0 %v10410_v30 }
0x127f   :  { %4369 = vmatpush1.bf16.msra.mxu1 %v9185_v45  ;;  %6867 = vmatpush3.bf16.msra.mxu0 %v9207_v49 }
0x1280   :  { %4370 = vmatprep.subr.bf16.mxu1 %v9189_v60  ;;  %6868 = vmatprep.subr.bf16.mxu0 %v10410_v30 }
0x1283   :  { %4371 = vmatpush1.bf16.msra.mxu1 %v9194_v23  ;;  %6869 = vmatpush3.bf16.msra.mxu0 %v9223_v19 }
0x1284   :  { %4372 = vmatprep.subr.bf16.mxu1 %v9198_v35  ;;  %6870 = vmatprep.subr.bf16.mxu0 %v10410_v30 }
0x1287   :  { %4373 = vmatpush1.bf16.msra.mxu1 %v9201_v48  ;;  %6871 = vmatpush3.bf16.msra.mxu0 %v9232_v11 }
0x1288   :  { %4374 = vmatprep.subr.bf16.mxu1 %v9205_v21  ;;  %6872 = vmatprep.subr.bf16.mxu0 %v10410_v30 }
0x128b   :  { %4375 = vmatpush1.bf16.msra.mxu1 %v9210_v55  ;;  %6873 = vmatpush3.bf16.msra.mxu0 %v9236_v38 }
0x128c   :  { %4376 = vmatprep.subr.bf16.mxu1 %v9214_v27  ;;  %6874 = vmatprep.subr.bf16.mxu0 %v10410_v30 }
0x128f   :  { %4377 = vmatpush1.bf16.msra.mxu1 %v9217_v62  ;;  %6875 = vmatpush3.bf16.msra.mxu0 %v9239_v39 }
0x1290   :  { %4378 = vmatprep.subr.bf16.mxu1 %v9221_v32  ;;  %6876 = vmatprep.subr.bf16.mxu0 %v10410_v30 }
0x1293   :  { %4379 = vmatpush1.bf16.msra.mxu1 %v9226_v26  ;;  %6877 = vmatpush3.bf16.msra.mxu0 %v9243_v52 }
0x1294   :  { %4507 = vmatprep.subr.bf16.mxu1 %v9167_v31  ;;  %6882 = vmatprep.subr.bf16.mxu0 %v10410_v30 }
0x1336   :  { %v4255_v56 = vpop.f32.mrf.mxu1  ;;  %v4298_v15 = vpop.f32.mrf.mxu0 }
0x1337   :  { %v4311_v50 = vadd.f32 %v4255_v56, %v3648_v46  ;;  %v4339_v36 = vadd.f32 %v9415_v28, %v4298_v15 }
0x1338   :  { %v4257_v40 = vpop.f32.mrf.mxu1  ;;  %v6860_v42 = vpop.f32.mrf.mxu0 }
0x1339   :  { %v5943_v8 = vmul.f32 -1.442695, %v4311_v50  ;;  %v4325_v5 = vadd.f32 %v4257_v40, %v3650_v33 }
0x133a   :  { %v4259_v7 = vpop.f32.mrf.mxu1  ;;  %v4301_v1 = vpop.f32.mrf.mxu0 }
0x133b   :  { %7496 = vpow2.f32 %v5943_v8  ;;  %v4312_v4 = vadd.f32 %v4259_v7, %v3652_v54  ;;  %v5945_v59 = vmul.f32 -1.442695, %v4325_v5  ;;  %v4340_v42 = vadd.f32 %v9415_v28, %v4301_v1  ;;  %v10539_v8 = vld [vmem:[#allocation22_spill] sm:$0xff] }
0x133c   :  { %v6861_v16 = vpop.f32.mrf.mxu0  ;;  %v4261_v17 = vpop.f32.mrf.mxu1  ;;  %v3760_v7 = vadd.f32 %v10539_v8, %v9419_v0 }
0x133d   :  { %v5944_v43 = vmul.f32 -1.442695, %v4312_v4  ;;  %v4326_v53 = vadd.f32 %v4261_v17, %v3654_v20 }
0x133f   :  { %7498 = vpow2.f32 %v5944_v43  ;;  %v5946_v34 = vmul.f32 -1.442695, %v4326_v53 }
0x1340   :  { %7500 = vpow2.f32 %v5945_v59 }
0x1341   :  { %7502 = vpow2.f32 %v5946_v34 }
0x1348   :  { %v7497_v14 = vpop.eup %7496 }
0x1349   :  { %v4319_v63 = vadd.f32 1.0, %v7497_v14 }
0x134b   :  { %7504 = vrcp.f32 %v4319_v63 }
0x134c   :  { %v7499_v61 = vpop.eup %7498 }
0x134d   :  { %v4320_v10 = vadd.f32 1.0, %v7499_v61  ;;  %v7501_v47 = vpop.eup %7500  ;;  %v10540_v61 = vld [vmem:[#allocation31_spill] sm:$0xff] }
0x134e   :  { %v7503_v41 = vpop.eup %7502  ;;  %v4333_v29 = vadd.f32 1.0, %v7501_v47 }
0x134f   :  { %7506 = vrcp.f32 %v4320_v10  ;;  %v4334_v56 = vadd.f32 1.0, %v7503_v41  ;;  %v3658_v10 = vadd.f32 %v10540_v61, %v9397_v13 }
0x1350   :  { %7508 = vrcp.f32 %v4333_v29 }
0x1351   :  { %7510 = vrcp.f32 %v4334_v56  ;;  %v10541_v56 = vld [vmem:[#allocation21_spill] sm:$0xff] }
0x1358   :  { %v7505_v46 = vpop.eup %7504 }
0x1359   :  { %v4341_v50 = vmul.f32 %v7505_v46, %v4339_v36 }
0x135b   :  { %v4343_v40 = vadd.f32 %v4341_v50, %v3757_v44  ;;  %v3662_v44 = vadd.f32 %v10541_v56, %v9397_v13  ;;  %v10544_v56 = vld [vmem:[#allocation33_spill] sm:$0xff] }
0x135c   :  { %v7507_v54 = vpop.eup %7506 }
0x135d   :  { %7512 = vtanh.f32 %v4343_v40  ;;  %v4342_v33 = vmul.f32 %v7507_v54, %v4340_v42  ;;  %v7509_v15 = vpop.eup %7508  ;;  %v10542_v54 = vld [vmem:[#allocation29_spill] sm:$0xff] }
0x135e   :  { %v7511_v16 = vpop.eup %7510  ;;  %v4347_v5 = vsub.f32 1.0, %v7509_v15  ;;  %v4351_v58 = vmul.f32 %v7509_v15, %v9482_v37  ;;  %v3660_v8 = vadd.f32 %v10542_v54, %v9409_v25 }
0x135f   :  { %v4344_v4 = vadd.f32 %v4342_v33, %v3760_v7  ;;  %v4348_v20 = vsub.f32 1.0, %v7511_v16  ;;  %v4352_v34 = vmul.f32 %v7511_v16, %v9485_v57 }
0x1361   :  { %7514 = vtanh.f32 %v4344_v4 }
0x136a   :  { %v7513_v43 = vpop.eup %7512 }
0x136b   :  { %v4349_v17 = vmul.f32 %v7513_v43, %v4347_v5  ;;  %v10543_v5 = vld [vmem:[#allocation35_spill] sm:$0xff] }
0x136c   :  { %v3664_v43 = vadd.f32 %v10543_v5, %v9409_v25 }
0x136d   :  { %v9539_v53 = vadd.f32 %v4351_v58, %v4349_v17 }
0x136e   :  { %v7515_v1 = vpop.eup %7514 }
0x136f   :  { %v4350_v59 = vmul.f32 %v7515_v1, %v4348_v20 }
0x1371   :  { %v9542_v14 = vadd.f32 %v4352_v34, %v4350_v59 }
0x1373   :  { %v4363_v63 = vpack.c.bf16 %v9542_v14, %v9539_v53 }
0x1375   :  { %4397 = vmatmul.mubr.bf16.vlgmr.msra.gmra.mxu1 %v4363_v63  ;;  %6879 = vmatmul.mubr.bf16.vlgmr.msra.gmra.mxu0 %v4363_v63 }
0x1376   :  { %4508 = vmatpush1.bf16.msra.mxu1 %v9169_v22  ;;  %6883 = vmatpush3.bf16.msra.mxu0 %v9175_v9 }
0x1377   :  { %4509 = vmatprep.subr.bf16.mxu1 %v9173_v51  ;;  %6884 = vmatprep.subr.bf16.mxu0 %v10410_v30 }
0x1378   :  { %4539 = vmatprep.mubr.bf16.mxu1 %v10411_v2  ;;  %6898 = vmatprep.mubr.msk.bf16.mxu0 %vm7753_vm2, %v10410_v30 }
0x137a   :  { %4510 = vmatpush1.bf16.msra.mxu1 %v9178_v12  ;;  %6885 = vmatpush3.bf16.msra.mxu0 %v9191_v24 }
0x137b   :  { %4511 = vmatprep.subr.bf16.mxu1 %v9182_v18  ;;  %6886 = vmatprep.subr.bf16.mxu0 %v10410_v30 }
0x137e   :  { %4512 = vmatpush1.bf16.msra.mxu1 %v9185_v45  ;;  %6887 = vmatpush3.bf16.msra.mxu0 %v9207_v49 }
0x137f   :  { %4513 = vmatprep.subr.bf16.mxu1 %v9189_v60  ;;  %6888 = vmatprep.subr.bf16.mxu0 %v10410_v30 }
0x1382   :  { %4514 = vmatpush1.bf16.msra.mxu1 %v9194_v23  ;;  %6889 = vmatpush3.bf16.msra.mxu0 %v9223_v19 }
0x1383   :  { %4515 = vmatprep.subr.bf16.mxu1 %v9198_v35  ;;  %6890 = vmatprep.subr.bf16.mxu0 %v10410_v30 }
0x1386   :  { %4516 = vmatpush1.bf16.msra.mxu1 %v9201_v48  ;;  %6891 = vmatpush3.bf16.msra.mxu0 %v9232_v11 }
0x1387   :  { %4517 = vmatprep.subr.bf16.mxu1 %v9205_v21  ;;  %6892 = vmatprep.subr.bf16.mxu0 %v10410_v30 }
0x138a   :  { %4518 = vmatpush1.bf16.msra.mxu1 %v9210_v55  ;;  %6893 = vmatpush3.bf16.msra.mxu0 %v9236_v38 }
0x138b   :  { %4519 = vmatprep.subr.bf16.mxu1 %v9214_v27  ;;  %6894 = vmatprep.subr.bf16.mxu0 %v10410_v30 }
0x138e   :  { %4520 = vmatpush1.bf16.msra.mxu1 %v9217_v62  ;;  %6895 = vmatpush3.bf16.msra.mxu0 %v9239_v39 }
0x138f   :  { %4521 = vmatprep.subr.bf16.mxu1 %v9221_v32  ;;  %6896 = vmatprep.subr.bf16.mxu0 %v10410_v30 }
0x1392   :  { %4522 = vmatpush1.bf16.msra.mxu1 %v9226_v26  ;;  %6897 = vmatpush3.bf16.msra.mxu0 %v9243_v52 }
0x1393   :  { %4650 = vmatprep.subr.bf16.mxu1 %v9167_v31  ;;  %6902 = vmatprep.subr.bf16.mxu0 %v10410_v30 }
0x1435   :  { %v4398_v47 = vpop.f32.mrf.mxu1  ;;  %v4441_v41 = vpop.f32.mrf.mxu0 }
0x1436   :  { %v4454_v29 = vadd.f32 %v4398_v47, %v3658_v10 }
0x1437   :  { %v4400_v36 = vpop.f32.mrf.mxu1  ;;  %v6880_v46 = vpop.f32.mrf.mxu0 }
0x1438   :  { %v5947_v50 = vmul.f32 -1.442695, %v4454_v29  ;;  %v4468_v4 = vadd.f32 %v4400_v36, %v3660_v8  ;;  %v4482_v29 = vadd.f32 %v9415_v28, %v4441_v41 }
0x1439   :  { %v4402_v40 = vpop.f32.mrf.mxu1  ;;  %v4444_v42 = vpop.f32.mrf.mxu0 }
0x143a   :  { %7516 = vpow2.f32 %v5947_v50  ;;  %v4455_v7 = vadd.f32 %v4402_v40, %v3662_v44  ;;  %v5949_v58 = vmul.f32 -1.442695, %v4468_v4  ;;  %v3765_v44 = vadd.f32 %v10544_v56, %v9419_v0 }
0x143b   :  { %v6881_v33 = vpop.f32.mrf.mxu0  ;;  %v4404_v16 = vpop.f32.mrf.mxu1  ;;  %v4483_v54 = vadd.f32 %v9415_v28, %v4444_v42 }
0x143c   :  { %v5948_v15 = vmul.f32 -1.442695, %v4455_v7  ;;  %v4469_v17 = vadd.f32 %v4404_v16, %v3664_v43  ;;  %v10545_v7 = vld [vmem:[#allocation20_spill] sm:$0xff] }
0x143d   :  { %v3768_v33 = vadd.f32 %v10545_v7, %v9419_v0 }
0x143e   :  { %7518 = vpow2.f32 %v5948_v15  ;;  %v5950_v20 = vmul.f32 -1.442695, %v4469_v17 }
0x143f   :  { %7520 = vpow2.f32 %v5949_v58 }
0x1440   :  { %7522 = vpow2.f32 %v5950_v20 }
0x1447   :  { %v7517_v1 = vpop.eup %7516 }
0x1448   :  { %v4462_v59 = vadd.f32 1.0, %v7517_v1 }
0x144a   :  { %7524 = vrcp.f32 %v4462_v59 }
0x144b   :  { %v7519_v34 = vpop.eup %7518 }
0x144c   :  { %v4463_v63 = vadd.f32 1.0, %v7519_v34  ;;  %v7521_v61 = vpop.eup %7520 }
0x144d   :  { %v7523_v10 = vpop.eup %7522  ;;  %v4476_v47 = vadd.f32 1.0, %v7521_v61 }
0x144e   :  { %7526 = vrcp.f32 %v4463_v63  ;;  %v4477_v46 = vadd.f32 1.0, %v7523_v10  ;;  %v10546_v10 = vld [vmem:[#allocation36_spill] sm:$0xff] }
0x144f   :  { %7528 = vrcp.f32 %v4476_v47  ;;  %v3668_v47 = vadd.f32 %v10546_v10, %v9397_v13 }
0x1450   :  { %7530 = vrcp.f32 %v4477_v46 }
0x1457   :  { %v7525_v36 = vpop.eup %7524 }
0x1458   :  { %v4484_v50 = vmul.f32 %v7525_v36, %v4482_v29 }
0x145a   :  { %v4486_v40 = vadd.f32 %v4484_v50, %v3765_v44  ;;  %v10547_v50 = vld [vmem:[#allocation34_spill] sm:$0xff] }
0x145b   :  { %v7527_v8 = vpop.eup %7526 }
0x145c   :  { %7532 = vtanh.f32 %v4486_v40  ;;  %v4485_v4 = vmul.f32 %v7527_v8, %v4483_v54  ;;  %v7529_v41 = vpop.eup %7528  ;;  %v3672_v40 = vadd.f32 %v10547_v50, %v9397_v13 }
0x145d   :  { %v7531_v16 = vpop.eup %7530  ;;  %v4490_v5 = vsub.f32 1.0, %v7529_v41  ;;  %v4494_v58 = vmul.f32 %v7529_v41, %v9539_v53 }
0x145e   :  { %v4487_v15 = vadd.f32 %v4485_v4, %v3768_v33  ;;  %v4491_v20 = vsub.f32 1.0, %v7531_v16  ;;  %v4495_v34 = vmul.f32 %v7531_v16, %v9542_v14  ;;  %v10548_v33 = vld [vmem:[#allocation23_spill] sm:$0xff] }
0x145f   :  { %v3670_v4 = vadd.f32 %v10548_v33, %v9409_v25 }
0x1460   :  { %7534 = vtanh.f32 %v4487_v15 }
0x1469   :  { %v7533_v43 = vpop.eup %7532 }
0x146a   :  { %v4492_v17 = vmul.f32 %v7533_v43, %v4490_v5 }
0x146c   :  { %v9596_v1 = vadd.f32 %v4494_v58, %v4492_v17  ;;  %v10549_v17 = vld [vmem:[#allocation32_spill] sm:$0xff] }
0x146d   :  { %v7535_v42 = vpop.eup %7534  ;;  %v3674_v58 = vadd.f32 %v10549_v17, %v9409_v25 }
0x146e   :  { %v4493_v59 = vmul.f32 %v7535_v42, %v4491_v20 }
0x1470   :  { %v9599_v63 = vadd.f32 %v4495_v34, %v4493_v59 }
0x1472   :  { %v4506_v61 = vpack.c.bf16 %v9599_v63, %v9596_v1 }
0x1474   :  { %4540 = vmatmul.mubr.bf16.vlgmr.msra.gmra.mxu1 %v4506_v61  ;;  %6899 = vmatmul.mubr.bf16.vlgmr.msra.gmra.mxu0 %v4506_v61 }
0x1475   :  { %4651 = vmatpush1.bf16.msra.mxu1 %v9169_v22  ;;  %6903 = vmatpush3.bf16.msra.mxu0 %v9175_v9 }
0x1476   :  { %4652 = vmatprep.subr.bf16.mxu1 %v9173_v51  ;;  %6904 = vmatprep.subr.bf16.mxu0 %v10410_v30 }
0x1477   :  { %4682 = vmatprep.mubr.bf16.mxu1 %v10411_v2  ;;  %6918 = vmatprep.mubr.msk.bf16.mxu0 %vm7753_vm2, %v10410_v30 }
0x1479   :  { %4653 = vmatpush1.bf16.msra.mxu1 %v9178_v12  ;;  %6905 = vmatpush3.bf16.msra.mxu0 %v9191_v24 }
0x147a   :  { %4654 = vmatprep.subr.bf16.mxu1 %v9182_v18  ;;  %6906 = vmatprep.subr.bf16.mxu0 %v10410_v30 }
0x147d   :  { %4655 = vmatpush1.bf16.msra.mxu1 %v9185_v45  ;;  %6907 = vmatpush3.bf16.msra.mxu0 %v9207_v49 }
0x147e   :  { %4656 = vmatprep.subr.bf16.mxu1 %v9189_v60  ;;  %6908 = vmatprep.subr.bf16.mxu0 %v10410_v30 }
0x1481   :  { %4657 = vmatpush1.bf16.msra.mxu1 %v9194_v23  ;;  %6909 = vmatpush3.bf16.msra.mxu0 %v9223_v19 }
0x1482   :  { %4658 = vmatprep.subr.bf16.mxu1 %v9198_v35  ;;  %6910 = vmatprep.subr.bf16.mxu0 %v10410_v30 }
0x1485   :  { %4659 = vmatpush1.bf16.msra.mxu1 %v9201_v48  ;;  %6911 = vmatpush3.bf16.msra.mxu0 %v9232_v11 }
0x1486   :  { %4660 = vmatprep.subr.bf16.mxu1 %v9205_v21  ;;  %6912 = vmatprep.subr.bf16.mxu0 %v10410_v30 }
0x1489   :  { %4661 = vmatpush1.bf16.msra.mxu1 %v9210_v55  ;;  %6913 = vmatpush3.bf16.msra.mxu0 %v9236_v38 }
0x148a   :  { %4662 = vmatprep.subr.bf16.mxu1 %v9214_v27  ;;  %6914 = vmatprep.subr.bf16.mxu0 %v10410_v30 }
0x148d   :  { %4663 = vmatpush1.bf16.msra.mxu1 %v9217_v62  ;;  %6915 = vmatpush3.bf16.msra.mxu0 %v9239_v39 }
0x148e   :  { %4664 = vmatprep.subr.bf16.mxu1 %v9221_v32  ;;  %6916 = vmatprep.subr.bf16.mxu0 %v10410_v30 }
0x1491   :  { %4665 = vmatpush1.bf16.msra.mxu1 %v9226_v26  ;;  %6917 = vmatpush3.bf16.msra.mxu0 %v9243_v52 }
0x1492   :  { %4793 = vmatprep.subr.bf16.mxu1 %v9167_v31  ;;  %6922 = vmatprep.subr.bf16.mxu0 %v10410_v30 }
0x1534   :  { %v4541_v29 = vpop.f32.mrf.mxu1  ;;  %v4584_v36 = vpop.f32.mrf.mxu0 }
0x1535   :  { %v4597_v46 = vadd.f32 %v4541_v29, %v3668_v47 }
0x1536   :  { %v4543_v56 = vpop.f32.mrf.mxu1  ;;  %v6900_v44 = vpop.f32.mrf.mxu0 }
0x1537   :  { %v5951_v54 = vmul.f32 -1.442695, %v4597_v46  ;;  %v4611_v16 = vadd.f32 %v4543_v56, %v3670_v4  ;;  %v4625_v44 = vadd.f32 %v9415_v28, %v4584_v36 }
0x1538   :  { %v4545_v8 = vpop.f32.mrf.mxu1  ;;  %v4587_v7 = vpop.f32.mrf.mxu0 }
0x1539   :  { %7536 = vpow2.f32 %v5951_v54  ;;  %v4598_v15 = vadd.f32 %v4545_v8, %v3672_v40  ;;  %v5953_v42 = vmul.f32 -1.442695, %v4611_v16  ;;  %v10550_v54 = vld [vmem:[#allocation25_spill] sm:$0xff]  ;;  %v10551_v16 = vld [vmem:[#allocation46_spill] sm:$0xff] }
0x153a   :  { %v6901_v41 = vpop.f32.mrf.mxu0  ;;  %v4547_v43 = vpop.f32.mrf.mxu1  ;;  %v3773_v8 = vadd.f32 %v10550_v54, %v9419_v0 }
0x153b   :  { %v5952_v5 = vmul.f32 -1.442695, %v4598_v15  ;;  %v4612_v20 = vadd.f32 %v4547_v43, %v3674_v58  ;;  %v4626_v15 = vadd.f32 %v9415_v28, %v4587_v7 }
0x153d   :  { %7538 = vpow2.f32 %v5952_v5  ;;  %v5954_v59 = vmul.f32 -1.442695, %v4612_v20  ;;  %v3776_v5 = vadd.f32 %v10551_v16, %v9419_v0 }
0x153e   :  { %7540 = vpow2.f32 %v5953_v42 }
0x153f   :  { %7542 = vpow2.f32 %v5954_v59 }
0x1546   :  { %v7537_v34 = vpop.eup %7536 }
0x1547   :  { %v4605_v61 = vadd.f32 1.0, %v7537_v34 }
0x1549   :  { %7544 = vrcp.f32 %v4605_v61 }
0x154a   :  { %v7539_v10 = vpop.eup %7538 }
0x154b   :  { %v4606_v47 = vadd.f32 1.0, %v7539_v10  ;;  %v7541_v29 = vpop.eup %7540 }
0x154c   :  { %v7543_v46 = vpop.eup %7542  ;;  %v4619_v56 = vadd.f32 1.0, %v7541_v29 }
0x154d   :  { %7546 = vrcp.f32 %v4606_v47  ;;  %v4620_v40 = vadd.f32 1.0, %v7543_v46 }
0x154e   :  { %7548 = vrcp.f32 %v4619_v56 }
0x154f   :  { %7550 = vrcp.f32 %v4620_v40 }
0x1556   :  { %v7545_v50 = vpop.eup %7544 }
0x1557   :  { %v4627_v33 = vmul.f32 %v7545_v50, %v4625_v44  ;;  %v10552_v44 = vld [vmem:[#allocation27_spill] sm:$0xff] }
0x1558   :  { %v3678_v50 = vadd.f32 %v10552_v44, %v9397_v13 }
0x1559   :  { %v4629_v4 = vadd.f32 %v4627_v33, %v3773_v8 }
0x155a   :  { %v7547_v41 = vpop.eup %7546 }
0x155b   :  { %7552 = vtanh.f32 %v4629_v4  ;;  %v4628_v43 = vmul.f32 %v7547_v41, %v4626_v15  ;;  %v7549_v36 = vpop.eup %7548  ;;  %v10553_v15 = vld [vmem:[#allocation38_spill] sm:$0xff] }
0x155c   :  { %v7551_v58 = vpop.eup %7550  ;;  %v4633_v20 = vsub.f32 1.0, %v7549_v36  ;;  %v4637_v34 = vmul.f32 %v7549_v36, %v9596_v1  ;;  %v3682_v41 = vadd.f32 %v10553_v15, %v9397_v13 }
0x155d   :  { %v4630_v17 = vadd.f32 %v4628_v43, %v3776_v5  ;;  %v4634_v61 = vsub.f32 1.0, %v7551_v58  ;;  %v4638_v29 = vmul.f32 %v7551_v58, %v9599_v63 }
0x155f   :  { %7554 = vtanh.f32 %v4630_v17  ;;  %v10554_v17 = vld [vmem:[#allocation43_spill] sm:$0xff] }
0x1560   :  { %v3680_v36 = vadd.f32 %v10554_v17, %v9409_v25 }
0x1568   :  { %v7553_v42 = vpop.eup %7552 }
0x1569   :  { %v4635_v59 = vmul.f32 %v7553_v42, %v4633_v20 }
0x156b   :  { %v9653_v10 = vadd.f32 %v4637_v34, %v4635_v59  ;;  %v10555_v34 = vld [vmem:[#allocation37_spill] sm:$0xff] }
0x156c   :  { %v7555_v7 = vpop.eup %7554 }
0x156d   :  { %v4636_v47 = vmul.f32 %v7555_v7, %v4634_v61  ;;  %v3684_v61 = vadd.f32 %v10555_v34, %v9409_v25 }
0x156f   :  { %v9656_v46 = vadd.f32 %v4638_v29, %v4636_v47 }
0x1571   :  { %v4649_v56 = vpack.c.bf16 %v9656_v46, %v9653_v10 }
0x1573   :  { %4683 = vmatmul.mubr.bf16.vlgmr.msra.gmra.mxu1 %v4649_v56  ;;  %6919 = vmatmul.mubr.bf16.vlgmr.msra.gmra.mxu0 %v4649_v56 }
0x1574   :  { %4794 = vmatpush1.bf16.msra.mxu1 %v9169_v22  ;;  %6923 = vmatpush3.bf16.msra.mxu0 %v9175_v9 }
0x1575   :  { %4795 = vmatprep.subr.bf16.mxu1 %v9173_v51  ;;  %6924 = vmatprep.subr.bf16.mxu0 %v10410_v30 }
0x1576   :  { %4825 = vmatprep.mubr.bf16.mxu1 %v10411_v2  ;;  %6938 = vmatprep.mubr.msk.bf16.mxu0 %vm7753_vm2, %v10410_v30 }
0x1578   :  { %4796 = vmatpush1.bf16.msra.mxu1 %v9178_v12  ;;  %6925 = vmatpush3.bf16.msra.mxu0 %v9191_v24 }
0x1579   :  { %4797 = vmatprep.subr.bf16.mxu1 %v9182_v18  ;;  %6926 = vmatprep.subr.bf16.mxu0 %v10410_v30 }
0x157c   :  { %4798 = vmatpush1.bf16.msra.mxu1 %v9185_v45  ;;  %6927 = vmatpush3.bf16.msra.mxu0 %v9207_v49 }
0x157d   :  { %4799 = vmatprep.subr.bf16.mxu1 %v9189_v60  ;;  %6928 = vmatprep.subr.bf16.mxu0 %v10410_v30 }
0x1580   :  { %4800 = vmatpush1.bf16.msra.mxu1 %v9194_v23  ;;  %6929 = vmatpush3.bf16.msra.mxu0 %v9223_v19 }
0x1581   :  { %4801 = vmatprep.subr.bf16.mxu1 %v9198_v35  ;;  %6930 = vmatprep.subr.bf16.mxu0 %v10410_v30 }
0x1584   :  { %4802 = vmatpush1.bf16.msra.mxu1 %v9201_v48  ;;  %6931 = vmatpush3.bf16.msra.mxu0 %v9232_v11 }
0x1585   :  { %4803 = vmatprep.subr.bf16.mxu1 %v9205_v21  ;;  %6932 = vmatprep.subr.bf16.mxu0 %v10410_v30 }
0x1588   :  { %4804 = vmatpush1.bf16.msra.mxu1 %v9210_v55  ;;  %6933 = vmatpush3.bf16.msra.mxu0 %v9236_v38 }
0x1589   :  { %4805 = vmatprep.subr.bf16.mxu1 %v9214_v27  ;;  %6934 = vmatprep.subr.bf16.mxu0 %v10410_v30 }
0x158c   :  { %4806 = vmatpush1.bf16.msra.mxu1 %v9217_v62  ;;  %6935 = vmatpush3.bf16.msra.mxu0 %v9239_v39 }
0x158d   :  { %4807 = vmatprep.subr.bf16.mxu1 %v9221_v32  ;;  %6936 = vmatprep.subr.bf16.mxu0 %v10410_v30 }
0x1590   :  { %4808 = vmatpush1.bf16.msra.mxu1 %v9226_v26  ;;  %6937 = vmatpush3.bf16.msra.mxu0 %v9243_v52 }
0x1591   :  { %4936 = vmatprep.subr.bf16.mxu1 %v9167_v31  ;;  %6942 = vmatprep.subr.bf16.mxu0 %v10410_v30 }
0x1633   :  { %v4684_v40 = vpop.f32.mrf.mxu1  ;;  %v4727_v54 = vpop.f32.mrf.mxu0 }
0x1634   :  { %v4740_v8 = vadd.f32 %v4684_v40, %v3678_v50  ;;  %v4768_v15 = vadd.f32 %v9415_v28, %v4727_v54 }
0x1635   :  { %v4686_v33 = vpop.f32.mrf.mxu1  ;;  %v6920_v4 = vpop.f32.mrf.mxu0 }
0x1636   :  { %v5955_v16 = vmul.f32 -1.442695, %v4740_v8  ;;  %v4754_v20 = vadd.f32 %v4686_v33, %v3680_v36 }
0x1637   :  { %v4688_v5 = vpop.f32.mrf.mxu1  ;;  %v4730_v43 = vpop.f32.mrf.mxu0 }
0x1638   :  { %7556 = vpow2.f32 %v5955_v16  ;;  %v4741_v31 = vadd.f32 %v4688_v5, %v3682_v41  ;;  %v5957_v47 = vmul.f32 -1.442695, %v4754_v20  ;;  %v10556_v5 = vld [vmem:[#allocation39_spill] sm:$0xff] }
0x1639   :  { %v6921_v58 = vpop.f32.mrf.mxu0  ;;  %v4690_v59 = vpop.f32.mrf.mxu1  ;;  %v3781_v17 = vadd.f32 %v10556_v5, %v9419_v0 }
0x163a   :  { %v5956_v42 = vmul.f32 -1.442695, %v4741_v31  ;;  %v4755_v7 = vadd.f32 %v4690_v59, %v3684_v61  ;;  %v4769_v58 = vadd.f32 %v9415_v28, %v4730_v43 }
0x163c   :  { %7558 = vpow2.f32 %v5956_v42  ;;  %v5958_v29 = vmul.f32 -1.442695, %v4755_v7  ;;  %v10557_v42 = vld [vmem:[#allocation40_spill] sm:$0xff] }
0x163d   :  { %7560 = vpow2.f32 %v5957_v47  ;;  %v3784_v59 = vadd.f32 %v10557_v42, %v9419_v0 }
0x163e   :  { %7562 = vpow2.f32 %v5958_v29 }
0x1645   :  { %v7557_v56 = vpop.eup %7556 }
0x1646   :  { %v4748_v44 = vadd.f32 1.0, %v7557_v56 }
0x1648   :  { %7564 = vrcp.f32 %v4748_v44 }
0x1649   :  { %v7559_v50 = vpop.eup %7558 }
0x164a   :  { %v4749_v40 = vadd.f32 1.0, %v7559_v50  ;;  %v7561_v8 = vpop.eup %7560 }
0x164b   :  { %v7563_v4 = vpop.eup %7562  ;;  %v4762_v33 = vadd.f32 1.0, %v7561_v8 }
0x164c   :  { %7566 = vrcp.f32 %v4749_v40  ;;  %v4763_v16 = vadd.f32 1.0, %v7563_v4 }
0x164d   :  { %7568 = vrcp.f32 %v4762_v33 }
0x164e   :  { %7570 = vrcp.f32 %v4763_v16 }
0x1655   :  { %v7565_v41 = vpop.eup %7564 }
0x1656   :  { %v4770_v36 = vmul.f32 %v7565_v41, %v4768_v15 }
0x1658   :  { %v4772_v31 = vadd.f32 %v4770_v36, %v3781_v17 }
0x1659   :  { %v7567_v20 = vpop.eup %7566 }
0x165a   :  { %7572 = vtanh.f32 %v4772_v31  ;;  %v4771_v34 = vmul.f32 %v7567_v20, %v4769_v58  ;;  %v7569_v54 = vpop.eup %7568  ;;  %v9760_v58 = vld [vmem:[#allocation10 + $0x2] ss:$0 sm:$0xff] }
0x165b   :  { %v7571_v7 = vpop.eup %7570  ;;  %v4776_v47 = vsub.f32 1.0, %v7569_v54  ;;  %v4780_v44 = vmul.f32 %v7569_v54, %v9653_v10 }
0x165c   :  { %v4773_v61 = vadd.f32 %v4771_v34, %v3784_v59  ;;  %v4777_v50 = vsub.f32 1.0, %v7571_v7  ;;  %v4781_v8 = vmul.f32 %v7571_v7, %v9656_v46  ;;  %v10562_v34 = vld [vmem:[#allocation49_spill] sm:$0xff] }
0x165e   :  { %7574 = vtanh.f32 %v4773_v61  ;;  %v3789_v61 = vadd.f32 %v10562_v34, %v9419_v0  ;;  %v5086_v34 = vld [vmem:[%s10360_s6 + $0x30] sm:$0xff] }
0x1667   :  { %v7573_v29 = vpop.eup %7572 }
0x1668   :  { %v4778_v56 = vmul.f32 %v7573_v29, %v4776_v47 }
0x166a   :  { %v9710_v40 = vadd.f32 %v4780_v44, %v4778_v56  ;;  %v10563_v56 = vld [vmem:[#allocation51_spill] sm:$0xff] }
0x166b   :  { %v7575_v28 = vpop.eup %7574  ;;  %v3792_v44 = vadd.f32 %v10563_v56, %v9419_v0  ;;  %v5084_v56 = vld [vmem:[%s10360_s6 + $0x20] sm:$0xff] }
0x166c   :  { %v4779_v43 = vmul.f32 %v7575_v28, %v4777_v50 }
0x166e   :  { %v9713_v4 = vadd.f32 %v4781_v8, %v4779_v43 }
0x1670   :  { %v4792_v33 = vpack.c.bf16 %v9713_v4, %v9710_v40 }
0x1672   :  { %4826 = vmatmul.mubr.bf16.vlgmr.msra.gmra.mxu1 %v4792_v33  ;;  %6939 = vmatmul.mubr.bf16.vlgmr.msra.gmra.mxu0 %v4792_v33 }
0x1673   :  { %4937 = vmatpush1.bf16.msra.mxu1 %v9169_v22  ;;  %6943 = vmatpush3.bf16.msra.mxu0 %v9175_v9 }
0x1674   :  { %4938 = vmatprep.subr.bf16.mxu1 %v9173_v51  ;;  %6944 = vmatprep.subr.bf16.mxu0 %v10410_v30 }
0x1675   :  { %4968 = vmatprep.mubr.bf16.mxu1 %v10411_v2  ;;  %6958 = vmatprep.mubr.msk.bf16.mxu0 %vm7753_vm2, %v10410_v30  ;;  %v10558_v2 = vld [vmem:[#allocation42_spill] sm:$0xff] }
0x1676   :  { %v3688_v22 = vadd.f32 %v10558_v2, %v9397_v13 }
0x1677   :  { %4939 = vmatpush1.bf16.msra.mxu1 %v9178_v12  ;;  %6945 = vmatpush3.bf16.msra.mxu0 %v9191_v24 }
0x1678   :  { %4940 = vmatprep.subr.bf16.mxu1 %v9182_v18  ;;  %6946 = vmatprep.subr.bf16.mxu0 %v10410_v30 }
0x167b   :  { %4941 = vmatpush1.bf16.msra.mxu1 %v9185_v45  ;;  %6947 = vmatpush3.bf16.msra.mxu0 %v9207_v49 }
0x167c   :  { %4942 = vmatprep.subr.bf16.mxu1 %v9189_v60  ;;  %6948 = vmatprep.subr.bf16.mxu0 %v10410_v30  ;;  %v10559_v60 = vld [vmem:[#allocation24_spill] sm:$0xff] }
0x167d   :  { %v3692_v24 = vadd.f32 %v10559_v60, %v9397_v13 }
0x167f   :  { %4943 = vmatpush1.bf16.msra.mxu1 %v9194_v23  ;;  %6949 = vmatpush3.bf16.msra.mxu0 %v9223_v19 }
0x1680   :  { %4944 = vmatprep.subr.bf16.mxu1 %v9198_v35  ;;  %6950 = vmatprep.subr.bf16.mxu0 %v10410_v30 }
0x1683   :  { %4945 = vmatpush1.bf16.msra.mxu1 %v9201_v48  ;;  %6951 = vmatpush3.bf16.msra.mxu0 %v9232_v11 }
0x1684   :  { %4946 = vmatprep.subr.bf16.mxu1 %v9205_v21  ;;  %6952 = vmatprep.subr.bf16.mxu0 %v10410_v30  ;;  %v10560_v21 = vld [vmem:[#allocation41_spill] sm:$0xff] }
0x1685   :  { %v3690_v49 = vadd.f32 %v10560_v21, %v9409_v25 }
0x1687   :  { %4947 = vmatpush1.bf16.msra.mxu1 %v9210_v55  ;;  %6953 = vmatpush3.bf16.msra.mxu0 %v9236_v38 }
0x1688   :  { %4948 = vmatprep.subr.bf16.mxu1 %v9214_v27  ;;  %6954 = vmatprep.subr.bf16.mxu0 %v10410_v30 }
0x168b   :  { %4949 = vmatpush1.bf16.msra.mxu1 %v9217_v62  ;;  %6955 = vmatpush3.bf16.msra.mxu0 %v9239_v39 }
0x168c   :  { %4950 = vmatprep.subr.bf16.mxu1 %v9221_v32  ;;  %6956 = vmatprep.subr.bf16.mxu0 %v10410_v30 }
0x168f   :  { %4951 = vmatpush1.bf16.msra.mxu1 %v9226_v26  ;;  %6957 = vmatpush3.bf16.msra.mxu0 %v9243_v52  ;;  %v10561_v26 = vld [vmem:[#allocation50_spill] sm:$0xff] }
0x1690   :  { %6982 = vmatprep.subr.bf16.mxu0 %v10410_v30  ;;  %6962 = vmatprep.subr.bf16.mxu1 %v10410_v30  ;;  %v3694_v11 = vadd.f32 %v10561_v26, %v9409_v25  ;;  %v5108_v26 = vld [vmem:[%s10360_s6 + $0xe0] sm:$0xff] }
0x1732   :  { %v4827_v51 = vpop.f32.mrf.mxu1  ;;  %v4870_v9 = vpop.f32.mrf.mxu0 }
0x1733   :  { %v4883_v12 = vadd.f32 %v4827_v51, %v3688_v22  ;;  %v4911_v20 = vadd.f32 %v9760_v58, %v4870_v9 }
0x1734   :  { %v4829_v18 = vpop.f32.mrf.mxu1  ;;  %v6940_v45 = vpop.f32.mrf.mxu0 }
0x1735   :  { %v5959_v23 = vmul.f32 -1.442695, %v4883_v12  ;;  %v4897_v62 = vadd.f32 %v4829_v18, %v3690_v49  ;;  %v5110_v49 = vld [vmem:[%s10360_s6 + $0xf0] sm:$0xff] }
0x1736   :  { %v4831_v35 = vpop.f32.mrf.mxu1  ;;  %v4873_v48 = vpop.f32.mrf.mxu0 }
0x1737   :  { %7576 = vpow2.f32 %v5959_v23  ;;  %v4884_v55 = vadd.f32 %v4831_v35, %v3692_v24  ;;  %v5961_v39 = vmul.f32 -1.442695, %v4897_v62  ;;  %v4912_v47 = vadd.f32 %v9760_v58, %v4873_v48  ;;  %v5094_v35 = vld [vmem:[%s10360_s6 + $0x70] sm:$0xff]  ;;  %v5095_v48 = vld [vmem:[%s10360_s6 + $0x78] sm:$0xff]  ;;  %v5092_v62 = vld [vmem:[%s10360_s6 + $0x60] sm:$0xff] }
0x1738   :  { %v6941_v27 = vpop.f32.mrf.mxu0  ;;  %v4833_v19 = vpop.f32.mrf.mxu1  ;;  %v5136_v21 = vpack.c.bf16 %v5095_v48, %v5094_v35  ;;  %v5097_v35 = vld [vmem:[%s10360_s6 + $0x88] sm:$0xff] }
0x1739   :  { %v5960_v32 = vmul.f32 -1.442695, %v4884_v55  ;;  %v4898_v38 = vadd.f32 %v4833_v19, %v3694_v11  ;;  %v5111_v55 = vld [vmem:[%s10360_s6 + $0xf8] sm:$0xff]  ;;  %v5109_v11 = vld [vmem:[%s10360_s6 + $0xe8] sm:$0xff] }
0x173a   :  { %v5145_v27 = vpack.c.bf16 %v5111_v55, %v5110_v49  ;;  %v10564_v49 = vld [vmem:[#allocation26_spill] sm:$0xff] }
0x173b   :  { %7578 = vpow2.f32 %v5960_v32  ;;  %v5962_v52 = vmul.f32 -1.442695, %v4898_v38  ;;  %v5093_v32 = vld [vmem:[%s10360_s6 + $0x68] sm:$0xff]  ;;  %v5144_v38 = vpack.c.bf16 %v5109_v11, %v5108_v26  ;;  %v3698_v55 = vadd.f32 %v10564_v49, %v9397_v13 }
0x173c   :  { %7580 = vpow2.f32 %v5961_v39  ;;  %v5135_v19 = vpack.c.bf16 %v5093_v32, %v5092_v62  ;;  %v5090_v39 = vld [vmem:[%s10360_s6 + $0x50] sm:$0xff]  ;;  %v4215_v49 = vmax.f32 %v9428_v3, %v9485_v57 }
0x173d   :  { %7582 = vpow2.f32 %v5962_v52  ;;  %v5091_v52 = vld [vmem:[%s10360_s6 + $0x58] sm:$0xff]  ;;  %v10565_v11 = vld [vmem:[#allocation44_spill] sm:$0xff] }
0x1744   :  { %v7577_v15 = vpop.eup %7576 }
0x1745   :  { %v4891_v41 = vadd.f32 1.0, %v7577_v15  ;;  %v5134_v15 = vpack.c.bf16 %v5091_v52, %v5090_v39 }
0x1747   :  { %7584 = vrcp.f32 %v4891_v41  ;;  %v5106_v41 = vld [vmem:[%s10360_s6 + $0xd0] sm:$0xff] }
0x1748   :  { %v7579_v16 = vpop.eup %7578 }
0x1749   :  { %v4892_v5 = vadd.f32 1.0, %v7579_v16  ;;  %v7581_v17 = vpop.eup %7580  ;;  %v5107_v16 = vld [vmem:[%s10360_s6 + $0xd8] sm:$0xff] }
0x174a   :  { %v7583_v36 = vpop.eup %7582  ;;  %v4905_v31 = vadd.f32 1.0, %v7581_v17  ;;  %v5088_v17 = vld [vmem:[%s10360_s6 + $0x40] sm:$0xff] }
0x174b   :  { %7586 = vrcp.f32 %v4892_v5  ;;  %v4906_v59 = vadd.f32 1.0, %v7583_v36  ;;  %v5143_v5 = vpack.c.bf16 %v5107_v16, %v5106_v41  ;;  %v5089_v36 = vld [vmem:[%s10360_s6 + $0x48] sm:$0xff]  ;;  %v10566_v41 = vld [vmem:[#allocation45_spill] sm:$0xff] }
0x174c   :  { %7588 = vrcp.f32 %v4905_v31  ;;  %v5133_v31 = vpack.c.bf16 %v5089_v36, %v5088_v17  ;;  %v3700_v16 = vadd.f32 %v10566_v41, %v9409_v25 }
0x174d   :  { %7590 = vrcp.f32 %v4906_v59 }
0x1754   :  { %v7585_v42 = vpop.eup %7584 }
0x1755   :  { %v4913_v54 = vmul.f32 %v7585_v42, %v4911_v20  ;;  %v5104_v20 = vld [vmem:[%s10360_s6 + $0xc0] sm:$0xff]  ;;  %v5105_v42 = vld [vmem:[%s10360_s6 + $0xc8] sm:$0xff] }
0x1756   :  { %v5142_v59 = vpack.c.bf16 %v5105_v42, %v5104_v20  ;;  %v10567_v42 = vld [vmem:[#allocation17_spill] sm:$0xff] }
0x1757   :  { %v4915_v7 = vadd.f32 %v4913_v54, %v3789_v61  ;;  %v5087_v61 = vld [vmem:[%s10360_s6 + $0x38] sm:$0xff] }
0x1758   :  { %v7587_v29 = vpop.eup %7586  ;;  %v5132_v54 = vpack.c.bf16 %v5087_v61, %v5086_v34 }
0x1759   :  { %7592 = vtanh.f32 %v4915_v7  ;;  %v4914_v50 = vmul.f32 %v7587_v29, %v4912_v47  ;;  %v7589_v43 = vpop.eup %7588  ;;  %v5102_v7 = vld [vmem:[%s10360_s6 + $0xb0] sm:$0xff]  ;;  %v5103_v47 = vld [vmem:[%s10360_s6 + $0xb8] sm:$0xff] }
0x175a   :  { %v7591_v8 = vpop.eup %7590  ;;  %v4919_v33 = vsub.f32 1.0, %v7589_v43  ;;  %v4923_v51 = vmul.f32 %v7589_v43, %v9710_v40  ;;  %v5141_v29 = vpack.c.bf16 %v5103_v47, %v5102_v7  ;;  %v5101_v43 = vld [vmem:[%s10360_s6 + $0xa8] sm:$0xff] }
0x175b   :  { %v4916_v28 = vadd.f32 %v4914_v50, %v3792_v44  ;;  %v4920_v9 = vsub.f32 1.0, %v7591_v8  ;;  %v4924_v60 = vmul.f32 %v7591_v8, %v9713_v4  ;;  %v5085_v44 = vld [vmem:[%s10360_s6 + $0x28] sm:$0xff] }
0x175c   :  { %v5131_v50 = vpack.c.bf16 %v5085_v44, %v5084_v56 }
0x175d   :  { %7594 = vtanh.f32 %v4916_v28  ;;  %v5100_v28 = vld [vmem:[%s10360_s6 + $0xa0] sm:$0xff] }
0x175e   :  { %v5140_v8 = vpack.c.bf16 %v5101_v43, %v5100_v28 }
0x1766   :  { %v7593_v2 = vpop.eup %7592 }
0x1767   :  { %v4921_v22 = vmul.f32 %v7593_v2, %v4919_v33  ;;  %v5082_v33 = vld [vmem:[%s10360_s6 + $0x10] sm:$0xff]  ;;  %v5083_v2 = vld [vmem:[%s10360_s6 + $0x18] sm:$0xff] }
0x1769   :  { %v9769_v12 = vadd.f32 %v4923_v51, %v4921_v22  ;;  %v5098_v22 = vld [vmem:[%s10360_s6 + $0x90] sm:$0xff]  ;;  %v5130_v51 = vpack.c.bf16 %v5083_v2, %v5082_v33 }
0x176a   :  { %v7595_v18 = vpop.eup %7594 }
0x176b   :  { %v4922_v45 = vmul.f32 %v7595_v18, %v4920_v9  ;;  %v5099_v9 = vld [vmem:[%s10360_s6 + $0x98] sm:$0xff]  ;;  %v5080_v18 = vld [vmem:[%s10360_s6] sm:$0xff] }
0x176d   :  { %v9772_v24 = vadd.f32 %v4924_v60, %v4922_v45  ;;  %v5081_v45 = vld [vmem:[%s10360_s6 + $0x8] sm:$0xff]  ;;  %v5139_v60 = vpack.c.bf16 %v5099_v9, %v5098_v22 }
0x176e   :  { %v5129_v48 = vpack.c.bf16 %v5081_v45, %v5080_v18  ;;  %v10569_v18 = vld [vmem:[#allocation48_spill] sm:$0xff] }
0x176f   :  { %v4935_v23 = vpack.c.bf16 %v9772_v24, %v9769_v12  ;;  %v3800_v45 = vadd.f32 %v10569_v18, %v9419_v0 }
0x1771   :  { %4969 = vmatmul.mubr.bf16.vlgmr.msra.gmra.mxu1 %v4935_v23  ;;  %6959 = vmatmul.mubr.bf16.vlgmr.msra.gmra.mxu0 %v4935_v23  ;;  %v5096_v23 = vld [vmem:[%s10360_s6 + $0x80] sm:$0xff] }
0x1772   :  { %6998 = vmatprep.mubr.msk.bf16.mxu0 %vm7753_vm2, %v10410_v30  ;;  %6978 = vmatprep.mubr.msk.bf16.mxu1 %vm7753_vm2, %v10410_v30 }
0x1773   :  { %6983 = vmatpush3.bf16.msra.mxu0 %v5136_v21  ;;  %6963 = vmatpush3.bf16.msra.mxu1 %v5145_v27  ;;  %v5138_v21 = vpack.c.bf16 %v5097_v35, %v5096_v23  ;;  %v4216_v35 = vadd.f32 %v9482_v37, %v9426_v6 }
0x1774   :  { %6984 = vmatprep.subr.bf16.mxu0 %v10410_v30  ;;  %6964 = vmatprep.subr.bf16.mxu1 %v10410_v30 }
0x1777   :  { %6985 = vmatpush3.bf16.msra.mxu0 %v5135_v19  ;;  %6965 = vmatpush3.bf16.msra.mxu1 %v5144_v38  ;;  %v3702_v38 = vadd.f32 %v10565_v11, %v9397_v13 }
0x1778   :  { %6986 = vmatprep.subr.bf16.mxu0 %v10410_v30  ;;  %6966 = vmatprep.subr.bf16.mxu1 %v10410_v30 }
0x177b   :  { %6987 = vmatpush3.bf16.msra.mxu0 %v5134_v15  ;;  %6967 = vmatpush3.bf16.msra.mxu1 %v5143_v5 }
0x177c   :  { %6988 = vmatprep.subr.bf16.mxu0 %v10410_v30  ;;  %6968 = vmatprep.subr.bf16.mxu1 %v10410_v30 }
0x177f   :  { %6989 = vmatpush3.bf16.msra.mxu0 %v5133_v31  ;;  %6969 = vmatpush3.bf16.msra.mxu1 %v5142_v59  ;;  %v3704_v59 = vadd.f32 %v10567_v42, %v9409_v25  ;;  %v10568_v25 = vld [vmem:[#allocation47_spill] sm:$0xff] }
0x1780   :  { %6990 = vmatprep.subr.bf16.mxu0 %v10410_v30  ;;  %6970 = vmatprep.subr.bf16.mxu1 %v10410_v30  ;;  %v3797_v33 = vadd.f32 %v10568_v25, %v9419_v0 }
0x1783   :  { %6991 = vmatpush3.bf16.msra.mxu0 %v5132_v54  ;;  %6971 = vmatpush3.bf16.msra.mxu1 %v5141_v29 }
0x1784   :  { %6992 = vmatprep.subr.bf16.mxu0 %v10410_v30  ;;  %6972 = vmatprep.subr.bf16.mxu1 %v10410_v30 }
0x1787   :  { %6993 = vmatpush3.bf16.msra.mxu0 %v5131_v50  ;;  %6973 = vmatpush3.bf16.msra.mxu1 %v5140_v8 }
0x1788   :  { %6994 = vmatprep.subr.bf16.mxu0 %v10410_v30  ;;  %6974 = vmatprep.subr.bf16.mxu1 %v10410_v30 }
0x178b   :  { %6995 = vmatpush3.bf16.msra.mxu0 %v5130_v51  ;;  %6975 = vmatpush3.bf16.msra.mxu1 %v5139_v60 }
0x178c   :  { %6996 = vmatprep.subr.bf16.mxu0 %v10410_v30  ;;  %6976 = vmatprep.subr.bf16.mxu1 %v10410_v30 }
0x178f   :  { %6997 = vmatpush3.bf16.msra.mxu0 %v5129_v48  ;;  %6977 = vmatpush3.bf16.msra.mxu1 %v5138_v21  ;;  %v4214_v21 = vmax.f32 %v9426_v6, %v9482_v37 }
0x1790   :  { %7022 = vmatprep.subr.bf16.mxu0 %v10410_v30  ;;  %7002 = vmatprep.subr.bf16.mxu1 %v10410_v30 }
0x1791   :  { %v4357_v0 = vmax.f32 %v4214_v21, %v9539_v53 }
0x1793   :  { %v4500_v6 = vmax.f32 %v4357_v0, %v9596_v1 }
0x1831   :  { %v4970_v27 = vpop.f32.mrf.mxu1  ;;  %v5013_v62 = vpop.f32.mrf.mxu0 }
0x1832   :  { %v5026_v32 = vadd.f32 %v4970_v27, %v3698_v55  ;;  %v5054_v28 = vadd.f32 %v9760_v58, %v5013_v62  ;;  %v4359_v55 = vadd.f32 %v9539_v53, %v4216_v35  ;;  %v4358_v27 = vmax.f32 %v4215_v49, %v9542_v14  ;;  %v5114_v35 = vld [vmem:[%s10360_s6 + $0x110] sm:$0xff]  ;;  %v5112_v49 = vld [vmem:[%s10360_s6 + $0x100] sm:$0xff] }
0x1833   :  { %v4972_v19 = vpop.f32.mrf.mxu1  ;;  %v6960_v26 = vpop.f32.mrf.mxu0 }
0x1834   :  { %v5963_v39 = vmul.f32 -1.442695, %v5026_v32  ;;  %v5040_v36 = vadd.f32 %v4972_v19, %v3700_v16  ;;  %v4502_v26 = vadd.f32 %v9596_v1, %v4359_v55  ;;  %v4501_v37 = vmax.f32 %v4358_v27, %v9599_v63 }
0x1835   :  { %v4974_v52 = vpop.f32.mrf.mxu1  ;;  %v5016_v15 = vpop.f32.mrf.mxu0 }
0x1836   :  { %7596 = vpow2.f32 %v5963_v39  ;;  %v5027_v5 = vadd.f32 %v4974_v52, %v3702_v38  ;;  %v5965_v61 = vmul.f32 -1.442695, %v5040_v36  ;;  %v5055_v51 = vadd.f32 %v9760_v58, %v5016_v15 }
0x1837   :  { %v6961_v17 = vpop.f32.mrf.mxu0  ;;  %v4976_v20 = vpop.f32.mrf.mxu1  ;;  %v4217_v58 = vadd.f32 %v9485_v57, %v9428_v3  ;;  %v4645_v53 = vadd.f32 %v9653_v10, %v4502_v26  ;;  %v4643_v39 = vmax.f32 %v4500_v6, %v9653_v10  ;;  %v4644_v52 = vmax.f32 %v4501_v37, %v9656_v46 }
0x1838   :  { %v5964_v31 = vmul.f32 -1.442695, %v5027_v5  ;;  %v5041_v34 = vadd.f32 %v4976_v20, %v3704_v59 }
0x1839   :  { %v4360_v19 = vadd.f32 %v9542_v14, %v4217_v58  ;;  %v4788_v1 = vadd.f32 %v9710_v40, %v4645_v53  ;;  %v4786_v5 = vmax.f32 %v4643_v39, %v9710_v40  ;;  %v4787_v17 = vmax.f32 %v4644_v52, %v9713_v4  ;;  %v5113_v58 = vld [vmem:[%s10360_s6 + $0x108] sm:$0xff] }
0x183a   :  { %7598 = vpow2.f32 %v5964_v31  ;;  %v5966_v54 = vmul.f32 -1.442695, %v5041_v34  ;;  %v5229_v55 = vpack.c.bf16 %v5113_v58, %v5112_v49  ;;  %v10080_v49 = vld [vmem:[#allocation12 + $0xa8] sm:$0xff]  ;;  %v5355_v58 = vld [vmem:[#allocation12 + $0x20] sm:$0xff] }
0x183b   :  { %7600 = vpow2.f32 %v5965_v61  ;;  %v4503_v57 = vadd.f32 %v9599_v63, %v4360_v19  ;;  %v4931_v10 = vadd.f32 %v9769_v12, %v4788_v1  ;;  %v4929_v20 = vmax.f32 %v4786_v5, %v9769_v12 }
0x183c   :  { %7602 = vpow2.f32 %v5966_v54 }
0x183d   :  { %v4646_v41 = vadd.f32 %v9656_v46, %v4503_v57  ;;  %v4930_v46 = vmax.f32 %v4787_v17, %v9772_v24  ;;  %v5967_v57 = vld [vmem:[%s10361_s7] ss:$0 sm:$0xff] }
0x183f   :  { %v4789_v31 = vadd.f32 %v9713_v4, %v4646_v41 }
0x1841   :  { %v4932_v59 = vadd.f32 %v9772_v24, %v4789_v31 }
0x1843   :  { %v7597_v13 = vpop.eup %7596 }
0x1844   :  { %v5034_v7 = vadd.f32 1.0, %v7597_v13  ;;  %v5127_v13 = vld [vmem:[%s10360_s6 + $0x178] sm:$0xff] }
0x1846   :  { %7604 = vrcp.f32 %v5034_v7 }
0x1847   :  { %v7599_v47 = vpop.eup %7598 }
0x1848   :  { %v5035_v29 = vadd.f32 1.0, %v7599_v47  ;;  %v7601_v56 = vpop.eup %7600 }
0x1849   :  { %v7603_v44 = vpop.eup %7602  ;;  %v5048_v50 = vadd.f32 1.0, %v7601_v56 }
0x184a   :  { %7606 = vrcp.f32 %v5035_v29  ;;  %v5049_v8 = vadd.f32 1.0, %v7603_v44  ;;  %v5124_v44 = vld [vmem:[%s10360_s6 + $0x160] sm:$0xff] }
0x184b   :  { %7608 = vrcp.f32 %v5048_v50  ;;  %v5125_v50 = vld [vmem:[%s10360_s6 + $0x168] sm:$0xff] }
0x184c   :  { %7610 = vrcp.f32 %v5049_v8  ;;  %v5123_v8 = vld [vmem:[%s10360_s6 + $0x158] sm:$0xff] }
0x1853   :  { %v7605_v43 = vpop.eup %7604 }
0x1854   :  { %v5056_v2 = vmul.f32 %v7605_v43, %v5054_v28  ;;  %v5235_v28 = vpack.c.bf16 %v5125_v50, %v5124_v44  ;;  %v5122_v43 = vld [vmem:[%s10360_s6 + $0x150] sm:$0xff]  ;;  %v10052_v44 = vld [vmem:[#allocation12 + $0xd8] sm:$0xff]  ;;  %v10054_v50 = vld [vmem:[#allocation12 + $0x50] sm:$0xff] }
0x1855   :  { %v5234_v25 = vpack.c.bf16 %v5123_v8, %v5122_v43  ;;  %v10059_v43 = vld [vmem:[#allocation12 + $0x58] sm:$0xff] }
0x1856   :  { %v5058_v22 = vadd.f32 %v5056_v2, %v3797_v33  ;;  %v5120_v33 = vld [vmem:[%s10360_s6 + $0x140] sm:$0xff]  ;;  %v5121_v2 = vld [vmem:[%s10360_s6 + $0x148] sm:$0xff]  ;;  %v5571_v8 = vpack.c.bf16 %v10059_v43, %v10054_v50 }
0x1857   :  { %v7607_v9 = vpop.eup %7606 }
0x1858   :  { %7612 = vtanh.f32 %v5058_v22  ;;  %v5057_v60 = vmul.f32 %v7607_v9, %v5055_v51  ;;  %v7609_v48 = vpop.eup %7608  ;;  %v5233_v22 = vpack.c.bf16 %v5121_v2, %v5120_v33  ;;  %v5118_v51 = vld [vmem:[%s10360_s6 + $0x130] sm:$0xff]  ;;  %v5119_v9 = vld [vmem:[%s10360_s6 + $0x138] sm:$0xff] }
0x1859   :  { %v7611_v62 = vpop.eup %7610  ;;  %v5062_v32 = vsub.f32 1.0, %v7609_v48  ;;  %v5066_v3 = vmul.f32 %v7609_v48, %v9769_v12  ;;  %v5126_v12 = vld [vmem:[%s10360_s6 + $0x170] sm:$0xff]  ;;  %v5232_v18 = vpack.c.bf16 %v5119_v9, %v5118_v51  ;;  %v5115_v48 = vld [vmem:[%s10360_s6 + $0x118] sm:$0xff]  ;;  %v10071_v9 = vld [vmem:[#allocation12 + $0xb8] sm:$0xff] }
0x185a   :  { %v5059_v23 = vadd.f32 %v5057_v60, %v3800_v45  ;;  %v5063_v14 = vsub.f32 1.0, %v7611_v62  ;;  %v5067_v63 = vmul.f32 %v7611_v62, %v9772_v24  ;;  %v5236_v29 = vpack.c.bf16 %v5127_v13, %v5126_v12  ;;  %v5116_v45 = vld [vmem:[%s10360_s6 + $0x120] sm:$0xff]  ;;  %v5117_v60 = vld [vmem:[%s10360_s6 + $0x128] sm:$0xff]  ;;  %v10038_v13 = vld [vmem:[#allocation12 + $0xe8] sm:$0xff] }
0x185b   :  { %v5230_v21 = vpack.c.bf16 %v5115_v48, %v5114_v35  ;;  %v10036_v12 = vld [vmem:[#allocation12 + $0xe0] sm:$0xff]  ;;  %v10065_v33 = vld [vmem:[#allocation12 + $0xc8] sm:$0xff]  ;;  %v10069_v51 = vld [vmem:[#allocation12 + $0xb0] sm:$0xff] }
0x185c   :  { %7614 = vtanh.f32 %v5059_v23  ;;  %v5231_v23 = vpack.c.bf16 %v5117_v60, %v5116_v45  ;;  %v5359_v2 = vld [vmem:[#allocation12 + $0x40] sm:$0xff]  ;;  %v5357_v45 = vld [vmem:[#allocation12 + $0x30] sm:$0xff]  ;;  %v5358_v60 = vld [vmem:[#allocation12 + $0x38] sm:$0xff]  ;;  %v5582_v35 = vpack.c.bf16 %v10071_v9, %v10069_v51 }
0x185d   :  { %v10077_v48 = vld [vmem:[#allocation12 + $0xa0] sm:$0xff] }
0x1865   :  { %v7613_v11 = vpop.eup %7612 }
0x1866   :  { %v5064_v38 = vmul.f32 %v7613_v11, %v5062_v32 }
0x1868   :  { %v9926_v15 = vadd.f32 %v5066_v3, %v5064_v38 }
0x1869   :  { %v7615_v16 = vpop.eup %7614 }
0x186a   :  { %v5065_v36 = vmul.f32 %v7615_v16, %v5063_v14  ;;  %v5074_v34 = vadd.f32 %v9926_v15, %v4931_v10  ;;  %v5072_v61 = vmax.f32 %v4929_v20, %v9926_v15 }
0x186c   :  { %v9936_v42 = vadd.f32 %v5067_v63, %v5065_v36  ;;  %v5078_v7 = vmul.f32 0.125, %v5074_v34  ;;  %v10025_v34 = vld [vmem:[#allocation12 + $0xf8] sm:$0xff] }
0x186e   :  { %v5318_v40 = vmul.f32 %v9936_v42, %v9936_v42  ;;  %v5073_v54 = vmax.f32 %v4930_v46, %v9936_v42  ;;  %v5075_v4 = vadd.f32 %v9936_v42, %v4932_v59  ;;  %v5228_v0 = vpack.c.bf16 %v9936_v42, %v9926_v15  ;;  %v10023_v59 = vld [vmem:[#allocation12 + $0xf0] sm:$0xff] }
0x186f   :  { %v5317_v46 = vmul.f32 %v9926_v15, %v9926_v15 }
0x1870   :  { %5321 = vadd.xlane.f32.xlu1 %v5318_v40  ;;  %v5128_v24 = vpack.c.bf16 %v5073_v54, %v5072_v61  ;;  %v5079_v47 = vmul.f32 0.125, %v5075_v4  ;;  %v10027_v40 = vld [vmem:[#allocation12 + $0x70] sm:$0xff]  ;;  %v5586_v61 = vpack.c.bf16 %v10025_v34, %v10023_v59  ;;  %v10031_v54 = vld [vmem:[#allocation12 + $0x78] sm:$0xff] }
0x1871   :  { %v5573_v4 = vpack.c.bf16 %v10031_v54, %v10027_v40 }
0x1872   :  { %6999 = vmatmul.mubr.bf16.vlgmr.msra.gmra.mxu0 %v5128_v24  ;;  %v5137_v56 = vpack.c.bf16 %v5079_v47, %v5078_v7  ;;  %v10040_v24 = vld [vmem:[#allocation12 + $0x60] sm:$0xff]  ;;  %v5585_v7 = vpack.c.bf16 %v10038_v13, %v10036_v12  ;;  %v10045_v47 = vld [vmem:[#allocation12 + $0x68] sm:$0xff] }
0x1873   :  { %7038 = vmatprep.mubr.msk.bf16.mxu0 %vm7753_vm2, %v10410_v30  ;;  %7023 = vmatpush3.bf16.msra.mxu0 %v5586_v61  ;;  %v5422_v61 = vmul.f32 %v5358_v60, %v5358_v60 }
0x1874   :  { %6979 = vmatmul.mubr.bf16.vlgmr.msra.gmra.mxu1 %v5137_v56  ;;  %7024 = vmatprep.subr.bf16.mxu0 %v10410_v30  ;;  %v10050_v56 = vld [vmem:[#allocation12 + $0xd0] sm:$0xff] }
0x1875   :  { %7003 = vmatpush3.bf16.msra.mxu1 %v5236_v29  ;;  %7018 = vmatprep.mubr.msk.bf16.mxu1 %vm7753_vm2, %v10410_v30  ;;  %v5572_v29 = vpack.c.bf16 %v10045_v47, %v10040_v24 }
0x1876   :  { %7004 = vmatprep.subr.bf16.mxu1 %v10410_v30 }
0x1877   :  { %7025 = vmatpush3.bf16.msra.mxu0 %v5585_v7  ;;  %v5423_v7 = vmul.f32 %v5359_v2, %v5359_v2 }
0x1878   :  { %7026 = vmatprep.subr.bf16.mxu0 %v10410_v30 }
0x1879   :  { %7005 = vmatpush3.bf16.msra.mxu1 %v5235_v28  ;;  %v5584_v28 = vpack.c.bf16 %v10052_v44, %v10050_v56 }
0x187a   :  { %7006 = vmatprep.subr.bf16.mxu1 %v10410_v30 }
0x187b   :  { %7027 = vmatpush3.bf16.msra.mxu0 %v5584_v28 }
0x187c   :  { %7028 = vmatprep.subr.bf16.mxu0 %v10410_v30 }
0x187d   :  { %7007 = vmatpush3.bf16.msra.mxu1 %v5234_v25  ;;  %v10063_v25 = vld [vmem:[#allocation12 + $0xc0] sm:$0xff] }
0x187e   :  { %7008 = vmatprep.subr.bf16.mxu1 %v10410_v30 }
0x1881   :  { %7009 = vmatpush3.bf16.msra.mxu1 %v5233_v22  ;;  %v5360_v22 = vld [vmem:[#allocation12 + $0x48] sm:$0xff] }
0x1882   :  { %7010 = vmatprep.subr.bf16.mxu1 %v10410_v30  ;;  %v5424_v28 = vmul.f32 %v5360_v22, %v5360_v22 }
0x1885   :  { %7011 = vmatpush3.bf16.msra.mxu1 %v5232_v18  ;;  %v5583_v18 = vpack.c.bf16 %v10065_v33, %v10063_v25 }
0x1886   :  { %7012 = vmatprep.subr.bf16.mxu1 %v10410_v30 }
0x1887   :  { %7029 = vmatpush3.bf16.msra.mxu0 %v5583_v18  ;;  %v5425_v18 = vmul.f32 %v10054_v50, %v10054_v50  ;;  %v5430_v50 = vmul.f32 %v10031_v54, %v10031_v54  ;;  %v5437_v54 = vmul.f32 %v10069_v51, %v10069_v51  ;;  %v5442_v51 = vmul.f32 %v10052_v44, %v10052_v44 }
0x1888   :  { %7030 = vmatprep.subr.bf16.mxu0 %v10410_v30 }
0x1889   :  { %7013 = vmatpush3.bf16.msra.mxu1 %v5231_v23  ;;  %v5570_v23 = vpack.c.bf16 %v5360_v22, %v5359_v2  ;;  %v5429_v22 = vmul.f32 %v10027_v40, %v10027_v40  ;;  %v5436_v40 = vmul.f32 %v10080_v49, %v10080_v49 }
0x188a   :  { %7014 = vmatprep.subr.bf16.mxu1 %v10410_v30 }
0x188b   :  { %7031 = vmatpush3.bf16.msra.mxu0 %v5582_v35 }
0x188c   :  { %7032 = vmatprep.subr.bf16.mxu0 %v10410_v30 }
0x188d   :  { %7015 = vmatpush3.bf16.msra.mxu1 %v5230_v21  ;;  %v5569_v21 = vpack.c.bf16 %v5358_v60, %v5357_v45  ;;  %v5427_v60 = vmul.f32 %v10040_v24, %v10040_v24 }
0x188e   :  { %7016 = vmatprep.subr.bf16.mxu1 %v10410_v30 }
0x1891   :  { %7017 = vmatpush3.bf16.msra.mxu1 %v5229_v55  ;;  %v5356_v55 = vld [vmem:[#allocation12 + $0x28] sm:$0xff] }
0x1892   :  { %7042 = vmatprep.subr.bf16.mxu1 %v10410_v30 }
0x1894   :  { %7019 = vmatmul.mubr.bf16.vlgmr.msra.gmra.mxu1 %v5228_v0  ;;  %v5581_v0 = vpack.c.bf16 %v10080_v49, %v10077_v48  ;;  %v5441_v49 = vmul.f32 %v10050_v56, %v10050_v56  ;;  %v5446_v56 = vmul.f32 %v10025_v34, %v10025_v34  ;;  %v10141_v34 = vld [vmem:[#allocation12 + $0x118] sm:$0xff] }
0x1895   :  { %7058 = vmatprep.mubr.msk.bf16.mxu1 %vm7753_vm2, %v10410_v30  ;;  %7043 = vmatpush3.bf16.msra.mxu1 %v5573_v4 }
0x1896   :  { %7044 = vmatprep.subr.bf16.mxu1 %v10410_v30  ;;  %7033 = vmatpush3.bf16.msra.mxu0 %v5581_v0 }
0x1897   :  { %7034 = vmatprep.subr.bf16.mxu0 %v10410_v30 }
0x1899   :  { %7045 = vmatpush3.bf16.msra.mxu1 %v5572_v29 }
0x189a   :  { %7046 = vmatprep.subr.bf16.mxu1 %v10410_v30 }
0x189d   :  { %7047 = vmatpush3.bf16.msra.mxu1 %v5571_v8 }
0x189e   :  { %7048 = vmatprep.subr.bf16.mxu1 %v10410_v30 }
0x18a1   :  { %7049 = vmatpush3.bf16.msra.mxu1 %v5570_v23  ;;  %v5426_v23 = vmul.f32 %v10059_v43, %v10059_v43 }
0x18a2   :  { %7050 = vmatprep.subr.bf16.mxu1 %v10410_v30 }
0x18a5   :  { %7051 = vmatpush3.bf16.msra.mxu1 %v5569_v21  ;;  %v5428_v21 = vmul.f32 %v10045_v47, %v10045_v47  ;;  %v5435_v47 = vmul.f32 %v10077_v48, %v10077_v48  ;;  %v5440_v48 = vmul.f32 %v10065_v33, %v10065_v33  ;;  %v5445_v33 = vmul.f32 %v10023_v59, %v10023_v59 }
0x18a6   :  { %7052 = vmatprep.subr.bf16.mxu1 %v10410_v30 }
0x1932   :  { %v5221_v27 = vpop.f32.mrf.mxu0 }
0x1934   :  { %v5180_v62 = vpop.f32.mrf.mxu1  ;;  %v7000_v32 = vpop.f32.mrf.mxu0 }
0x1935   :  { %v5222_v38 = vadd.f32 %v5221_v27, %v5180_v62  ;;  %v5568_v27 = vpack.c.bf16 %v5356_v55, %v5355_v58  ;;  %v5353_v62 = vld [vmem:[#allocation12 + $0x10] sm:$0xff]  ;;  %v5351_v32 = vld [vmem:[#allocation12] sm:$0xff] }
0x1936   :  { %v6980_v19 = vpop.f32.mrf.mxu1  ;;  %v5224_v26 = vpop.f32.mrf.mxu0 }
0x1937   :  { %v5352_v19 = vld [vmem:[#allocation12 + $0x8] sm:$0xff]  ;;  %7053 = vmatpush3.bf16.msra.mxu1 %v5568_v27 }
0x1938   :  { %v5183_v11 = vpop.f32.mrf.mxu1  ;;  %v7001_v6 = vpop.f32.mrf.mxu0  ;;  %7054 = vmatprep.subr.bf16.mxu1 %v10410_v30 }
0x1939   :  { %v5225_v52 = vadd.f32 %v5224_v26, %v5183_v11  ;;  %v5369_v26 = vld [vmem:[#allocation12 + $0x90] sm:$0xff]  ;;  %v5370_v11 = vld [vmem:[#allocation12 + $0x98] sm:$0xff]  ;;  %v5417_v6 = vmul.f32 %v5353_v62, %v5353_v62 }
0x193a   :  { %v6981_v37 = vpop.f32.mrf.mxu1  ;;  %v5434_v24 = vmul.f32 %v5370_v11, %v5370_v11 }
0x193b   :  { %v5415_v37 = vmul.f32 %v5351_v32, %v5351_v32 }
0x1954   :  { %v5271_v3 = vpop.f32.mrf.mxu1 }
0x1955   :  { %v5278_v53 = vadd.f32 %v5271_v3, %v5222_v38  ;;  %v5416_v38 = vmul.f32 %v5352_v19, %v5352_v19  ;;  %v5354_v3 = vld [vmem:[#allocation12 + $0x18] sm:$0xff] }
0x1956   :  { %v7020_v39 = vpop.f32.mrf.mxu1 }
0x1957   :  { %v5287_v14 = vadd.f32 %v5967_v57, %v5278_v53  ;;  %v5479_v53 = vadd.f32 %v5416_v38, %v5415_v37  ;;  %v5580_v39 = vpack.c.bf16 %v5370_v11, %v5369_v26 }
0x1958   :  { %v5274_v41 = vpop.f32.mrf.mxu1 }
0x1959   :  { %v5279_v1 = vadd.f32 %v5274_v41, %v5225_v52  ;;  %vm5289_vm3 = vcmp.gt.f32.partialorder %v5287_v14, 0.0  ;;  %v5291_v16 = vmul.f32 0.2, %v5287_v14  ;;  %v5419_v52 = vmul.f32 %v5355_v58, %v5355_v58  ;;  %v5367_v41 = vld [vmem:[#allocation12 + $0x80] sm:$0xff]  ;;  %7035 = vmatpush3.bf16.msra.mxu0 %v5580_v39 }
0x195a   :  { %v7021_v5 = vpop.f32.mrf.mxu1  ;;  %7036 = vmatprep.subr.bf16.mxu0 %v10410_v30  ;;  %v5431_v27 = vmul.f32 %v5367_v41, %v5367_v41 }
0x195b   :  { %v5288_v17 = vadd.f32 %v5967_v57, %v5279_v1  ;;  %v10013_v36 = vsel %vm5289_vm3, %v5287_v14, %v5291_v16  ;;  %v5418_v57 = vmul.f32 %v5354_v3, %v5354_v3  ;;  %v5567_v14 = vpack.c.bf16 %v5354_v3, %v5353_v62  ;;  %v5368_v1 = vld [vmem:[#allocation12 + $0x88] sm:$0xff] }
0x195c   :  { %v5295_v63 = vmul.f32 %v10013_v36, %v10013_v36  ;;  %v5480_v16 = vadd.f32 %v5479_v53, %v5417_v6  ;;  %v5420_v5 = vmul.f32 %v5356_v55, %v5356_v55  ;;  %v5432_v43 = vmul.f32 %v5368_v1, %v5368_v1 }
0x195d   :  { %vm5290_vm4 = vcmp.gt.f32.partialorder %v5288_v17, 0.0  ;;  %v5292_v31 = vmul.f32 0.2, %v5288_v17  ;;  %7055 = vmatpush3.bf16.msra.mxu1 %v5567_v14  ;;  %v5438_v53 = vmul.f32 %v10071_v9, %v10071_v9  ;;  %v5443_v9 = vmul.f32 %v10036_v12, %v10036_v12  ;;  %v10133_v12 = vld [vmem:[#allocation12 + $0x108] sm:$0xff] }
0x195e   :  { %5297 = vadd.xlane.f32.xlu0 %v5295_v63  ;;  %v5579_v63 = vpack.c.bf16 %v5368_v1, %v5367_v41  ;;  %7056 = vmatprep.subr.bf16.mxu1 %v10410_v30 }
0x195f   :  { %v10017_v10 = vsel %vm5290_vm4, %v5288_v17, %v5292_v31  ;;  %v5481_v17 = vadd.f32 %v5480_v16, %v5418_v57  ;;  %v5421_v31 = vmul.f32 %v5357_v45, %v5357_v45 }
0x1960   :  { %v5296_v20 = vmul.f32 %v10017_v10, %v10017_v10  ;;  %7037 = vmatpush3.bf16.msra.mxu0 %v5579_v63  ;;  %v10129_v63 = vld [vmem:[#allocation12 + $0x100] sm:$0xff] }
0x1961   :  { %7062 = vmatprep.subr.bf16.mxu0 %v10410_v30  ;;  %v5447_v44 = vmul.f32 %v10129_v63, %v10129_v63 }
0x1962   :  { %5299 = vadd.xlane.f32.xlu0 %v5296_v20  ;;  %v5482_v20 = vadd.f32 %v5481_v17, %v5419_v52 }
0x1964   :  { %v5483_v4 = vadd.f32 %v5482_v20, %v5420_v5 }
0x1966   :  { %5319 = vadd.xlane.f32.xlu0 %v5317_v46  ;;  %v5566_v46 = vpack.c.bf16 %v5352_v19, %v5351_v32  ;;  %v5484_v29 = vadd.f32 %v5483_v4, %v5421_v31  ;;  %v5433_v19 = vmul.f32 %v5369_v26, %v5369_v26  ;;  %v5439_v26 = vmul.f32 %v10063_v25, %v10063_v25 }
0x1967   :  { %v5444_v25 = vmul.f32 %v10038_v13, %v10038_v13  ;;  %v5448_v13 = vmul.f32 %v10133_v12, %v10133_v12  ;;  %v5450_v4 = vmul.f32 %v10141_v34, %v10141_v34 }
0x1968   :  { %7057 = vmatpush3.bf16.msra.mxu1 %v5566_v46  ;;  %v5485_v8 = vadd.f32 %v5484_v29, %v5422_v61  ;;  %v10137_v46 = vld [vmem:[#allocation12 + $0x110] sm:$0xff]  ;;  %v10145_v29 = vld [vmem:[#allocation12 + $0x120] sm:$0xff] }
0x1969   :  { %7082 = vmatprep.subr.bf16.mxu1 %v10410_v30  ;;  %v5449_v59 = vmul.f32 %v10137_v46, %v10137_v46 }
0x196a   :  { %v5486_v45 = vadd.f32 %v5485_v8, %v5423_v7 }
0x196c   :  { %v5487_v35 = vadd.f32 %v5486_v45, %v5424_v28  ;;  %v5451_v28 = vmul.f32 %v10145_v29, %v10145_v29 }
0x196e   :  { %v5488_v2 = vadd.f32 %v5487_v35, %v5425_v18  ;;  %v10149_v18 = vld [vmem:[#allocation12 + $0x128] sm:$0xff]  ;;  %v10153_v35 = vld [vmem:[#allocation12 + $0x130] sm:$0xff] }
0x196f   :  { %v5452_v45 = vmul.f32 %v10149_v18, %v10149_v18 }
0x1970   :  { %v5489_v58 = vadd.f32 %v5488_v2, %v5426_v23 }
0x1972   :  { %v5490_v55 = vadd.f32 %v5489_v58, %v5427_v60  ;;  %v5453_v60 = vmul.f32 %v10153_v35, %v10153_v35 }
0x1974   :  { %v5491_v0 = vadd.f32 %v5490_v55, %v5428_v21  ;;  %v10157_v21 = vld [vmem:[#allocation12 + $0x138] sm:$0xff]  ;;  %v10161_v55 = vld [vmem:[#allocation12 + $0x140] sm:$0xff] }
0x1975   :  { %v5454_v58 = vmul.f32 %v10157_v21, %v10157_v21 }
0x1976   :  { %v5492_v62 = vadd.f32 %v5491_v0, %v5429_v22 }
0x1978   :  { %v5493_v32 = vadd.f32 %v5492_v62, %v5430_v50  ;;  %v5455_v50 = vmul.f32 %v10161_v55, %v10161_v55 }
0x197a   :  { %v5494_v6 = vadd.f32 %v5493_v32, %v5431_v27  ;;  %v10165_v27 = vld [vmem:[#allocation12 + $0x148] sm:$0xff]  ;;  %v10169_v32 = vld [vmem:[#allocation12 + $0x150] sm:$0xff] }
0x197b   :  { %v5456_v62 = vmul.f32 %v10165_v27, %v10165_v27 }
0x197c   :  { %v5495_v37 = vadd.f32 %v5494_v6, %v5432_v43  ;;  %v5457_v6 = vmul.f32 %v10169_v32, %v10169_v32 }
0x197e   :  { %v5496_v38 = vadd.f32 %v5495_v37, %v5433_v19  ;;  %v5304_v19 = vpop.xlane.xlu1 %5303  ;;  %v10173_v37 = vld [vmem:[#allocation12 + $0x158] sm:$0xff] }
0x1980   :  { %v5497_v3 = vadd.f32 %v5496_v38, %v5434_v24  ;;  %v5458_v38 = vmul.f32 %v10173_v37, %v10173_v37 }
0x1982   :  { %v5498_v57 = vadd.f32 %v5497_v3, %v5435_v47  ;;  %v5312_v47 = vpop.xlane.xlu0 %5311  ;;  %v10177_v3 = vld [vmem:[#allocation12 + $0x160] sm:$0xff] }
0x1984   :  { %v5499_v39 = vadd.f32 %v5498_v57, %v5436_v40 }
0x1986   :  { %v5500_v11 = vadd.f32 %v5499_v39, %v5437_v54  ;;  %v5459_v54 = vmul.f32 %v10177_v3, %v10177_v3  ;;  %v5306_v39 = vpop.xlane.xlu1 %5305 }
0x1988   :  { %v5501_v52 = vadd.f32 %v5500_v11, %v5438_v53  ;;  %v10181_v53 = vld [vmem:[#allocation12 + $0x168] sm:$0xff] }
0x1989   :  { %v5460_v11 = vmul.f32 %v10181_v53, %v10181_v53 }
0x198a   :  { %v5502_v14 = vadd.f32 %v5501_v52, %v5439_v26  ;;  %v10185_v52 = vld [vmem:[#allocation12 + $0x170] sm:$0xff] }
0x198c   :  { %v5503_v41 = vadd.f32 %v5502_v14, %v5440_v48 }
0x198e   :  { %v5504_v1 = vadd.f32 %v5503_v41, %v5441_v49  ;;  %v5461_v49 = vmul.f32 %v10185_v52, %v10185_v52  ;;  %v10189_v41 = vld [vmem:[#allocation12 + $0x178] sm:$0xff] }
0x1990   :  { %v5505_v16 = vadd.f32 %v5504_v1, %v5442_v51 }
0x1992   :  { %v5506_v5 = vadd.f32 %v5505_v16, %v5443_v9  ;;  %v5314_v9 = vpop.xlane.xlu1 %5313 }
0x1994   :  { %v5507_v17 = vadd.f32 %v5506_v5, %v5444_v25  ;;  %v5462_v25 = vmul.f32 %v10189_v41, %v10189_v41  ;;  %v10193_v5 = vld [vmem:[#allocation12 + $0x180] sm:$0xff] }
0x1996   :  { %v5508_v31 = vadd.f32 %v5507_v17, %v5445_v33 }
0x1998   :  { %v5509_v20 = vadd.f32 %v5508_v31, %v5446_v56  ;;  %v5463_v56 = vmul.f32 %v10193_v5, %v10193_v5 }
0x199a   :  { %v5510_v61 = vadd.f32 %v5509_v20, %v5447_v44 }
0x199c   :  { %v5511_v7 = vadd.f32 %v5510_v61, %v5448_v13  ;;  %v5322_v13 = vpop.xlane.xlu1 %5321 }
0x199e   :  { %v5512_v8 = vadd.f32 %v5511_v7, %v5449_v59  ;;  %v10197_v59 = vld [vmem:[#allocation12 + $0x188] sm:$0xff] }
0x19a0   :  { %v5513_v23 = vadd.f32 %v5512_v8, %v5450_v4  ;;  %v10201_v8 = vld [vmem:[#allocation12 + $0x190] sm:$0xff] }
0x19a2   :  { %v5514_v2 = vadd.f32 %v5513_v23, %v5451_v28  ;;  %v5464_v28 = vmul.f32 %v10197_v59, %v10197_v59  ;;  %v5465_v23 = vmul.f32 %v10201_v8, %v10201_v8 }
0x19a4   :  { %v5515_v22 = vadd.f32 %v5514_v2, %v5452_v45 }
0x19a6   :  { %v5516_v0 = vadd.f32 %v5515_v22, %v5453_v60  ;;  %v10205_v60 = vld [vmem:[#allocation12 + $0x198] sm:$0xff]  ;;  %v10209_v22 = vld [vmem:[#allocation12 + $0x1a0] sm:$0xff] }
0x19a7   :  { %v5466_v2 = vmul.f32 %v10205_v60, %v10205_v60 }
0x19a8   :  { %v5517_v43 = vadd.f32 %v5516_v0, %v5454_v58 }
0x19aa   :  { %v5518_v24 = vadd.f32 %v5517_v43, %v5455_v50  ;;  %v5467_v50 = vmul.f32 %v10209_v22, %v10209_v22 }
0x19ac   :  { %v5519_v40 = vadd.f32 %v5518_v24, %v5456_v62  ;;  %v10213_v62 = vld [vmem:[#allocation12 + $0x1a8] sm:$0xff] }
0x19ad   :  { %v5468_v43 = vmul.f32 %v10213_v62, %v10213_v62 }
0x19ae   :  { %v5520_v57 = vadd.f32 %v5519_v40, %v5457_v6  ;;  %v10217_v6 = vld [vmem:[#allocation12 + $0x1b0] sm:$0xff] }
0x19af   :  { %v5469_v24 = vmul.f32 %v10217_v6, %v10217_v6 }
0x19b0   :  { %v5521_v48 = vadd.f32 %v5520_v57, %v5458_v38  ;;  %v10221_v38 = vld [vmem:[#allocation12 + $0x1b8] sm:$0xff]  ;;  %v10225_v57 = vld [vmem:[#allocation12 + $0x1c0] sm:$0xff] }
0x19b1   :  { %v5470_v40 = vmul.f32 %v10221_v38, %v10221_v38 }
0x19b2   :  { %v5522_v14 = vadd.f32 %v5521_v48, %v5459_v54  ;;  %v10229_v48 = vld [vmem:[#allocation12 + $0x1d0] sm:$0xff] }
0x19b4   :  { %v5523_v16 = vadd.f32 %v5522_v14, %v5460_v11 }
0x19b6   :  { %v5524_v17 = vadd.f32 %v5523_v16, %v5461_v49  ;;  %v10231_v49 = vld [vmem:[#allocation12 + $0x1c8] sm:$0xff] }
0x19b8   :  { %v5525_v61 = vadd.f32 %v5524_v17, %v5462_v25 }
0x19ba   :  { %v5526_v45 = vadd.f32 %v5525_v61, %v5463_v56 }
0x19bc   :  { %v5527_v58 = vadd.f32 %v5526_v45, %v5464_v28 }
0x19be   :  { %v5528_v0 = vadd.f32 %v5527_v58, %v5465_v23  ;;  %v5411_v58 = vld [vmem:[#allocation12 + $0x1e0] sm:$0xff] }
0x19e7   :  { %v5298_v26 = vpop.xlane.xlu0 %5297 }
0x19e8   :  { %v5307_v51 = vadd.f32 %v5304_v19, %v5298_v26  ;;  %v5529_v19 = vadd.f32 %v5528_v0, %v5466_v2 }
0x19ea   :  { %v5315_v31 = vadd.f32 %v5312_v47, %v5307_v51  ;;  %v5530_v47 = vadd.f32 %v5529_v19, %v5467_v50  ;;  %v5475_v50 = vmul.f32 %v5411_v58, %v5411_v58 }
0x19eb   :  { %v5300_v1 = vpop.xlane.xlu0 %5299 }
0x19ec   :  { %v5308_v33 = vadd.f32 %v5306_v39, %v5300_v1  ;;  %v5531_v54 = vadd.f32 %v5530_v47, %v5468_v43  ;;  %v5471_v39 = vmul.f32 %v10225_v57, %v10225_v57  ;;  %v5472_v1 = vmul.f32 %v10231_v49, %v10231_v49 }
0x19ee   :  { %v5316_v44 = vadd.f32 %v5314_v9, %v5308_v33  ;;  %v5532_v26 = vadd.f32 %v5531_v54, %v5469_v24  ;;  %v5473_v9 = vmul.f32 %v10229_v48, %v10229_v48 }
0x19ef   :  { %v5320_v20 = vpop.xlane.xlu0 %5319 }
0x19f0   :  { %v5324_v4 = vadd.f32 %v5322_v13, %v5316_v44  ;;  %v5323_v7 = vadd.f32 %v5320_v20, %v5315_v31  ;;  %v5533_v25 = vadd.f32 %v5532_v26, %v5470_v40  ;;  %v10237_v20 = vld [vmem:[#allocation12 + $0x1d8] sm:$0xff] }
0x19f1   :  { %v5474_v45 = vmul.f32 %v10237_v20, %v10237_v20 }
0x19f2   :  { %7616 = vrsqrt.f32 %v5324_v4  ;;  %vm5334_vm5 = vcmp.eq.f32.partialorder %v5324_v4, inf  ;;  %vm5336_vm6 = vcmp.eq.f32.partialorder %v5324_v4, 0.0  ;;  %v5337_v16 = vand.u32 2147483648, %v5324_v4 }
0x19f3   :  { %7618 = vrsqrt.f32 %v5323_v7  ;;  %vm5327_vm7 = vcmp.eq.f32.partialorder %v5323_v7, inf  ;;  %v5330_v17 = vand.u32 2147483648, %v5323_v7  ;;  %v5534_v44 = vadd.f32 %v5533_v25, %v5471_v39  ;;  %v10570_v25 = vld [vmem:[#allocation28_spill] sm:$0xff] }
0x19f4   :  { %vm5329_vm8 = vcmp.eq.f32.partialorder %v5323_v7, 0.0 }
0x19f5   :  { %v5535_v23 = vadd.f32 %v5534_v44, %v5472_v1  ;;  %v10243_v1 = vld [vmem:[#allocation12 + $0x1f0] sm:$0xff] }
0x19f7   :  { %v5536_v0 = vadd.f32 %v5535_v23, %v5473_v9  ;;  %v10245_v9 = vld [vmem:[#allocation12 + $0x1f8] sm:$0xff] }
0x19f9   :  { %v5537_v19 = vadd.f32 %v5536_v0, %v5474_v45 }
0x19fb   :  { %v5538_v24 = vadd.f32 %v5537_v19, %v5475_v50  ;;  %v5735_v50 = vpack.c.bf16 %v10237_v20, %v10229_v48 }
0x19ff   :  { %v7617_v11 = vpop.eup %7616 }
0x1a00   :  { %v7619_v14 = vpop.eup %7618  ;;  %v5333_v51 = vmul.f32 %v7617_v11, %v5324_v4 }
0x1a01   :  { %v5326_v33 = vmul.f32 %v7619_v14, %v5323_v7 }
0x1a02   :  { %v5335_v56 = vsel %vm5334_vm5, %v5324_v4, %v5333_v51  ;;  %v5412_v4 = vld [vmem:[#allocation12 + $0x1e8] sm:$0xff] }
0x1a03   :  { %v5328_v31 = vsel %vm5327_vm7, %v5323_v7, %v5326_v33  ;;  %v5338_v13 = vsel %vm5336_vm6, %v5337_v16, %v5335_v56  ;;  %v5476_v43 = vmul.f32 %v5412_v4, %v5412_v4  ;;  %v10571_v56 = vld [vmem:[#allocation30_spill] sm:$0xff] }
0x1a04   :  { %v5331_v61 = vsel %vm5329_vm8, %v5330_v17, %v5328_v31  ;;  %v5342_v28 = vadd.f32 1e-07, %v5338_v13  ;;  %vm5340_vm9 = vcmp.gt.f32.partialorder %v5338_v13, 1e-05  ;;  %v10572_v31 = vld [vmem:[#allocation19_spill] sm:$0xff] }
0x1a05   :  { %v5341_v2 = vadd.f32 1e-07, %v5331_v61  ;;  %v10241_v7 = vadd.f32 %v5538_v24, %v5476_v43  ;;  %vm5339_vm10 = vcmp.gt.f32.partialorder %v5331_v61, 1e-05 }
0x1a06   :  { %7620 = vrcp.f32 %v5342_v28  ;;  %v10573_v28 = vld [vmem:[#allocation16_spill] sm:$0xff] }
0x1a07   :  { %7622 = vrcp.f32 %v5341_v2  ;;  %v5679_v2 = vpack.c.bf16 %v10173_v37, %v10169_v32  ;;  %v5677_v32 = vpack.c.bf16 %v10157_v21, %v10153_v35  ;;  %v5733_v37 = vpack.c.bf16 %v10221_v38, %v10217_v6 }
0x1a08   :  { %v5675_v35 = vpack.c.bf16 %v10141_v34, %v10137_v46  ;;  %v5731_v21 = vpack.c.bf16 %v10205_v60, %v10201_v8 }
0x1a13   :  { %v7621_v47 = vpop.eup %7620 }
0x1a14   :  { %v7623_v40 = vpop.eup %7622  ;;  %v5346_v54 = vmul.f32 1e-05, %v7621_v47 }
0x1a15   :  { %v5344_v39 = vmul.f32 1e-05, %v7623_v40 }
0x1a16   :  { %v5348_v26 = vsel %vm5340_vm9, %v5346_v54, 1.0 }
0x1a17   :  { %v5347_v11 = vsel %vm5339_vm10, %v5344_v39, 1.0  ;;  %v5350_v14 = vmul.f32 100000.0, %v5348_v26 }
0x1a18   :  { %v5349_v51 = vmul.f32 100000.0, %v5347_v11 }
0x1a19   :  { %v5575_v16 = vmul.f32 %v5350_v14, %v10570_v25  ;;  %v5562_v33 = vmul.f32 %v5350_v14, %v10017_v10  ;;  %v10250_v17 = vmul.f32 %v5350_v14, %v10571_v56  ;;  %v10253_v44 = vmul.f32 %v5350_v14, %v9936_v42 }
0x1a1a   :  { %v5574_v13 = vmul.f32 %v5349_v51, %v10572_v31  ;;  %v5561_v61 = vmul.f32 %v5349_v51, %v10013_v36  ;;  %v10258_v45 = vmul.f32 %v5349_v51, %v10573_v28  ;;  %v10261_v23 = vmul.f32 %v5349_v51, %v9926_v15 }
0x1a1b   :  { %5577 = vst [vmem:[%s10363_s9 + $0x28] sm:$0xff] %v5575_v16  ;;  %5564 = vst [vmem:[%s10363_s9 + $0x20] sm:$0xff] %v5562_v33  ;;  %v5681_v42 = vpack.c.bf16 %v10189_v41, %v10185_v52  ;;  %v5737_v36 = vpack.c.bf16 %v10245_v9, %v10243_v1  ;;  %v5680_v52 = vpack.c.bf16 %v10181_v53, %v10177_v3 }
0x1a1c   :  { %5672 = vst [vmem:[%s10363_s9 + $0x30] sm:$0xff] %v10250_v17  ;;  %5728 = vst [vmem:[%s10363_s9 + $0x38] sm:$0xff] %v10253_v44  ;;  %v5578_v15 = vpack.c.bf16 %v5575_v16, %v5574_v13  ;;  %v5565_v10 = vpack.c.bf16 %v5562_v33, %v5561_v61  ;;  %v5736_v41 = vpack.c.bf16 %v5412_v4, %v5411_v58 }
0x1a1d   :  { %5576 = vst [vmem:[%s10363_s9 + $0x8] sm:$0xff] %v5574_v13  ;;  %5563 = vst [vmem:[%s10363_s9] sm:$0xff] %v5561_v61  ;;  %v5678_v3 = vpack.c.bf16 %v10165_v27, %v10161_v55  ;;  %v5734_v53 = vpack.c.bf16 %v10231_v49, %v10225_v57  ;;  %v5676_v55 = vpack.c.bf16 %v10149_v18, %v10145_v29 }
0x1a1e   :  { %5671 = vst [vmem:[%s10363_s9 + $0x10] sm:$0xff] %v10258_v45  ;;  %5727 = vst [vmem:[%s10363_s9 + $0x18] sm:$0xff] %v10261_v23  ;;  %7039 = vmatmul.mubr.bf16.vlgmr.msra.gmra.mxu0 %v5578_v15  ;;  %7059 = vmatmul.mubr.bf16.vlgmr.msra.gmra.mxu1 %v5565_v10  ;;  %v5732_v27 = vpack.c.bf16 %v10213_v62, %v10209_v22  ;;  %v5674_v29 = vpack.c.bf16 %v10133_v12, %v10129_v63 }
0x1a1f   :  { %7063 = vmatpush3.bf16.msra.mxu0 %v5681_v42  ;;  %7083 = vmatpush3.bf16.msra.mxu1 %v5737_v36  ;;  %v5730_v18 = vpack.c.bf16 %v10197_v59, %v10193_v5  ;;  %v5673_v46 = vpack.c.bf16 %v10250_v17, %v10258_v45  ;;  %v5729_v34 = vpack.c.bf16 %v10253_v44, %v10261_v23 }
0x1a20   :  { %7064 = vmatprep.subr.bf16.mxu0 %v10410_v30  ;;  %7084 = vmatprep.subr.bf16.mxu1 %v10410_v30  ;;  %v5477_v63 = vmul.f32 %v10243_v1, %v10243_v1  ;;  %v5478_v12 = vmul.f32 %v10245_v9, %v10245_v9 }
0x1a21   :  { %7078 = vmatprep.mubr.msk.bf16.mxu0 %vm7753_vm2, %v10410_v30  ;;  %7098 = vmatprep.mubr.msk.bf16.mxu1 %vm7753_vm2, %v10410_v30 }
0x1a22   :  { %v5540_v5 = vadd.f32 %v10241_v7, %v5477_v63 }
0x1a23   :  { %7065 = vmatpush3.bf16.msra.mxu0 %v5680_v52  ;;  %7085 = vmatpush3.bf16.msra.mxu1 %v5736_v41 }
0x1a24   :  { %7066 = vmatprep.subr.bf16.mxu0 %v10410_v30  ;;  %7086 = vmatprep.subr.bf16.mxu1 %v10410_v30  ;;  %v5541_v59 = vadd.f32 %v5540_v5, %v5478_v12 }
0x1a27   :  { %7067 = vmatpush3.bf16.msra.mxu0 %v5679_v2  ;;  %7087 = vmatpush3.bf16.msra.mxu1 %v5735_v50 }
0x1a28   :  { %7068 = vmatprep.subr.bf16.mxu0 %v10410_v30  ;;  %7088 = vmatprep.subr.bf16.mxu1 %v10410_v30 }
0x1a2b   :  { %7069 = vmatpush3.bf16.msra.mxu0 %v5678_v3  ;;  %7089 = vmatpush3.bf16.msra.mxu1 %v5734_v53 }
0x1a2c   :  { %7070 = vmatprep.subr.bf16.mxu0 %v10410_v30  ;;  %7090 = vmatprep.subr.bf16.mxu1 %v10410_v30 }
0x1a2f   :  { %7071 = vmatpush3.bf16.msra.mxu0 %v5677_v32  ;;  %7091 = vmatpush3.bf16.msra.mxu1 %v5733_v37 }
0x1a30   :  { %7072 = vmatprep.subr.bf16.mxu0 %v10410_v30  ;;  %7092 = vmatprep.subr.bf16.mxu1 %v10410_v30 }
0x1a33   :  { %7073 = vmatpush3.bf16.msra.mxu0 %v5676_v55  ;;  %7093 = vmatpush3.bf16.msra.mxu1 %v5732_v27 }
0x1a34   :  { %7074 = vmatprep.subr.bf16.mxu0 %v10410_v30  ;;  %7094 = vmatprep.subr.bf16.mxu1 %v10410_v30 }
0x1a37   :  { %7075 = vmatpush3.bf16.msra.mxu0 %v5675_v35  ;;  %7095 = vmatpush3.bf16.msra.mxu1 %v5731_v21 }
0x1a38   :  { %7076 = vmatprep.subr.bf16.mxu0 %v10410_v30  ;;  %7096 = vmatprep.subr.bf16.mxu1 %v10410_v30  ;;  %v5542_v30 = vrot.slane %v5541_v59, 4 }
0x1a3a   :  { %v5543_v8 = vadd.f32 %v5542_v30, %v5541_v59 }
0x1a3b   :  { %7077 = vmatpush3.bf16.msra.mxu0 %v5674_v29  ;;  %7097 = vmatpush3.bf16.msra.mxu1 %v5730_v18 }
0x1a3c   :  { %v5544_v60 = vrot.slane %v5543_v8, 2 }
0x1a3e   :  { %7079 = vmatmul.mubr.bf16.vlgmr.msra.gmra.mxu0 %v5673_v46  ;;  %7099 = vmatmul.mubr.bf16.vlgmr.msra.gmra.mxu1 %v5729_v34  ;;  %v5545_v22 = vadd.f32 %v5544_v60, %v5543_v8 }
0x1a40   :  { %v5546_v62 = vrot.slane %v5545_v22, 1 }
0x1a42   :  { %v5547_v6 = vadd.f32 %v5546_v62, %v5545_v22 }
0x1a44   :  { %7624 = vrsqrt.f32 %v5547_v6  ;;  %vm5550_vm11 = vcmp.eq.f32.partialorder %v5547_v6, inf  ;;  %v5553_v48 = vand.u32 2147483648, %v5547_v6  ;;  %vm5552_vm12 = vcmp.eq.f32.partialorder %v5547_v6, 0.0 }
0x1a51   :  { %v7625_v38 = vpop.eup %7624 }
0x1a52   :  { %v5549_v57 = vmul.f32 %v7625_v38, %v5547_v6 }
0x1a54   :  { %v5551_v58 = vsel %vm5550_vm11, %v5547_v6, %v5549_v57 }
0x1a55   :  { %v5554_v43 = vsel %vm5552_vm12, %v5553_v48, %v5551_v58 }
0x1a56   :  { %v5556_v40 = vadd.f32 1e-07, %v5554_v43  ;;  %vm5555_vm13 = vcmp.gt.f32.partialorder %v5554_v43, 1e-05 }
0x1a58   :  { %7626 = vrcp.f32 %v5556_v40 }
0x1a65   :  { %v7627_v54 = vpop.eup %7626 }
0x1a66   :  { %v5558_v39 = vmul.f32 1e-05, %v7627_v54 }
0x1a68   :  { %v5559_v26 = vsel %vm5555_vm13, %v5558_v39, 1.0 }
0x1a69   :  { %v5560_v9 = vmul.f32 100000.0, %v5559_v26 }
0x1ade   :  { %v5621_v49 = vpop.f32.mrf.mxu0  ;;  %v5662_v20 = vpop.f32.mrf.mxu1 }
0x1adf   :  { %v5663_v11 = vadd.f32 %v5662_v20, %v5621_v49 }
0x1ae0   :  { %v7040_v0 = vpop.f32.mrf.mxu0  ;;  %v7060_v4 = vpop.f32.mrf.mxu1 }
0x1ae2   :  { %v5624_v19 = vpop.f32.mrf.mxu0  ;;  %v5665_v24 = vpop.f32.mrf.mxu1 }
0x1ae3   :  { %v5666_v33 = vadd.f32 %v5665_v24, %v5624_v19 }
0x1ae4   :  { %v7041_v7 = vpop.f32.mrf.mxu0  ;;  %v7061_v47 = vpop.f32.mrf.mxu1 }
0x1afe   :  { %v5716_v14 = vpop.f32.mrf.mxu0  ;;  %v5772_v51 = vpop.f32.mrf.mxu1 }
0x1aff   :  { %v5723_v1 = vadd.f32 %v5716_v14, %v5663_v11 }
0x1b00   :  { %v7080_v25 = vpop.f32.mrf.mxu0  ;;  %v7100_v16 = vpop.f32.mrf.mxu1 }
0x1b01   :  { %v5779_v56 = vadd.f32 %v5772_v51, %v5723_v1 }
0x1b02   :  { %v5719_v17 = vpop.f32.mrf.mxu0  ;;  %v5775_v44 = vpop.f32.mrf.mxu1 }
0x1b03   :  { %v5781_v31 = vmul.f32 %v5779_v56, %v5560_v9  ;;  %v5724_v13 = vadd.f32 %v5719_v17, %v5666_v33 }
0x1b04   :  { %v7081_v61 = vpop.f32.mrf.mxu0  ;;  %v7101_v28 = vpop.f32.mrf.mxu1 }
0x1b05   :  { %5783 = vst [vmem:[%s10364_s10] sm:$0xff] %v5781_v31  ;;  %v5780_v45 = vadd.f32 %v5775_v44, %v5724_v13 }
0x1b07   :  { %v5782_v23 = vmul.f32 %v5780_v45, %v5560_v9 }
0x1b09   :  { %5784 = vst [vmem:[%s10364_s10 + $0x8] sm:$0xff] %v5782_v23 }
0x1b0a   :  { %5793 = vsyncpa [#allocation6], 1 }
0x1b0b   :  { %5794 = vsyncpa [#allocation8], 1 }
0x1b0c   :  { %5795 = vsyncpa [#allocation11], 1 }

</bundles_post_ra>
